<compile_context>
chip_gen: v5e
topology: v5e:2x2
jax: 0.10.0
libtpu: 0.0.40
codegen_flags: <defaults>
</compile_context>

<pallas_src>
import functools
import math

import jax
import jax.numpy as jnp
from jax.experimental import pallas as pl
from jax.experimental.pallas import tpu as pltpu


_SQRT1_2 = 0.7071067811865476


def _erf_f32(x):
    """erf via Abramowitz & Stegun 7.1.26.

    The divide is routed to the EUP via pl.reciprocal(approx=True) so the
    VALU slot (the binding unit for this elementwise-heavy kernel) only sees
    mul/add/select; total |err| stays well below the bf16 noise floor.
    """
    a1 = 0.254829592
    a2 = -0.284496736
    a3 = 1.421413741
    a4 = -1.453152027
    a5 = 1.061405429
    p = 0.3275911
    ax = jnp.abs(x)
    t = pl.reciprocal(1.0 + p * ax, approx=True)
    poly = ((((a5 * t + a4) * t + a3) * t + a2) * t + a1) * t
    y = 1.0 - poly * jnp.exp(-ax * ax)
    return jnp.where(x < 0.0, -y, y)


def _gelu_exact(x):
    return 0.5 * x * (1.0 + _erf_f32(x * _SQRT1_2))


def _fused_mlp_kernel(x_ref, w1_ref, b1_ref, w2_ref, b2_ref, o_ref, acc_ref,
                      *, n_chunks, chunk):
    """One row tile: (tm, Din) -> fc1 -> GELU -> fc2 -> (tm, Dout).

    The hidden dimension is processed in `chunk`-wide slices so only a
    (tm, chunk) hidden tile is live at a time; partial fc2 products accumulate
    into the f32 VMEM scratch `acc_ref`.
    """
    xm = x_ref[...].astype(w1_ref.dtype)                 # (tm, Din) MXU feed
    for ci in range(n_chunks):                           # static full unroll
        off = ci * chunk                                 # static, 128-aligned
        h = jnp.dot(xm, w1_ref[:, pl.ds(off, chunk)],
                    preferred_element_type=jnp.float32)  # (tm, chunk) f32
        h = _gelu_exact(h + b1_ref[:, pl.ds(off, chunk)])
        contrib = jnp.dot(h.astype(w2_ref.dtype),
                          w2_ref[pl.ds(off, chunk), :],
                          preferred_element_type=jnp.float32)
        if ci == 0:
            acc_ref[...] = contrib
        else:
            acc_ref[...] += contrib
    o_ref[...] = (acc_ref[...] + b2_ref[...]).astype(o_ref.dtype)
    # TODO(synk): nn.Dropout is identity here (drop=0.0 / eval); stochastic
    # dropout would need pltpu.prng_seed + pltpu.prng_random_bits masking.


def _round_up(a, b):
    return ((a + b - 1) // b) * b


def _tensorcores_per_chip():
    try:
        kind = jax.devices()[0].device_kind.lower()
    except Exception:
        return 1
    return 2 if ("v7" in kind or "7x" in kind) else 1


def _vmem_capacity_bytes():
    try:
        cap = getattr(pltpu.get_tpu_info(), "vmem_capacity_bytes", None)
        if cap:
            return int(cap)
    except Exception:
        pass
    return 64 * (1 << 20)  # conservative: v7x per-TensorCore VMEM


def _pick_hidden_chunk(d_hid, target=512):
    """Largest multiple-of-128 divisor of d_hid that is <= target (else d_hid)."""
    if d_hid <= target or d_hid % 128 != 0:
        return d_hid
    for c in range(target - target % 128, 0, -128):
        if d_hid % c == 0:
            return c
    return d_hid


def _pick_row_tile(tm, m, d_in, d_hid, d_out, chunk, act_itemsize,
                   out_itemsize, w_itemsize, w_bufs, budget_bytes, align=256):
    """Row tile that fits the VMEM budget, keeps MXU passes full-height and
    (on 2-TC chips) keeps the parallel grid balanced across both cores."""
    # Resident operands: weights + biases (biases pad to 8 sublanes).
    fixed = w_bufs * (d_in * d_hid + d_hid * d_out) * w_itemsize
    fixed += w_bufs * 8 * (d_hid + d_out) * 4
    # Per-row bytes: double-buffered activation in/out tiles, f32 accumulator
    # scratch, live (tm, chunk) hidden slice in f32 + its MXU-dtype copy for
    # the second matmul, the cast x copy, plus GELU temporaries margin.
    per_row = 2 * d_in * act_itemsize + 2 * d_out * out_itemsize
    per_row += d_out * 4
    per_row += chunk * (4 + w_itemsize) + d_in * w_itemsize
    per_row += 3 * chunk * 4
    avail = max(budget_bytes - fixed, 1 << 20)
    tm_fit = max(8, (avail // per_row) // 8 * 8)
    tm = max(8, min(int(tm), int(tm_fit), _round_up(m, 8)))
    tm = (tm // align) * align if tm >= align else _round_up(tm, 8)
    # v7x: 2 TensorCores share the "parallel" axis — keep an even step count.
    n_tc = _tensorcores_per_chip()
    if n_tc > 1 and m > n_tc * align:
        steps = pl.cdiv(m, tm)
        if steps % n_tc != 0:
            steps = _round_up(steps, n_tc)
            tm = max(8, _round_up(pl.cdiv(m, steps), 8))
    return tm


def mlp_forward(x, w1, b1, w2, b2, *, tm=1024, mxu_dtype=jnp.bfloat16,
                hidden_chunk=512, vmem_budget_bytes=None):
    """JAX/Pallas equivalent of Mlp.forward (fc1 -> GELU -> fc2 -> dropout(0)).

    x:  (..., D_in)
    w1: (D_hidden, D_in),  b1: (D_hidden,)    -- nn.Linear(fc1) params
    w2: (D_out, D_hidden), b2: (D_out,)       -- nn.Linear(fc2) params

    Note: the host-side weight transpose/cast runs per call; wrap this function
    in jax.jit (or pre-transpose the weights once) for production use.
    """
    d_in = x.shape[-1]
    d_hid, d_in_w = w1.shape
    d_out, d_hid_w = w2.shape
    assert d_in_w == d_in and d_hid_w == d_hid

    lead_shape = x.shape[:-1]
    out_dtype = x.dtype
    # Stream activations in the MXU feed dtype (halves activation HBM bytes).
    x2d = x.reshape(-1, d_in).astype(mxu_dtype)
    m = x2d.shape[0]

    chunk = _pick_hidden_chunk(d_hid, target=hidden_chunk)
    n_chunks = d_hid // chunk
    assert n_chunks * chunk == d_hid

    # Transposed once so the kernel computes x @ W^T directly; MXU feed dtype
    # halves resident weight VMEM and weight DMA bytes.
    w1t = w1.T.astype(mxu_dtype)                 # (D_in, D_hidden)
    w2t = w2.T.astype(mxu_dtype)                 # (D_hidden, D_out)
    b1_2d = b1.reshape(1, d_hid).astype(jnp.float32)
    b2_2d = b2.reshape(1, d_out).astype(jnp.float32)

    capacity = _vmem_capacity_bytes()
    if vmem_budget_bytes is None:
        vmem_budget_bytes = max(24 << 20, (capacity * 3) // 4)
    vmem_limit_bytes = int(min(max(vmem_budget_bytes + (8 << 20), 32 << 20),
                               capacity - (4 << 20)))

    act_itemsize = jnp.dtype(x2d.dtype).itemsize
    out_itemsize = jnp.dtype(out_dtype).itemsize
    w_itemsize = jnp.dtype(mxu_dtype).itemsize

    kernel = functools.partial(_fused_mlp_kernel, n_chunks=n_chunks,
                               chunk=chunk)

    def run(single_buffer_weights):
        w_bufs = 1 if single_buffer_weights else 2
        tmb = _pick_row_tile(tm, m, d_in, d_hid, d_out, chunk, act_itemsize,
                             out_itemsize, w_itemsize, w_bufs,
                             vmem_budget_bytes)
        grid = pl.cdiv(m, tmb)

        def resident(shape):
            idx = lambda i, _s=shape: (0,) * len(_s)
            if single_buffer_weights:
                # Constant-index blocks are never re-DMA'd; single buffering
                # halves their resident VMEM so tm can grow.
                return pl.BlockSpec(shape, idx, pipeline_mode=pl.Buffered(1))
            return pl.BlockSpec(shape, idx)

        return pl.pallas_call(
            kernel,
            out_shape=jax.ShapeDtypeStruct((m, d_out), out_dtype),
            grid_spec=pltpu.PrefetchScalarGridSpec(
                num_scalar_prefetch=0,
                grid=(grid,),
                in_specs=[
                    pl.BlockSpec((tmb, d_in), lambda i: (i, 0)),   # activations
                    resident((d_in, d_hid)),                       # fc1 weight^T
                    resident((1, d_hid)),                          # fc1 bias
                    resident((d_hid, d_out)),                      # fc2 weight^T
                    resident((1, d_out)),                          # fc2 bias
                ],
                out_specs=pl.BlockSpec((tmb, d_out), lambda i: (i, 0)),
                scratch_shapes=[pltpu.VMEM((tmb, d_out), jnp.float32)],
            ),
            compiler_params=pltpu.CompilerParams(
                dimension_semantics=("parallel",),
                vmem_limit_bytes=vmem_limit_bytes,
            ),
        )(x2d, w1t, b1_2d, w2t, b2_2d)

    try:
        out = run(single_buffer_weights=True)
    except Exception:  # fall back if Buffered(1) is unsupported by this Pallas
        out = run(single_buffer_weights=False)

    return out.reshape(*lead_shape, d_out)


def _reference_forward(x, w1, b1, w2, b2):
    """Pure-JAX reference matching the PyTorch module (exact-erf GELU)."""
    xf = x.astype(jnp.float32)
    h = xf @ w1.T.astype(jnp.float32) + b1.astype(jnp.float32)
    h = jax.nn.gelu(h, approximate=False)
    y = h @ w2.T.astype(jnp.float32) + b2.astype(jnp.float32)
    return y.astype(x.dtype)


if __name__ == "__main__":
    # Small deterministic example: tokens (B, N, C) with lane-friendly dims
    # (in=128 -> hidden=256 -> out=128), matching Mlp(in, hidden) defaults.
    B, N, D_IN, D_HID = 2, 128, 128, 256
    D_OUT = D_IN  # out_features defaults to in_features

    key = jax.random.PRNGKey(0)
    kx, kw1, kb1, kw2, kb2 = jax.random.split(key, 5)
    x = jax.random.normal(kx, (B, N, D_IN), dtype=jnp.float32)
    w1 = (1.0 / math.sqrt(D_IN)) * jax.random.normal(
        kw1, (D_HID, D_IN), dtype=jnp.float32)
    b1 = 0.02 * jax.random.normal(kb1, (D_HID,), dtype=jnp.float32)
    w2 = (1.0 / math.sqrt(D_HID)) * jax.random.normal(
        kw2, (D_OUT, D_HID), dtype=jnp.float32)
    b2 = 0.02 * jax.random.normal(kb2, (D_OUT,), dtype=jnp.float32)

    ref = _reference_forward(x, w1, b1, w2, b2)

    # Performance path: bf16 MXU operands + activation stream, f32 accumulation.
    out_bf16 = jax.block_until_ready(
        mlp_forward(x, w1, b1, w2, b2, mxu_dtype=jnp.bfloat16))
    assert out_bf16.shape == (B, N, D_OUT), out_bf16.shape
    err_bf16 = float(jnp.max(jnp.abs(out_bf16 - ref)))
    assert jnp.allclose(out_bf16, ref, atol=5e-2, rtol=5e-2), err_bf16

    # Full-precision path for a sanity check of the fused math.
    out_f32 = jax.block_until_ready(
        mlp_forward(x, w1, b1, w2, b2, mxu_dtype=jnp.float32))
    err_f32 = float(jnp.max(jnp.abs(out_f32 - ref)))
    assert jnp.allclose(out_f32, ref, atol=5e-2, rtol=5e-2), err_f32

    # Exercise the multi-step grid + multi-chunk hidden loop explicitly.
    out_multi = jax.block_until_ready(
        mlp_forward(x, w1, b1, w2, b2, mxu_dtype=jnp.bfloat16,
                    tm=128, hidden_chunk=128))
    err_multi = float(jnp.max(jnp.abs(out_multi - ref)))
    assert jnp.allclose(out_multi, ref, atol=5e-2, rtol=5e-2), err_multi

    print("KERNEL_OK")
</pallas_src>

<mosaic_0001>
module attributes {stable_mosaic.version = 11 : i64} {
  func.func @_fused_mlp_kernel(%arg0: i32, %arg1: memref<256x128xbf16, #tpu.memory_space<vmem>>, %arg2: memref<128x256xbf16, #tpu.memory_space<vmem>>, %arg3: memref<1x256xf32, #tpu.memory_space<vmem>>, %arg4: memref<256x128xbf16, #tpu.memory_space<vmem>>, %arg5: memref<1x128xf32, #tpu.memory_space<vmem>>, %arg6: memref<256x128xf32, #tpu.memory_space<vmem>>, %arg7: memref<256x128xf32, #tpu.memory_space<vmem>>) attributes {dimension_semantics = [#tpu.dimension_semantics<parallel>], iteration_bounds = array<i64: 1>, scalar_prefetch = 0 : i64, scratch_operands = 1 : i64, tpu.core_type = #tpu.core_type<tc>, window_params = [{transform_indices = @transform_0, window_bounds = array<i64: 256, 128>}, {pipeline_mode = #tpu.pipeline_mode<synchronous>, transform_indices = @transform_1, window_bounds = array<i64: 128, 256>}, {pipeline_mode = #tpu.pipeline_mode<synchronous>, transform_indices = @transform_2, window_bounds = array<i64: 1, 256>}, {pipeline_mode = #tpu.pipeline_mode<synchronous>, transform_indices = @transform_3, window_bounds = array<i64: 256, 128>}, {pipeline_mode = #tpu.pipeline_mode<synchronous>, transform_indices = @transform_4, window_bounds = array<i64: 1, 128>}, {transform_indices = @transform_5, window_bounds = array<i64: 256, 128>}]} {
    %c0 = arith.constant 0 : index
    %c0_0 = arith.constant 0 : index
    %0 = vector.load %arg1[%c0, %c0_0] : memref<256x128xbf16, #tpu.memory_space<vmem>>, vector<256x128xbf16>
    %c0_1 = arith.constant 0 : index
    %c0_2 = arith.constant 0 : index
    %1 = vector.load %arg2[%c0_1, %c0_2] : memref<128x256xbf16, #tpu.memory_space<vmem>>, vector<128x256xbf16>
    %cst = arith.constant dense<0.000000e+00> : vector<256x256xf32>
    %2 = tpu.matmul %0, %1, %cst {dimension_numbers = #tpu.dot_dimension_numbers<[1], [0], [0], [1], [0, 0, 1, 1], [], []>} : vector<256x128xbf16>, vector<128x256xbf16>, vector<256x256xf32> -> vector<256x256xf32>
    %c0_3 = arith.constant 0 : index
    %c0_4 = arith.constant 0 : index
    %3 = vector.load %arg3[%c0_3, %c0_4] : memref<1x256xf32, #tpu.memory_space<vmem>>, vector<1x256xf32>
    %4 = vector.broadcast %3 : vector<1x256xf32> to vector<256x256xf32>
    %5 = arith.addf %2, %4 : vector<256x256xf32>
    %cst_5 = arith.constant 5.000000e-01 : f32
    %6 = vector.broadcast %cst_5 : f32 to vector<256x256xf32>
    %7 = arith.mulf %6, %5 : vector<256x256xf32>
    %cst_6 = arith.constant 0.707106769 : f32
    %8 = vector.broadcast %cst_6 : f32 to vector<256x256xf32>
    %9 = arith.mulf %5, %8 : vector<256x256xf32>
    %10 = math.absf %9 : vector<256x256xf32>
    %cst_7 = arith.constant 0.327591091 : f32
    %11 = vector.broadcast %cst_7 : f32 to vector<256x256xf32>
    %12 = arith.mulf %11, %10 : vector<256x256xf32>
    %cst_8 = arith.constant 1.000000e+00 : f32
    %13 = vector.broadcast %cst_8 : f32 to vector<256x256xf32>
    %14 = arith.addf %13, %12 : vector<256x256xf32>
    %15 = tpu.reciprocal %14 {approx = true} : vector<256x256xf32> -> vector<256x256xf32>
    %cst_9 = arith.constant 1.06140542 : f32
    %16 = vector.broadcast %cst_9 : f32 to vector<256x256xf32>
    %17 = arith.mulf %16, %15 : vector<256x256xf32>
    %cst_10 = arith.constant -1.45315206 : f32
    %18 = vector.broadcast %cst_10 : f32 to vector<256x256xf32>
    %19 = arith.addf %17, %18 : vector<256x256xf32>
    %20 = arith.mulf %19, %15 : vector<256x256xf32>
    %cst_11 = arith.constant 1.42141378 : f32
    %21 = vector.broadcast %cst_11 : f32 to vector<256x256xf32>
    %22 = arith.addf %20, %21 : vector<256x256xf32>
    %23 = arith.mulf %22, %15 : vector<256x256xf32>
    %cst_12 = arith.constant -0.284496725 : f32
    %24 = vector.broadcast %cst_12 : f32 to vector<256x256xf32>
    %25 = arith.addf %23, %24 : vector<256x256xf32>
    %26 = arith.mulf %25, %15 : vector<256x256xf32>
    %cst_13 = arith.constant 0.254829586 : f32
    %27 = vector.broadcast %cst_13 : f32 to vector<256x256xf32>
    %28 = arith.addf %26, %27 : vector<256x256xf32>
    %29 = arith.mulf %28, %15 : vector<256x256xf32>
    %cst_14 = arith.constant 0.000000e+00 : f32
    %30 = vector.broadcast %cst_14 : f32 to vector<256x256xf32>
    %31 = arith.subf %30, %10 : vector<256x256xf32>
    %32 = arith.mulf %31, %10 : vector<256x256xf32>
    %33 = math.exp %32 : vector<256x256xf32>
    %34 = arith.mulf %29, %33 : vector<256x256xf32>
    %cst_15 = arith.constant 1.000000e+00 : f32
    %35 = vector.broadcast %cst_15 : f32 to vector<256x256xf32>
    %36 = arith.subf %35, %34 : vector<256x256xf32>
    %cst_16 = arith.constant 0.000000e+00 : f32
    %37 = vector.broadcast %cst_16 : f32 to vector<256x256xf32>
    %38 = arith.cmpf olt, %9, %37 : vector<256x256xf32>
    %cst_17 = arith.constant 0.000000e+00 : f32
    %39 = vector.broadcast %cst_17 : f32 to vector<256x256xf32>
    %40 = arith.subf %39, %36 : vector<256x256xf32>
    %41 = arith.select %38, %40, %36 : vector<256x256xi1>, vector<256x256xf32>
    %cst_18 = arith.constant 1.000000e+00 : f32
    %42 = vector.broadcast %cst_18 : f32 to vector<256x256xf32>
    %43 = arith.addf %42, %41 : vector<256x256xf32>
    %44 = arith.mulf %7, %43 : vector<256x256xf32>
    %45 = arith.truncf %44 : vector<256x256xf32> to vector<256x256xbf16>
    %c0_19 = arith.constant 0 : index
    %c0_20 = arith.constant 0 : index
    %46 = vector.load %arg4[%c0_19, %c0_20] : memref<256x128xbf16, #tpu.memory_space<vmem>>, vector<256x128xbf16>
    %cst_21 = arith.constant dense<0.000000e+00> : vector<256x128xf32>
    %47 = tpu.matmul %45, %46, %cst_21 {dimension_numbers = #tpu.dot_dimension_numbers<[1], [0], [0], [1], [0, 0, 1, 1], [], []>} : vector<256x256xbf16>, vector<256x128xbf16>, vector<256x128xf32> -> vector<256x128xf32>
    %c0_22 = arith.constant 0 : index
    %c0_23 = arith.constant 0 : index
    %48 = vector.load %arg7[%c0_22, %c0_23] : memref<256x128xf32, #tpu.memory_space<vmem>>, vector<256x128xf32>
    tpu.vector_store %arg7[%c0_22, %c0_23], %47 {strides = array<i32>} : memref<256x128xf32, #tpu.memory_space<vmem>>, vector<256x128xf32>,
    %c0_24 = arith.constant 0 : index
    %c0_25 = arith.constant 0 : index
    %49 = vector.load %arg7[%c0_24, %c0_25] : memref<256x128xf32, #tpu.memory_space<vmem>>, vector<256x128xf32>
    %c0_26 = arith.constant 0 : index
    %c0_27 = arith.constant 0 : index
    %50 = vector.load %arg5[%c0_26, %c0_27] : memref<1x128xf32, #tpu.memory_space<vmem>>, vector<1x128xf32>
    %51 = vector.broadcast %50 : vector<1x128xf32> to vector<256x128xf32>
    %52 = arith.addf %49, %51 : vector<256x128xf32>
    %c0_28 = arith.constant 0 : index
    %c0_29 = arith.constant 0 : index
    %53 = vector.load %arg6[%c0_28, %c0_29] : memref<256x128xf32, #tpu.memory_space<vmem>>, vector<256x128xf32>
    tpu.vector_store %arg6[%c0_28, %c0_29], %52 {strides = array<i32>} : memref<256x128xf32, #tpu.memory_space<vmem>>, vector<256x128xf32>,
    return
  }
  func.func @transform_0(%arg0: i32) -> (i32, i32) {
    %c0_i32 = arith.constant 0 : i32
    %c0_i32_0 = arith.constant 0 : i32
    return %arg0, %c0_i32 : i32, i32
  }
  func.func @transform_1(%arg0: i32) -> (i32, i32) {
    %c0_i32 = arith.constant 0 : i32
    %c0_i32_0 = arith.constant 0 : i32
    %c0_i32_1 = arith.constant 0 : i32
    return %c0_i32, %c0_i32_0 : i32, i32
  }
  func.func @transform_2(%arg0: i32) -> (i32, i32) {
    %c0_i32 = arith.constant 0 : i32
    %c0_i32_0 = arith.constant 0 : i32
    %c0_i32_1 = arith.constant 0 : i32
    return %c0_i32, %c0_i32_0 : i32, i32
  }
  func.func @transform_3(%arg0: i32) -> (i32, i32) {
    %c0_i32 = arith.constant 0 : i32
    %c0_i32_0 = arith.constant 0 : i32
    %c0_i32_1 = arith.constant 0 : i32
    return %c0_i32, %c0_i32_0 : i32, i32
  }
  func.func @transform_4(%arg0: i32) -> (i32, i32) {
    %c0_i32 = arith.constant 0 : i32
    %c0_i32_0 = arith.constant 0 : i32
    %c0_i32_1 = arith.constant 0 : i32
    return %c0_i32, %c0_i32_0 : i32, i32
  }
  func.func @transform_5(%arg0: i32) -> (i32, i32) {
    %c0_i32 = arith.constant 0 : i32
    %c0_i32_0 = arith.constant 0 : i32
    return %arg0, %c0_i32 : i32, i32
  }
}

module attributes {stable_mosaic.version = 11 : i64} {
  func.func @_fused_mlp_kernel(%arg0: i32, %arg1: memref<256x128xbf16, #tpu.memory_space<vmem>>, %arg2: memref<128x256xbf16, #tpu.memory_space<vmem>>, %arg3: memref<1x256xf32, #tpu.memory_space<vmem>>, %arg4: memref<256x128xbf16, #tpu.memory_space<vmem>>, %arg5: memref<1x128xf32, #tpu.memory_space<vmem>>, %arg6: memref<256x128xf32, #tpu.memory_space<vmem>>, %arg7: memref<256x128xf32, #tpu.memory_space<vmem>>) attributes {dimension_semantics = [#tpu.dimension_semantics<parallel>], iteration_bounds = array<i64: 1>, scalar_prefetch = 0 : i64, scratch_operands = 1 : i64, tpu.core_type = #tpu.core_type<tc>, window_params = [{transform_indices = @transform_0, window_bounds = array<i64: 256, 128>}, {pipeline_mode = #tpu.pipeline_mode<synchronous>, transform_indices = @transform_1, window_bounds = array<i64: 128, 256>}, {pipeline_mode = #tpu.pipeline_mode<synchronous>, transform_indices = @transform_2, window_bounds = array<i64: 1, 256>}, {pipeline_mode = #tpu.pipeline_mode<synchronous>, transform_indices = @transform_3, window_bounds = array<i64: 256, 128>}, {pipeline_mode = #tpu.pipeline_mode<synchronous>, transform_indices = @transform_4, window_bounds = array<i64: 1, 128>}, {transform_indices = @transform_5, window_bounds = array<i64: 256, 128>}]} {
    %c0 = arith.constant 0 : index
    %c0_0 = arith.constant 0 : index
    %0 = vector.load %arg1[%c0, %c0_0] : memref<256x128xbf16, #tpu.memory_space<vmem>>, vector<256x128xbf16>
    %c0_1 = arith.constant 0 : index
    %c0_2 = arith.constant 0 : index
    %1 = vector.load %arg2[%c0_1, %c0_2] : memref<128x256xbf16, #tpu.memory_space<vmem>>, vector<128x256xbf16>
    %cst = arith.constant dense<0.000000e+00> : vector<256x256xf32>
    %2 = tpu.matmul %0, %1, %cst {dimension_numbers = #tpu.dot_dimension_numbers<[1], [0], [0], [1], [0, 0, 1, 1], [], []>} : vector<256x128xbf16>, vector<128x256xbf16>, vector<256x256xf32> -> vector<256x256xf32>
    %c0_3 = arith.constant 0 : index
    %c0_4 = arith.constant 0 : index
    %3 = vector.load %arg3[%c0_3, %c0_4] : memref<1x256xf32, #tpu.memory_space<vmem>>, vector<1x256xf32>
    %4 = vector.broadcast %3 : vector<1x256xf32> to vector<256x256xf32>
    %5 = arith.addf %2, %4 : vector<256x256xf32>
    %cst_5 = arith.constant 5.000000e-01 : f32
    %6 = vector.broadcast %cst_5 : f32 to vector<256x256xf32>
    %7 = arith.mulf %6, %5 : vector<256x256xf32>
    %cst_6 = arith.constant 0.707106769 : f32
    %8 = vector.broadcast %cst_6 : f32 to vector<256x256xf32>
    %9 = arith.mulf %5, %8 : vector<256x256xf32>
    %10 = math.absf %9 : vector<256x256xf32>
    %cst_7 = arith.constant 0.327591091 : f32
    %11 = vector.broadcast %cst_7 : f32 to vector<256x256xf32>
    %12 = arith.mulf %11, %10 : vector<256x256xf32>
    %cst_8 = arith.constant 1.000000e+00 : f32
    %13 = vector.broadcast %cst_8 : f32 to vector<256x256xf32>
    %14 = arith.addf %13, %12 : vector<256x256xf32>
    %15 = tpu.reciprocal %14 {approx = true} : vector<256x256xf32> -> vector<256x256xf32>
    %cst_9 = arith.constant 1.06140542 : f32
    %16 = vector.broadcast %cst_9 : f32 to vector<256x256xf32>
    %17 = arith.mulf %16, %15 : vector<256x256xf32>
    %cst_10 = arith.constant -1.45315206 : f32
    %18 = vector.broadcast %cst_10 : f32 to vector<256x256xf32>
    %19 = arith.addf %17, %18 : vector<256x256xf32>
    %20 = arith.mulf %19, %15 : vector<256x256xf32>
    %cst_11 = arith.constant 1.42141378 : f32
    %21 = vector.broadcast %cst_11 : f32 to vector<256x256xf32>
    %22 = arith.addf %20, %21 : vector<256x256xf32>
    %23 = arith.mulf %22, %15 : vector<256x256xf32>
    %cst_12 = arith.constant -0.284496725 : f32
    %24 = vector.broadcast %cst_12 : f32 to vector<256x256xf32>
    %25 = arith.addf %23, %24 : vector<256x256xf32>
    %26 = arith.mulf %25, %15 : vector<256x256xf32>
    %cst_13 = arith.constant 0.254829586 : f32
    %27 = vector.broadcast %cst_13 : f32 to vector<256x256xf32>
    %28 = arith.addf %26, %27 : vector<256x256xf32>
    %29 = arith.mulf %28, %15 : vector<256x256xf32>
    %cst_14 = arith.constant 0.000000e+00 : f32
    %30 = vector.broadcast %cst_14 : f32 to vector<256x256xf32>
    %31 = arith.subf %30, %10 : vector<256x256xf32>
    %32 = arith.mulf %31, %10 : vector<256x256xf32>
    %33 = math.exp %32 : vector<256x256xf32>
    %34 = arith.mulf %29, %33 : vector<256x256xf32>
    %cst_15 = arith.constant 1.000000e+00 : f32
    %35 = vector.broadcast %cst_15 : f32 to vector<256x256xf32>
    %36 = arith.subf %35, %34 : vector<256x256xf32>
    %cst_16 = arith.constant 0.000000e+00 : f32
    %37 = vector.broadcast %cst_16 : f32 to vector<256x256xf32>
    %38 = arith.cmpf olt, %9, %37 : vector<256x256xf32>
    %cst_17 = arith.constant 0.000000e+00 : f32
    %39 = vector.broadcast %cst_17 : f32 to vector<256x256xf32>
    %40 = arith.subf %39, %36 : vector<256x256xf32>
    %41 = arith.select %38, %40, %36 : vector<256x256xi1>, vector<256x256xf32>
    %cst_18 = arith.constant 1.000000e+00 : f32
    %42 = vector.broadcast %cst_18 : f32 to vector<256x256xf32>
    %43 = arith.addf %42, %41 : vector<256x256xf32>
    %44 = arith.mulf %7, %43 : vector<256x256xf32>
    %45 = arith.truncf %44 : vector<256x256xf32> to vector<256x256xbf16>
    %c0_19 = arith.constant 0 : index
    %c0_20 = arith.constant 0 : index
    %46 = vector.load %arg4[%c0_19, %c0_20] : memref<256x128xbf16, #tpu.memory_space<vmem>>, vector<256x128xbf16>
    %cst_21 = arith.constant dense<0.000000e+00> : vector<256x128xf32>
    %47 = tpu.matmul %45, %46, %cst_21 {dimension_numbers = #tpu.dot_dimension_numbers<[1], [0], [0], [1], [0, 0, 1, 1], [], []>} : vector<256x256xbf16>, vector<256x128xbf16>, vector<256x128xf32> -> vector<256x128xf32>
    %c0_22 = arith.constant 0 : index
    %c0_23 = arith.constant 0 : index
    %48 = vector.load %arg7[%c0_22, %c0_23] : memref<256x128xf32, #tpu.memory_space<vmem>>, vector<256x128xf32>
    tpu.vector_store %arg7[%c0_22, %c0_23], %47 {strides = array<i32>} : memref<256x128xf32, #tpu.memory_space<vmem>>, vector<256x128xf32>,
    %c0_24 = arith.constant 0 : index
    %c0_25 = arith.constant 0 : index
    %49 = vector.load %arg7[%c0_24, %c0_25] : memref<256x128xf32, #tpu.memory_space<vmem>>, vector<256x128xf32>
    %c0_26 = arith.constant 0 : index
    %c0_27 = arith.constant 0 : index
    %50 = vector.load %arg5[%c0_26, %c0_27] : memref<1x128xf32, #tpu.memory_space<vmem>>, vector<1x128xf32>
    %51 = vector.broadcast %50 : vector<1x128xf32> to vector<256x128xf32>
    %52 = arith.addf %49, %51 : vector<256x128xf32>
    %c0_28 = arith.constant 0 : index
    %c0_29 = arith.constant 0 : index
    %53 = vector.load %arg6[%c0_28, %c0_29] : memref<256x128xf32, #tpu.memory_space<vmem>>, vector<256x128xf32>
    tpu.vector_store %arg6[%c0_28, %c0_29], %52 {strides = array<i32>} : memref<256x128xf32, #tpu.memory_space<vmem>>, vector<256x128xf32>,
    return
  }
  func.func @transform_0(%arg0: i32) -> (i32, i32) {
    %c0_i32 = arith.constant 0 : i32
    %c0_i32_0 = arith.constant 0 : i32
    return %arg0, %c0_i32 : i32, i32
  }
  func.func @transform_1(%arg0: i32) -> (i32, i32) {
    %c0_i32 = arith.constant 0 : i32
    %c0_i32_0 = arith.constant 0 : i32
    %c0_i32_1 = arith.constant 0 : i32
    return %c0_i32, %c0_i32_0 : i32, i32
  }
  func.func @transform_2(%arg0: i32) -> (i32, i32) {
    %c0_i32 = arith.constant 0 : i32
    %c0_i32_0 = arith.constant 0 : i32
    %c0_i32_1 = arith.constant 0 : i32
    return %c0_i32, %c0_i32_0 : i32, i32
  }
  func.func @transform_3(%arg0: i32) -> (i32, i32) {
    %c0_i32 = arith.constant 0 : i32
    %c0_i32_0 = arith.constant 0 : i32
    %c0_i32_1 = arith.constant 0 : i32
    return %c0_i32, %c0_i32_0 : i32, i32
  }
  func.func @transform_4(%arg0: i32) -> (i32, i32) {
    %c0_i32 = arith.constant 0 : i32
    %c0_i32_0 = arith.constant 0 : i32
    %c0_i32_1 = arith.constant 0 : i32
    return %c0_i32, %c0_i32_0 : i32, i32
  }
  func.func @transform_5(%arg0: i32) -> (i32, i32) {
    %c0_i32 = arith.constant 0 : i32
    %c0_i32_0 = arith.constant 0 : i32
    return %arg0, %c0_i32 : i32, i32
  }
}

</mosaic_0001>

<bundles_post_ra>
// kernel: tpu_custom_call.1
= control target key start
LH: loop header
LB: loop body
LE: loop exit
PB: predicated region body
PF: predicated region fallthrough
CT: control target
= control target key end

     0   :  { %10 = vsyncpa [#allocation4], 0  ;;  %s4930_s0 = inlined_call_operand.hbm [shape: bf16[256,128], index: 0, kind: input, shape index: {}]   ;;  %s4931_s1 = inlined_call_operand.hbm [shape: bf16[128,256], index: 1, kind: input, shape index: {}]   ;;  %s4932_s2 = inlined_call_operand.hbm [shape: f32[1,256], index: 2, kind: input, shape index: {}]   ;;  %s4933_s3 = inlined_call_operand.hbm [shape: bf16[256,128], index: 3, kind: input, shape index: {}]   ;;  %s4934_s4 = inlined_call_operand.vmem [shape: f32[1,128], index: 4, kind: input, shape index: {}]   ;;  %s4935_s5 = inlined_call_operand.hbm [shape: f32[256,128], index: 5, kind: output, shape index: {}]  }
   0x1   :  { %11 = vsyncpa [#allocation7], 0 }
   0x2   :  { %12 = vsyncpa [#allocation10], 0  ;;  %s31_s20 = sshll.u32 %s4931_s1, 4  ;;  %s32_s20 = int_to_ptr.hbm [resolvable:$true] %s31_s20 }
   0x3   :  { %13 = vsyncpa [#allocation5], 0  ;;  %s3281_s21 = smov [#allocation6]   ;;  %s18_s25 = sshll.u32 %s4930_s0, 4  ;;  %s19_s25 = int_to_ptr.hbm [resolvable:$true] %s18_s25 }
   0x4   :  { %s33_s22 = sshll.u32 %s3281_s21, 4  ;;  %s3282_s26 = smov 128   ;;  %s34_s22 = int_to_ptr.vmem [resolvable:$true] %s33_s22 }
   0x5   :  { %s3283_s27 = smov 8   ;;  %s3284_s28 = smov [#allocation3]  }
   0x6   :  { %39 = dma.hbm_to_vmem [thread:$0]  %s32_s20, 2048, %s34_s22, [#allocation7], %s3282_s26, %s3282_s26, %s3283_s27  }
   0x7   :  { %s20_s29 = sshll.u32 %s3284_s28, 4  ;;  %s3285_s1 = smov 64   ;;  %s21_s29 = int_to_ptr.vmem [resolvable:$true] %s20_s29 }
   0x8   :  { %s3286_s30 = smov 4   ;;  %s45_s8 = sshll.u32 %s4932_s2, 4  ;;  %s46_s8 = int_to_ptr.hbm [resolvable:$true] %s45_s8 }
   0x9   :  { %26 = dma.hbm_to_vmem [thread:$0]  %s19_s25, 2048, %s21_s29, [#allocation4], %s3285_s1, %s3285_s1, %s3286_s30  }
   0xa   :  { %s3287_s9 = smov [#allocation8]   ;;  %s55_s12 = sshll.u32 %s4933_s3, 4  ;;  %s56_s12 = int_to_ptr.hbm [resolvable:$true] %s55_s12 }
   0xb   :  { %s47_s0 = sshll.u32 %s3287_s9, 4  ;;  %s3288_s13 = smov [#allocation9]   ;;  %s48_s0 = int_to_ptr.vmem [resolvable:$true] %s47_s0 }
   0xc   :  { %50 = dma.hbm_to_vmem [thread:$0]  %s46_s8, 32, %s48_s0, [#allocation7]  }
   0xd   :  { %s57_s14 = sshll.u32 %s3288_s13, 4  ;;  %s58_s14 = int_to_ptr.vmem [resolvable:$true] %s57_s14 }
   0xe   :  { %63 = dma.hbm_to_vmem [thread:$0]  %s56_s12, 2048, %s58_s14, [#allocation10], %s3285_s1, %s3285_s1, %s3286_s30  }
   0xf   :  { %3273 = dma.done.wait [#allocation4], 2048  }
  0x10   :  { %3274 = vsyncadd [#allocation4], 4294965248 }
  0x11   :  { %3275 = dma.done.wait [#allocation7], 2080  }
  0x12   :  { %3276 = vsyncadd [#allocation7], 4294965216 }
  0x13   :  { %3277 = dma.done.wait [#allocation10], 2048  }
  0x14   :  { %3278 = vsyncadd [#allocation10], 4294965248  ;;  %v2767_v0 = vld [vmem:[#allocation6 + $0x70] sm:$0xf]  ;;  %v2868_v1 = vld [vmem:[#allocation6 + $0x74] sm:$0xf0] }
  0x15   :  { %v2867_v2 = vld [vmem:[#allocation6 + $0x74] sm:$0xf]  ;;  %v2768_v3 = vor.u32 %v2868_v1, %v2767_v0  ;;  %v2769_v4 = vld [vmem:[#allocation6 + $0x78] sm:$0xf0]  ;;  %v2759_v5 = vld [vmem:[#allocation6 + $0x60] sm:$0xf] }
  0x16   :  { %v2866_v6 = vld [vmem:[#allocation6 + $0x64] sm:$0xf0]  ;;  %v2772_v7 = vor.u32 %v2867_v2, %v2769_v4  ;;  %v2865_v8 = vld [vmem:[#allocation6 + $0x64] sm:$0xf]  ;;  %v2761_v9 = vld [vmem:[#allocation6 + $0x68] sm:$0xf0] }
  0x17   :  { %312 = vmatpush.bf16.msra.mxu0 %v2768_v3  ;;  %v2760_v10 = vor.u32 %v2866_v6, %v2759_v5  ;;  %v2764_v11 = vor.u32 %v2865_v8, %v2761_v9  ;;  %v2751_v12 = vld [vmem:[#allocation6 + $0x50] sm:$0xf]  ;;  %v2864_v13 = vld [vmem:[#allocation6 + $0x54] sm:$0xf0]  ;;  %v2863_v14 = vld [vmem:[#allocation6 + $0x54] sm:$0xf] }
  0x18   :  { %401 = vmatpush.bf16.msra.mxu1 %v2772_v7  ;;  %v2753_v15 = vld [vmem:[#allocation6 + $0x58] sm:$0xf0]  ;;  %v2752_v16 = vor.u32 %v2864_v13, %v2751_v12  ;;  %v2743_v18 = vld [vmem:[#allocation6 + $0x40] sm:$0xf]  ;;  %v2862_v19 = vld [vmem:[#allocation6 + $0x44] sm:$0xf0] }
  0x19   :  { %v2756_v17 = vor.u32 %v2863_v14, %v2753_v15  ;;  %v2861_v20 = vld [vmem:[#allocation6 + $0x44] sm:$0xf]  ;;  %v2745_v21 = vld [vmem:[#allocation6 + $0x48] sm:$0xf0]  ;;  %v2744_v22 = vor.u32 %v2862_v19, %v2743_v18  ;;  %v2735_v24 = vld [vmem:[#allocation6 + $0x30] sm:$0xf] }
  0x1a   :  { %v2748_v23 = vor.u32 %v2861_v20, %v2745_v21  ;;  %v2860_v25 = vld [vmem:[#allocation6 + $0x34] sm:$0xf0]  ;;  %v2859_v26 = vld [vmem:[#allocation6 + $0x34] sm:$0xf]  ;;  %v2737_v27 = vld [vmem:[#allocation6 + $0x38] sm:$0xf0] }
  0x1b   :  { %313 = vmatpush.bf16.msra.mxu0 %v2760_v10  ;;  %v2736_v28 = vor.u32 %v2860_v25, %v2735_v24  ;;  %v2740_v29 = vor.u32 %v2859_v26, %v2737_v27  ;;  %v2727_v30 = vld [vmem:[#allocation6 + $0x20] sm:$0xf]  ;;  %v2858_v31 = vld [vmem:[#allocation6 + $0x24] sm:$0xf0]  ;;  %v2857_v32 = vld [vmem:[#allocation6 + $0x24] sm:$0xf] }
  0x1c   :  { %402 = vmatpush.bf16.msra.mxu1 %v2764_v11  ;;  %v2729_v33 = vld [vmem:[#allocation6 + $0x28] sm:$0xf0]  ;;  %v2728_v34 = vor.u32 %v2858_v31, %v2727_v30  ;;  %v2719_v36 = vld [vmem:[#allocation6 + $0x10] sm:$0xf]  ;;  %v2856_v37 = vld [vmem:[#allocation6 + $0x14] sm:$0xf0] }
  0x1d   :  { %v2732_v35 = vor.u32 %v2857_v32, %v2729_v33  ;;  %v2855_v38 = vld [vmem:[#allocation6 + $0x14] sm:$0xf]  ;;  %v2721_v39 = vld [vmem:[#allocation6 + $0x18] sm:$0xf0]  ;;  %v2720_v40 = vor.u32 %v2856_v37, %v2719_v36  ;;  %v2711_v42 = vld [vmem:[#allocation6] sm:$0xf] }
  0x1e   :  { %v2724_v41 = vor.u32 %v2855_v38, %v2721_v39  ;;  %v2854_v43 = vld [vmem:[#allocation6 + $0x4] sm:$0xf0]  ;;  %v2853_v44 = vld [vmem:[#allocation6 + $0x4] sm:$0xf]  ;;  %v2713_v45 = vld [vmem:[#allocation6 + $0x8] sm:$0xf0] }
  0x1f   :  { %314 = vmatpush.bf16.msra.mxu0 %v2752_v16  ;;  %v2712_v46 = vor.u32 %v2854_v43, %v2711_v42  ;;  %v2716_v47 = vor.u32 %v2853_v44, %v2713_v45  ;;  %v2837_v48 = vld [vmem:[#allocation3] sm:$0xff]  ;;  %v2838_v49 = vld [vmem:[#allocation3 + $0x8] sm:$0xff]  ;;  %v2839_v50 = vld [vmem:[#allocation3 + $0x10] sm:$0xff]  ;;  %s3289_s17 = smov [#allocation11]   ;;  %s2630_s21 = sshll.u32 %s4935_s5, 4  ;;  %s2631_s21 = int_to_ptr.hbm [resolvable:$true] %s2630_s21 }
  0x20   :  { %403 = vmatpush.bf16.msra.mxu1 %v2756_v17  ;;  %v2840_v51 = vld [vmem:[#allocation3 + $0x18] sm:$0xff]  ;;  %v2841_v52 = vld [vmem:[#allocation3 + $0x20] sm:$0xff]  ;;  %v2842_v53 = vld [vmem:[#allocation3 + $0x28] sm:$0xff]  ;;  %s2628_s18 = sshll.u32 %s3289_s17, 4  ;;  %s2629_s18 = int_to_ptr.vmem [resolvable:$true] %s2628_s18 }
  0x21   :  { %v2843_v54 = vld [vmem:[#allocation3 + $0x30] sm:$0xff]  ;;  %v2844_v55 = vld [vmem:[#allocation3 + $0x38] sm:$0xff]  ;;  %v130_v58 = vld [vmem:[#allocation8] sm:$0x3] }
  0x22   :  { %v2876_v56 = vld [vmem:[#allocation9 + $0x38] sm:$0xff]  ;;  %v3335_v59 = vperm.slane %v130_v58, 0  ;;  %v2875_v60 = vld [vmem:[#allocation9 + $0x30] sm:$0xff]  ;;  %v2874_v1 = vld [vmem:[#allocation9 + $0x28] sm:$0xff]  ;;  %v3347_v14 = vperm.slane %v130_v58, 1 }
  0x23   :  { %315 = vmatpush.bf16.msra.mxu0 %v2744_v22  ;;  %v2884_v57 = vld [vmem:[#allocation9 + $0x78] sm:$0xff]  ;;  %2314 = vmatpush.bf16.msra.mxu2 %v2876_v56  ;;  %v2883_v61 = vld [vmem:[#allocation9 + $0x70] sm:$0xff]  ;;  %v2882_v2 = vld [vmem:[#allocation9 + $0x68] sm:$0xff] }
  0x24   :  { %404 = vmatpush.bf16.msra.mxu1 %v2748_v23  ;;  %2403 = vmatpush.bf16.msra.mxu3 %v2884_v57  ;;  %v2845_v62 = vld [vmem:[#allocation3 + $0x40] sm:$0xff]  ;;  %v2871_v17 = vld [vmem:[#allocation9 + $0x10] sm:$0xff]  ;;  %v2846_v21 = vld [vmem:[#allocation3 + $0x48] sm:$0xff] }
  0x25   :  { %v2873_v5 = vld [vmem:[#allocation9 + $0x20] sm:$0xff]  ;;  %v2872_v12 = vld [vmem:[#allocation9 + $0x18] sm:$0xff]  ;;  %v2879_v18 = vld [vmem:[#allocation9 + $0x50] sm:$0xff] }
  0x26   :  { %v2881_v6 = vld [vmem:[#allocation9 + $0x60] sm:$0xff]  ;;  %v2880_v13 = vld [vmem:[#allocation9 + $0x58] sm:$0xff]  ;;  %v2870_v24 = vld [vmem:[#allocation9 + $0x8] sm:$0xff] }
  0x27   :  { %316 = vmatpush.bf16.msra.mxu0 %v2736_v28  ;;  %2315 = vmatpush.bf16.msra.mxu2 %v2875_v60  ;;  %v2878_v25 = vld [vmem:[#allocation9 + $0x48] sm:$0xff]  ;;  %v2869_v30 = vld [vmem:[#allocation9] sm:$0xff] }
  0x28   :  { %405 = vmatpush.bf16.msra.mxu1 %v2740_v29  ;;  %2404 = vmatpush.bf16.msra.mxu3 %v2883_v61  ;;  %v2877_v31 = vld [vmem:[#allocation9 + $0x40] sm:$0xff] }
  0x2b   :  { %317 = vmatpush.bf16.msra.mxu0 %v2728_v34  ;;  %2316 = vmatpush.bf16.msra.mxu2 %v2874_v1 }
  0x2c   :  { %406 = vmatpush.bf16.msra.mxu1 %v2732_v35  ;;  %2405 = vmatpush.bf16.msra.mxu3 %v2882_v2 }
  0x2f   :  { %318 = vmatpush.bf16.msra.mxu0 %v2720_v40  ;;  %2317 = vmatpush.bf16.msra.mxu2 %v2873_v5 }
  0x30   :  { %407 = vmatpush.bf16.msra.mxu1 %v2724_v41  ;;  %2406 = vmatpush.bf16.msra.mxu3 %v2881_v6 }
  0x33   :  { %319 = vmatpush.bf16.msra.mxu0 %v2712_v46  ;;  %2318 = vmatpush.bf16.msra.mxu2 %v2872_v12  ;;  %v2847_v46 = vld [vmem:[#allocation3 + $0x50] sm:$0xff] }
  0x34   :  { %408 = vmatpush.bf16.msra.mxu1 %v2716_v47  ;;  %2407 = vmatpush.bf16.msra.mxu3 %v2880_v13 }
  0x36   :  { %320 = vmatmul.bf16.vlgmr.msra.gmra.mxu0 %v2837_v48 }
  0x37   :  { %409 = vmatmul.bf16.vlgmr.msra.gmra.mxu1 %v2837_v48  ;;  %2319 = vmatpush.bf16.msra.mxu2 %v2871_v17 }
  0x38   :  { %2408 = vmatpush.bf16.msra.mxu3 %v2879_v18 }
  0x3b   :  { %2320 = vmatpush.bf16.msra.mxu2 %v2870_v24 }
  0x3c   :  { %2409 = vmatpush.bf16.msra.mxu3 %v2878_v25 }
  0x3f   :  { %2321 = vmatpush.bf16.msra.mxu2 %v2869_v30 }
  0x40   :  { %2410 = vmatpush.bf16.msra.mxu3 %v2877_v31 }
  0x46   :  { %325 = vmatmul.bf16.gmra.mxu0 %v2838_v49 }
  0x47   :  { %414 = vmatmul.bf16.gmra.mxu1 %v2838_v49 }
  0x56   :  { %330 = vmatmul.bf16.gmra.mxu0 %v2839_v50 }
  0x57   :  { %419 = vmatmul.bf16.gmra.mxu1 %v2839_v50 }
  0x66   :  { %335 = vmatmul.bf16.gmra.mxu0 %v2840_v51 }
  0x67   :  { %424 = vmatmul.bf16.gmra.mxu1 %v2840_v51 }
  0x76   :  { %340 = vmatmul.bf16.gmra.mxu0 %v2841_v52 }
  0x77   :  { %429 = vmatmul.bf16.gmra.mxu1 %v2841_v52 }
  0x86   :  { %345 = vmatmul.bf16.gmra.mxu0 %v2842_v53 }
  0x87   :  { %434 = vmatmul.bf16.gmra.mxu1 %v2842_v53 }
  0x96   :  { %350 = vmatmul.bf16.gmra.mxu0 %v2843_v54 }
  0x97   :  { %439 = vmatmul.bf16.gmra.mxu1 %v2843_v54 }
  0xa6   :  { %355 = vmatmul.bf16.gmra.mxu0 %v2844_v55 }
  0xa7   :  { %444 = vmatmul.bf16.gmra.mxu1 %v2844_v55 }
  0xb3   :  { %v321_v63 = vpop.f32.mrf.mxu0 }
  0xb4   :  { %v3338_v0 = vadd.f32 %v321_v63, %v3335_v59  ;;  %v410_v8 = vpop.f32.mrf.mxu1 }
  0xb5   :  { %v3354_v19 = vadd.f32 %v410_v8, %v3347_v14 }
  0xb6   :  { %v3341_v3 = vmul.f32 0.70710677, %v3338_v0  ;;  %360 = vmatmul.bf16.gmra.mxu0 %v2845_v62 }
  0xb7   :  { %449 = vmatmul.bf16.gmra.mxu1 %v2845_v62  ;;  %v3357_v28 = vmul.f32 0.70710677, %v3354_v19 }
  0xb8   :  { %v618_v4 = vand.u32 2147483647, %v3341_v3  ;;  %vm1834_vm0 = vcmp.lt.f32.partialorder %v3341_v3, 0.0 }
  0xb9   :  { %v3363_v33 = vand.u32 2147483647, %v3357_v28  ;;  %vm1835_vm2 = vcmp.lt.f32.partialorder %v3357_v28, 0.0 }
  0xba   :  { %v682_v7 = vmul.f32 0.3275911, %v618_v4  ;;  %v1450_v38 = vsub.f32 0.0, %v618_v4 }
  0xbb   :  { %v323_v9 = vpop.f32.mrf.mxu0  ;;  %v683_v39 = vmul.f32 0.3275911, %v3363_v33  ;;  %v1451_v25 = vsub.f32 0.0, %v3363_v33 }
  0xbc   :  { %v746_v10 = vadd.f32 1.0, %v682_v7  ;;  %v3345_v11 = vadd.f32 %v323_v9, %v3335_v59  ;;  %v412_v26 = vpop.f32.mrf.mxu1  ;;  %v1514_v44 = vmul.f32 %v1450_v38, %v618_v4  ;;  %v2848_v9 = vld [vmem:[#allocation3 + $0x58] sm:$0xff] }
  0xbd   :  { %v3360_v29 = vadd.f32 %v412_v26, %v3347_v14  ;;  %v747_v45 = vadd.f32 1.0, %v683_v39 }
  0xbe   :  { %2895 = vrcp.f32 %v746_v10  ;;  %v3350_v15 = vmul.f32 0.70710677, %v3345_v11  ;;  %v1578_v53 = vmul.f32 1.442695, %v1514_v44 }
  0xbf   :  { %v3366_v35 = vmul.f32 0.70710677, %v3360_v29 }
  0xc0   :  { %v620_v16 = vand.u32 2147483647, %v3350_v15  ;;  %vm1836_vm1 = vcmp.lt.f32.partialorder %v3350_v15, 0.0 }
  0xc1   :  { %v3370_v40 = vand.u32 2147483647, %v3366_v35  ;;  %vm1837_vm3 = vcmp.lt.f32.partialorder %v3366_v35, 0.0 }
  0xc2   :  { %v684_v20 = vmul.f32 0.3275911, %v620_v16  ;;  %v1452_v42 = vsub.f32 0.0, %v620_v16 }
  0xc3   :  { %v685_v49 = vmul.f32 0.3275911, %v3370_v40  ;;  %v326_v57 = vpop.f32.mrf.mxu0 }
  0xc4   :  { %v2896_v22 = vpop.eup %2895  ;;  %v748_v23 = vadd.f32 1.0, %v684_v20  ;;  %v1516_v51 = vmul.f32 %v1452_v42, %v620_v16  ;;  %v415_v2 = vpop.f32.mrf.mxu1  ;;  %v3379_v18 = vadd.f32 %v326_v57, %v3335_v59 }
  0xc5   :  { %v874_v27 = vmul.f32 1.0614054, %v2896_v22  ;;  %v749_v54 = vadd.f32 1.0, %v685_v49  ;;  %v3397_v38 = vadd.f32 %v415_v2, %v3347_v14 }
  0xc6   :  { %2897 = vrcp.f32 %v748_v23  ;;  %365 = vmatmul.bf16.gmra.mxu0 %v2846_v21  ;;  %v1582_v56 = vmul.f32 1.442695, %v1516_v51  ;;  %v3388_v26 = vmul.f32 0.70710677, %v3379_v18 }
  0xc7   :  { %454 = vmatmul.bf16.gmra.mxu1 %v2846_v21  ;;  %v938_v32 = vadd.f32 -1.4531521, %v874_v27  ;;  %2899 = vrcp.f32 %v747_v45 }
  0xc8   :  { %2901 = vpow2.f32 %v1578_v53  ;;  %v622_v42 = vand.u32 2147483647, %v3388_v26  ;;  %vm1838_vm4 = vcmp.lt.f32.partialorder %v3388_v26, 0.0 }
  0xc9   :  { %v1002_v37 = vmul.f32 %v2896_v22, %v938_v32  ;;  %2903 = vrcp.f32 %v749_v54 }
  0xca   :  { %2905 = vpow2.f32 %v1582_v56 }
  0xcb   :  { %v1066_v43 = vadd.f32 1.4214138, %v1002_v37  ;;  %v328_v13 = vpop.f32.mrf.mxu0  ;;  %v1453_v37 = vsub.f32 0.0, %v3370_v40 }
  0xcc   :  { %v2898_v34 = vpop.eup %2897  ;;  %v3382_v21 = vadd.f32 %v328_v13, %v3335_v59  ;;  %v417_v30 = vpop.f32.mrf.mxu1 }
  0xcd   :  { %v876_v36 = vmul.f32 1.0614054, %v2898_v34  ;;  %v1130_v48 = vmul.f32 %v2896_v22, %v1066_v43  ;;  %v3373_v62 = vpop.eup %2899  ;;  %v3402_v3 = vadd.f32 %v417_v30, %v3347_v14  ;;  %v1517_v49 = vmul.f32 %v1453_v37, %v3370_v40 }
  0xce   :  { %v875_v4 = vmul.f32 1.0614054, %v3373_v62  ;;  %v2902_v5 = vpop.eup %2901  ;;  %v3392_v31 = vmul.f32 0.70710677, %v3382_v21  ;;  %v493_v30 = vmul.f32 0.5, %v3360_v29 }
  0xcf   :  { %v940_v41 = vadd.f32 -1.4531521, %v876_v36  ;;  %v1194_v52 = vadd.f32 -0.28449672, %v1130_v48  ;;  %v3376_v8 = vpop.eup %2903  ;;  %v492_v48 = vmul.f32 0.5, %v3345_v11 }
  0xd0   :  { %v2906_v12 = vpop.eup %2905  ;;  %v939_v17 = vadd.f32 -1.4531521, %v875_v4  ;;  %v877_v23 = vmul.f32 1.0614054, %v3376_v8  ;;  %v3406_v15 = vand.u32 2147483647, %v3392_v31 }
  0xd1   :  { %v1004_v47 = vmul.f32 %v2898_v34, %v940_v41  ;;  %v1258_v58 = vmul.f32 %v2896_v22, %v1194_v52  ;;  %v1515_v41 = vmul.f32 %v1451_v25, %v3363_v33  ;;  %v3412_v33 = vmul.f32 0.70710677, %v3397_v38 }
  0xd2   :  { %v1003_v24 = vmul.f32 %v3373_v62, %v939_v17  ;;  %v941_v36 = vadd.f32 -1.4531521, %v877_v23  ;;  %v686_v52 = vmul.f32 0.3275911, %v622_v42  ;;  %v3416_v53 = vmul.f32 0.70710677, %v3402_v3 }
  0xd3   :  { %v1068_v50 = vadd.f32 1.4214138, %v1004_v47  ;;  %v1322_v61 = vadd.f32 0.2548296, %v1258_v58  ;;  %v1580_v51 = vmul.f32 1.442695, %v1515_v41  ;;  %v331_v56 = vpop.f32.mrf.mxu0 }
  0xd4   :  { %v1067_v39 = vadd.f32 1.4214138, %v1003_v24  ;;  %v1005_v47 = vmul.f32 %v3376_v8, %v941_v36  ;;  %v2849_v58 = vld [vmem:[#allocation3 + $0x60] sm:$0xff]  ;;  %v1584_v11 = vmul.f32 1.442695, %v1517_v49  ;;  %v332_v25 = vadd.f32 %v331_v56, %v3335_v59 }
  0xd5   :  { %v1132_v55 = vmul.f32 %v2898_v34, %v1068_v50  ;;  %v1386_v1 = vmul.f32 %v2896_v22, %v1322_v61  ;;  %v623_v40 = vand.u32 2147483647, %v3412_v33  ;;  %2907 = vpow2.f32 %v1580_v51 }
  0xd6   :  { %370 = vmatmul.bf16.gmra.mxu0 %v2847_v46  ;;  %v1131_v50 = vmul.f32 %v3373_v62, %v1067_v39  ;;  %v1069_v57 = vadd.f32 1.4214138, %v1005_v47  ;;  %2909 = vpow2.f32 %v1584_v11  ;;  %v1456_v37 = vsub.f32 0.0, %v3406_v15 }
  0xd7   :  { %459 = vmatmul.bf16.gmra.mxu1 %v2847_v46  ;;  %v1196_v60 = vadd.f32 -0.28449672, %v1132_v55  ;;  %v1706_v7 = vmul.f32 %v2902_v5, %v1386_v1  ;;  %v490_v46 = vmul.f32 0.5, %v3338_v0  ;;  %v688_v55 = vmul.f32 0.3275911, %v3406_v15 }
  0xd8   :  { %v1195_v61 = vadd.f32 -0.28449672, %v1131_v50  ;;  %v625_v1 = vand.u32 2147483647, %v3416_v53  ;;  %v1133_v2 = vmul.f32 %v3376_v8, %v1069_v57  ;;  %v1454_v5 = vsub.f32 0.0, %v622_v42 }
  0xd9   :  { %v1260_v63 = vmul.f32 %v2898_v34, %v1196_v60  ;;  %v1770_v16 = vsub.f32 1.0, %v1706_v7  ;;  %v3441_v47 = vmul.f32 0.5, %v3397_v38  ;;  %v3454_v38 = vmul.f32 0.5, %v3382_v21 }
  0xda   :  { %v1259_v4 = vmul.f32 %v3373_v62, %v1195_v61  ;;  %v1197_v7 = vadd.f32 -0.28449672, %v1133_v2  ;;  %v689_v13 = vmul.f32 0.3275911, %v625_v1  ;;  %v1518_v24 = vmul.f32 %v1454_v5, %v622_v42 }
  0xdb   :  { %v1324_v6 = vadd.f32 0.2548296, %v1260_v63  ;;  %v1898_v22 = vsub.f32 0.0, %v1770_v16  ;;  %v750_v63 = vadd.f32 1.0, %v686_v52  ;;  %v2908_v23 = vpop.eup %2907  ;;  %v333_v41 = vpop.f32.mrf.mxu0  ;;  %v3436_v42 = vmul.f32 0.5, %v3379_v18 }
  0xdc   :  { %v1261_v17 = vmul.f32 %v3376_v8, %v1197_v7  ;;  %v753_v39 = vadd.f32 1.0, %v689_v13  ;;  %v1520_v18 = vmul.f32 %v1456_v37, %v3406_v15  ;;  %v3467_v28 = vmul.f32 0.5, %v332_v25 }
  0xdd   :  { %v1388_v10 = vmul.f32 %v2898_v34, %v1324_v6  ;;  %v1962_v34 = vsel %vm1834_vm0, %v1898_v22, %v1770_v16  ;;  %v752_v6 = vadd.f32 1.0, %v688_v55  ;;  %2911 = vrcp.f32 %v750_v63  ;;  %v420_v16 = vpop.f32.mrf.mxu1 }
  0xde   :  { %v2026_v44 = vadd.f32 1.0, %v1962_v34  ;;  %v1590_v63 = vmul.f32 1.442695, %v1520_v18  ;;  %vm1840_vm5 = vcmp.lt.f32.partialorder %v3392_v31, 0.0  ;;  %vm1839_vm6 = vcmp.lt.f32.partialorder %v3412_v33, 0.0 }
  0xdf   :  { %v1708_v20 = vmul.f32 %v2906_v12, %v1388_v10  ;;  %v1455_v10 = vsub.f32 0.0, %v623_v40  ;;  %v1323_v12 = vadd.f32 0.2548296, %v1259_v4  ;;  %2913 = vrcp.f32 %v752_v6 }
  0xe0   :  { %v2090_v0 = vmul.f32 %v2026_v44, %v490_v46  ;;  %v1457_v44 = vsub.f32 0.0, %v625_v1  ;;  %v1586_v46 = vmul.f32 1.442695, %v1518_v24  ;;  %vm1841_vm7 = vcmp.lt.f32.partialorder %v3416_v53, 0.0 }
  0xe1   :  { %v1772_v27 = vsub.f32 1.0, %v1708_v20  ;;  %v3425_v20 = vmul.f32 0.5, %v3354_v19  ;;  %v1387_v22 = vmul.f32 %v3373_v62, %v1323_v12  ;;  %v1519_v34 = vmul.f32 %v1455_v10, %v623_v40  ;;  %v2910_v62 = vpop.eup %2909 }
  0xe2   :  { %v421_v19 = vadd.f32 %v420_v16, %v3347_v14  ;;  %v1521_v55 = vmul.f32 %v1457_v44, %v625_v1 }
  0xe3   :  { %v1900_v32 = vsub.f32 0.0, %v1772_v27  ;;  %v1707_v36 = vmul.f32 %v2908_v23, %v1387_v22  ;;  %v3438_v29 = vpop.eup %2911  ;;  %v1588_v50 = vmul.f32 1.442695, %v1519_v34 }
  0xe4   :  { %v878_v57 = vmul.f32 1.0614054, %v3438_v29  ;;  %v1592_v4 = vmul.f32 1.442695, %v1521_v55  ;;  %v3479_v13 = vmul.f32 0.5, %v421_v19 }
  0xe5   :  { %v1964_v43 = vsel %vm1836_vm1, %v1900_v32, %v1772_v27  ;;  %v1325_v27 = vadd.f32 0.2548296, %v1261_v17  ;;  %v3448_v52 = vpop.eup %2913  ;;  %v422_v15 = vpop.f32.mrf.mxu1 }
  0xe6   :  { %375 = vmatmul.bf16.gmra.mxu0 %v2848_v9  ;;  %v2028_v45 = vadd.f32 1.0, %v1964_v43  ;;  %v880_v61 = vmul.f32 1.0614054, %v3448_v52  ;;  %v3475_v5 = vadd.f32 %v422_v15, %v3347_v14  ;;  %v942_v7 = vadd.f32 -1.4531521, %v878_v57 }
  0xe7   :  { %464 = vmatmul.bf16.gmra.mxu1 %v2848_v9  ;;  %v687_v9 = vmul.f32 0.3275911, %v623_v40  ;;  %v1389_v43 = vmul.f32 %v3376_v8, %v1325_v27  ;;  %v3446_v8 = vadd.f32 %v333_v41, %v3335_v59 }
  0xe8   :  { %v2092_v54 = vmul.f32 %v2028_v45, %v492_v48  ;;  %v1771_v45 = vsub.f32 1.0, %v1707_v36  ;;  %v3443_v48 = vmul.f32 0.70710677, %v332_v25  ;;  %v944_v16 = vadd.f32 -1.4531521, %v880_v61  ;;  %v2850_v36 = vld [vmem:[#allocation3 + $0x68] sm:$0xff] }
  0xe9   :  { %v751_v32 = vadd.f32 1.0, %v687_v9  ;;  %v1709_v49 = vmul.f32 %v2910_v62, %v1389_v43  ;;  %v1006_v23 = vmul.f32 %v3438_v29, %v942_v7  ;;  %v3503_v61 = vmul.f32 0.5, %v3446_v8 }
  0xea   :  { %v2154_v60 = vpack.c.bf16 %v2092_v54, %v2090_v0  ;;  %v1899_v51 = vsub.f32 0.0, %v1771_v45  ;;  %v3451_v0 = vmul.f32 0.70710677, %v421_v19  ;;  %v626_v11 = vand.u32 2147483647, %v3443_v48 }
  0xeb   :  { %2915 = vrcp.f32 %v751_v32  ;;  %v1773_v54 = vsub.f32 1.0, %v1709_v49  ;;  %v1008_v32 = vmul.f32 %v3448_v52, %v944_v16  ;;  %v1070_v41 = vadd.f32 1.4214138, %v1006_v23 }
  0xec   :  { %2322 = vmatmul.bf16.vlgmr.msra.gmra.mxu2 %v2154_v60  ;;  %2917 = vrcp.f32 %v753_v39  ;;  %v1963_v56 = vsel %vm1835_vm2, %v1899_v51, %v1771_v45  ;;  %v3464_v60 = vmul.f32 0.70710677, %v3446_v8  ;;  %v627_v1 = vand.u32 2147483647, %v3451_v0 }
  0xed   :  { %2919 = vpow2.f32 %v1586_v46  ;;  %v1901_v40 = vsub.f32 0.0, %v1773_v54  ;;  %v2027_v21 = vadd.f32 1.0, %v1963_v56  ;;  %v690_v10 = vmul.f32 0.3275911, %v626_v11  ;;  %v336_v56 = vpop.f32.mrf.mxu0 }
  0xee   :  { %2921 = vpow2.f32 %v1588_v50  ;;  %v1458_v12 = vsub.f32 0.0, %v626_v11  ;;  %v3482_v17 = vand.u32 2147483647, %v3464_v60  ;;  %v691_v25 = vmul.f32 0.3275911, %v627_v1 }
  0xef   :  { %v2091_v35 = vmul.f32 %v2027_v21, %v3425_v20  ;;  %v1459_v27 = vsub.f32 0.0, %v627_v1  ;;  %v3493_v39 = vmul.f32 0.70710677, %v3475_v5  ;;  %v1072_v62 = vadd.f32 1.4214138, %v1008_v32 }
  0xf0   :  { %v1522_v43 = vmul.f32 %v1458_v12, %v626_v11  ;;  %2923 = vpow2.f32 %v1590_v63  ;;  %v692_v45 = vmul.f32 0.3275911, %v3482_v17  ;;  %v1134_v46 = vmul.f32 %v3438_v29, %v1070_v41 }
  0xf1   :  { %v3472_v2 = vpop.eup %2915  ;;  %2925 = vpow2.f32 %v1592_v4  ;;  %v755_v50 = vadd.f32 1.0, %v691_v25  ;;  %v1136_v51 = vmul.f32 %v3448_v52, %v1072_v62  ;;  %v629_v55 = vand.u32 2147483647, %v3493_v39 }
  0xf2   :  { %v3477_v9 = vpop.eup %2917  ;;  %v879_v34 = vmul.f32 1.0614054, %v3472_v2  ;;  %v1198_v57 = vadd.f32 -0.28449672, %v1134_v46  ;;  %v1594_v15 = vmul.f32 1.442695, %v1522_v43 }
  0xf3   :  { %v3486_v24 = vpop.eup %2919  ;;  %v881_v20 = vmul.f32 1.0614054, %v3477_v9  ;;  %v756_v63 = vadd.f32 1.0, %v692_v45  ;;  %v693_v16 = vmul.f32 0.3275911, %v629_v55  ;;  %v3519_v43 = vmul.f32 0.5, %v3475_v5 }
  0xf4   :  { %v3490_v37 = vpop.eup %2921  ;;  %v943_v44 = vadd.f32 -1.4531521, %v879_v34  ;;  %vm1842_vm8 = vcmp.lt.f32.partialorder %v3443_v48, 0.0  ;;  %vm1844_vm9 = vcmp.lt.f32.partialorder %v3464_v60, 0.0  ;;  %vm1843_vm10 = vcmp.lt.f32.partialorder %v3451_v0, 0.0 }
  0xf5   :  { %v945_v49 = vadd.f32 -1.4531521, %v881_v20  ;;  %v757_v45 = vadd.f32 1.0, %v693_v16  ;;  %vm1845_vm11 = vcmp.lt.f32.partialorder %v3493_v39, 0.0 }
  0xf6   :  { %380 = vmatmul.bf16.gmra.mxu0 %v2849_v58  ;;  %v1007_v18 = vmul.f32 %v3472_v2, %v943_v44  ;;  %v2924_v12 = vpop.eup %2923 }
  0xf7   :  { %469 = vmatmul.bf16.gmra.mxu1 %v2849_v58  ;;  %v3460_v58 = vmul.f32 0.5, %v3402_v3  ;;  %v1965_v3 = vsel %vm1837_vm3, %v1901_v40, %v1773_v54  ;;  %v1523_v54 = vmul.f32 %v1459_v27, %v627_v1  ;;  %v1009_v11 = vmul.f32 %v3477_v9, %v945_v49  ;;  %v2926_v8 = vpop.eup %2925 }
  0xf8   :  { %v2029_v6 = vadd.f32 1.0, %v1965_v3  ;;  %v1200_v40 = vadd.f32 -0.28449672, %v1136_v51  ;;  %v1071_v21 = vadd.f32 1.4214138, %v1007_v18  ;;  %v1262_v3 = vmul.f32 %v3438_v29, %v1198_v57 }
  0xf9   :  { %v1073_v4 = vadd.f32 1.4214138, %v1009_v11  ;;  %v1460_v1 = vsub.f32 0.0, %v3482_v17  ;;  %v1596_v25 = vmul.f32 1.442695, %v1523_v54  ;;  %v337_v27 = vadd.f32 %v336_v56, %v3335_v59 }
  0xfa   :  { %v2093_v22 = vmul.f32 %v2029_v6, %v493_v30  ;;  %v754_v30 = vadd.f32 1.0, %v690_v10  ;;  %v425_v6 = vpop.f32.mrf.mxu1  ;;  %v1264_v7 = vmul.f32 %v3448_v52, %v1200_v40  ;;  %v1135_v10 = vmul.f32 %v3472_v2, %v1071_v21 }
  0xfb   :  { %v1137_v23 = vmul.f32 %v3477_v9, %v1073_v4 }
  0xfc   :  { %v2155_v19 = vpack.c.bf16 %v2093_v22, %v2091_v35  ;;  %2927 = vrcp.f32 %v754_v30  ;;  %v1461_v35 = vsub.f32 0.0, %v629_v55  ;;  %v1326_v22 = vadd.f32 0.2548296, %v1262_v3 }
  0xfd   :  { %2929 = vrcp.f32 %v755_v50  ;;  %v1328_v32 = vadd.f32 0.2548296, %v1264_v7  ;;  %v1199_v34 = vadd.f32 -0.28449672, %v1135_v10  ;;  %v1201_v41 = vadd.f32 -0.28449672, %v1137_v23 }
  0xfe   :  { %2411 = vmatmul.bf16.vlgmr.msra.gmra.mxu3 %v2155_v19  ;;  %2931 = vrcp.f32 %v756_v63  ;;  %v1390_v19 = vmul.f32 %v3438_v29, %v1326_v22  ;;  %v1524_v30 = vmul.f32 %v1460_v1, %v3482_v17  ;;  %v1525_v46 = vmul.f32 %v1461_v35, %v629_v55 }
  0xff   :  { %v1392_v62 = vmul.f32 %v3448_v52, %v1328_v32  ;;  %v1263_v44 = vmul.f32 %v3472_v2, %v1199_v34  ;;  %v1265_v50 = vmul.f32 %v3477_v9, %v1201_v41  ;;  %2933 = vpow2.f32 %v1594_v15  ;;  %v338_v52 = vpop.f32.mrf.mxu0 }
 0x100   :  { %v1710_v49 = vmul.f32 %v3486_v24, %v1390_v19  ;;  %v3527_v29 = vmul.f32 0.70710677, %v337_v27  ;;  %2935 = vpow2.f32 %v1596_v25  ;;  %v1598_v24 = vmul.f32 1.442695, %v1524_v30 }
 0x101   :  { %v1712_v18 = vmul.f32 %v2924_v12, %v1392_v62  ;;  %v1327_v17 = vadd.f32 0.2548296, %v1263_v44  ;;  %v1329_v56 = vadd.f32 0.2548296, %v1265_v50  ;;  %v3533_v55 = vmul.f32 0.5, %v337_v27 }
 0x102   :  { %v3515_v20 = vpop.eup %2927  ;;  %v1774_v54 = vsub.f32 1.0, %v1710_v49  ;;  %2937 = vrcp.f32 %v757_v45  ;;  %v1600_v40 = vmul.f32 1.442695, %v1525_v46  ;;  %v630_v3 = vand.u32 2147483647, %v3527_v29  ;;  %v427_v10 = vpop.f32.mrf.mxu1 }
 0x103   :  { %v3525_v51 = vpop.eup %2929  ;;  %v1776_v57 = vsub.f32 1.0, %v1712_v18  ;;  %v1391_v11 = vmul.f32 %v3472_v2, %v1327_v17  ;;  %v1393_v63 = vmul.f32 %v3477_v9, %v1329_v56  ;;  %v3541_v4 = vadd.f32 %v338_v52, %v3335_v59 }
 0x104   :  { %v3536_v15 = vpop.eup %2931  ;;  %v1902_v21 = vsub.f32 0.0, %v1774_v54  ;;  %v882_v16 = vmul.f32 1.0614054, %v3515_v20  ;;  %2939 = vpow2.f32 %v1598_v24  ;;  %v694_v34 = vmul.f32 0.3275911, %v630_v3 }
 0x105   :  { %v1904_v1 = vsub.f32 0.0, %v1776_v57  ;;  %v1713_v12 = vmul.f32 %v2926_v8, %v1393_v63  ;;  %v3548_v35 = vpop.eup %2933  ;;  %v884_v25 = vmul.f32 1.0614054, %v3536_v15  ;;  %v3558_v8 = vmul.f32 0.70710677, %v3541_v4 }
 0x106   :  { %385 = vmatmul.bf16.gmra.mxu0 %v2850_v36  ;;  %v1966_v2 = vsel %vm1838_vm4, %v1902_v21, %v1774_v54  ;;  %v3553_v27 = vpop.eup %2935  ;;  %v3561_v19 = vadd.f32 %v427_v10, %v3347_v14  ;;  %v946_v45 = vadd.f32 -1.4531521, %v882_v16  ;;  %2941 = vpow2.f32 %v1600_v40 }
 0x107   :  { %474 = vmatmul.bf16.gmra.mxu1 %v2850_v36  ;;  %v426_v36 = vadd.f32 %v425_v6, %v3347_v14  ;;  %v1711_v6 = vmul.f32 %v3490_v37, %v1391_v11  ;;  %v1968_v9 = vsel %vm1840_vm5, %v1904_v1, %v1776_v57  ;;  %v2030_v22 = vadd.f32 1.0, %v1966_v2 }
 0x108   :  { %v2032_v32 = vadd.f32 1.0, %v1968_v9  ;;  %v1777_v26 = vsub.f32 1.0, %v1713_v12  ;;  %v3563_v41 = vpop.eup %2937  ;;  %v948_v50 = vadd.f32 -1.4531521, %v884_v25  ;;  %v758_v56 = vadd.f32 1.0, %v694_v34 }
 0x109   :  { %v3530_v5 = vmul.f32 0.70710677, %v426_v36  ;;  %v1775_v23 = vsub.f32 1.0, %v1711_v6  ;;  %v3555_v37 = vmul.f32 0.5, %v426_v36  ;;  %v2094_v30 = vmul.f32 %v2030_v22, %v3436_v42  ;;  %v2851_v6 = vld [vmem:[#allocation3 + $0x70] sm:$0xff] }
 0x10a   :  { %v2096_v62 = vmul.f32 %v2032_v32, %v3454_v38  ;;  %v1905_v44 = vsub.f32 0.0, %v1777_v26  ;;  %v1462_v36 = vsub.f32 0.0, %v630_v3  ;;  %v3572_v42 = vmul.f32 0.70710677, %v3561_v19  ;;  %v3574_v24 = vpop.eup %2939 }
 0x10b   :  { %v631_v7 = vand.u32 2147483647, %v3530_v5  ;;  %v1903_v31 = vsub.f32 0.0, %v1775_v23  ;;  %v632_v57 = vand.u32 2147483647, %v3558_v8  ;;  %v1010_v33 = vmul.f32 %v3515_v20, %v946_v45 }
 0x10c   :  { %v2156_v17 = vpack.c.bf16 %v2096_v62, %v2094_v30  ;;  %v1969_v52 = vsel %vm1841_vm7, %v1905_v44, %v1777_v26  ;;  %v1012_v11 = vmul.f32 %v3536_v15, %v948_v50  ;;  %v883_v21 = vmul.f32 1.0614054, %v3525_v51  ;;  %v3586_v26 = vpop.eup %2941  ;;  %v430_v62 = vpop.f32.mrf.mxu1 }
 0x10d   :  { %v695_v46 = vmul.f32 0.3275911, %v631_v7  ;;  %v1967_v49 = vsel %vm1839_vm6, %v1903_v31, %v1775_v23  ;;  %v1463_v18 = vsub.f32 0.0, %v631_v7  ;;  %v2033_v38 = vadd.f32 1.0, %v1969_v52 }
 0x10e   :  { %v2031_v54 = vadd.f32 1.0, %v1967_v49  ;;  %2327 = vmatmul.bf16.gmra.mxu2 %v2156_v17  ;;  %v1526_v53 = vmul.f32 %v1462_v36, %v630_v3  ;;  %v1074_v2 = vadd.f32 1.4214138, %v1010_v33  ;;  %v1076_v12 = vadd.f32 1.4214138, %v1012_v11  ;;  %v341_v3 = vpop.f32.mrf.mxu0 }
 0x10f   :  { %v759_v63 = vadd.f32 1.0, %v695_v46  ;;  %v2097_v1 = vmul.f32 %v2033_v38, %v3460_v58  ;;  %v1527_v10 = vmul.f32 %v1463_v18, %v631_v7  ;;  %v885_v16 = vmul.f32 1.0614054, %v3563_v41 }
 0x110   :  { %v2095_v40 = vmul.f32 %v2031_v54, %v3441_v47  ;;  %2943 = vrcp.f32 %v758_v56  ;;  %v633_v9 = vand.u32 2147483647, %v3572_v42  ;;  %v947_v23 = vadd.f32 -1.4531521, %v883_v21 }
 0x111   :  { %v696_v25 = vmul.f32 0.3275911, %v632_v57  ;;  %v1138_v32 = vmul.f32 %v3515_v20, %v1074_v2  ;;  %v1140_v47 = vmul.f32 %v3536_v15, %v1076_v12  ;;  %v949_v58 = vadd.f32 -1.4531521, %v885_v16 }
 0x112   :  { %v2157_v22 = vpack.c.bf16 %v2097_v1, %v2095_v40  ;;  %v1602_v7 = vmul.f32 1.442695, %v1526_v53  ;;  %v3589_v34 = vmul.f32 0.5, %v3541_v4  ;;  %v1464_v31 = vsub.f32 0.0, %v632_v57 }
 0x113   :  { %v1011_v30 = vmul.f32 %v3525_v51, %v947_v23  ;;  %2945 = vrcp.f32 %v759_v63  ;;  %v1202_v44 = vadd.f32 -0.28449672, %v1138_v32  ;;  %v1204_v45 = vadd.f32 -0.28449672, %v1140_v47 }
 0x114   :  { %2416 = vmatmul.bf16.gmra.mxu3 %v2157_v22  ;;  %v1013_v36 = vmul.f32 %v3563_v41, %v949_v58  ;;  %v697_v46 = vmul.f32 0.3275911, %v633_v9  ;;  %v1465_v49 = vsub.f32 0.0, %v633_v9  ;;  %v342_v50 = vadd.f32 %v341_v3, %v3335_v59 }
 0x115   :  { %v1075_v18 = vadd.f32 1.4214138, %v1011_v30  ;;  %v760_v17 = vadd.f32 1.0, %v696_v25  ;;  %v1266_v52 = vmul.f32 %v3515_v20, %v1202_v44  ;;  %v1268_v4 = vmul.f32 %v3536_v15, %v1204_v45  ;;  %v432_v45 = vpop.f32.mrf.mxu1 }
 0x116   :  { %390 = vmatmul.bf16.gmra.mxu0 %v2851_v6  ;;  %v1077_v54 = vadd.f32 1.4214138, %v1013_v36  ;;  %v3596_v56 = vpop.eup %2943  ;;  %v1604_v38 = vmul.f32 1.442695, %v1527_v10  ;;  %v1528_v33 = vmul.f32 %v1464_v31, %v632_v57  ;;  %v431_v11 = vadd.f32 %v430_v62, %v3347_v14 }
 0x117   :  { %479 = vmatmul.bf16.gmra.mxu1 %v2851_v6  ;;  %v1139_v21 = vmul.f32 %v3525_v51, %v1075_v18  ;;  %v3601_v53 = vmul.f32 0.5, %v3561_v19  ;;  %v1330_v63 = vadd.f32 0.2548296, %v1266_v52  ;;  %v1332_v40 = vadd.f32 0.2548296, %v1268_v4 }
 0x118   :  { %v1141_v1 = vmul.f32 %v3563_v41, %v1077_v54  ;;  %v761_v6 = vadd.f32 1.0, %v697_v46  ;;  %v1529_v2 = vmul.f32 %v1465_v49, %v633_v9  ;;  %v3606_v12 = vmul.f32 0.70710677, %v342_v50 }
 0x119   :  { %v1203_v57 = vadd.f32 -0.28449672, %v1139_v21  ;;  %v3608_v10 = vpop.eup %2945  ;;  %2947 = vrcp.f32 %v760_v17  ;;  %v1394_v16 = vmul.f32 %v3515_v20, %v1330_v63  ;;  %v1396_v19 = vmul.f32 %v3536_v15, %v1332_v40  ;;  %v343_v15 = vpop.f32.mrf.mxu0 }
 0x11a   :  { %v1205_v22 = vadd.f32 -0.28449672, %v1141_v1  ;;  %2949 = vpow2.f32 %v1602_v7  ;;  %v1606_v23 = vmul.f32 1.442695, %v1528_v33  ;;  %v3612_v25 = vmul.f32 0.70710677, %v431_v11 }
 0x11b   :  { %v1267_v3 = vmul.f32 %v3525_v51, %v1203_v57  ;;  %2951 = vpow2.f32 %v1604_v38  ;;  %v1714_v9 = vmul.f32 %v3548_v35, %v1394_v16  ;;  %v1716_v32 = vmul.f32 %v3574_v24, %v1396_v19 }
 0x11c   :  { %v1269_v47 = vmul.f32 %v3563_v41, %v1205_v22  ;;  %2953 = vrcp.f32 %v761_v6  ;;  %v3618_v58 = vmul.f32 0.5, %v342_v50  ;;  %v634_v20 = vand.u32 2147483647, %v3606_v12 }
 0x11d   :  { %v1331_v31 = vadd.f32 0.2548296, %v1267_v3  ;;  %v1608_v7 = vmul.f32 1.442695, %v1529_v2  ;;  %v1778_v30 = vsub.f32 1.0, %v1714_v9  ;;  %v1780_v62 = vsub.f32 1.0, %v1716_v32 }
 0x11e   :  { %v1333_v44 = vadd.f32 0.2548296, %v1269_v47  ;;  %2955 = vpow2.f32 %v1606_v23  ;;  %v3623_v35 = vmul.f32 0.5, %v431_v11  ;;  %v635_v24 = vand.u32 2147483647, %v3612_v25 }
 0x11f   :  { %v1395_v36 = vmul.f32 %v3525_v51, %v1331_v31  ;;  %v3627_v46 = vpop.eup %2947  ;;  %v344_v49 = vadd.f32 %v343_v15, %v3335_v59  ;;  %v1906_v50 = vsub.f32 0.0, %v1778_v30  ;;  %v1908_v18 = vsub.f32 0.0, %v1780_v62 }
 0x120   :  { %v1397_v17 = vmul.f32 %v3563_v41, %v1333_v44  ;;  %v3631_v52 = vpop.eup %2949  ;;  %v698_v4 = vmul.f32 0.3275911, %v634_v20  ;;  %v1466_v54 = vsub.f32 0.0, %v634_v20  ;;  %v886_v33 = vmul.f32 1.0614054, %v3596_v56 }
 0x121   :  { %v1715_v38 = vmul.f32 %v3553_v27, %v1395_v36  ;;  %v3635_v11 = vpop.eup %2951  ;;  %v3638_v51 = vadd.f32 %v432_v45, %v3347_v14  ;;  %v1970_v21 = vsel %vm1842_vm8, %v1906_v50, %v1778_v30  ;;  %v1972_v63 = vsel %vm1844_vm9, %v1908_v18, %v1780_v62  ;;  %v346_v31 = vpop.f32.mrf.mxu0 }
 0x122   :  { %v1717_v41 = vmul.f32 %v3586_v26, %v1397_v17  ;;  %v3645_v40 = vpop.eup %2953  ;;  %v2034_v1 = vadd.f32 1.0, %v1970_v21  ;;  %v2036_v6 = vadd.f32 1.0, %v1972_v63  ;;  %v888_v2 = vmul.f32 1.0614054, %v3627_v46  ;;  %v2852_v21 = vld [vmem:[#allocation3 + $0x78] sm:$0xff] }
 0x123   :  { %v1779_v27 = vsub.f32 1.0, %v1715_v38  ;;  %v699_v57 = vmul.f32 0.3275911, %v635_v24  ;;  %v1467_v16 = vsub.f32 0.0, %v635_v24  ;;  %v3648_v19 = vmul.f32 0.70710677, %v344_v49 }
 0x124   :  { %v1781_v22 = vsub.f32 1.0, %v1717_v41  ;;  %v3650_v23 = vpop.eup %2955  ;;  %v2098_v48 = vmul.f32 %v2034_v1, %v3467_v28  ;;  %v2100_v60 = vmul.f32 %v2036_v6, %v3503_v61  ;;  %v950_v26 = vadd.f32 -1.4531521, %v886_v33 }
 0x125   :  { %v1907_v3 = vsub.f32 0.0, %v1779_v27  ;;  %2957 = vpow2.f32 %v1608_v7  ;;  %v762_v9 = vadd.f32 1.0, %v698_v4  ;;  %v3655_v32 = vmul.f32 0.70710677, %v3638_v51 }
 0x126   :  { %v1909_v47 = vsub.f32 0.0, %v1781_v22  ;;  %v1530_v15 = vmul.f32 %v1466_v54, %v634_v20  ;;  %v2158_v30 = vpack.c.bf16 %v2100_v60, %v2098_v48  ;;  %v952_v44 = vadd.f32 -1.4531521, %v888_v2  ;;  %395 = vmatmul.bf16.gmra.mxu0 %v2852_v21 }
 0x127   :  { %v1971_v62 = vsel %vm1843_vm10, %v1907_v3, %v1779_v27  ;;  %v763_v45 = vadd.f32 1.0, %v699_v57  ;;  %v636_v28 = vand.u32 2147483647, %v3648_v19  ;;  %v1531_v7 = vmul.f32 %v1467_v16, %v635_v24  ;;  %484 = vmatmul.bf16.gmra.mxu1 %v2852_v21 }
 0x128   :  { %v1973_v61 = vsel %vm1845_vm11, %v1909_v47, %v1781_v22  ;;  %v2035_v36 = vadd.f32 1.0, %v1971_v62  ;;  %2332 = vmatmul.bf16.gmra.mxu2 %v2158_v30  ;;  %v1014_v18 = vmul.f32 %v3596_v56, %v950_v26  ;;  %v1016_v20 = vmul.f32 %v3627_v46, %v952_v44 }
 0x129   :  { %v2037_v50 = vadd.f32 1.0, %v1973_v61  ;;  %v3664_v17 = vmul.f32 0.5, %v344_v49  ;;  %v637_v0 = vand.u32 2147483647, %v3655_v32  ;;  %v3668_v4 = vadd.f32 %v346_v31, %v3335_v59  ;;  %v435_v49 = vpop.f32.mrf.mxu1 }
 0x12a   :  { %v887_v54 = vmul.f32 1.0614054, %v3608_v10  ;;  %v2099_v39 = vmul.f32 %v2035_v36, %v3479_v13  ;;  %v1078_v24 = vadd.f32 1.4214138, %v1014_v18  ;;  %v1080_v33 = vadd.f32 1.4214138, %v1016_v20 }
 0x12b   :  { %v2101_v38 = vmul.f32 %v2037_v50, %v3519_v43  ;;  %v3673_v63 = vpop.eup %2957  ;;  %2959 = vrcp.f32 %v762_v9  ;;  %v1468_v41 = vsub.f32 0.0, %v636_v28  ;;  %v889_v1 = vmul.f32 1.0614054, %v3645_v40 }
 0x12c   :  { %v951_v6 = vadd.f32 -1.4531521, %v887_v54  ;;  %v700_v27 = vmul.f32 0.3275911, %v636_v28  ;;  %v1142_v57 = vmul.f32 %v3596_v56, %v1078_v24  ;;  %v1144_v16 = vmul.f32 %v3627_v46, %v1080_v33  ;;  %v348_v33 = vpop.f32.mrf.mxu0 }
 0x12d   :  { %v2159_v2 = vpack.c.bf16 %v2101_v38, %v2099_v39  ;;  %v1469_v13 = vsub.f32 0.0, %v637_v0  ;;  %v3679_v43 = vmul.f32 0.70710677, %v3668_v4  ;;  %v953_v22 = vadd.f32 -1.4531521, %v889_v1 }
 0x12e   :  { %v1015_v48 = vmul.f32 %v3608_v10, %v951_v6  ;;  %v1610_v60 = vmul.f32 1.442695, %v1530_v15  ;;  %v3683_v3 = vadd.f32 %v435_v49, %v3347_v14  ;;  %v1206_v26 = vadd.f32 -0.28449672, %v1142_v57 }
 0x12f   :  { %2421 = vmatmul.bf16.gmra.mxu3 %v2159_v2  ;;  %v1208_v9 = vadd.f32 -0.28449672, %v1144_v16  ;;  %v1612_v47 = vmul.f32 1.442695, %v1531_v7  ;;  %v1532_v31 = vmul.f32 %v1468_v41, %v636_v28  ;;  %v1017_v30 = vmul.f32 %v3645_v40, %v953_v22 }
 0x130   :  { %v1079_v62 = vadd.f32 1.4214138, %v1015_v48  ;;  %v764_v44 = vadd.f32 1.0, %v700_v27  ;;  %v701_v61 = vmul.f32 0.3275911, %v637_v0  ;;  %v1270_v36 = vmul.f32 %v3596_v56, %v1206_v26 }
 0x131   :  { %v1272_v50 = vmul.f32 %v3627_v46, %v1208_v9  ;;  %v3688_v18 = vpop.eup %2959  ;;  %v1533_v15 = vmul.f32 %v1469_v13, %v637_v0  ;;  %v638_v20 = vand.u32 2147483647, %v3679_v43  ;;  %v1081_v54 = vadd.f32 1.4214138, %v1017_v30 }
 0x132   :  { %v1143_v39 = vmul.f32 %v3608_v10, %v1079_v62  ;;  %2961 = vrcp.f32 %v763_v45  ;;  %v3693_v28 = vmul.f32 0.70710677, %v3683_v3  ;;  %v1334_v7 = vadd.f32 0.2548296, %v1270_v36 }
 0x133   :  { %v1336_v38 = vadd.f32 0.2548296, %v1272_v50  ;;  %vm1846_vm12 = vcmp.lt.f32.partialorder %v3527_v29, 0.0  ;;  %vm1848_vm13 = vcmp.lt.f32.partialorder %v3558_v8, 0.0  ;;  %2963 = vpow2.f32 %v1610_v60 }
 0x134   :  { %v1614_v24 = vmul.f32 1.442695, %v1532_v31  ;;  %v1145_v0 = vmul.f32 %v3645_v40, %v1081_v54  ;;  %v1207_v21 = vadd.f32 -0.28449672, %v1143_v39  ;;  %2965 = vpow2.f32 %v1612_v47 }
 0x135   :  { %v765_v41 = vadd.f32 1.0, %v701_v61  ;;  %v1398_v49 = vmul.f32 %v3596_v56, %v1334_v7  ;;  %v1400_v45 = vmul.f32 %v3627_v46, %v1336_v38  ;;  %2967 = vrcp.f32 %v764_v44 }
 0x136   :  { %v1616_v1 = vmul.f32 1.442695, %v1533_v15  ;;  %v1209_v6 = vadd.f32 -0.28449672, %v1145_v0  ;;  %v1271_v27 = vmul.f32 %v3608_v10, %v1207_v21  ;;  %v1470_v2 = vsub.f32 0.0, %v638_v20  ;;  %v351_v0 = vpop.f32.mrf.mxu0 }
 0x137   :  { %v639_v57 = vand.u32 2147483647, %v3693_v28  ;;  %v1718_v16 = vmul.f32 %v3631_v52, %v1398_v49  ;;  %v1720_v13 = vmul.f32 %v3650_v23, %v1400_v45  ;;  %2969 = vpow2.f32 %v1614_v24  ;;  %v437_v23 = vpop.f32.mrf.mxu1 }
 0x138   :  { %v702_v22 = vmul.f32 0.3275911, %v638_v20  ;;  %v1273_v48 = vmul.f32 %v3645_v40, %v1209_v6  ;;  %v1335_v60 = vadd.f32 0.2548296, %v1271_v27  ;;  %v3705_v56 = vpop.eup %2961  ;;  %vm1847_vm14 = vcmp.lt.f32.partialorder %v3530_v5, 0.0 }
 0x139   :  { %2971 = vrcp.f32 %v765_v41  ;;  %v349_v46 = vadd.f32 %v348_v33, %v3335_v59  ;;  %v1782_v26 = vsub.f32 1.0, %v1718_v16  ;;  %v1784_v9 = vsub.f32 1.0, %v1720_v13  ;;  %v3709_v47 = vpop.eup %2963 }
 0x13a   :  { %v3712_v52 = vmul.f32 0.5, %v3638_v51  ;;  %2973 = vpow2.f32 %v1616_v1  ;;  %v1337_v31 = vadd.f32 0.2548296, %v1273_v48  ;;  %v1399_v30 = vmul.f32 %v3608_v10, %v1335_v60  ;;  %v3715_v62 = vpop.eup %2965 }
 0x13b   :  { %vm1849_vm15 = vcmp.lt.f32.partialorder %v3572_v42, 0.0  ;;  %v1534_v44 = vmul.f32 %v1470_v2, %v638_v20  ;;  %v1471_v61 = vsub.f32 0.0, %v639_v57  ;;  %v1910_v36 = vsub.f32 0.0, %v1782_v26  ;;  %v3718_v15 = vpop.eup %2967 }
 0x13c   :  { %v1912_v50 = vsub.f32 0.0, %v1784_v9  ;;  %v3721_v54 = vmul.f32 0.5, %v3668_v4  ;;  %v766_v51 = vadd.f32 1.0, %v702_v22  ;;  %v1401_v39 = vmul.f32 %v3645_v40, %v1337_v31 }
 0x13d   :  { %v1719_v7 = vmul.f32 %v3635_v11, %v1399_v30  ;;  %v3725_v38 = vmul.f32 0.70710677, %v349_v46  ;;  %v438_v10 = vadd.f32 %v437_v23, %v3347_v14  ;;  %v1974_v20 = vsel %vm1846_vm12, %v1910_v36, %v1782_v26  ;;  %v3732_v33 = vpop.eup %2969 }
 0x13e   :  { %v1976_v24 = vsel %vm1848_vm13, %v1912_v50, %v1784_v9  ;;  %v2038_v4 = vadd.f32 1.0, %v1974_v20  ;;  %v1721_v41 = vmul.f32 %v3673_v63, %v1401_v39  ;;  %v1618_v11 = vmul.f32 1.442695, %v1534_v44 }
 0x13f   :  { %v2040_v21 = vadd.f32 1.0, %v1976_v24  ;;  %v1783_v40 = vsub.f32 1.0, %v1719_v7  ;;  %v3735_v49 = vpop.eup %2971  ;;  %v703_v45 = vmul.f32 0.3275911, %v639_v57  ;;  %v1535_v1 = vmul.f32 %v1471_v61, %v639_v57  ;;  %v440_v50 = vpop.f32.mrf.mxu1 }
 0x140   :  { %v890_v6 = vmul.f32 1.0614054, %v3688_v18  ;;  %v3738_v29 = vpop.eup %2973  ;;  %v2102_v8 = vmul.f32 %v2038_v4, %v3533_v55  ;;  %v1785_v2 = vsub.f32 1.0, %v1721_v41  ;;  %2975 = vrcp.f32 %v766_v51 }
 0x141   :  { %v2104_v27 = vmul.f32 %v2040_v21, %v3589_v34  ;;  %v1911_v16 = vsub.f32 0.0, %v1783_v40  ;;  %v640_v13 = vand.u32 2147483647, %v3725_v38  ;;  %v3743_v63 = vmul.f32 0.70710677, %v438_v10 }
 0x142   :  { %v3746_v22 = vadd.f32 %v351_v0, %v3335_v59  ;;  %v1913_v57 = vsub.f32 0.0, %v1785_v2  ;;  %v892_v26 = vmul.f32 1.0614054, %v3718_v15  ;;  %2977 = vpow2.f32 %v1618_v11 }
 0x143   :  { %v2160_v48 = vpack.c.bf16 %v2104_v27, %v2102_v8  ;;  %v1975_v60 = vsel %vm1847_vm14, %v1911_v16, %v1783_v40  ;;  %v3752_v55 = vmul.f32 0.5, %v3683_v3  ;;  %v767_v34 = vadd.f32 1.0, %v703_v45  ;;  %v353_v40 = vpop.f32.mrf.mxu0 }
 0x144   :  { %v2039_v9 = vadd.f32 1.0, %v1975_v60  ;;  %v1620_v23 = vmul.f32 1.442695, %v1535_v1  ;;  %v1977_v31 = vsel %vm1849_vm15, %v1913_v57, %v1785_v2  ;;  %v954_v30 = vadd.f32 -1.4531521, %v890_v6 }
 0x145   :  { %2337 = vmatmul.bf16.gmra.mxu2 %v2160_v48  ;;  %v956_v44 = vadd.f32 -1.4531521, %v892_v26  ;;  %v3756_v61 = vmul.f32 0.5, %v349_v46  ;;  %v704_v36 = vmul.f32 0.3275911, %v640_v13  ;;  %v1472_v5 = vsub.f32 0.0, %v640_v13 }
 0x146   :  { %v2041_v51 = vadd.f32 1.0, %v1977_v31  ;;  %v641_v39 = vand.u32 2147483647, %v3743_v63  ;;  %v3760_v3 = vmul.f32 0.70710677, %v3746_v22  ;;  %v1018_v7 = vmul.f32 %v3688_v18, %v954_v30  ;;  %v3764_v24 = vpop.eup %2975 }
 0x147   :  { %v1020_v20 = vmul.f32 %v3718_v15, %v956_v44  ;;  %v2103_v42 = vmul.f32 %v2039_v9, %v3555_v37  ;;  %v891_v0 = vmul.f32 1.0614054, %v3705_v56  ;;  %v893_v4 = vmul.f32 1.0614054, %v3735_v49 }
 0x148   :  { %v2105_v46 = vmul.f32 %v2041_v51, %v3601_v53  ;;  %v3770_v21 = vmul.f32 0.5, %v438_v10  ;;  %v3773_v41 = vadd.f32 %v440_v50, %v3347_v14  ;;  %v1082_v11 = vadd.f32 1.4214138, %v1018_v7  ;;  %v3775_v1 = vpop.eup %2977 }
 0x149   :  { %v1084_v45 = vadd.f32 1.4214138, %v1020_v20  ;;  %v1536_v6 = vmul.f32 %v1472_v5, %v640_v13  ;;  %v955_v27 = vadd.f32 -1.4531521, %v891_v0  ;;  %v957_v37 = vadd.f32 -1.4531521, %v893_v4 }
 0x14a   :  { %v2161_v8 = vpack.c.bf16 %v2105_v46, %v2103_v42  ;;  %v768_v2 = vadd.f32 1.0, %v704_v36  ;;  %v1473_v53 = vsub.f32 0.0, %v641_v39  ;;  %v1146_v16 = vmul.f32 %v3688_v18, %v1082_v11  ;;  %v442_v42 = vpop.f32.mrf.mxu1 }
 0x14b   :  { %v1148_v48 = vmul.f32 %v3718_v15, %v1084_v45  ;;  %v705_v10 = vmul.f32 0.3275911, %v641_v39  ;;  %v642_v57 = vand.u32 2147483647, %v3760_v3  ;;  %v1019_v60 = vmul.f32 %v3705_v56, %v955_v27 }
 0x14c   :  { %2426 = vmatmul.bf16.gmra.mxu3 %v2161_v8  ;;  %v1021_v26 = vmul.f32 %v3735_v49, %v957_v37  ;;  %2979 = vrcp.f32 %v767_v34  ;;  %v3783_v13 = vmul.f32 0.70710677, %v3773_v41  ;;  %v1210_v9 = vadd.f32 -0.28449672, %v1146_v16 }
 0x14d   :  { %v1212_v31 = vadd.f32 -0.28449672, %v1148_v48  ;;  %2981 = vpow2.f32 %v1620_v23  ;;  %v1622_v30 = vmul.f32 1.442695, %v1536_v6  ;;  %v1083_v44 = vadd.f32 1.4214138, %v1019_v60 }
 0x14e   :  { %v1085_v36 = vadd.f32 1.4214138, %v1021_v26  ;;  %2983 = vrcp.f32 %v768_v2  ;;  %v1537_v5 = vmul.f32 %v1473_v53, %v641_v39  ;;  %v1274_v50 = vmul.f32 %v3688_v18, %v1210_v9  ;;  %v356_v2 = vpop.f32.mrf.mxu0 }
 0x14f   :  { %v1276_v51 = vmul.f32 %v3718_v15, %v1212_v31  ;;  %v769_v7 = vadd.f32 1.0, %v705_v10  ;;  %v706_v20 = vmul.f32 0.3275911, %v642_v57  ;;  %v1147_v34 = vmul.f32 %v3705_v56, %v1083_v44 }
 0x150   :  { %v1149_v46 = vmul.f32 %v3735_v49, %v1085_v36  ;;  %v643_v0 = vand.u32 2147483647, %v3783_v13  ;;  %v3791_v23 = vadd.f32 %v353_v40, %v3335_v59  ;;  %v1338_v4 = vadd.f32 0.2548296, %v1274_v50 }
 0x151   :  { %v1340_v11 = vadd.f32 0.2548296, %v1276_v51  ;;  %vm1850_vm0 = vcmp.lt.f32.partialorder %v3606_v12, 0.0  ;;  %vm1852_vm1 = vcmp.lt.f32.partialorder %v3648_v19, 0.0  ;;  %2985 = vpow2.f32 %v1622_v30 }
 0x152   :  { %v1474_v39 = vsub.f32 0.0, %v642_v57  ;;  %v1211_v45 = vadd.f32 -0.28449672, %v1147_v34  ;;  %v1213_v6 = vadd.f32 -0.28449672, %v1149_v46  ;;  %v3795_v8 = vpop.eup %2979  ;;  %v3798_v37 = vadd.f32 %v442_v42, %v3347_v14 }
 0x153   :  { %v1624_v27 = vmul.f32 1.442695, %v1537_v5  ;;  %v1402_v40 = vmul.f32 %v3688_v18, %v1338_v4  ;;  %v1404_v53 = vmul.f32 %v3718_v15, %v1340_v11  ;;  %v3802_v16 = vpop.eup %2981  ;;  %2987 = vrcp.f32 %v769_v7 }
 0x154   :  { %v3805_v48 = vmul.f32 0.5, %v3746_v22  ;;  %v1275_v10 = vmul.f32 %v3705_v56, %v1211_v45  ;;  %v1277_v60 = vmul.f32 %v3735_v49, %v1213_v6  ;;  %v3809_v26 = vpop.eup %2983  ;;  %v1475_v9 = vsub.f32 0.0, %v643_v0  ;;  %v445_v45 = vpop.f32.mrf.mxu1 }
 0x155   :  { %v3812_v31 = vmul.f32 0.70710677, %v3791_v23  ;;  %v1722_v18 = vmul.f32 %v3709_v47, %v1402_v40  ;;  %v1724_v15 = vmul.f32 %v3732_v33, %v1404_v53  ;;  %v770_v30 = vadd.f32 1.0, %v706_v20 }
 0x156   :  { %v1538_v44 = vmul.f32 %v1474_v39, %v642_v57  ;;  %v1339_v36 = vadd.f32 0.2548296, %v1275_v10  ;;  %v1341_v5 = vadd.f32 0.2548296, %v1277_v60  ;;  %vm1851_vm2 = vcmp.lt.f32.partialorder %v3612_v25, 0.0 }
 0x157   :  { %vm1853_vm3 = vcmp.lt.f32.partialorder %v3655_v32, 0.0  ;;  %2989 = vpow2.f32 %v1624_v27  ;;  %v3819_v22 = vmul.f32 0.70710677, %v3798_v37  ;;  %v1786_v50 = vsub.f32 1.0, %v1722_v18  ;;  %v3821_v7 = vpop.eup %2985 }
 0x158   :  { %v1788_v51 = vsub.f32 1.0, %v1724_v15  ;;  %v3824_v47 = vmul.f32 0.5, %v3773_v41  ;;  %v707_v33 = vmul.f32 0.3275911, %v643_v0  ;;  %v1403_v57 = vmul.f32 %v3705_v56, %v1339_v36 }
 0x159   :  { %v1405_v20 = vmul.f32 %v3735_v49, %v1341_v5  ;;  %v1539_v42 = vmul.f32 %v1475_v9, %v643_v0  ;;  %v644_v34 = vand.u32 2147483647, %v3812_v31  ;;  %v1914_v46 = vsub.f32 0.0, %v1786_v50  ;;  %v3829_v11 = vpop.eup %2987 }
 0x15a   :  { %v1916_v4 = vsub.f32 0.0, %v1788_v51  ;;  %2991 = vrcp.f32 %v770_v30  ;;  %v1626_v39 = vmul.f32 1.442695, %v1538_v44  ;;  %v1723_v6 = vmul.f32 %v3715_v62, %v1403_v57 }
 0x15b   :  { %v1725_v41 = vmul.f32 %v3738_v29, %v1405_v20  ;;  %v645_v27 = vand.u32 2147483647, %v3819_v22  ;;  %v3835_v56 = vadd.f32 %v356_v2, %v3335_v59  ;;  %v1978_v49 = vsel %vm1850_vm0, %v1914_v46, %v1786_v50  ;;  %v358_v2 = vpop.f32.mrf.mxu0 }
 0x15c   :  { %v1980_v0 = vsel %vm1852_vm1, %v1916_v4, %v1788_v51  ;;  %v2042_v40 = vadd.f32 1.0, %v1978_v49  ;;  %v1787_v10 = vsub.f32 1.0, %v1723_v6  ;;  %v771_v62 = vadd.f32 1.0, %v707_v33 }
 0x15d   :  { %v2044_v53 = vadd.f32 1.0, %v1980_v0  ;;  %v1789_v60 = vsub.f32 1.0, %v1725_v41  ;;  %v3841_v9 = vpop.eup %2989  ;;  %v1628_v18 = vmul.f32 1.442695, %v1539_v42  ;;  %v1476_v29 = vsub.f32 0.0, %v644_v34 }
 0x15e   :  { %v3844_v15 = vadd.f32 %v445_v45, %v3347_v14  ;;  %v2106_v30 = vmul.f32 %v2042_v40, %v3618_v58  ;;  %v1915_v44 = vsub.f32 0.0, %v1787_v10  ;;  %2993 = vpow2.f32 %v1626_v39 }
 0x15f   :  { %v2108_v12 = vmul.f32 %v2044_v53, %v3664_v17  ;;  %v1917_v19 = vsub.f32 0.0, %v1789_v60  ;;  %v3849_v36 = vmul.f32 0.5, %v3791_v23  ;;  %v708_v5 = vmul.f32 0.3275911, %v644_v34 }
 0x160   :  { %v3852_v50 = vmul.f32 0.70710677, %v3835_v56  ;;  %v3854_v51 = vpop.eup %2991  ;;  %v709_v33 = vmul.f32 0.3275911, %v645_v27  ;;  %v1979_v20 = vsel %vm1851_vm2, %v1915_v44, %v1787_v10  ;;  %v1477_v17 = vsub.f32 0.0, %v645_v27 }
 0x161   :  { %v2162_v57 = vpack.c.bf16 %v2108_v12, %v2106_v30  ;;  %v1981_v58 = vsel %vm1853_vm3, %v1917_v19, %v1789_v60  ;;  %v3861_v42 = vmul.f32 0.70710677, %v3844_v15  ;;  %v2043_v23 = vadd.f32 1.0, %v1979_v20 }
 0x162   :  { %v2045_v46 = vadd.f32 1.0, %v1981_v58  ;;  %v1540_v4 = vmul.f32 %v1476_v29, %v644_v34  ;;  %v894_v39 = vmul.f32 1.0614054, %v3764_v24  ;;  %v896_v45 = vmul.f32 1.0614054, %v3809_v26 }
 0x163   :  { %2342 = vmatmul.bf16.gmra.mxu2 %v2162_v57  ;;  %v895_v6 = vmul.f32 1.0614054, %v3795_v8  ;;  %v646_v25 = vand.u32 2147483647, %v3852_v50  ;;  %v2107_v41 = vmul.f32 %v2043_v23, %v3623_v35  ;;  %v897_v49 = vmul.f32 1.0614054, %v3829_v11  ;;  %v3876_v20 = vpop.f32.mrf.mxu0 }
 0x164   :  { %v2109_v32 = vmul.f32 %v2045_v46, %v3712_v52  ;;  %2995 = vrcp.f32 %v771_v62  ;;  %v958_v0 = vadd.f32 -1.4531521, %v894_v39  ;;  %v960_v40 = vadd.f32 -1.4531521, %v896_v45  ;;  %v3870_v34 = vpop.eup %2993 }
 0x165   :  { %v959_v53 = vadd.f32 -1.4531521, %v895_v6  ;;  %v772_v10 = vadd.f32 1.0, %v708_v5  ;;  %v1541_v60 = vmul.f32 %v1477_v17, %v645_v27  ;;  %v961_v30 = vadd.f32 -1.4531521, %v897_v49  ;;  %v447_v27 = vpop.f32.mrf.mxu1 }
 0x166   :  { %v2163_v29 = vpack.c.bf16 %v2109_v32, %v2107_v41  ;;  %v647_v12 = vand.u32 2147483647, %v3861_v42  ;;  %v1022_v44 = vmul.f32 %v3764_v24, %v958_v0  ;;  %v1024_v35 = vmul.f32 %v3809_v26, %v960_v40 }
 0x167   :  { %v1023_v52 = vmul.f32 %v3795_v8, %v959_v53  ;;  %v1630_v19 = vmul.f32 1.442695, %v1540_v4  ;;  %v773_v57 = vadd.f32 1.0, %v709_v33  ;;  %v1478_v62 = vsub.f32 0.0, %v646_v25 }
 0x168   :  { %2431 = vmatmul.bf16.gmra.mxu3 %v2163_v29  ;;  %v1025_v58 = vmul.f32 %v3829_v11, %v961_v30  ;;  %2997 = vpow2.f32 %v1628_v18  ;;  %v1086_v5 = vadd.f32 1.4214138, %v1022_v44  ;;  %v1088_v17 = vadd.f32 1.4214138, %v1024_v35 }
 0x169   :  { %v1087_v23 = vadd.f32 1.4214138, %v1023_v52  ;;  %2999 = vrcp.f32 %v772_v10  ;;  %v1632_v46 = vmul.f32 1.442695, %v1541_v60  ;;  %v710_v39 = vmul.f32 0.3275911, %v646_v25 }
 0x16a   :  { %v1089_v45 = vadd.f32 1.4214138, %v1025_v58  ;;  %v3879_v6 = vpop.eup %2995  ;;  %v1479_v41 = vsub.f32 0.0, %v647_v12  ;;  %v1150_v33 = vmul.f32 %v3764_v24, %v1086_v5  ;;  %v1152_v4 = vmul.f32 %v3809_v26, %v1088_v17 }
 0x16b   :  { %v1151_v32 = vmul.f32 %v3795_v8, %v1087_v23  ;;  %v1542_v49 = vmul.f32 %v1478_v62, %v646_v25  ;;  %v359_v18 = vadd.f32 %v358_v2, %v3335_v59  ;;  %v448_v0 = vadd.f32 %v447_v27, %v3347_v14 }
 0x16c   :  { %v1153_v40 = vmul.f32 %v3829_v11, %v1089_v45  ;;  %3001 = vpow2.f32 %v1630_v19  ;;  %v1214_v53 = vadd.f32 -0.28449672, %v1150_v33  ;;  %v1216_v10 = vadd.f32 -0.28449672, %v1152_v4 }
 0x16d   :  { %v1215_v60 = vadd.f32 -0.28449672, %v1151_v32  ;;  %3003 = vrcp.f32 %v773_v57  ;;  %v774_v29 = vadd.f32 1.0, %v710_v39  ;;  %v711_v30 = vmul.f32 0.3275911, %v647_v12 }
 0x16e   :  { %v1217_v44 = vadd.f32 -0.28449672, %v1153_v40  ;;  %v3887_v35 = vpop.eup %2997  ;;  %v1543_v52 = vmul.f32 %v1479_v41, %v647_v12  ;;  %v1278_v58 = vmul.f32 %v3764_v24, %v1214_v53  ;;  %v1280_v25 = vmul.f32 %v3809_v26, %v1216_v10  ;;  %v3905_v41 = vpop.f32.mrf.mxu0 }
 0x16f   :  { %v1279_v2 = vmul.f32 %v3795_v8, %v1215_v60  ;;  %v3892_v62 = vpop.eup %2999  ;;  %v1634_v27 = vmul.f32 1.442695, %v1542_v49  ;;  %v3894_v19 = vmul.f32 0.70710677, %v359_v18  ;;  %v3896_v5 = vmul.f32 0.70710677, %v448_v0 }
 0x170   :  { %v1281_v57 = vmul.f32 %v3829_v11, %v1217_v44  ;;  %3005 = vpow2.f32 %v1632_v46  ;;  %v1342_v17 = vadd.f32 0.2548296, %v1278_v58  ;;  %v1344_v23 = vadd.f32 0.2548296, %v1280_v25  ;;  %v450_v44 = vpop.f32.mrf.mxu1 }
 0x171   :  { %v1343_v39 = vadd.f32 0.2548296, %v1279_v2  ;;  %vm1854_vm4 = vcmp.lt.f32.partialorder %v3679_v43, 0.0  ;;  %vm1855_vm5 = vcmp.lt.f32.partialorder %v3693_v28, 0.0  ;;  %vm1856_vm6 = vcmp.lt.f32.partialorder %v3725_v38, 0.0 }
 0x172   :  { %v3903_v12 = vmul.f32 0.5, %v3798_v37  ;;  %3007 = vrcp.f32 %v774_v29  ;;  %v775_v45 = vadd.f32 1.0, %v711_v30  ;;  %v1345_v33 = vadd.f32 0.2548296, %v1281_v57  ;;  %v3907_v4 = vpop.eup %3001 }
 0x173   :  { %vm1857_vm7 = vcmp.lt.f32.partialorder %v3743_v63, 0.0  ;;  %v1636_v46 = vmul.f32 1.442695, %v1543_v52  ;;  %v1406_v32 = vmul.f32 %v3764_v24, %v1342_v17  ;;  %v1408_v49 = vmul.f32 %v3809_v26, %v1344_v23  ;;  %v3913_v53 = vpop.eup %3003 }
 0x174   :  { %v1407_v40 = vmul.f32 %v3795_v8, %v1343_v39  ;;  %v3916_v37 = vmul.f32 0.5, %v3835_v56  ;;  %3009 = vpow2.f32 %v1634_v27  ;;  %v648_v10 = vand.u32 2147483647, %v3894_v19 }
 0x175   :  { %v1409_v60 = vmul.f32 %v3829_v11, %v1345_v33  ;;  %v649_v29 = vand.u32 2147483647, %v3896_v5  ;;  %v1726_v30 = vmul.f32 %v3775_v1, %v1406_v32  ;;  %v1728_v24 = vmul.f32 %v3821_v7, %v1408_v49 }
 0x176   :  { %v1727_v26 = vmul.f32 %v3802_v16, %v1407_v40  ;;  %v3925_v8 = vmul.f32 0.5, %v3844_v15  ;;  %3011 = vrcp.f32 %v775_v45  ;;  %v3929_v56 = vadd.f32 %v3876_v20, %v3335_v59  ;;  %v3932_v11 = vpop.eup %3005 }
 0x177   :  { %v1729_v52 = vmul.f32 %v3841_v9, %v1409_v60  ;;  %3013 = vpow2.f32 %v1636_v46  ;;  %v1790_v58 = vsub.f32 1.0, %v1726_v30  ;;  %v1792_v1 = vsub.f32 1.0, %v1728_v24 }
 0x178   :  { %v1791_v25 = vsub.f32 1.0, %v1727_v26  ;;  %v3934_v7 = vpop.eup %3007  ;;  %v3936_v16 = vmul.f32 0.5, %v359_v18  ;;  %v712_v15 = vmul.f32 0.3275911, %v648_v10  ;;  %v3938_v2 = vmul.f32 0.5, %v448_v0 }
 0x179   :  { %v1793_v27 = vsub.f32 1.0, %v1729_v52  ;;  %v713_v57 = vmul.f32 0.3275911, %v649_v29  ;;  %v1918_v20 = vsub.f32 0.0, %v1790_v58  ;;  %v1920_v17 = vsub.f32 0.0, %v1792_v1  ;;  %v3957_v52 = vpop.f32.mrf.mxu0 }
 0x17a   :  { %v1919_v23 = vsub.f32 0.0, %v1791_v25  ;;  %v3940_v39 = vpop.eup %3009  ;;  %v1480_v9 = vsub.f32 0.0, %v648_v10  ;;  %v3943_v45 = vmul.f32 0.70710677, %v3929_v56  ;;  %v898_v46 = vmul.f32 1.0614054, %v3854_v51 }
 0x17b   :  { %v1921_v33 = vsub.f32 0.0, %v1793_v27  ;;  %v1982_v18 = vsel %vm1854_vm4, %v1918_v20, %v1790_v58  ;;  %v1984_v0 = vsel %vm1856_vm6, %v1920_v17, %v1792_v1  ;;  %v900_v49 = vmul.f32 1.0614054, %v3892_v62 }
 0x17c   :  { %v1983_v32 = vsel %vm1855_vm5, %v1919_v23, %v1791_v25  ;;  %v3953_v40 = vpop.eup %3011  ;;  %v2046_v60 = vadd.f32 1.0, %v1982_v18  ;;  %v2048_v30 = vadd.f32 1.0, %v1984_v0  ;;  %v776_v58 = vadd.f32 1.0, %v712_v15  ;;  %v452_v0 = vpop.f32.mrf.mxu1 }
 0x17d   :  { %v1985_v24 = vsel %vm1857_vm7, %v1921_v33, %v1793_v27  ;;  %v2047_v26 = vadd.f32 1.0, %v1983_v32  ;;  %v3959_v43 = vpop.eup %3013  ;;  %v1481_v38 = vsub.f32 0.0, %v649_v29  ;;  %v3962_v1 = vadd.f32 %v450_v44, %v3347_v14 }
 0x17e   :  { %v2049_v28 = vadd.f32 1.0, %v1985_v24  ;;  %v1544_v25 = vmul.f32 %v1480_v9, %v648_v10  ;;  %v2110_v20 = vmul.f32 %v2046_v60, %v3721_v54  ;;  %v2112_v17 = vmul.f32 %v2048_v30, %v3756_v61 }
 0x17f   :  { %v962_v23 = vadd.f32 -1.4531521, %v898_v46  ;;  %v650_v63 = vand.u32 2147483647, %v3943_v45  ;;  %v2111_v27 = vmul.f32 %v2047_v26, %v3752_v55  ;;  %v964_v18 = vadd.f32 -1.4531521, %v900_v49 }
 0x180   :  { %v2113_v33 = vmul.f32 %v2049_v28, %v3770_v21  ;;  %v2164_v15 = vpack.c.bf16 %v2112_v17, %v2110_v20  ;;  %v899_v44 = vmul.f32 1.0614054, %v3879_v6  ;;  %v901_v10 = vmul.f32 1.0614054, %v3913_v53 }
 0x181   :  { %v1026_v32 = vmul.f32 %v3854_v51, %v962_v23  ;;  %v777_v9 = vadd.f32 1.0, %v713_v57  ;;  %v3973_v54 = vmul.f32 0.70710677, %v3962_v1  ;;  %v1028_v46 = vmul.f32 %v3892_v62, %v964_v18 }
 0x182   :  { %v2165_v61 = vpack.c.bf16 %v2113_v33, %v2111_v27  ;;  %v1545_v60 = vmul.f32 %v1481_v38, %v649_v29  ;;  %2347 = vmatmul.bf16.gmra.mxu2 %v2164_v15  ;;  %v963_v21 = vadd.f32 -1.4531521, %v899_v44  ;;  %v965_v49 = vadd.f32 -1.4531521, %v901_v10  ;;  %v3986_v27 = vpop.f32.mrf.mxu0 }
 0x183   :  { %v1090_v55 = vadd.f32 1.4214138, %v1026_v32  ;;  %3015 = vrcp.f32 %v776_v58  ;;  %v1482_v30 = vsub.f32 0.0, %v650_v63  ;;  %v364_v24 = vadd.f32 %v3905_v41, %v3335_v59 }
 0x184   :  { %2436 = vmatmul.bf16.gmra.mxu3 %v2165_v61  ;;  %v1092_v26 = vadd.f32 1.4214138, %v1028_v46  ;;  %v714_v28 = vmul.f32 0.3275911, %v650_v63  ;;  %v1027_v20 = vmul.f32 %v3879_v6, %v963_v21  ;;  %v1029_v17 = vmul.f32 %v3913_v53, %v965_v49 }
 0x185   :  { %v1154_v57 = vmul.f32 %v3854_v51, %v1090_v55  ;;  %v1638_v23 = vmul.f32 1.442695, %v1544_v25  ;;  %v651_v29 = vand.u32 2147483647, %v3973_v54  ;;  %v3983_v38 = vadd.f32 %v452_v0, %v3347_v14 }
 0x186   :  { %v1156_v58 = vmul.f32 %v3892_v62, %v1092_v26  ;;  %3017 = vrcp.f32 %v777_v9  ;;  %v1091_v33 = vadd.f32 1.4214138, %v1027_v20  ;;  %v1093_v18 = vadd.f32 1.4214138, %v1029_v17 }
 0x187   :  { %v1218_v41 = vadd.f32 -0.28449672, %v1154_v57  ;;  %v1640_v15 = vmul.f32 1.442695, %v1545_v60  ;;  %v1546_v32 = vmul.f32 %v1482_v30, %v650_v63  ;;  %v3988_v44 = vmul.f32 0.70710677, %v364_v24  ;;  %v455_v63 = vpop.f32.mrf.mxu1 }
 0x188   :  { %v1220_v10 = vadd.f32 -0.28449672, %v1156_v58  ;;  %v778_v61 = vadd.f32 1.0, %v714_v28  ;;  %v1155_v46 = vmul.f32 %v3879_v6, %v1091_v33  ;;  %v1157_v0 = vmul.f32 %v3913_v53, %v1093_v18 }
 0x189   :  { %v1282_v25 = vmul.f32 %v3854_v51, %v1218_v41  ;;  %v3993_v55 = vpop.eup %3015  ;;  %v715_v9 = vmul.f32 0.3275911, %v651_v29  ;;  %v1483_v21 = vsub.f32 0.0, %v651_v29  ;;  %v3996_v49 = vmul.f32 0.70710677, %v3983_v38 }
 0x18a   :  { %v1284_v60 = vmul.f32 %v3892_v62, %v1220_v10  ;;  %3019 = vpow2.f32 %v1638_v23  ;;  %v1219_v26 = vadd.f32 -0.28449672, %v1155_v46  ;;  %v1221_v28 = vadd.f32 -0.28449672, %v1157_v0 }
 0x18b   :  { %v1346_v30 = vadd.f32 0.2548296, %v1282_v25  ;;  %vm1858_vm8 = vcmp.lt.f32.partialorder %v3760_v3, 0.0  ;;  %3021 = vpow2.f32 %v1640_v15  ;;  %v1642_v57 = vmul.f32 1.442695, %v1546_v32 }
 0x18c   :  { %v652_v20 = vand.u32 2147483647, %v3988_v44  ;;  %v1348_v17 = vadd.f32 0.2548296, %v1284_v60  ;;  %v4001_v58 = vpop.eup %3017  ;;  %vm1860_vm9 = vcmp.lt.f32.partialorder %v3812_v31, 0.0  ;;  %v4005_v41 = vmul.f32 0.5, %v3929_v56 }
 0x18d   :  { %v1410_v23 = vmul.f32 %v3854_v51, %v1346_v30  ;;  %v1283_v33 = vmul.f32 %v3879_v6, %v1219_v26  ;;  %v1285_v18 = vmul.f32 %v3913_v53, %v1221_v28  ;;  %3023 = vrcp.f32 %v778_v61  ;;  %v4025_v30 = vpop.f32.mrf.mxu0 }
 0x18e   :  { %v779_v10 = vadd.f32 1.0, %v715_v9  ;;  %v1547_v15 = vmul.f32 %v1483_v21, %v651_v29  ;;  %v1412_v32 = vmul.f32 %v3892_v62, %v1348_v17  ;;  %v653_v25 = vand.u32 2147483647, %v3996_v49 }
 0x18f   :  { %v1730_v46 = vmul.f32 %v3870_v34, %v1410_v23  ;;  %v1347_v0 = vadd.f32 0.2548296, %v1283_v33  ;;  %v1349_v60 = vadd.f32 0.2548296, %v1285_v18  ;;  %vm1859_vm10 = vcmp.lt.f32.partialorder %v3783_v13, 0.0 }
 0x190   :  { %vm1861_vm11 = vcmp.lt.f32.partialorder %v3819_v22, 0.0  ;;  %3025 = vpow2.f32 %v1642_v57  ;;  %v4016_v51 = vmul.f32 0.5, %v3962_v1  ;;  %v1484_v56 = vsub.f32 0.0, %v652_v20  ;;  %v4019_v29 = vpop.eup %3019 }
 0x191   :  { %v1732_v61 = vmul.f32 %v3907_v4, %v1412_v32  ;;  %v4021_v62 = vmul.f32 0.5, %v364_v24  ;;  %v1794_v9 = vsub.f32 1.0, %v1730_v46  ;;  %v1411_v34 = vmul.f32 %v3879_v6, %v1347_v0  ;;  %v4027_v26 = vpop.eup %3021 }
 0x192   :  { %v1413_v21 = vmul.f32 %v3913_v53, %v1349_v60  ;;  %3027 = vrcp.f32 %v779_v10  ;;  %v1644_v28 = vmul.f32 1.442695, %v1547_v15  ;;  %v4031_v1 = vadd.f32 %v3957_v52, %v3335_v59  ;;  %v457_v15 = vpop.f32.mrf.mxu1 }
 0x193   :  { %v1796_v4 = vsub.f32 1.0, %v1732_v61  ;;  %v1485_v57 = vsub.f32 0.0, %v653_v25  ;;  %v1922_v17 = vsub.f32 0.0, %v1794_v9  ;;  %v1731_v24 = vmul.f32 %v3887_v35, %v1411_v34  ;;  %v4035_v6 = vpop.eup %3023 }
 0x194   :  { %v1733_v23 = vmul.f32 %v3932_v11, %v1413_v21  ;;  %v716_v53 = vmul.f32 0.3275911, %v652_v20  ;;  %v1548_v33 = vmul.f32 %v1484_v56, %v652_v20  ;;  %v717_v18 = vmul.f32 0.3275911, %v653_v25 }
 0x195   :  { %v1924_v32 = vsub.f32 0.0, %v1796_v4  ;;  %v4038_v10 = vmul.f32 0.5, %v3983_v38  ;;  %v1986_v52 = vsel %vm1858_vm8, %v1922_v17, %v1794_v9  ;;  %v1795_v46 = vsub.f32 1.0, %v1731_v24 }
 0x196   :  { %v1797_v0 = vsub.f32 1.0, %v1733_v23  ;;  %v4042_v60 = vpop.eup %3025  ;;  %v4045_v35 = vmul.f32 0.70710677, %v4031_v1  ;;  %v4048_v11 = vadd.f32 %v455_v63, %v3347_v14  ;;  %v2050_v56 = vadd.f32 1.0, %v1986_v52 }
 0x197   :  { %4965 = vst [vmem:[#allocation16_spill] sm:$0xff] %v4038_v10  ;;  %v1988_v20 = vsel %vm1860_vm9, %v1924_v32, %v1796_v4  ;;  %v1549_v38 = vmul.f32 %v1485_v57, %v653_v25  ;;  %v1923_v34 = vsub.f32 0.0, %v1795_v46  ;;  %3029 = vpow2.f32 %v1644_v28 }
 0x198   :  { %v2052_v61 = vadd.f32 1.0, %v1988_v20  ;;  %v1925_v21 = vsub.f32 0.0, %v1797_v0  ;;  %v4052_v3 = vpop.eup %3027  ;;  %v780_v9 = vadd.f32 1.0, %v716_v53  ;;  %v1646_v17 = vmul.f32 1.442695, %v1548_v33 }
 0x199   :  { %v781_v24 = vadd.f32 1.0, %v717_v18  ;;  %v2114_v23 = vmul.f32 %v2050_v56, %v3805_v48  ;;  %v1987_v63 = vsel %vm1859_vm10, %v1923_v34, %v1795_v46  ;;  %v654_v25 = vand.u32 2147483647, %v4045_v35  ;;  %v4064_v18 = vpop.f32.mrf.mxu0 }
 0x19a   :  { %v2116_v10 = vmul.f32 %v2052_v61, %v3849_v36  ;;  %v1989_v31 = vsel %vm1861_vm11, %v1925_v21, %v1797_v0  ;;  %v4062_v4 = vmul.f32 0.70710677, %v4048_v11  ;;  %v2051_v57 = vadd.f32 1.0, %v1987_v63  ;;  %v4079_v34 = vpop.f32.mrf.mxu1 }
 0x19b   :  { %v2053_v28 = vadd.f32 1.0, %v1989_v31  ;;  %v1648_v53 = vmul.f32 1.442695, %v1549_v38  ;;  %v902_v48 = vmul.f32 1.0614054, %v3934_v7  ;;  %v4070_v13 = vadd.f32 %v3986_v27, %v3335_v59 }
 0x19c   :  { %4966 = vst [vmem:[#allocation17_spill] sm:$0xff] %v4062_v4  ;;  %v2166_v33 = vpack.c.bf16 %v2116_v10, %v2114_v23  ;;  %v904_v36 = vmul.f32 1.0614054, %v3993_v55  ;;  %v2115_v22 = vmul.f32 %v2051_v57, %v3824_v47  ;;  %v903_v52 = vmul.f32 1.0614054, %v3953_v40 }
 0x19d   :  { %v2117_v32 = vmul.f32 %v2053_v28, %v3903_v12  ;;  %3031 = vrcp.f32 %v780_v9  ;;  %v966_v46 = vadd.f32 -1.4531521, %v902_v48  ;;  %v905_v0 = vmul.f32 1.0614054, %v4001_v58  ;;  %v4076_v20 = vpop.eup %3029 }
 0x19e   :  { %2352 = vmatmul.bf16.gmra.mxu2 %v2166_v33  ;;  %v968_v10 = vadd.f32 -1.4531521, %v904_v36  ;;  %v1486_v56 = vsub.f32 0.0, %v654_v25  ;;  %v655_v38 = vand.u32 2147483647, %v4062_v4  ;;  %3033 = vpow2.f32 %v1646_v17 }
 0x19f   :  { %v2167_v61 = vpack.c.bf16 %v2117_v32, %v2115_v22  ;;  %v967_v27 = vadd.f32 -1.4531521, %v903_v52  ;;  %v1030_v47 = vmul.f32 %v3934_v7, %v966_v46  ;;  %v969_v21 = vadd.f32 -1.4531521, %v905_v0 }
 0x1a0   :  { %v1032_v12 = vmul.f32 %v3993_v55, %v968_v10  ;;  %3035 = vrcp.f32 %v781_v24  ;;  %v4084_v9 = vmul.f32 0.70710677, %v4070_v13  ;;  %v4087_v23 = vadd.f32 %v457_v15, %v3347_v14 }
 0x1a1   :  { %2441 = vmatmul.bf16.gmra.mxu3 %v2167_v61  ;;  %v1031_v63 = vmul.f32 %v3953_v40, %v967_v27  ;;  %v718_v31 = vmul.f32 0.3275911, %v654_v25  ;;  %v1094_v57 = vadd.f32 1.4214138, %v1030_v47  ;;  %v1033_v28 = vmul.f32 %v4001_v58, %v969_v21 }
 0x1a2   :  { %4967 = vst [vmem:[#allocation18_spill] sm:$0xff] %v4084_v9  ;;  %v1096_v17 = vadd.f32 1.4214138, %v1032_v12  ;;  %3037 = vpow2.f32 %v1648_v53  ;;  %v1550_v33 = vmul.f32 %v1486_v56, %v654_v25  ;;  %v1487_v48 = vsub.f32 0.0, %v655_v38  ;;  %v4106_v12 = vpop.f32.mrf.mxu0 }
 0x1a3   :  { %v1095_v36 = vadd.f32 1.4214138, %v1031_v63  ;;  %v4091_v22 = vpop.eup %3031  ;;  %v719_v24 = vmul.f32 0.3275911, %v655_v38  ;;  %v1158_v32 = vmul.f32 %v3934_v7, %v1094_v57  ;;  %v1097_v52 = vadd.f32 1.4214138, %v1033_v28 }
 0x1a4   :  { %v1160_v15 = vmul.f32 %v3993_v55, %v1096_v17  ;;  %v4096_v46 = vmul.f32 0.5, %v4031_v1  ;;  %v656_v10 = vand.u32 2147483647, %v4084_v9  ;;  %v4100_v0 = vmul.f32 0.70710677, %v4087_v23  ;;  %v4103_v53 = vpop.eup %3033 }
 0x1a5   :  { %v1159_v25 = vmul.f32 %v3953_v40, %v1095_v36  ;;  %v782_v56 = vadd.f32 1.0, %v718_v31  ;;  %v1222_v61 = vadd.f32 -0.28449672, %v1158_v32  ;;  %v1161_v47 = vmul.f32 %v4001_v58, %v1097_v52 }
 0x1a6   :  { %4968 = vst [vmem:[#allocation19_spill] sm:$0xff] %v4096_v46  ;;  %v1224_v27 = vadd.f32 -0.28449672, %v1160_v15  ;;  %v4108_v21 = vpop.eup %3035  ;;  %v1650_v1 = vmul.f32 1.442695, %v1550_v33  ;;  %v4111_v63 = vmul.f32 0.5, %v4048_v11  ;;  %v1551_v57 = vmul.f32 %v1487_v48, %v655_v38  ;;  %v4119_v33 = vpop.f32.mrf.mxu1 }
 0x1a7   :  { %v1223_v17 = vadd.f32 -0.28449672, %v1159_v25  ;;  %v783_v28 = vadd.f32 1.0, %v719_v24  ;;  %v1286_v36 = vmul.f32 %v3934_v7, %v1222_v61  ;;  %v1225_v31 = vadd.f32 -0.28449672, %v1161_v47 }
 0x1a8   :  { %v1288_v4 = vmul.f32 %v3993_v55, %v1224_v27  ;;  %v4115_v32 = vpop.eup %3037  ;;  %v720_v15 = vmul.f32 0.3275911, %v656_v10  ;;  %v1488_v52 = vsub.f32 0.0, %v656_v10  ;;  %v657_v46 = vand.u32 2147483647, %v4100_v0 }
 0x1a9   :  { %v1287_v9 = vmul.f32 %v3953_v40, %v1223_v17  ;;  %3039 = vrcp.f32 %v782_v56  ;;  %v1350_v11 = vadd.f32 0.2548296, %v1286_v36  ;;  %v1289_v48 = vmul.f32 %v4001_v58, %v1225_v31 }
 0x1aa   :  { %v1352_v38 = vadd.f32 0.2548296, %v1288_v4  ;;  %vm1862_vm12 = vcmp.lt.f32.partialorder %v3852_v50, 0.0  ;;  %vm1864_vm13 = vcmp.lt.f32.partialorder %v3894_v19, 0.0  ;;  %3041 = vpow2.f32 %v1650_v1 }
 0x1ab   :  { %v1652_v24 = vmul.f32 1.442695, %v1551_v57  ;;  %v4126_v25 = vadd.f32 %v4025_v30, %v3335_v59  ;;  %v1351_v61 = vadd.f32 0.2548296, %v1287_v9  ;;  %vm1863_vm14 = vcmp.lt.f32.partialorder %v3861_v42, 0.0 }
 0x1ac   :  { %3043 = vrcp.f32 %v783_v28  ;;  %v1414_v56 = vmul.f32 %v3934_v7, %v1350_v11  ;;  %v1416_v4 = vmul.f32 %v3993_v55, %v1352_v38  ;;  %v1353_v27 = vadd.f32 0.2548296, %v1289_v48 }
 0x1ad   :  { %vm1865_vm15 = vcmp.lt.f32.partialorder %v3896_v5, 0.0  ;;  %v784_v47 = vadd.f32 1.0, %v720_v15  ;;  %v1552_v17 = vmul.f32 %v1488_v52, %v656_v10  ;;  %v721_v36 = vmul.f32 0.3275911, %v657_v46 }
 0x1ae   :  { %v1415_v1 = vmul.f32 %v3953_v40, %v1351_v61  ;;  %v1489_v57 = vsub.f32 0.0, %v657_v46  ;;  %v1734_v30 = vmul.f32 %v3940_v39, %v1414_v56  ;;  %v1736_v9 = vmul.f32 %v4019_v29, %v1416_v4  ;;  %v4146_v39 = vpop.f32.mrf.mxu0 }
 0x1af   :  { %v1417_v31 = vmul.f32 %v4001_v58, %v1353_v27  ;;  %3045 = vpow2.f32 %v1652_v24  ;;  %v4137_v7 = vmul.f32 0.5, %v4070_v13  ;;  %v4140_v55 = vmul.f32 0.70710677, %v4126_v25  ;;  %v4143_v10 = vpop.eup %3039 }
 0x1b0   :  { %v1735_v28 = vmul.f32 %v3959_v43, %v1415_v1  ;;  %v1798_v15 = vsub.f32 1.0, %v1734_v30  ;;  %v1800_v40 = vsub.f32 1.0, %v1736_v9  ;;  %v906_v29 = vmul.f32 1.0614054, %v4035_v6  ;;  %v4149_v58 = vpop.eup %3041 }
 0x1b1   :  { %4969 = vst [vmem:[#allocation20_spill] sm:$0xff] %v4140_v55  ;;  %v1737_v52 = vmul.f32 %v4027_v26, %v1417_v31  ;;  %3047 = vrcp.f32 %v784_v47  ;;  %v1654_v13 = vmul.f32 1.442695, %v1552_v17  ;;  %v785_v11 = vadd.f32 1.0, %v721_v36 }
 0x1b2   :  { %v1799_v38 = vsub.f32 1.0, %v1735_v28  ;;  %v4151_v48 = vpop.eup %3043  ;;  %v1553_v24 = vmul.f32 %v1489_v57, %v657_v46  ;;  %v1926_v43 = vsub.f32 0.0, %v1798_v15  ;;  %v1928_v61 = vsub.f32 0.0, %v1800_v40  ;;  %v4163_v46 = vpop.f32.mrf.mxu1 }
 0x1b3   :  { %v1801_v56 = vsub.f32 1.0, %v1737_v52  ;;  %v658_v4 = vand.u32 2147483647, %v4140_v55  ;;  %v4156_v26 = vadd.f32 %v4079_v34, %v3347_v14  ;;  %v908_v1 = vmul.f32 1.0614054, %v4091_v22 }
 0x1b4   :  { %v1927_v27 = vsub.f32 0.0, %v1799_v38  ;;  %v1990_v47 = vsel %vm1862_vm12, %v1926_v43, %v1798_v15  ;;  %v1992_v17 = vsel %vm1864_vm13, %v1928_v61, %v1800_v40  ;;  %v970_v57 = vadd.f32 -1.4531521, %v906_v29 }
 0x1b5   :  { %v1929_v36 = vsub.f32 0.0, %v1801_v56  ;;  %v4165_v30 = vpop.eup %3045  ;;  %3049 = vpow2.f32 %v1654_v13  ;;  %v2054_v9 = vadd.f32 1.0, %v1990_v47  ;;  %v2056_v31 = vadd.f32 1.0, %v1992_v17  ;;  %v2412_v47 = vpop.f32.mrf.mxu3 }
 0x1b6   :  { %v1991_v34 = vsel %vm1863_vm14, %v1927_v27, %v1799_v38  ;;  %v4170_v28 = vmul.f32 0.5, %v4087_v23  ;;  %3051 = vrcp.f32 %v785_v11  ;;  %v4177_v40 = vmul.f32 0.70710677, %v4156_v26  ;;  %v2323_v27 = vpop.f32.mrf.mxu2 }
 0x1b7   :  { %v1993_v50 = vsel %vm1865_vm15, %v1929_v36, %v1801_v56  ;;  %v2055_v19 = vadd.f32 1.0, %v1991_v34  ;;  %v4174_v15 = vpop.eup %3047  ;;  %v2118_v52 = vmul.f32 %v2054_v9, %v3916_v37  ;;  %v2120_v29 = vmul.f32 %v2056_v31, %v3936_v16  ;;  %v4187_v37 = vld [vmem:[%s4934_s4] ss:$0 sm:$0xff]  ;;  %v381_v36 = vpop.f32.mrf.mxu0 }
 0x1b8   :  { %4970 = vst [vmem:[#allocation21_spill] sm:$0xff] %v4177_v40  ;;  %v2057_v13 = vadd.f32 1.0, %v1993_v50  ;;  %v1656_v42 = vmul.f32 1.442695, %v1553_v24  ;;  %v722_v38 = vmul.f32 0.3275911, %v658_v4  ;;  %v1034_v23 = vmul.f32 %v4035_v6, %v970_v57 }
 0x1b9   :  { %v972_v43 = vadd.f32 -1.4531521, %v908_v1  ;;  %v1490_v11 = vsub.f32 0.0, %v658_v4  ;;  %v2168_v61 = vpack.c.bf16 %v2120_v29, %v2118_v52  ;;  %v2119_v5 = vmul.f32 %v2055_v19, %v3925_v8 }
 0x1ba   :  { %v2121_v56 = vmul.f32 %v2057_v13, %v3938_v2  ;;  %v1098_v24 = vadd.f32 1.4214138, %v1034_v23  ;;  %v907_v1 = vmul.f32 1.0614054, %v4052_v3  ;;  %v909_v17 = vmul.f32 1.0614054, %v4108_v21 }
 0x1bb   :  { %v1036_v16 = vmul.f32 %v4091_v22, %v972_v43  ;;  %v4192_v57 = vpop.eup %3049  ;;  %v659_v8 = vand.u32 2147483647, %v4177_v40  ;;  %2357 = vmatmul.bf16.gmra.mxu2 %v2168_v61  ;;  %v2413_v9 = vadd.f32 %v2412_v47, %v2323_v27  ;;  %v4196_v31 = vadd.f32 %v381_v36, %v3335_v59  ;;  %v4203_v61 = vpop.f32.mrf.mxu1 }
 0x1bc   :  { %v2169_v2 = vpack.c.bf16 %v2121_v56, %v2119_v5  ;;  %v4198_v34 = vpop.eup %3051  ;;  %v1162_v19 = vmul.f32 %v4035_v6, %v1098_v24  ;;  %v971_v52 = vadd.f32 -1.4531521, %v907_v1  ;;  %v973_v29 = vadd.f32 -1.4531521, %v909_v17 }
 0x1bd   :  { %v1100_v50 = vadd.f32 1.4214138, %v1036_v16  ;;  %v786_v13 = vadd.f32 1.0, %v722_v38  ;;  %v1554_v43 = vmul.f32 %v1490_v11, %v658_v4  ;;  %v2560_v23 = vadd.f32 %v4187_v37, %v2413_v9 }
 0x1be   :  { %2446 = vmatmul.bf16.gmra.mxu3 %v2169_v2  ;;  %v910_v40 = vmul.f32 1.0614054, %v4143_v10  ;;  %v1226_v56 = vadd.f32 -0.28449672, %v1162_v19  ;;  %v1035_v27 = vmul.f32 %v4052_v3, %v971_v52  ;;  %v1037_v47 = vmul.f32 %v4108_v21, %v973_v29 }
 0x1bf   :  { %v1164_v5 = vmul.f32 %v4091_v22, %v1100_v50  ;;  %3053 = vpow2.f32 %v1656_v42  ;;  %v4210_v16 = vadd.f32 %v4064_v18, %v3335_v59  ;;  %2592 = vst [vmem:[#allocation11] sm:$0xff] %v2560_v23  ;;  %v4213_v4 = vmul.f32 0.70710677, %v4196_v31 }
 0x1c0   :  { %v912_v38 = vmul.f32 1.0614054, %v4174_v15  ;;  %v1290_v24 = vmul.f32 %v4035_v6, %v1226_v56  ;;  %v1099_v1 = vadd.f32 1.4214138, %v1035_v27  ;;  %v1101_v17 = vadd.f32 1.4214138, %v1037_v47 }
 0x1c1   :  { %4971 = vst [vmem:[#allocation22_spill] sm:$0xff] %v4213_v4  ;;  %v1228_v11 = vadd.f32 -0.28449672, %v1164_v5  ;;  %3055 = vrcp.f32 %v786_v13  ;;  %v1658_v36 = vmul.f32 1.442695, %v1554_v43  ;;  %v1491_v2 = vsub.f32 0.0, %v659_v8 }
 0x1c2   :  { %v974_v9 = vadd.f32 -1.4531521, %v910_v40  ;;  %v1354_v50 = vadd.f32 0.2548296, %v1290_v24  ;;  %v1163_v18 = vmul.f32 %v4052_v3, %v1099_v1  ;;  %v1165_v19 = vmul.f32 %v4108_v21, %v1101_v17 }
 0x1c3   :  { %v1292_v42 = vmul.f32 %v4091_v22, %v1228_v11  ;;  %vm1866_vm0 = vcmp.lt.f32.partialorder %v3943_v45, 0.0  ;;  %v4222_v52 = vmul.f32 0.70710677, %v4210_v16  ;;  %v4225_v29 = vand.u32 2147483647, %v4213_v4  ;;  %v2414_v4 = vpop.f32.mrf.mxu3 }
 0x1c4   :  { %v976_v23 = vadd.f32 -1.4531521, %v912_v38  ;;  %v1038_v13 = vmul.f32 %v4143_v10, %v974_v9  ;;  %v1418_v40 = vmul.f32 %v4035_v6, %v1354_v50  ;;  %v1227_v5 = vadd.f32 -0.28449672, %v1163_v18 }
 0x1c5   :  { %4972 = vst [vmem:[#allocation23_spill] sm:$0xff] %v4222_v52  ;;  %v1356_v43 = vadd.f32 0.2548296, %v1292_v42  ;;  %v1229_v56 = vadd.f32 -0.28449672, %v1165_v19  ;;  %v4229_v27 = vpop.eup %3053  ;;  %vm1868_vm1 = vcmp.lt.f32.partialorder %v3988_v44, 0.0  ;;  %3057 = vpow2.f32 %v1658_v36 }
 0x1c6   :  { %v723_v47 = vmul.f32 0.3275911, %v659_v8  ;;  %v4234_v11 = vadd.f32 %v4119_v33, %v3347_v14  ;;  %v1040_v24 = vmul.f32 %v4174_v15, %v976_v23  ;;  %v1738_v1 = vmul.f32 %v4042_v60, %v1418_v40 }
 0x1c7   :  { %v1420_v38 = vmul.f32 %v4091_v22, %v1356_v43  ;;  %v1291_v6 = vmul.f32 %v4052_v3, %v1227_v5  ;;  %v1293_v17 = vmul.f32 %v4108_v21, %v1229_v56  ;;  %v4241_v9 = vpop.eup %3055  ;;  %v1555_v42 = vmul.f32 %v1491_v2, %v659_v8  ;;  %v470_v22 = vpop.f32.mrf.mxu1 }
 0x1c8   :  { %v660_v36 = vand.u32 2147483647, %v4222_v52  ;;  %v730_v50 = vmul.f32 0.3275911, %v4225_v29  ;;  %v1102_v18 = vadd.f32 1.4214138, %v1038_v13  ;;  %v4252_v8 = vadd.f32 %v470_v22, %v3347_v14 }
 0x1c9   :  { %v1740_v33 = vmul.f32 %v4103_v53, %v1420_v38  ;;  %v1802_v19 = vsub.f32 1.0, %v1738_v1  ;;  %v1355_v23 = vadd.f32 0.2548296, %v1291_v6  ;;  %v1357_v55 = vadd.f32 0.2548296, %v1293_v17 }
 0x1ca   :  { %vm1867_vm2 = vcmp.lt.f32.partialorder %v3973_v54, 0.0  ;;  %vm1869_vm3 = vcmp.lt.f32.partialorder %v3996_v49, 0.0  ;;  %v787_v60 = vadd.f32 1.0, %v723_v47  ;;  %v4249_v43 = vmul.f32 0.70710677, %v4234_v11  ;;  %4974 = vst [vmem:[#allocation25_spill] sm:$0xff] %v4252_v8 }
 0x1cb   :  { %v1104_v2 = vadd.f32 1.4214138, %v1040_v24  ;;  %v1804_v40 = vsub.f32 1.0, %v1740_v33  ;;  %v1930_v13 = vsub.f32 0.0, %v1802_v19  ;;  %v1419_v53 = vmul.f32 %v4052_v3, %v1355_v23  ;;  %v4256_v56 = vpop.eup %3057  ;;  %v2325_v33 = vpop.f32.mrf.mxu2 }
 0x1cc   :  { %4973 = vst [vmem:[#allocation24_spill] sm:$0xff] %v4249_v43  ;;  %v1421_v5 = vmul.f32 %v4108_v21, %v1357_v55  ;;  %v1660_v38 = vmul.f32 1.442695, %v1555_v42  ;;  %v1492_v1 = vsub.f32 0.0, %v660_v36  ;;  %v794_v6 = vadd.f32 1.0, %v730_v50 }
 0x1cd   :  { %4975 = vst [vmem:[#allocation26_spill] sm:$0xff] %v4256_v56  ;;  %v1166_v47 = vmul.f32 %v4143_v10, %v1102_v18  ;;  %v1932_v17 = vsub.f32 0.0, %v1804_v40  ;;  %v1994_v52 = vsel %vm1866_vm0, %v1930_v13, %v1802_v19  ;;  %v1739_v22 = vmul.f32 %v4076_v20, %v1419_v53 }
 0x1ce   :  { %v1741_v24 = vmul.f32 %v4115_v32, %v1421_v5  ;;  %v661_v3 = vand.u32 2147483647, %v4249_v43  ;;  %v2058_v21 = vadd.f32 1.0, %v1994_v52  ;;  %v4265_v55 = vmul.f32 0.70710677, %v4252_v8  ;;  %v383_v43 = vpop.f32.mrf.mxu0 }
 0x1cf   :  { %v1168_v42 = vmul.f32 %v4174_v15, %v1104_v2  ;;  %v1996_v50 = vsel %vm1868_vm1, %v1932_v17, %v1804_v40  ;;  %v1803_v18 = vsub.f32 1.0, %v1739_v22  ;;  %v2415_v19 = vadd.f32 %v2414_v4, %v2325_v33 }
 0x1d0   :  { %v1805_v45 = vsub.f32 1.0, %v1741_v24  ;;  %v724_v23 = vmul.f32 0.3275911, %v660_v36  ;;  %v2060_v20 = vadd.f32 1.0, %v1996_v50  ;;  %3059 = vrcp.f32 %v794_v6  ;;  %v4976_v24 = vld [vmem:[#allocation16_spill] sm:$0xff]  ;;  %v472_v50 = vpop.f32.mrf.mxu1 }
 0x1d1   :  { %v1230_v32 = vadd.f32 -0.28449672, %v1166_v47  ;;  %v1556_v13 = vmul.f32 %v1492_v1, %v660_v36  ;;  %v1931_v53 = vsub.f32 0.0, %v1803_v18  ;;  %v2561_v52 = vadd.f32 %v4187_v37, %v2415_v19 }
 0x1d2   :  { %v1933_v5 = vsub.f32 0.0, %v1805_v45  ;;  %v1493_v56 = vsub.f32 0.0, %v661_v3  ;;  %v2122_v8 = vmul.f32 %v2058_v21, %v4005_v41  ;;  %v2124_v2 = vmul.f32 %v2060_v20, %v4021_v62 }
 0x1d3   :  { %v4274_v44 = vadd.f32 %v383_v43, %v3335_v59  ;;  %v1995_v4 = vsel %vm1867_vm2, %v1931_v53, %v1803_v18  ;;  %v4281_v36 = vand.u32 2147483647, %v4265_v55  ;;  %2593 = vst [vmem:[#allocation11 + $0x8] sm:$0xff] %v2561_v52  ;;  %v1232_v1 = vadd.f32 -0.28449672, %v1168_v42  ;;  %v4978_v53 = vld [vmem:[#allocation18_spill] sm:$0xff] }
 0x1d4   :  { %v1997_v40 = vsel %vm1869_vm3, %v1933_v5, %v1805_v45  ;;  %v2170_v6 = vpack.c.bf16 %v2124_v2, %v2122_v8  ;;  %v2059_v47 = vadd.f32 1.0, %v1995_v4  ;;  %v1294_v41 = vmul.f32 %v4143_v10, %v1230_v32 }
 0x1d5   :  { %v2061_v17 = vadd.f32 1.0, %v1997_v40  ;;  %3061 = vrcp.f32 %v787_v60  ;;  %v788_v62 = vadd.f32 1.0, %v724_v23  ;;  %v725_v43 = vmul.f32 0.3275911, %v661_v3 }
 0x1d6   :  { %v4286_v54 = vadd.f32 %v4106_v12, %v3335_v59  ;;  %v4288_v22 = vpop.eup %3059  ;;  %3063 = vpow2.f32 %v1660_v38  ;;  %2362 = vmatmul.bf16.gmra.mxu2 %v2170_v6  ;;  %v2123_v49 = vmul.f32 %v2059_v47, %v4016_v51  ;;  %v4293_v8 = vmul.f32 0.70710677, %v4274_v44 }
 0x1d7   :  { %v2125_v33 = vmul.f32 %v2061_v17, %v4976_v24  ;;  %v1662_v21 = vmul.f32 1.442695, %v1556_v13  ;;  %v1557_v42 = vmul.f32 %v1493_v56, %v661_v3  ;;  %v731_v60 = vmul.f32 0.3275911, %v4281_v36 }
 0x1d8   :  { %v911_v18 = vmul.f32 1.0614054, %v4151_v48  ;;  %v4299_v12 = vadd.f32 %v4163_v46, %v3347_v14  ;;  %v1296_v45 = vmul.f32 %v4174_v15, %v1232_v1  ;;  %v1358_v51 = vadd.f32 0.2548296, %v1294_v41 }
 0x1d9   :  { %v2171_v38 = vpack.c.bf16 %v2125_v33, %v2123_v49  ;;  %3065 = vrcp.f32 %v788_v62  ;;  %v789_v19 = vadd.f32 1.0, %v725_v43  ;;  %v4303_v23 = vmul.f32 0.70710677, %v4286_v54 }
 0x1da   :  { %v922_v56 = vmul.f32 1.0614054, %v4288_v22  ;;  %vm1870_vm4 = vcmp.lt.f32.partialorder %v4045_v35, 0.0  ;;  %v4308_v3 = vand.u32 2147483647, %v4293_v8  ;;  %v4311_v46 = vadd.f32 %v472_v50, %v3347_v14 }
 0x1db   :  { %4977 = vst [vmem:[#allocation16_spill] sm:$0xff] %v4303_v23  ;;  %2451 = vmatmul.bf16.gmra.mxu3 %v2171_v38  ;;  %v1360_v20 = vadd.f32 0.2548296, %v1296_v45  ;;  %v1422_v32 = vmul.f32 %v4143_v10, %v1358_v51  ;;  %v4314_v13 = vpop.eup %3061  ;;  %vm1872_vm5 = vcmp.lt.f32.partialorder %v4978_v53, 0.0  ;;  %3067 = vpow2.f32 %v1662_v21  ;;  %v4980_v53 = vld [vmem:[#allocation19_spill] sm:$0xff] }
 0x1dc   :  { %v795_v5 = vadd.f32 1.0, %v731_v60  ;;  %v913_v52 = vmul.f32 1.0614054, %v4198_v34  ;;  %v975_v2 = vadd.f32 -1.4531521, %v911_v18  ;;  %v4318_v4 = vpop.eup %3063  ;;  %v4326_v10 = vmul.f32 0.5, %v4126_v25 }
 0x1dd   :  { %v1664_v40 = vmul.f32 1.442695, %v1557_v42  ;;  %v4321_v1 = vmul.f32 0.70710677, %v4299_v12  ;;  %v1424_v6 = vmul.f32 %v4174_v15, %v1360_v20  ;;  %v1742_v47 = vmul.f32 %v4149_v58, %v1422_v32  ;;  %v2417_v20 = vpop.f32.mrf.mxu3 }
 0x1de   :  { %3069 = vrcp.f32 %v789_v19  ;;  %v662_v17 = vand.u32 2147483647, %v4303_v23  ;;  %v986_v41 = vadd.f32 -1.4531521, %v922_v56  ;;  %v732_v62 = vmul.f32 0.3275911, %v4308_v3 }
 0x1df   :  { %4979 = vst [vmem:[#allocation18_spill] sm:$0xff] %v4321_v1  ;;  %v4331_v43 = vmul.f32 0.70710677, %v4311_v46  ;;  %v1744_v49 = vmul.f32 %v4192_v57, %v1424_v6  ;;  %v1806_v24 = vsub.f32 1.0, %v1742_v47  ;;  %v4334_v33 = vpop.eup %3065  ;;  %v4337_v15 = vmul.f32 0.5, %v4156_v26 }
 0x1e0   :  { %3071 = vrcp.f32 %v795_v5  ;;  %v977_v25 = vadd.f32 -1.4531521, %v913_v52  ;;  %v1039_v58 = vmul.f32 %v4151_v48, %v975_v2  ;;  %v4341_v21 = vmul.f32 0.5, %v4210_v16  ;;  %v2328_v16 = vpop.f32.mrf.mxu2 }
 0x1e1   :  { %3073 = vpow2.f32 %v1664_v40  ;;  %v663_v42 = vand.u32 2147483647, %v4321_v1  ;;  %v1808_v60 = vsub.f32 1.0, %v1744_v49  ;;  %v4344_v50 = vpop.eup %3067  ;;  %v726_v57 = vmul.f32 0.3275911, %v662_v17 }
 0x1e2   :  { %v1934_v18 = vsub.f32 0.0, %v1806_v24  ;;  %v1041_v38 = vmul.f32 %v4198_v34, %v977_v25  ;;  %v1103_v45 = vadd.f32 1.4214138, %v1039_v58  ;;  %v1050_v26 = vmul.f32 %v4288_v22, %v986_v41 }
 0x1e3   :  { %v796_v51 = vadd.f32 1.0, %v732_v62  ;;  %v4349_v19 = vand.u32 2147483647, %v4331_v43  ;;  %v1936_v56 = vsub.f32 0.0, %v1808_v60  ;;  %v2418_v40 = vadd.f32 %v2417_v20, %v2328_v16  ;;  %v386_v20 = vpop.f32.mrf.mxu0 }
 0x1e4   :  { %v4351_v32 = vpop.eup %3069  ;;  %v1998_v5 = vsel %vm1870_vm4, %v1934_v18, %v1806_v24  ;;  %v1105_v52 = vadd.f32 1.4214138, %v1041_v38  ;;  %v1167_v2 = vmul.f32 %v4151_v48, %v1103_v45  ;;  %v1494_v6 = vsub.f32 0.0, %v662_v17 }
 0x1e5   :  { %v727_v47 = vmul.f32 0.3275911, %v663_v42  ;;  %v4358_v41 = vadd.f32 %v4146_v39, %v3335_v59  ;;  %v2000_v62 = vsel %vm1872_vm5, %v1936_v56, %v1808_v60  ;;  %v2062_v25 = vadd.f32 1.0, %v1998_v5 }
 0x1e6   :  { %v4362_v49 = vpop.eup %3071  ;;  %v2064_v58 = vadd.f32 1.0, %v2000_v62  ;;  %v1169_v35 = vmul.f32 %v4198_v34, %v1105_v52  ;;  %v1231_v24 = vadd.f32 -0.28449672, %v1167_v2  ;;  %v790_v38 = vadd.f32 1.0, %v726_v57 }
 0x1e7   :  { %v4365_v18 = vpop.eup %3073  ;;  %v1495_v45 = vsub.f32 0.0, %v663_v42  ;;  %3075 = vrcp.f32 %v796_v51  ;;  %v2562_v16 = vadd.f32 %v4187_v37, %v2418_v40  ;;  %v1114_v39 = vadd.f32 1.4214138, %v1050_v26 }
 0x1e8   :  { %v733_v1 = vmul.f32 0.3275911, %v4349_v19  ;;  %v2126_v60 = vmul.f32 %v2062_v25, %v4980_v53  ;;  %v2128_v56 = vmul.f32 %v2064_v58, %v4137_v7  ;;  %v1558_v5 = vmul.f32 %v1494_v6, %v662_v17  ;;  %v4982_v58 = vld [vmem:[#allocation17_spill] sm:$0xff] }
 0x1e9   :  { %v923_v62 = vmul.f32 1.0614054, %v4362_v49  ;;  %v1233_v52 = vadd.f32 -0.28449672, %v1169_v35  ;;  %v1295_v2 = vmul.f32 %v4151_v48, %v1231_v24  ;;  %2594 = vst [vmem:[#allocation11 + $0x10] sm:$0xff] %v2562_v16  ;;  %v791_v57 = vadd.f32 1.0, %v727_v47 }
 0x1ea   :  { %v4374_v51 = vmul.f32 0.70710677, %v4358_v41  ;;  %v2172_v40 = vpack.c.bf16 %v2128_v56, %v2126_v60  ;;  %v4377_v26 = vadd.f32 %v386_v20, %v3335_v59  ;;  %v4381_v25 = vadd.f32 %v4203_v61, %v3347_v14 }
 0x1eb   :  { %v1498_v7 = vsub.f32 0.0, %v4225_v29  ;;  %v1297_v17 = vmul.f32 %v4198_v34, %v1233_v52  ;;  %v1359_v6 = vadd.f32 0.2548296, %v1295_v2  ;;  %vm1871_vm6 = vcmp.lt.f32.partialorder %v4982_v58, 0.0 }
 0x1ec   :  { %4981 = vst [vmem:[#allocation19_spill] sm:$0xff] %v4374_v51  ;;  %3077 = vrcp.f32 %v790_v38  ;;  %v1559_v47 = vmul.f32 %v1495_v45, %v663_v42  ;;  %v1178_v35 = vmul.f32 %v4288_v22, %v1114_v39  ;;  %v797_v24 = vadd.f32 1.0, %v733_v1  ;;  %2367 = vmatmul.bf16.gmra.mxu2 %v2172_v40 }
 0x1ed   :  { %v4387_v16 = vpop.eup %3075  ;;  %v987_v20 = vadd.f32 -1.4531521, %v923_v62  ;;  %v1361_v53 = vadd.f32 0.2548296, %v1297_v17  ;;  %v1423_v61 = vmul.f32 %v4151_v48, %v1359_v6  ;;  %v4391_v60 = vmul.f32 0.70710677, %v4377_v26 }
 0x1ee   :  { %vm1873_vm7 = vcmp.lt.f32.partialorder %v4100_v0, 0.0  ;;  %v4395_v56 = vmul.f32 0.5, %v4234_v11  ;;  %v1666_v38 = vmul.f32 1.442695, %v1558_v5  ;;  %3079 = vrcp.f32 %v791_v57 }
 0x1ef   :  { %4983 = vst [vmem:[#allocation17_spill] sm:$0xff] %v4391_v60  ;;  %v664_v42 = vand.u32 2147483647, %v4374_v51  ;;  %v4399_v1 = vmul.f32 0.70710677, %v4381_v25  ;;  %v1562_v45 = vmul.f32 %v1498_v7, %v4225_v29  ;;  %v1425_v39 = vmul.f32 %v4198_v34, %v1361_v53 }
 0x1f0   :  { %v1743_v48 = vmul.f32 %v4165_v30, %v1423_v61  ;;  %v1668_v62 = vmul.f32 1.442695, %v1559_v47  ;;  %v1242_v52 = vadd.f32 -0.28449672, %v1178_v35  ;;  %v924_v2 = vmul.f32 1.0614054, %v4387_v16 }
 0x1f1   :  { %4984 = vst [vmem:[#allocation27_spill] sm:$0xff] %v4399_v1  ;;  %3081 = vrcp.f32 %v797_v24  ;;  %v1051_v11 = vmul.f32 %v4362_v49, %v987_v20  ;;  %v1745_v5 = vmul.f32 %v4229_v27, %v1425_v39  ;;  %v4408_v40 = vand.u32 2147483647, %v4391_v60  ;;  %v475_v27 = vpop.f32.mrf.mxu1 }
 0x1f2   :  { %v1807_v57 = vsub.f32 1.0, %v1743_v48  ;;  %v4410_v17 = vpop.eup %3077  ;;  %v4413_v29 = vmul.f32 0.5, %v4286_v54  ;;  %3083 = vpow2.f32 %v1666_v38  ;;  %v4416_v30 = vmul.f32 0.5, %v4299_v12 }
 0x1f3   :  { %v1496_v34 = vsub.f32 0.0, %v664_v42  ;;  %v665_v7 = vand.u32 2147483647, %v4399_v1  ;;  %v1674_v6 = vmul.f32 1.442695, %v1562_v45  ;;  %v1809_v47 = vsub.f32 1.0, %v1745_v5 }
 0x1f4   :  { %4985 = vst [vmem:[#allocation28_spill] sm:$0xff] %v4413_v29  ;;  %v1935_v35 = vsub.f32 0.0, %v1807_v57  ;;  %v4419_v24 = vpop.eup %3079  ;;  %3085 = vpow2.f32 %v1668_v62  ;;  %v4422_v20 = vmul.f32 0.5, %v4358_v41  ;;  %v1306_v54 = vmul.f32 %v4288_v22, %v1242_v52 }
 0x1f5   :  { %4986 = vst [vmem:[#allocation29_spill] sm:$0xff] %v4416_v30  ;;  %v988_v53 = vadd.f32 -1.4531521, %v924_v2  ;;  %v1115_v61 = vadd.f32 1.4214138, %v1051_v11  ;;  %v1937_v38 = vsub.f32 0.0, %v1809_v47  ;;  %v1560_v5 = vmul.f32 %v1496_v34, %v664_v42  ;;  %v2330_v2 = vpop.f32.mrf.mxu2  ;;  %v2419_v11 = vpop.f32.mrf.mxu3 }
 0x1f6   :  { %4987 = vst [vmem:[#allocation30_spill] sm:$0xff] %v4422_v20  ;;  %v1999_v12 = vsel %vm1871_vm6, %v1935_v35, %v1807_v57  ;;  %v734_v39 = vmul.f32 0.3275911, %v4408_v40  ;;  %v728_v48 = vmul.f32 0.3275911, %v664_v42  ;;  %v4431_v62 = vadd.f32 %v475_v27, %v3347_v14 }
 0x1f7   :  { %v4428_v45 = vpop.eup %3081  ;;  %v2063_v30 = vadd.f32 1.0, %v1999_v12  ;;  %v729_v41 = vmul.f32 0.3275911, %v665_v7  ;;  %v1497_v20 = vsub.f32 0.0, %v665_v7  ;;  %3087 = vpow2.f32 %v1674_v6 }
 0x1f8   :  { %v2001_v52 = vsel %vm1873_vm7, %v1937_v38, %v1809_v47  ;;  %v4435_v58 = vpop.eup %3083  ;;  %v1370_v57 = vadd.f32 0.2548296, %v1306_v54  ;;  %v1499_v35 = vsub.f32 0.0, %v4281_v36  ;;  %v1052_v29 = vmul.f32 %v4387_v16, %v988_v53 }
 0x1f9   :  { %4988 = vst [vmem:[#allocation31_spill] sm:$0xff] %v4435_v58  ;;  %v2065_v42 = vadd.f32 1.0, %v2001_v52  ;;  %v1179_v34 = vmul.f32 %v4362_v49, %v1115_v61  ;;  %v1500_v27 = vsub.f32 0.0, %v4308_v3  ;;  %v925_v12 = vmul.f32 1.0614054, %v4428_v45 }
 0x1fa   :  { %v798_v6 = vadd.f32 1.0, %v734_v39  ;;  %v4442_v1 = vpop.eup %3085  ;;  %v2127_v0 = vmul.f32 %v2063_v30, %v4111_v63  ;;  %v4447_v54 = vmul.f32 0.70710677, %v4431_v62  ;;  %v2420_v38 = vadd.f32 %v2419_v11, %v2330_v2  ;;  %v388_v2 = vpop.f32.mrf.mxu0 }
 0x1fb   :  { %4989 = vst [vmem:[#allocation32_spill] sm:$0xff] %v4442_v1  ;;  %v2129_v47 = vmul.f32 %v2065_v42, %v4170_v28  ;;  %v792_v58 = vadd.f32 1.0, %v728_v48  ;;  %v1670_v53 = vmul.f32 1.442695, %v1560_v5  ;;  %v1561_v52 = vmul.f32 %v1497_v20, %v665_v7 }
 0x1fc   :  { %4990 = vst [vmem:[#allocation33_spill] sm:$0xff] %v4447_v54  ;;  %v914_v61 = vmul.f32 1.0614054, %v4241_v9  ;;  %v1434_v51 = vmul.f32 %v4288_v22, %v1370_v57  ;;  %v1116_v23 = vadd.f32 1.4214138, %v1052_v29  ;;  %v2563_v39 = vadd.f32 %v4187_v37, %v2420_v38 }
 0x1fd   :  { %v2173_v60 = vpack.c.bf16 %v2129_v47, %v2127_v0  ;;  %v3088_v1 = vpop.eup %3087  ;;  %v4453_v63 = vmul.f32 0.5, %v4381_v25  ;;  %v793_v28 = vadd.f32 1.0, %v729_v41  ;;  %v1243_v30 = vadd.f32 -0.28449672, %v1179_v34 }
 0x1fe   :  { %v1563_v42 = vmul.f32 %v1499_v35, %v4281_v36  ;;  %v1564_v48 = vmul.f32 %v1500_v27, %v4308_v3  ;;  %v989_v7 = vadd.f32 -1.4531521, %v925_v12  ;;  %3089 = vrcp.f32 %v798_v6  ;;  %2595 = vst [vmem:[#allocation11 + $0x18] sm:$0xff] %v2563_v39  ;;  %v4995_v39 = vld [vmem:[#allocation22_spill] sm:$0xff] }
 0x1ff   :  { %4991 = vst [vmem:[#allocation34_spill] sm:$0xff] %v4453_v63  ;;  %2456 = vmatmul.bf16.gmra.mxu3 %v2173_v60  ;;  %v4458_v22 = vand.u32 2147483647, %v4447_v54  ;;  %3091 = vrcp.f32 %v792_v58  ;;  %v1672_v29 = vmul.f32 1.442695, %v1561_v52  ;;  %v1501_v20 = vsub.f32 0.0, %v4349_v19 }
 0x200   :  { %v978_v25 = vadd.f32 -1.4531521, %v914_v61  ;;  %3093 = vpow2.f32 %v1670_v53  ;;  %v4461_v5 = vmul.f32 %v3088_v1, %v1434_v51  ;;  %v1180_v36 = vmul.f32 %v4387_v16, %v1116_v23  ;;  %v4992_v23 = vld [vmem:[#allocation25_spill] sm:$0xff] }
 0x201   :  { %v4465_v41 = vadd.f32 %v388_v2, %v3335_v59  ;;  %3095 = vrcp.f32 %v793_v28  ;;  %v1307_v3 = vmul.f32 %v4362_v49, %v1243_v30  ;;  %v1676_v60 = vmul.f32 1.442695, %v1563_v42  ;;  %v477_v30 = vpop.f32.mrf.mxu1 }
 0x202   :  { %v916_v11 = vmul.f32 1.0614054, %v4334_v33  ;;  %v1678_v57 = vmul.f32 1.442695, %v1564_v48  ;;  %v1053_v58 = vmul.f32 %v4428_v45, %v989_v7  ;;  %v735_v35 = vmul.f32 0.3275911, %v4458_v22 }
 0x203   :  { %v1042_v34 = vmul.f32 %v4241_v9, %v978_v25  ;;  %3097 = vpow2.f32 %v1672_v29  ;;  %v4473_v51 = vmul.f32 0.5, %v4196_v31  ;;  %v4476_v1 = vmul.f32 0.5, %v4992_v23 }
 0x204   :  { %v1565_v27 = vmul.f32 %v1501_v20, %v4349_v19  ;;  %v4479_v12 = vpop.eup %3089  ;;  %v1818_v6 = vsub.f32 1.0, %v4461_v5  ;;  %v4483_v0 = vmul.f32 0.5, %v4274_v44  ;;  %v1244_v47 = vadd.f32 -0.28449672, %v1180_v36 }
 0x205   :  { %v4486_v38 = vmul.f32 0.70710677, %v4465_v41  ;;  %v4488_v53 = vpop.eup %3091  ;;  %v1371_v31 = vadd.f32 0.2548296, %v1307_v3  ;;  %3099 = vpow2.f32 %v1676_v60  ;;  %v4491_v52 = vmul.f32 0.5, %v4311_v46 }
 0x206   :  { %v980_v61 = vadd.f32 -1.4531521, %v916_v11  ;;  %v4493_v19 = vpop.eup %3093  ;;  %vm1882_vm8 = vcmp.lt.f32.partialorder %v4995_v39, 0.0  ;;  %3101 = vpow2.f32 %v1678_v57  ;;  %v1117_v28 = vadd.f32 1.4214138, %v1053_v58 }
 0x207   :  { %4993 = vst [vmem:[#allocation25_spill] sm:$0xff] %v4486_v38  ;;  %v799_v44 = vadd.f32 1.0, %v735_v35  ;;  %v1106_v42 = vadd.f32 1.4214138, %v1042_v34  ;;  %v4496_v2 = vpop.eup %3095  ;;  %v1680_v48 = vmul.f32 1.442695, %v1565_v27  ;;  %v1308_v25 = vmul.f32 %v4387_v16, %v1244_v47  ;;  %v2333_v27 = vpop.f32.mrf.mxu2 }
 0x208   :  { %4994 = vst [vmem:[#allocation35_spill] sm:$0xff] %v4493_v19  ;;  %v926_v7 = vmul.f32 1.0614054, %v4479_v12  ;;  %v1044_v29 = vmul.f32 %v4334_v33, %v980_v61  ;;  %v915_v46 = vmul.f32 1.0614054, %v4314_v13  ;;  %v1946_v20 = vsub.f32 0.0, %v1818_v6  ;;  %v2422_v47 = vpop.f32.mrf.mxu3 }
 0x209   :  { %v4503_v5 = vand.u32 2147483647, %v4486_v38  ;;  %v1170_v36 = vmul.f32 %v4241_v9, %v1106_v42  ;;  %v4506_v3 = vpop.eup %3097  ;;  %v1435_v60 = vmul.f32 %v4362_v49, %v1371_v31  ;;  %v4510_v11 = vadd.f32 %v477_v30, %v3347_v14 }
 0x20a   :  { %4996 = vst [vmem:[#allocation22_spill] sm:$0xff] %v4506_v3  ;;  %v1108_v57 = vadd.f32 1.4214138, %v1044_v29  ;;  %v917_v58 = vmul.f32 1.0614054, %v4351_v32  ;;  %v1181_v35 = vmul.f32 %v4428_v45, %v1117_v28  ;;  %3103 = vrcp.f32 %v799_v44 }
 0x20b   :  { %v1234_v34 = vadd.f32 -0.28449672, %v1170_v36  ;;  %v979_v23 = vadd.f32 -1.4531521, %v915_v46  ;;  %v3100_v61 = vpop.eup %3099  ;;  %v990_v63 = vadd.f32 -1.4531521, %v926_v7  ;;  %v2423_v3 = vadd.f32 %v2422_v47, %v2333_v27 }
 0x20c   :  { %v1172_v42 = vmul.f32 %v4334_v33, %v1108_v57  ;;  %v981_v38 = vadd.f32 -1.4531521, %v917_v58  ;;  %v3102_v49 = vpop.eup %3101  ;;  %v1372_v31 = vadd.f32 0.2548296, %v1308_v25  ;;  %v736_v30 = vmul.f32 0.3275911, %v4503_v5 }
 0x20d   :  { %v1298_v29 = vmul.f32 %v4241_v9, %v1234_v34  ;;  %v1043_v54 = vmul.f32 %v4314_v13, %v979_v23  ;;  %v4519_v28 = vmul.f32 0.70710677, %v4510_v11  ;;  %v2564_v7 = vadd.f32 %v4187_v37, %v2423_v3  ;;  %v4997_v47 = vld [vmem:[#allocation20_spill] sm:$0xff] }
 0x20e   :  { %v1236_v44 = vadd.f32 -0.28449672, %v1172_v42  ;;  %v1045_v46 = vmul.f32 %v4351_v32, %v981_v38  ;;  %v1755_v36 = vmul.f32 %v3100_v61, %v1435_v60  ;;  %v1245_v57 = vadd.f32 -0.28449672, %v1181_v35 }
 0x20f   :  { %v1362_v58 = vadd.f32 0.2548296, %v1298_v29  ;;  %v1107_v27 = vadd.f32 1.4214138, %v1043_v54  ;;  %vm1874_vm9 = vcmp.lt.f32.partialorder %v4997_v47, 0.0  ;;  %v2010_v25 = vsel %vm1882_vm8, %v1946_v20, %v1818_v6  ;;  %2596 = vst [vmem:[#allocation11 + $0x20] sm:$0xff] %v2564_v7 }
 0x210   :  { %v1054_v34 = vmul.f32 %v4479_v12, %v990_v63  ;;  %v1300_v23 = vmul.f32 %v4334_v33, %v1236_v44  ;;  %v1109_v19 = vadd.f32 1.4214138, %v1045_v46  ;;  %v4528_v42 = vpop.eup %3103  ;;  %v1436_v38 = vmul.f32 %v4387_v16, %v1372_v31  ;;  %v4998_v20 = vld [vmem:[#allocation23_spill] sm:$0xff]  ;;  %v4999_v16 = vld [vmem:[#allocation26_spill] sm:$0xff] }
 0x211   :  { %v800_v37 = vadd.f32 1.0, %v736_v30  ;;  %v1426_v3 = vmul.f32 %v4241_v9, %v1362_v58  ;;  %v1171_v54 = vmul.f32 %v4314_v13, %v1107_v27  ;;  %vm1883_vm10 = vcmp.lt.f32.partialorder %v4265_v55, 0.0 }
 0x212   :  { %3105 = vpow2.f32 %v1680_v48  ;;  %v4535_v6 = vand.u32 2147483647, %v4519_v28  ;;  %v1364_v63 = vadd.f32 0.2548296, %v1300_v23  ;;  %v1173_v39 = vmul.f32 %v4351_v32, %v1109_v19 }
 0x213   :  { %vm1876_vm11 = vcmp.lt.f32.partialorder %v4998_v20, 0.0  ;;  %v1819_v60 = vsub.f32 1.0, %v1755_v36  ;;  %v1309_v35 = vmul.f32 %v4428_v45, %v1245_v57  ;;  %v1746_v61 = vmul.f32 %v4999_v16, %v1426_v3  ;;  %v391_v16 = vpop.f32.mrf.mxu0 }
 0x214   :  { %v1235_v31 = vadd.f32 -0.28449672, %v1171_v54  ;;  %v2074_v9 = vadd.f32 1.0, %v2010_v25  ;;  %v1118_v30 = vadd.f32 1.4214138, %v1054_v34  ;;  %v1428_v29 = vmul.f32 %v4334_v33, %v1364_v63 }
 0x215   :  { %v1237_v44 = vadd.f32 -0.28449672, %v1173_v39  ;;  %v4542_v48 = vmul.f32 %v3102_v49, %v1436_v38  ;;  %v927_v46 = vmul.f32 1.0614054, %v4528_v42  ;;  %3107 = vrcp.f32 %v800_v37 }
 0x216   :  { %v1810_v7 = vsub.f32 1.0, %v1746_v61  ;;  %v737_v19 = vmul.f32 0.3275911, %v4535_v6  ;;  %v1748_v36 = vmul.f32 %v4344_v50, %v1428_v29  ;;  %v1299_v57 = vmul.f32 %v4314_v13, %v1235_v31  ;;  %v5001_v61 = vld [vmem:[#allocation24_spill] sm:$0xff] }
 0x217   :  { %v1301_v58 = vmul.f32 %v4351_v32, %v1237_v44  ;;  %v1947_v27 = vsub.f32 0.0, %v1819_v60  ;;  %v1373_v25 = vadd.f32 0.2548296, %v1309_v35  ;;  %v1502_v34 = vsub.f32 0.0, %v4408_v40  ;;  %v5000_v35 = vld [vmem:[#allocation21_spill] sm:$0xff] }
 0x218   :  { %v1938_v33 = vsub.f32 0.0, %v1810_v7  ;;  %v3106_v23 = vpop.eup %3105  ;;  %v1182_v49 = vmul.f32 %v4479_v12, %v1118_v30  ;;  %v1812_v38 = vsub.f32 1.0, %v1748_v36  ;;  %v1363_v3 = vadd.f32 0.2548296, %v1299_v57 }
 0x219   :  { %v1365_v37 = vadd.f32 0.2548296, %v1301_v58  ;;  %v4552_v54 = vmul.f32 %v2074_v9, %v4473_v51  ;;  %v991_v63 = vadd.f32 -1.4531521, %v927_v46  ;;  %v1503_v50 = vsub.f32 0.0, %v4458_v22 }
 0x21a   :  { %v2002_v39 = vsel %vm1874_vm9, %v1938_v33, %v1810_v7  ;;  %vm1875_vm12 = vcmp.lt.f32.partialorder %v5000_v35, 0.0  ;;  %vm1877_vm13 = vcmp.lt.f32.partialorder %v5001_v61, 0.0  ;;  %v1820_v31 = vsub.f32 1.0, %v4542_v48 }
 0x21b   :  { %vm1884_vm14 = vcmp.lt.f32.partialorder %v4293_v8, 0.0  ;;  %v801_v30 = vadd.f32 1.0, %v737_v19  ;;  %v1940_v29 = vsub.f32 0.0, %v1812_v38  ;;  %v1427_v51 = vmul.f32 %v4314_v13, %v1363_v3  ;;  %v4562_v9 = vpop.eup %3107 }
 0x21c   :  { %v2011_v44 = vsel %vm1883_vm10, %v1947_v27, %v1819_v60  ;;  %v1566_v47 = vmul.f32 %v1502_v34, %v4408_v40  ;;  %v2066_v46 = vadd.f32 1.0, %v2002_v39  ;;  %v1429_v7 = vmul.f32 %v4351_v32, %v1365_v37  ;;  %v480_v40 = vpop.f32.mrf.mxu1 }
 0x21d   :  { %v1437_v36 = vmul.f32 %v4428_v45, %v1373_v25  ;;  %v1246_v57 = vadd.f32 -0.28449672, %v1182_v49  ;;  %v2004_v48 = vsel %vm1876_vm11, %v1940_v29, %v1812_v38  ;;  %v4572_v19 = vadd.f32 %v391_v16, %v3335_v59 }
 0x21e   :  { %v1055_v13 = vmul.f32 %v4528_v42, %v991_v63  ;;  %v2068_v58 = vadd.f32 1.0, %v2004_v48  ;;  %v1747_v55 = vmul.f32 %v4318_v4, %v1427_v51  ;;  %v1749_v60 = vmul.f32 %v4365_v18, %v1429_v7 }
 0x21f   :  { %v1948_v27 = vsub.f32 0.0, %v1820_v31  ;;  %v1567_v32 = vmul.f32 %v1503_v50, %v4458_v22  ;;  %v928_v45 = vmul.f32 1.0614054, %v4562_v9  ;;  %3109 = vrcp.f32 %v801_v30  ;;  %v2335_v50 = vpop.f32.mrf.mxu2 }
 0x220   :  { %v2130_v20 = vmul.f32 %v2066_v46, %v4326_v10  ;;  %v2132_v25 = vmul.f32 %v2068_v58, %v4341_v21  ;;  %v1811_v34 = vsub.f32 1.0, %v1747_v55  ;;  %v1813_v33 = vsub.f32 1.0, %v1749_v60  ;;  %v2424_v10 = vpop.f32.mrf.mxu3 }
 0x221   :  { %v4581_v49 = vmul.f32 %v3106_v23, %v1437_v36  ;;  %v4584_v38 = vmul.f32 0.5, %v4377_v26  ;;  %v1310_v4 = vmul.f32 %v4479_v12, %v1246_v57  ;;  %v4588_v18 = vmul.f32 0.70710677, %v4572_v19 }
 0x222   :  { %v1119_v22 = vadd.f32 1.4214138, %v1055_v13  ;;  %v2174_v3 = vpack.c.bf16 %v2132_v25, %v2130_v20  ;;  %v1939_v37 = vsub.f32 0.0, %v1811_v34  ;;  %v1941_v63 = vsub.f32 0.0, %v1813_v33 }
 0x223   :  { %v2075_v39 = vadd.f32 1.0, %v2011_v44  ;;  %v1682_v21 = vmul.f32 1.442695, %v1566_v47  ;;  %v4591_v16 = vmul.f32 0.5, %v4431_v62  ;;  %v1684_v23 = vmul.f32 1.442695, %v1567_v32 }
 0x224   :  { %v2012_v26 = vsel %vm1884_vm14, %v1948_v27, %v1820_v31  ;;  %v992_v30 = vadd.f32 -1.4531521, %v928_v45  ;;  %2372 = vmatmul.bf16.gmra.mxu2 %v2174_v3  ;;  %v2003_v29 = vsel %vm1875_vm12, %v1939_v37, %v1811_v34  ;;  %v2005_v51 = vsel %vm1877_vm13, %v1941_v63, %v1813_v33  ;;  %v393_v27 = vpop.f32.mrf.mxu0  ;;  %v482_v32 = vpop.f32.mrf.mxu1 }
 0x225   :  { %v4599_v46 = vpop.eup %3109  ;;  %vm1885_vm15 = vcmp.lt.f32.partialorder %v4331_v43, 0.0  ;;  %v2067_v44 = vadd.f32 1.0, %v2003_v29  ;;  %v2069_v47 = vadd.f32 1.0, %v2005_v51  ;;  %v4603_v62 = vand.u32 2147483647, %v4588_v18 }
 0x226   :  { %v2425_v7 = vadd.f32 %v2424_v10, %v2335_v50  ;;  %v1821_v8 = vsub.f32 1.0, %v4581_v49  ;;  %v1374_v31 = vadd.f32 0.2548296, %v1310_v4  ;;  %v1183_v36 = vmul.f32 %v4528_v42, %v1119_v22 }
 0x227   :  { %v4608_v35 = vadd.f32 %v480_v40, %v3347_v14  ;;  %v4611_v61 = vmul.f32 %v2075_v39, %v4476_v1  ;;  %3111 = vpow2.f32 %v1682_v21  ;;  %v2131_v57 = vmul.f32 %v2067_v44, %v4337_v15  ;;  %v4624_v15 = vld [vmem:[%s4934_s4] ss:$0 sm:$0xff] }
 0x228   :  { %v2133_v48 = vmul.f32 %v2069_v47, %v4395_v56  ;;  %v2076_v13 = vadd.f32 1.0, %v2012_v26  ;;  %v4616_v58 = vmul.f32 0.5, %v4465_v41  ;;  %v1056_v55 = vmul.f32 %v4562_v9, %v992_v30 }
 0x229   :  { %v929_v60 = vmul.f32 1.0614054, %v4599_v46  ;;  %3113 = vpow2.f32 %v1684_v23  ;;  %v738_v1 = vmul.f32 0.3275911, %v4603_v62  ;;  %v2565_v56 = vadd.f32 %v4624_v15, %v2425_v7 }
 0x22a   :  { %v2175_v40 = vpack.c.bf16 %v2133_v48, %v2131_v57  ;;  %v1949_v45 = vsub.f32 0.0, %v1821_v8  ;;  %v1438_v41 = vmul.f32 %v4479_v12, %v1374_v31  ;;  %v1247_v20 = vadd.f32 -0.28449672, %v1183_v36 }
 0x22b   :  { %v4629_v25 = vmul.f32 0.70710677, %v4608_v35  ;;  %2597 = vst [vmem:[#allocation11 + $0x28] sm:$0xff] %v2565_v56  ;;  %v4632_v34 = vadd.f32 %v393_v27, %v3335_v59  ;;  %v4635_v33 = vadd.f32 %v482_v32, %v3347_v14  ;;  %v918_v49 = vmul.f32 1.0614054, %v4410_v17 }
 0x22c   :  { %2461 = vmatmul.bf16.gmra.mxu3 %v2175_v40  ;;  %v920_v4 = vmul.f32 1.0614054, %v4488_v53  ;;  %v4640_v22 = vmul.f32 %v2076_v13, %v4483_v0  ;;  %v1120_v12 = vadd.f32 1.4214138, %v1056_v55  ;;  %v993_v3 = vadd.f32 -1.4531521, %v929_v60 }
 0x22d   :  { %v919_v37 = vmul.f32 1.0614054, %v4419_v24  ;;  %v3112_v63 = vpop.eup %3111  ;;  %v1504_v50 = vsub.f32 0.0, %v4503_v5  ;;  %v802_v10 = vadd.f32 1.0, %v738_v1  ;;  %v4645_v39 = vmul.f32 0.70710677, %v4632_v34 }
 0x22e   :  { %v4648_v21 = vmul.f32 0.70710677, %v4635_v33  ;;  %v2013_v23 = vsel %vm1885_vm15, %v1949_v45, %v1821_v8  ;;  %v4653_v0 = vand.u32 2147483647, %v4629_v25  ;;  %v982_v26 = vadd.f32 -1.4531521, %v918_v49 }
 0x22f   :  { %v984_v30 = vadd.f32 -1.4531521, %v920_v4  ;;  %v4655_v29 = vpop.eup %3113  ;;  %v4657_v51 = vmul.f32 %v3112_v63, %v1438_v41  ;;  %v1311_v44 = vmul.f32 %v4528_v42, %v1247_v20  ;;  %v4661_v47 = vmul.f32 0.5, %v4510_v11  ;;  %v5002_v45 = vld [vmem:[#allocation17_spill] sm:$0xff] }
 0x230   :  { %v4664_v7 = vand.u32 2147483647, %v4645_v39  ;;  %v4667_v43 = vand.u32 2147483647, %v4648_v21  ;;  %v1046_v8 = vmul.f32 %v4410_v17, %v982_v26  ;;  %v983_v36 = vadd.f32 -1.4531521, %v919_v37 }
 0x231   :  { %v1048_v31 = vmul.f32 %v4488_v53, %v984_v30  ;;  %v1184_v57 = vmul.f32 %v4562_v9, %v1120_v12  ;;  %v1568_v48 = vmul.f32 %v1504_v50, %v4503_v5  ;;  %v1057_v13 = vmul.f32 %v4599_v46, %v993_v3 }
 0x232   :  { %v740_v11 = vmul.f32 0.3275911, %v4664_v7  ;;  %v1505_v55 = vsub.f32 0.0, %v4535_v6  ;;  %3115 = vrcp.f32 %v802_v10  ;;  %v739_v60 = vmul.f32 0.3275911, %v4653_v0 }
 0x233   :  { %v1110_v27 = vadd.f32 1.4214138, %v1046_v8  ;;  %v1822_v32 = vsub.f32 1.0, %v4657_v51  ;;  %v741_v1 = vmul.f32 0.3275911, %v4667_v43  ;;  %vm1886_vm0 = vcmp.lt.f32.partialorder %v5002_v45, 0.0 }
 0x234   :  { %v804_v40 = vadd.f32 1.0, %v740_v11  ;;  %v921_v56 = vmul.f32 1.0614054, %v4496_v2  ;;  %v1375_v5 = vadd.f32 0.2548296, %v1311_v44  ;;  %v1047_v49 = vmul.f32 %v4419_v24, %v983_v36 }
 0x235   :  { %v1112_v41 = vadd.f32 1.4214138, %v1048_v31  ;;  %v1174_v20 = vmul.f32 %v4410_v17, %v1110_v27  ;;  %v2077_v4 = vadd.f32 1.0, %v2013_v23  ;;  %v1248_v12 = vadd.f32 -0.28449672, %v1184_v57  ;;  %v2338_v57 = vpop.f32.mrf.mxu2 }
 0x236   :  { %v1121_v3 = vadd.f32 1.4214138, %v1057_v13  ;;  %3117 = vrcp.f32 %v804_v40  ;;  %v1686_v37 = vmul.f32 1.442695, %v1568_v48  ;;  %v803_v63 = vadd.f32 1.0, %v739_v60  ;;  %v2427_v13 = vpop.f32.mrf.mxu3 }
 0x237   :  { %v1176_v50 = vmul.f32 %v4488_v53, %v1112_v41  ;;  %v1238_v10 = vadd.f32 -0.28449672, %v1174_v20  ;;  %v1950_v26 = vsub.f32 0.0, %v1822_v32  ;;  %v1569_v30 = vmul.f32 %v1505_v55, %v4535_v6 }
 0x238   :  { %v805_v51 = vadd.f32 1.0, %v741_v1  ;;  %v985_v8 = vadd.f32 -1.4531521, %v921_v56  ;;  %v4685_v44 = vpop.eup %3115  ;;  %v1439_v31 = vmul.f32 %v4528_v42, %v1375_v5  ;;  %v1111_v36 = vadd.f32 1.4214138, %v1047_v49  ;;  %v5003_v56 = vld [vmem:[#allocation16_spill] sm:$0xff] }
 0x239   :  { %v1240_v11 = vadd.f32 -0.28449672, %v1176_v50  ;;  %v1302_v23 = vmul.f32 %v4410_v17, %v1238_v10  ;;  %v1312_v48 = vmul.f32 %v4562_v9, %v1248_v12  ;;  %v1185_v60 = vmul.f32 %v4599_v46, %v1121_v3 }
 0x23a   :  { %v1049_v27 = vmul.f32 %v4496_v2, %v985_v8  ;;  %v2428_v40 = vadd.f32 %v2427_v13, %v2338_v57  ;;  %3119 = vrcp.f32 %v803_v63  ;;  %v1175_v1 = vmul.f32 %v4419_v24, %v1111_v36  ;;  %v5004_v63 = vld [vmem:[#allocation19_spill] sm:$0xff] }
 0x23b   :  { %v1304_v6 = vmul.f32 %v4488_v53, %v1240_v11  ;;  %v1366_v55 = vadd.f32 0.2548296, %v1302_v23  ;;  %vm1878_vm1 = vcmp.lt.f32.partialorder %v5003_v56, 0.0  ;;  %v930_v5 = vmul.f32 1.0614054, %v4685_v44  ;;  %v5005_v36 = vld [vmem:[#allocation31_spill] sm:$0xff] }
 0x23c   :  { %v4694_v42 = vpop.eup %3117  ;;  %3121 = vrcp.f32 %v805_v51  ;;  %v1113_v41 = vadd.f32 1.4214138, %v1049_v27  ;;  %v2566_v20 = vadd.f32 %v4624_v15, %v2428_v40  ;;  %v1239_v3 = vadd.f32 -0.28449672, %v1175_v1 }
 0x23d   :  { %3123 = vpow2.f32 %v1686_v37  ;;  %v1368_v49 = vadd.f32 0.2548296, %v1304_v6  ;;  %v1430_v12 = vmul.f32 %v4410_v17, %v1366_v55  ;;  %vm1880_vm2 = vcmp.lt.f32.partialorder %v5004_v63, 0.0 }
 0x23e   :  { %v2014_v50 = vsel %vm1886_vm0, %v1950_v26, %v1822_v32  ;;  %v1376_v10 = vadd.f32 0.2548296, %v1312_v48  ;;  %v1249_v8 = vadd.f32 -0.28449672, %v1185_v60  ;;  %v1177_v11 = vmul.f32 %v4496_v2, %v1113_v41  ;;  %2598 = vst [vmem:[#allocation11 + $0x30] sm:$0xff] %v2566_v20  ;;  %v5006_v60 = vld [vmem:[#allocation35_spill] sm:$0xff] }
 0x23f   :  { %v932_v23 = vmul.f32 1.0614054, %v4694_v42  ;;  %v1432_v51 = vmul.f32 %v4488_v53, %v1368_v49  ;;  %v1750_v57 = vmul.f32 %v5005_v36, %v1430_v12  ;;  %v1303_v37 = vmul.f32 %v4419_v24, %v1239_v3 }
 0x240   :  { %v4709_v17 = vmul.f32 %v2077_v4, %v4491_v52  ;;  %v1759_v13 = vmul.f32 %v4655_v29, %v1439_v31  ;;  %v994_v45 = vadd.f32 -1.4531521, %v930_v5  ;;  %v1241_v32 = vadd.f32 -0.28449672, %v1177_v11  ;;  %v4712_v26 = vpop.eup %3119  ;;  %v5007_v29 = vld [vmem:[#allocation18_spill] sm:$0xff]  ;;  %v5008_v31 = vld [vmem:[#allocation33_spill] sm:$0xff] }
 0x241   :  { %v1688_v48 = vmul.f32 1.442695, %v1569_v30  ;;  %v1752_v27 = vmul.f32 %v5006_v60, %v1432_v51  ;;  %v1814_v40 = vsub.f32 1.0, %v1750_v57  ;;  %v1367_v6 = vadd.f32 0.2548296, %v1303_v37  ;;  %v5009_v51 = vld [vmem:[#allocation32_spill] sm:$0xff]  ;;  %v396_v57 = vpop.f32.mrf.mxu0 }
 0x242   :  { %v4715_v53 = vpop.eup %3121  ;;  %v2078_v55 = vadd.f32 1.0, %v2014_v50  ;;  %v1440_v1 = vmul.f32 %v4562_v9, %v1376_v10  ;;  %v1313_v41 = vmul.f32 %v4599_v46, %v1249_v8  ;;  %v1305_v52 = vmul.f32 %v4496_v2, %v1241_v32  ;;  %v2429_v32 = vpop.f32.mrf.mxu3 }
 0x243   :  { %v3124_v4 = vpop.eup %3123  ;;  %vm1879_vm3 = vcmp.lt.f32.partialorder %v5007_v29, 0.0  ;;  %vm1887_vm4 = vcmp.lt.f32.partialorder %v5008_v31, 0.0  ;;  %v996_v5 = vadd.f32 -1.4531521, %v932_v23  ;;  %v1816_v30 = vsub.f32 1.0, %v1752_v27  ;;  %v5010_v23 = vld [vmem:[#allocation27_spill] sm:$0xff] }
 0x244   :  { %v1942_v20 = vsub.f32 0.0, %v1814_v40  ;;  %v1431_v49 = vmul.f32 %v4419_v24, %v1367_v6  ;;  %v1823_v12 = vsub.f32 1.0, %v1759_v13  ;;  %v1058_v3 = vmul.f32 %v4685_v44, %v994_v45  ;;  %v2340_v45 = vpop.f32.mrf.mxu2 }
 0x245   :  { %v931_v50 = vmul.f32 1.0614054, %v4712_v26  ;;  %v1369_v9 = vadd.f32 0.2548296, %v1305_v52  ;;  %v933_v10 = vmul.f32 1.0614054, %v4715_v53  ;;  %v4730_v37 = vmul.f32 %v3124_v4, %v1440_v1 }
 0x246   :  { %v1944_v8 = vsub.f32 0.0, %v1816_v30  ;;  %v2006_v11 = vsel %vm1878_vm1, %v1942_v20, %v1814_v40  ;;  %v1751_v36 = vmul.f32 %v5009_v51, %v1431_v49  ;;  %vm1881_vm5 = vcmp.lt.f32.partialorder %v5010_v23, 0.0  ;;  %v5011_v49 = vld [vmem:[#allocation22_spill] sm:$0xff]  ;;  %v5012_v51 = vld [vmem:[#allocation25_spill] sm:$0xff] }
 0x247   :  { %v1377_v24 = vadd.f32 0.2548296, %v1313_v41  ;;  %3125 = vpow2.f32 %v1688_v48  ;;  %v2070_v13 = vadd.f32 1.0, %v2006_v11  ;;  %v1060_v60 = vmul.f32 %v4694_v42, %v996_v5  ;;  %v5013_v5 = vld [vmem:[#allocation28_spill] sm:$0xff]  ;;  %v5016_v23 = vld [vmem:[#allocation34_spill] sm:$0xff] }
 0x248   :  { %v2008_v27 = vsel %vm1880_vm2, %v1944_v8, %v1816_v30  ;;  %v1433_v56 = vmul.f32 %v4496_v2, %v1369_v9  ;;  %v1815_v40 = vsub.f32 1.0, %v1751_v36  ;;  %v4737_v6 = vmul.f32 %v2078_v55, %v4584_v38  ;;  %v5014_v30 = vld [vmem:[#allocation30_spill] sm:$0xff] }
 0x249   :  { %v1951_v52 = vsub.f32 0.0, %v1823_v12  ;;  %v1122_v20 = vadd.f32 1.4214138, %v1058_v3  ;;  %v2072_v1 = vadd.f32 1.0, %v2008_v27  ;;  %v1506_v41 = vsub.f32 0.0, %v4603_v62 }
 0x24a   :  { %v995_v48 = vadd.f32 -1.4531521, %v931_v50  ;;  %v997_v4 = vadd.f32 -1.4531521, %v933_v10  ;;  %v1753_v11 = vmul.f32 %v5011_v49, %v1433_v56  ;;  %vm1888_vm6 = vcmp.lt.f32.partialorder %v5012_v51, 0.0  ;;  %v485_v50 = vpop.f32.mrf.mxu1 }
 0x24b   :  { %v2134_v63 = vmul.f32 %v2070_v13, %v5013_v5  ;;  %v2136_v8 = vmul.f32 %v2072_v1, %v5014_v30  ;;  %v1943_v2 = vsub.f32 0.0, %v1815_v40  ;;  %v4745_v9 = vadd.f32 %v396_v57, %v3335_v59 }
 0x24c   :  { %v1824_v38 = vsub.f32 1.0, %v4730_v37  ;;  %v1441_v55 = vmul.f32 %v4599_v46, %v1377_v24  ;;  %v1124_v3 = vadd.f32 1.4214138, %v1060_v60  ;;  %v1817_v36 = vsub.f32 1.0, %v1753_v11 }
 0x24d   :  { %v3126_v10 = vpop.eup %3125  ;;  %v2015_v27 = vsel %vm1887_vm4, %v1951_v52, %v1823_v12  ;;  %v1186_v56 = vmul.f32 %v4685_v44, %v1122_v20  ;;  %v2176_v13 = vpack.c.bf16 %v2136_v8, %v2134_v63  ;;  %v2007_v1 = vsel %vm1879_vm3, %v1943_v2, %v1815_v40  ;;  %v2343_v52 = vpop.f32.mrf.mxu2 }
 0x24e   :  { %v1570_v57 = vmul.f32 %v1506_v41, %v4603_v62  ;;  %v1059_v49 = vmul.f32 %v4712_v26, %v995_v48  ;;  %v1061_v37 = vmul.f32 %v4715_v53, %v997_v4  ;;  %v1945_v46 = vsub.f32 0.0, %v1817_v36  ;;  %v2432_v20 = vpop.f32.mrf.mxu3  ;;  %v398_v63 = vpop.f32.mrf.mxu0 }
 0x24f   :  { %2377 = vmatmul.bf16.gmra.mxu2 %v2176_v13  ;;  %v2071_v24 = vadd.f32 1.0, %v2007_v1  ;;  %v4758_v60 = vmul.f32 0.70710677, %v4745_v9  ;;  %v4761_v31 = vadd.f32 %v485_v50, %v3347_v14  ;;  %v2430_v12 = vadd.f32 %v2429_v32, %v2340_v45 }
 0x250   :  { %v1952_v29 = vsub.f32 0.0, %v1824_v38  ;;  %v4763_v40 = vmul.f32 %v3126_v10, %v1441_v55  ;;  %v1188_v62 = vmul.f32 %v4694_v42, %v1124_v3  ;;  %v2009_v41 = vsel %vm1881_vm5, %v1945_v46, %v1817_v36  ;;  %v5015_v55 = vld [vmem:[#allocation29_spill] sm:$0xff] }
 0x251   :  { %v1250_v48 = vadd.f32 -0.28449672, %v1186_v56  ;;  %v1508_v4 = vsub.f32 0.0, %v4664_v7  ;;  %v2073_v11 = vadd.f32 1.0, %v2009_v41  ;;  %v4770_v5 = vand.u32 2147483647, %v4758_v60 }
 0x252   :  { %v1690_v30 = vmul.f32 1.442695, %v1570_v57  ;;  %v1123_v45 = vadd.f32 1.4214138, %v1059_v49  ;;  %v4773_v32 = vmul.f32 0.70710677, %v4761_v31  ;;  %v2567_v8 = vadd.f32 %v4624_v15, %v2430_v12 }
 0x253   :  { %v1125_v2 = vadd.f32 1.4214138, %v1061_v37  ;;  %v2135_v3 = vmul.f32 %v2071_v24, %v5015_v55  ;;  %v2137_v36 = vmul.f32 %v2073_v11, %v5016_v23  ;;  %v742_v50 = vmul.f32 0.3275911, %v4770_v5 }
 0x254   :  { %v2016_v10 = vsel %vm1888_vm6, %v1952_v29, %v1824_v38  ;;  %v1252_v56 = vadd.f32 -0.28449672, %v1188_v62  ;;  %v4782_v13 = vand.u32 2147483647, %v4773_v32  ;;  %2599 = vst [vmem:[#allocation11 + $0x38] sm:$0xff] %v2567_v8  ;;  %v4785_v1 = vadd.f32 %v398_v63, %v3335_v59  ;;  %v487_v29 = vpop.f32.mrf.mxu1 }
 0x255   :  { %v1314_v57 = vmul.f32 %v4685_v44, %v1250_v48  ;;  %v1572_v49 = vmul.f32 %v1508_v4, %v4664_v7  ;;  %v2177_v37 = vpack.c.bf16 %v2137_v36, %v2135_v3  ;;  %v806_v46 = vadd.f32 1.0, %v742_v50  ;;  %v2345_v7 = vpop.f32.mrf.mxu2 }
 0x256   :  { %v4789_v24 = vadd.f32 1.0, %v2015_v27  ;;  %v1825_v12 = vsub.f32 1.0, %v4763_v40  ;;  %vm1889_vm7 = vcmp.lt.f32.partialorder %v4519_v28, 0.0  ;;  %v1187_v51 = vmul.f32 %v4712_v26, %v1123_v45  ;;  %v2434_v27 = vpop.f32.mrf.mxu3 }
 0x257   :  { %v743_v38 = vmul.f32 0.3275911, %v4782_v13  ;;  %v4795_v62 = vadd.f32 1.0, %v2016_v10  ;;  %v1507_v59 = vsub.f32 0.0, %v4653_v0  ;;  %v1189_v41 = vmul.f32 %v4715_v53, %v1125_v2  ;;  %2466 = vmatmul.bf16.gmra.mxu3 %v2177_v37 }
 0x258   :  { %3127 = vrcp.f32 %v806_v46  ;;  %v1316_v48 = vmul.f32 %v4694_v42, %v1252_v56  ;;  %v1509_v40 = vsub.f32 0.0, %v4667_v43  ;;  %v4802_v11 = vmul.f32 0.70710677, %v4785_v1 }
 0x259   :  { %v807_v4 = vadd.f32 1.0, %v743_v38  ;;  %v1378_v63 = vadd.f32 0.2548296, %v1314_v57  ;;  %3129 = vpow2.f32 %v1690_v30  ;;  %v1694_v45 = vmul.f32 1.442695, %v1572_v49 }
 0x25a   :  { %v4805_v8 = vadd.f32 %v487_v29, %v3347_v14  ;;  %v1953_v55 = vsub.f32 0.0, %v1825_v12  ;;  %v1251_v2 = vadd.f32 -0.28449672, %v1187_v51  ;;  %v4808_v3 = vand.u32 2147483647, %v4802_v11 }
 0x25b   :  { %3131 = vrcp.f32 %v807_v4  ;;  %v1571_v23 = vmul.f32 %v1507_v59, %v4653_v0  ;;  %v1253_v36 = vadd.f32 -0.28449672, %v1189_v41  ;;  %v2178_v10 = vpack.c.bf16 %v4640_v22, %v4552_v54 }
 0x25c   :  { %v4812_v50 = vmul.f32 0.70710677, %v4805_v8  ;;  %v1380_v30 = vadd.f32 0.2548296, %v1316_v48  ;;  %v1573_v56 = vmul.f32 %v1509_v40, %v4667_v43  ;;  %v744_v14 = vmul.f32 0.3275911, %v4808_v3 }
 0x25d   :  { %v2433_v57 = vadd.f32 %v2432_v20, %v2343_v52  ;;  %v1442_v37 = vmul.f32 %v4685_v44, %v1378_v63  ;;  %3133 = vpow2.f32 %v1694_v45  ;;  %v2435_v46 = vadd.f32 %v2434_v27, %v2345_v7  ;;  %v2348_v59 = vpop.f32.mrf.mxu2 }
 0x25e   :  { %v4818_v49 = vpop.eup %3127  ;;  %v4822_v0 = vand.u32 2147483647, %v4812_v50  ;;  %v1315_v51 = vmul.f32 %v4712_v26, %v1251_v2  ;;  %v808_v54 = vadd.f32 1.0, %v744_v14  ;;  %v2017_v52 = vsel %vm1889_vm7, %v1953_v55, %v1825_v12  ;;  %v2437_v41 = vpop.f32.mrf.mxu3 }
 0x25f   :  { %v934_v38 = vmul.f32 1.0614054, %v4818_v49  ;;  %v2568_v22 = vadd.f32 %v4624_v15, %v2433_v57  ;;  %v3130_v43 = vpop.eup %3129  ;;  %v1317_v20 = vmul.f32 %v4715_v53, %v1253_v36  ;;  %2382 = vmatmul.bf16.gmra.mxu2 %v2178_v10  ;;  %v2569_v29 = vadd.f32 %v4624_v15, %v2435_v46 }
 0x260   :  { %v745_v44 = vmul.f32 0.3275911, %v4822_v0  ;;  %v1444_v27 = vmul.f32 %v4694_v42, %v1380_v30  ;;  %3135 = vrcp.f32 %v808_v54  ;;  %v2438_v40 = vadd.f32 %v2437_v41, %v2348_v59 }
 0x261   :  { %v4832_v7 = vpop.eup %3131  ;;  %v998_v48 = vadd.f32 -1.4531521, %v934_v38  ;;  %2600 = vst [vmem:[#allocation11 + $0x40] sm:$0xff] %v2568_v22  ;;  %v4835_v4 = vmul.f32 %v3130_v43, %v1442_v37  ;;  %v1696_v28 = vmul.f32 1.442695, %v1573_v56  ;;  %v1510_v42 = vsub.f32 0.0, %v4770_v5 }
 0x262   :  { %v935_v12 = vmul.f32 1.0614054, %v4832_v7  ;;  %v809_v63 = vadd.f32 1.0, %v745_v44  ;;  %2601 = vst [vmem:[#allocation11 + $0x48] sm:$0xff] %v2569_v29  ;;  %v1379_v45 = vadd.f32 0.2548296, %v1315_v51  ;;  %v2570_v36 = vadd.f32 %v4624_v15, %v2438_v40 }
 0x263   :  { %v1692_v55 = vmul.f32 1.442695, %v1571_v23  ;;  %v1062_v2 = vmul.f32 %v4818_v49, %v998_v48  ;;  %v3134_v10 = vpop.eup %3133  ;;  %v2179_v14 = vpack.c.bf16 %v4709_v17, %v4611_v61  ;;  %v4845_v56 = vmul.f32 %v4789_v24, %v4591_v16 }
 0x264   :  { %v999_v30 = vadd.f32 -1.4531521, %v935_v12  ;;  %3137 = vrcp.f32 %v809_v63  ;;  %v1764_v57 = vmul.f32 %v3134_v10, %v1444_v27  ;;  %v1381_v37 = vadd.f32 0.2548296, %v1317_v20  ;;  %2602 = vst [vmem:[#allocation11 + $0x50] sm:$0xff] %v2570_v36 }
 0x265   :  { %v1126_v46 = vadd.f32 1.4214138, %v1062_v2  ;;  %v1826_v23 = vsub.f32 1.0, %v4835_v4  ;;  %3139 = vpow2.f32 %v1696_v28  ;;  %v1512_v38 = vsub.f32 0.0, %v4808_v3  ;;  %v2350_v44 = vpop.f32.mrf.mxu2 }
 0x266   :  { %v1063_v51 = vmul.f32 %v4832_v7, %v999_v30  ;;  %v4850_v54 = vpop.eup %3135  ;;  %v2144_v61 = vmul.f32 %v4795_v62, %v4616_v58  ;;  %v2081_v17 = vadd.f32 1.0, %v2017_v52  ;;  %vm1890_vm8 = vcmp.lt.f32.partialorder %v4588_v18, 0.0  ;;  %v2439_v29 = vpop.f32.mrf.mxu3 }
 0x267   :  { %3141 = vpow2.f32 %v1692_v55  ;;  %v1190_v16 = vmul.f32 %v4818_v49, %v1126_v46  ;;  %v1443_v24 = vmul.f32 %v4712_v26, %v1379_v45  ;;  %v1574_v22 = vmul.f32 %v1510_v42, %v4770_v5  ;;  %2471 = vmatmul.bf16.gmra.mxu3 %v2179_v14 }
 0x268   :  { %v1127_v43 = vadd.f32 1.4214138, %v1063_v51  ;;  %v936_v20 = vmul.f32 1.0614054, %v4850_v54  ;;  %v1828_v59 = vsub.f32 1.0, %v1764_v57  ;;  %v1445_v41 = vmul.f32 %v4715_v53, %v1381_v37 }
 0x269   :  { %v1254_v58 = vadd.f32 -0.28449672, %v1190_v16  ;;  %v2440_v62 = vadd.f32 %v2439_v29, %v2350_v44  ;;  %v1954_v27 = vsub.f32 0.0, %v1826_v23  ;;  %v1576_v40 = vmul.f32 %v1512_v38, %v4808_v3 }
 0x26a   :  { %v4860_v52 = vpop.eup %3137  ;;  %v1000_v48 = vadd.f32 -1.4531521, %v936_v20  ;;  %v1513_v26 = vsub.f32 0.0, %v4822_v0  ;;  %v1191_v4 = vmul.f32 %v4832_v7, %v1127_v43  ;;  %v1698_v53 = vmul.f32 1.442695, %v1574_v22 }
 0x26b   :  { %v1318_v5 = vmul.f32 %v4818_v49, %v1254_v58  ;;  %v937_v28 = vmul.f32 1.0614054, %v4860_v52  ;;  %v2571_v12 = vadd.f32 %v4624_v15, %v2440_v62  ;;  %v3140_v63 = vpop.eup %3139  ;;  %v1511_v45 = vsub.f32 0.0, %v4782_v13 }
 0x26c   :  { %v1064_v55 = vmul.f32 %v4850_v54, %v1000_v48  ;;  %v2180_v2 = vpack.c.bf16 %v2144_v61, %v4737_v6  ;;  %v2145_v3 = vmul.f32 %v2081_v17, %v4661_v47  ;;  %v1956_v10 = vsub.f32 0.0, %v1828_v59 }
 0x26d   :  { %v3142_v36 = vpop.eup %3141  ;;  %v1765_v42 = vmul.f32 %v3140_v63, %v1445_v41  ;;  %v1001_v30 = vadd.f32 -1.4531521, %v937_v28  ;;  %2603 = vst [vmem:[#allocation11 + $0x58] sm:$0xff] %v2571_v12  ;;  %v1702_v37 = vmul.f32 1.442695, %v1576_v40  ;;  %v1577_v46 = vmul.f32 %v1513_v26, %v4822_v0  ;;  %v2353_v17 = vpop.f32.mrf.mxu2 }
 0x26e   :  { %v1763_v14 = vmul.f32 %v3142_v36, %v1443_v24  ;;  %v1128_v57 = vadd.f32 1.4214138, %v1064_v55  ;;  %vm1892_vm9 = vcmp.lt.f32.partialorder %v4645_v39, 0.0  ;;  %v1382_v51 = vadd.f32 0.2548296, %v1318_v5  ;;  %v2442_v24 = vpop.f32.mrf.mxu3 }
 0x26f   :  { %v1255_v38 = vadd.f32 -0.28449672, %v1191_v4  ;;  %v1065_v16 = vmul.f32 %v4860_v52, %v1001_v30  ;;  %v2018_v6 = vsel %vm1890_vm8, %v1954_v27, %v1826_v23  ;;  %3143 = vpow2.f32 %v1698_v53  ;;  %2387 = vmatmul.bf16.gmra.mxu2 %v2180_v2 }
 0x270   :  { %v1575_v47 = vmul.f32 %v1511_v45, %v4782_v13  ;;  %v1192_v61 = vmul.f32 %v4850_v54, %v1128_v57  ;;  %v2020_v22 = vsel %vm1892_vm9, %v1956_v10, %v1828_v59  ;;  %v1829_v43 = vsub.f32 1.0, %v1765_v42 }
 0x271   :  { %v1129_v0 = vadd.f32 1.4214138, %v1065_v16  ;;  %v2443_v20 = vadd.f32 %v2442_v24, %v2353_v17  ;;  %v1827_v39 = vsub.f32 1.0, %v1763_v14  ;;  %3145 = vpow2.f32 %v1702_v37 }
 0x272   :  { %v1256_v44 = vadd.f32 -0.28449672, %v1192_v61  ;;  %v1704_v29 = vmul.f32 1.442695, %v1577_v46  ;;  %v1446_v41 = vmul.f32 %v4818_v49, %v1382_v51  ;;  %v1319_v18 = vmul.f32 %v4832_v7, %v1255_v38 }
 0x273   :  { %v1193_v23 = vmul.f32 %v4860_v52, %v1129_v0  ;;  %v2572_v13 = vadd.f32 %v4624_v15, %v2443_v20  ;;  %v2084_v58 = vadd.f32 1.0, %v2020_v22  ;;  %v1700_v62 = vmul.f32 1.442695, %v1575_v47 }
 0x274   :  { %v1320_v27 = vmul.f32 %v4850_v54, %v1256_v44  ;;  %v2181_v59 = vpack.c.bf16 %v2145_v3, %v4845_v56  ;;  %v548_v48 = vmul.f32 0.5, %v4632_v34  ;;  %v1957_v40 = vsub.f32 0.0, %v1829_v43 }
 0x275   :  { %v1257_v26 = vadd.f32 -0.28449672, %v1193_v23  ;;  %2604 = vst [vmem:[#allocation11 + $0x60] sm:$0xff] %v2572_v13  ;;  %v3144_v5 = vpop.eup %3143  ;;  %v2082_v4 = vadd.f32 1.0, %v2018_v6  ;;  %v1955_v49 = vsub.f32 0.0, %v1827_v39  ;;  %3147 = vpow2.f32 %v1704_v29  ;;  %v2355_v56 = vpop.f32.mrf.mxu2 }
 0x276   :  { %v1384_v28 = vadd.f32 0.2548296, %v1320_v27  ;;  %v546_v12 = vmul.f32 0.5, %v4572_v19  ;;  %v1766_v63 = vmul.f32 %v3144_v5, %v1446_v41  ;;  %v1383_v53 = vadd.f32 0.2548296, %v1319_v18  ;;  %v2444_v36 = vpop.f32.mrf.mxu3 }
 0x277   :  { %v1321_v45 = vmul.f32 %v4860_v52, %v1257_v26  ;;  %v3146_v55 = vpop.eup %3145  ;;  %v2148_v2 = vmul.f32 %v2084_v58, %v548_v48  ;;  %vm1893_vm10 = vcmp.lt.f32.partialorder %v4648_v21, 0.0  ;;  %3149 = vpow2.f32 %v1700_v62  ;;  %2476 = vmatmul.bf16.gmra.mxu3 %v2181_v59 }
 0x278   :  { %v1448_v34 = vmul.f32 %v4850_v54, %v1384_v28  ;;  %vm1891_vm11 = vcmp.lt.f32.partialorder %v4629_v25, 0.0  ;;  %v2021_v3 = vsel %vm1893_vm10, %v1957_v40, %v1829_v43  ;;  %v2445_v42 = vadd.f32 %v2444_v36, %v2355_v56 }
 0x279   :  { %v1385_v10 = vadd.f32 0.2548296, %v1321_v45  ;;  %v2146_v19 = vmul.f32 %v2082_v4, %v546_v12  ;;  %v2019_v30 = vsel %vm1891_vm11, %v1955_v49, %v1827_v39  ;;  %v1830_v57 = vsub.f32 1.0, %v1766_v63 }
 0x27a   :  { %v1768_v14 = vmul.f32 %v3146_v55, %v1448_v34  ;;  %v1447_v37 = vmul.f32 %v4832_v7, %v1383_v53  ;;  %v2573_v21 = vadd.f32 %v4624_v15, %v2445_v42  ;;  %v2085_v54 = vadd.f32 1.0, %v2021_v3 }
 0x27b   :  { %v1449_v46 = vmul.f32 %v4860_v52, %v1385_v10  ;;  %v3148_v51 = vpop.eup %3147  ;;  %v2182_v16 = vpack.c.bf16 %v2148_v2, %v2146_v19  ;;  %v2083_v47 = vadd.f32 1.0, %v2019_v30  ;;  %v549_v61 = vmul.f32 0.5, %v4635_v33 }
 0x27c   :  { %v1832_v38 = vsub.f32 1.0, %v1768_v14  ;;  %2605 = vst [vmem:[#allocation11 + $0x68] sm:$0xff] %v2573_v21  ;;  %v1958_v24 = vsub.f32 0.0, %v1830_v57  ;;  %v547_v43 = vmul.f32 0.5, %v4608_v35  ;;  %vm1896_vm12 = vcmp.lt.f32.partialorder %v4802_v11, 0.0 }
 0x27d   :  { %v1769_v6 = vmul.f32 %v3148_v51, %v1449_v46  ;;  %v3150_v25 = vpop.eup %3149  ;;  %v2149_v7 = vmul.f32 %v2085_v54, %v549_v61  ;;  %v2358_v52 = vpop.f32.mrf.mxu2  ;;  %vm1894_vm13 = vcmp.lt.f32.partialorder %v4758_v60, 0.0  ;;  %v552_v11 = vmul.f32 0.5, %v4785_v1 }
 0x27e   :  { %v1960_v17 = vsub.f32 0.0, %v1832_v38  ;;  %v1767_v22 = vmul.f32 %v3150_v25, %v1447_v37  ;;  %v2447_v0 = vpop.f32.mrf.mxu3  ;;  %v2147_v29 = vmul.f32 %v2083_v47, %v547_v43  ;;  %v2022_v41 = vsel %vm1894_vm13, %v1958_v24, %v1830_v57 }
 0x27f   :  { %2392 = vmatmul.bf16.gmra.mxu2 %v2182_v16  ;;  %v1833_v39 = vsub.f32 1.0, %v1769_v6  ;;  %v2448_v44 = vadd.f32 %v2447_v0, %v2358_v52  ;;  %v2086_v35 = vadd.f32 1.0, %v2022_v41  ;;  %v550_v27 = vmul.f32 0.5, %v4745_v9 }
 0x280   :  { %v2024_v20 = vsel %vm1896_vm12, %v1960_v17, %v1832_v38  ;;  %v1831_v18 = vsub.f32 1.0, %v1767_v22  ;;  %v2183_v13 = vpack.c.bf16 %v2149_v7, %v2147_v29  ;;  %vm1897_vm14 = vcmp.lt.f32.partialorder %v4812_v50, 0.0 }
 0x281   :  { %v2574_v33 = vadd.f32 %v4624_v15, %v2448_v44  ;;  %v2088_v23 = vadd.f32 1.0, %v2024_v20  ;;  %v1961_v58 = vsub.f32 0.0, %v1833_v39  ;;  %v2150_v5 = vmul.f32 %v2086_v35, %v550_v27 }
 0x282   :  { %v1959_v62 = vsub.f32 0.0, %v1831_v18  ;;  %vm1895_vm15 = vcmp.lt.f32.partialorder %v4773_v32, 0.0  ;;  %v553_v9 = vmul.f32 0.5, %v4805_v8  ;;  %v551_v63 = vmul.f32 0.5, %v4761_v31 }
 0x283   :  { %2606 = vst [vmem:[#allocation11 + $0x70] sm:$0xff] %v2574_v33  ;;  %v2152_v59 = vmul.f32 %v2088_v23, %v552_v11  ;;  %v2025_v40 = vsel %vm1897_vm14, %v1961_v58, %v1833_v39 }
 0x284   :  { %v2023_v4 = vsel %vm1895_vm15, %v1959_v62, %v1831_v18  ;;  %v2089_v28 = vadd.f32 1.0, %v2025_v40 }
 0x285   :  { %v2360_v48 = vpop.f32.mrf.mxu2  ;;  %v2184_v12 = vpack.c.bf16 %v2152_v59, %v2150_v5  ;;  %v2087_v1 = vadd.f32 1.0, %v2023_v4 }
 0x286   :  { %v2449_v60 = vpop.f32.mrf.mxu3  ;;  %v2153_v50 = vmul.f32 %v2089_v28, %v553_v9 }
 0x287   :  { %2481 = vmatmul.bf16.gmra.mxu3 %v2183_v13  ;;  %v2450_v26 = vadd.f32 %v2449_v60, %v2360_v48  ;;  %v2151_v2 = vmul.f32 %v2087_v1, %v551_v63 }
 0x289   :  { %v2575_v49 = vadd.f32 %v4624_v15, %v2450_v26  ;;  %v2185_v32 = vpack.c.bf16 %v2153_v50, %v2151_v2 }
 0x28b   :  { %2607 = vst [vmem:[#allocation11 + $0x78] sm:$0xff] %v2575_v49 }
 0x28d   :  { %v2363_v53 = vpop.f32.mrf.mxu2 }
 0x28e   :  { %v2452_v45 = vpop.f32.mrf.mxu3 }
 0x28f   :  { %2397 = vmatmul.bf16.gmra.mxu2 %v2184_v12  ;;  %v2453_v55 = vadd.f32 %v2452_v45, %v2363_v53 }
 0x291   :  { %v2576_v34 = vadd.f32 %v4624_v15, %v2453_v55  ;;  %v3152_v55 = vld [vmem:[%s4934_s4] ss:$0 sm:$0xff] }
 0x293   :  { %2608 = vst [vmem:[#allocation11 + $0x80] sm:$0xff] %v2576_v34 }
 0x295   :  { %v2365_v56 = vpop.f32.mrf.mxu2 }
 0x296   :  { %v2454_v36 = vpop.f32.mrf.mxu3 }
 0x297   :  { %2486 = vmatmul.bf16.gmra.mxu3 %v2185_v32  ;;  %v2455_v3 = vadd.f32 %v2454_v36, %v2365_v56 }
 0x299   :  { %v2577_v10 = vadd.f32 %v4624_v15, %v2455_v3 }
 0x29b   :  { %2609 = vst [vmem:[#allocation11 + $0x88] sm:$0xff] %v2577_v10 }
 0x29d   :  { %v2368_v8 = vpop.f32.mrf.mxu2 }
 0x29e   :  { %v2457_v42 = vpop.f32.mrf.mxu3 }
 0x29f   :  { %v2458_v31 = vadd.f32 %v2457_v42, %v2368_v8 }
 0x2a1   :  { %v2578_v19 = vadd.f32 %v4624_v15, %v2458_v31 }
 0x2a3   :  { %2610 = vst [vmem:[#allocation11 + $0x90] sm:$0xff] %v2578_v19 }
 0x2a5   :  { %v2370_v30 = vpop.f32.mrf.mxu2 }
 0x2a6   :  { %v2459_v14 = vpop.f32.mrf.mxu3 }
 0x2a7   :  { %v2460_v57 = vadd.f32 %v2459_v14, %v2370_v30 }
 0x2a9   :  { %v2579_v37 = vadd.f32 %v4624_v15, %v2460_v57 }
 0x2ab   :  { %2611 = vst [vmem:[#allocation11 + $0x98] sm:$0xff] %v2579_v37 }
 0x2ad   :  { %v2373_v46 = vpop.f32.mrf.mxu2 }
 0x2af   :  { %v2462_v21 = vpop.f32.mrf.mxu3 }
 0x2b0   :  { %v2463_v51 = vadd.f32 %v2462_v21, %v2373_v46 }
 0x2b2   :  { %v2580_v54 = vadd.f32 %v4624_v15, %v2463_v51 }
 0x2b4   :  { %2612 = vst [vmem:[#allocation11 + $0xa0] sm:$0xff] %v2580_v54 }
 0x2b5   :  { %v2375_v38 = vpop.f32.mrf.mxu2 }
 0x2b7   :  { %v2464_v16 = vpop.f32.mrf.mxu3 }
 0x2b8   :  { %v2465_v6 = vadd.f32 %v2464_v16, %v2375_v38 }
 0x2ba   :  { %v2581_v25 = vadd.f32 %v4624_v15, %v2465_v6 }
 0x2bc   :  { %2613 = vst [vmem:[#allocation11 + $0xa8] sm:$0xff] %v2581_v25 }
 0x2d2   :  { %v2378_v47 = vpop.f32.mrf.mxu2 }
 0x2da   :  { %v2467_v61 = vpop.f32.mrf.mxu3  ;;  %v2380_v17 = vpop.f32.mrf.mxu2 }
 0x2db   :  { %v2468_v24 = vadd.f32 %v2467_v61, %v2378_v47 }
 0x2dd   :  { %v2582_v22 = vadd.f32 %v4624_v15, %v2468_v24 }
 0x2df   :  { %2614 = vst [vmem:[#allocation11 + $0xb0] sm:$0xff] %v2582_v22 }
 0x2e2   :  { %v2469_v43 = vpop.f32.mrf.mxu3  ;;  %v2383_v7 = vpop.f32.mrf.mxu2 }
 0x2e3   :  { %v2470_v52 = vadd.f32 %v2469_v43, %v2380_v17 }
 0x2e5   :  { %v2583_v0 = vadd.f32 %v4624_v15, %v2470_v52 }
 0x2e7   :  { %2615 = vst [vmem:[#allocation11 + $0xb8] sm:$0xff] %v2583_v0 }
 0x2ea   :  { %v2472_v20 = vpop.f32.mrf.mxu3  ;;  %v2385_v39 = vpop.f32.mrf.mxu2 }
 0x2eb   :  { %v2473_v44 = vadd.f32 %v2472_v20, %v2383_v7 }
 0x2ed   :  { %v2584_v29 = vadd.f32 %v4624_v15, %v2473_v44 }
 0x2ef   :  { %2616 = vst [vmem:[#allocation11 + $0xc0] sm:$0xff] %v2584_v29 }
 0x2f2   :  { %v2474_v41 = vpop.f32.mrf.mxu3  ;;  %v2388_v18 = vpop.f32.mrf.mxu2 }
 0x2f3   :  { %v2475_v33 = vadd.f32 %v2474_v41, %v2385_v39 }
 0x2f5   :  { %v2585_v23 = vadd.f32 %v4624_v15, %v2475_v33 }
 0x2f7   :  { %2617 = vst [vmem:[#allocation11 + $0xc8] sm:$0xff] %v2585_v23 }
 0x2fa   :  { %v2477_v13 = vpop.f32.mrf.mxu3  ;;  %v2390_v58 = vpop.f32.mrf.mxu2 }
 0x2fb   :  { %v2478_v35 = vadd.f32 %v2477_v13, %v2388_v18 }
 0x2fd   :  { %v2586_v11 = vadd.f32 %v4624_v15, %v2478_v35 }
 0x2ff   :  { %2618 = vst [vmem:[#allocation11 + $0xd0] sm:$0xff] %v2586_v11 }
 0x302   :  { %v2479_v62 = vpop.f32.mrf.mxu3  ;;  %v2393_v27 = vpop.f32.mrf.mxu2 }
 0x303   :  { %v2480_v59 = vadd.f32 %v2479_v62, %v2390_v58 }
 0x305   :  { %v2587_v48 = vadd.f32 %v4624_v15, %v2480_v59 }
 0x307   :  { %2619 = vst [vmem:[#allocation11 + $0xd8] sm:$0xff] %v2587_v48 }
 0x30a   :  { %v2482_v60 = vpop.f32.mrf.mxu3  ;;  %v2395_v26 = vpop.f32.mrf.mxu2 }
 0x30b   :  { %v2483_v40 = vadd.f32 %v2482_v60, %v2393_v27 }
 0x30d   :  { %v2588_v5 = vadd.f32 %v4624_v15, %v2483_v40 }
 0x30f   :  { %2620 = vst [vmem:[#allocation11 + $0xe0] sm:$0xff] %v2588_v5 }
 0x312   :  { %v2484_v4 = vpop.f32.mrf.mxu3  ;;  %v2398_v12 = vpop.f32.mrf.mxu2 }
 0x313   :  { %v2485_v49 = vadd.f32 %v2484_v4, %v2395_v26 }
 0x315   :  { %v2589_v28 = vadd.f32 %v4624_v15, %v2485_v49 }
 0x317   :  { %2621 = vst [vmem:[#allocation11 + $0xe8] sm:$0xff] %v2589_v28 }
 0x31a   :  { %v2487_v1 = vpop.f32.mrf.mxu3  ;;  %v2400_v50 = vpop.f32.mrf.mxu2 }
 0x31b   :  { %v2488_v9 = vadd.f32 %v2487_v1, %v2398_v12 }
 0x31d   :  { %v2590_v63 = vadd.f32 %v4624_v15, %v2488_v9 }
 0x31f   :  { %2622 = vst [vmem:[#allocation11 + $0xf0] sm:$0xff] %v2590_v63 }
 0x322   :  { %v2489_v53 = vpop.f32.mrf.mxu3 }
 0x323   :  { %v2490_v45 = vadd.f32 %v2489_v53, %v2400_v50 }
 0x325   :  { %v2591_v2 = vadd.f32 %v3152_v55, %v2490_v45 }
 0x327   :  { %2623 = vst [vmem:[#allocation11 + $0xf8] sm:$0xff] %v2591_v2 }
 0x328   :  { %2636 = dma.vmem_to_hbm [thread:$0]  %s2629_s18, 4096, %s2631_s21, [#allocation5], %s3282_s26, %s3282_s26, %s3283_s27  }
 0x329   :  { %3279 = dma.done.wait [#allocation5], 4096  }
 0x32a   :  { %3280 = vsyncadd [#allocation5], 4294963200 }
 0x32b   :  { %2641 = vsyncpa [#allocation4], 1 }
 0x32c   :  { %2642 = vsyncpa [#allocation7], 1 }
 0x32d   :  { %2643 = vsyncpa [#allocation10], 1 }
 0x32e   :  { %2644 = vsyncpa [#allocation5], 1 }

// kernel: tpu_custom_call.1
= control target key start
LH: loop header
LB: loop body
LE: loop exit
PB: predicated region body
PF: predicated region fallthrough
CT: control target
= control target key end

     0   :  { %10 = vsyncpa [#allocation4], 0  ;;  %s4930_s0 = inlined_call_operand.hbm [shape: bf16[256,128], index: 0, kind: input, shape index: {}]   ;;  %s4931_s1 = inlined_call_operand.hbm [shape: bf16[128,256], index: 1, kind: input, shape index: {}]   ;;  %s4932_s2 = inlined_call_operand.hbm [shape: f32[1,256], index: 2, kind: input, shape index: {}]   ;;  %s4933_s3 = inlined_call_operand.hbm [shape: bf16[256,128], index: 3, kind: input, shape index: {}]   ;;  %s4934_s4 = inlined_call_operand.vmem [shape: f32[1,128], index: 4, kind: input, shape index: {}]   ;;  %s4935_s5 = inlined_call_operand.hbm [shape: f32[256,128], index: 5, kind: output, shape index: {}]  }
   0x1   :  { %11 = vsyncpa [#allocation7], 0 }
   0x2   :  { %12 = vsyncpa [#allocation10], 0  ;;  %s31_s20 = sshll.u32 %s4931_s1, 4  ;;  %s32_s20 = int_to_ptr.hbm [resolvable:$true] %s31_s20 }
   0x3   :  { %13 = vsyncpa [#allocation5], 0  ;;  %s3281_s21 = smov [#allocation6]   ;;  %s18_s25 = sshll.u32 %s4930_s0, 4  ;;  %s19_s25 = int_to_ptr.hbm [resolvable:$true] %s18_s25 }
   0x4   :  { %s33_s22 = sshll.u32 %s3281_s21, 4  ;;  %s3282_s26 = smov 128   ;;  %s34_s22 = int_to_ptr.vmem [resolvable:$true] %s33_s22 }
   0x5   :  { %s3283_s27 = smov 8   ;;  %s3284_s28 = smov [#allocation3]  }
   0x6   :  { %39 = dma.hbm_to_vmem [thread:$0]  %s32_s20, 2048, %s34_s22, [#allocation7], %s3282_s26, %s3282_s26, %s3283_s27  }
   0x7   :  { %s20_s29 = sshll.u32 %s3284_s28, 4  ;;  %s3285_s1 = smov 64   ;;  %s21_s29 = int_to_ptr.vmem [resolvable:$true] %s20_s29 }
   0x8   :  { %s3286_s30 = smov 4   ;;  %s45_s8 = sshll.u32 %s4932_s2, 4  ;;  %s46_s8 = int_to_ptr.hbm [resolvable:$true] %s45_s8 }
   0x9   :  { %26 = dma.hbm_to_vmem [thread:$0]  %s19_s25, 2048, %s21_s29, [#allocation4], %s3285_s1, %s3285_s1, %s3286_s30  }
   0xa   :  { %s3287_s9 = smov [#allocation8]   ;;  %s55_s12 = sshll.u32 %s4933_s3, 4  ;;  %s56_s12 = int_to_ptr.hbm [resolvable:$true] %s55_s12 }
   0xb   :  { %s47_s0 = sshll.u32 %s3287_s9, 4  ;;  %s3288_s13 = smov [#allocation9]   ;;  %s48_s0 = int_to_ptr.vmem [resolvable:$true] %s47_s0 }
   0xc   :  { %50 = dma.hbm_to_vmem [thread:$0]  %s46_s8, 32, %s48_s0, [#allocation7]  }
   0xd   :  { %s57_s14 = sshll.u32 %s3288_s13, 4  ;;  %s58_s14 = int_to_ptr.vmem [resolvable:$true] %s57_s14 }
   0xe   :  { %63 = dma.hbm_to_vmem [thread:$0]  %s56_s12, 2048, %s58_s14, [#allocation10], %s3285_s1, %s3285_s1, %s3286_s30  }
   0xf   :  { %3273 = dma.done.wait [#allocation4], 2048  }
  0x10   :  { %3274 = vsyncadd [#allocation4], 4294965248 }
  0x11   :  { %3275 = dma.done.wait [#allocation7], 2080  }
  0x12   :  { %3276 = vsyncadd [#allocation7], 4294965216 }
  0x13   :  { %3277 = dma.done.wait [#allocation10], 2048  }
  0x14   :  { %3278 = vsyncadd [#allocation10], 4294965248  ;;  %v2767_v0 = vld [vmem:[#allocation6 + $0x70] sm:$0xf]  ;;  %v2868_v1 = vld [vmem:[#allocation6 + $0x74] sm:$0xf0] }
  0x15   :  { %v2867_v2 = vld [vmem:[#allocation6 + $0x74] sm:$0xf]  ;;  %v2768_v3 = vor.u32 %v2868_v1, %v2767_v0  ;;  %v2769_v4 = vld [vmem:[#allocation6 + $0x78] sm:$0xf0]  ;;  %v2759_v5 = vld [vmem:[#allocation6 + $0x60] sm:$0xf] }
  0x16   :  { %v2866_v6 = vld [vmem:[#allocation6 + $0x64] sm:$0xf0]  ;;  %v2772_v7 = vor.u32 %v2867_v2, %v2769_v4  ;;  %v2865_v8 = vld [vmem:[#allocation6 + $0x64] sm:$0xf]  ;;  %v2761_v9 = vld [vmem:[#allocation6 + $0x68] sm:$0xf0] }
  0x17   :  { %312 = vmatpush.bf16.msra.mxu0 %v2768_v3  ;;  %v2760_v10 = vor.u32 %v2866_v6, %v2759_v5  ;;  %v2764_v11 = vor.u32 %v2865_v8, %v2761_v9  ;;  %v2751_v12 = vld [vmem:[#allocation6 + $0x50] sm:$0xf]  ;;  %v2864_v13 = vld [vmem:[#allocation6 + $0x54] sm:$0xf0]  ;;  %v2863_v14 = vld [vmem:[#allocation6 + $0x54] sm:$0xf] }
  0x18   :  { %401 = vmatpush.bf16.msra.mxu1 %v2772_v7  ;;  %v2753_v15 = vld [vmem:[#allocation6 + $0x58] sm:$0xf0]  ;;  %v2752_v16 = vor.u32 %v2864_v13, %v2751_v12  ;;  %v2743_v18 = vld [vmem:[#allocation6 + $0x40] sm:$0xf]  ;;  %v2862_v19 = vld [vmem:[#allocation6 + $0x44] sm:$0xf0] }
  0x19   :  { %v2756_v17 = vor.u32 %v2863_v14, %v2753_v15  ;;  %v2861_v20 = vld [vmem:[#allocation6 + $0x44] sm:$0xf]  ;;  %v2745_v21 = vld [vmem:[#allocation6 + $0x48] sm:$0xf0]  ;;  %v2744_v22 = vor.u32 %v2862_v19, %v2743_v18  ;;  %v2735_v24 = vld [vmem:[#allocation6 + $0x30] sm:$0xf] }
  0x1a   :  { %v2748_v23 = vor.u32 %v2861_v20, %v2745_v21  ;;  %v2860_v25 = vld [vmem:[#allocation6 + $0x34] sm:$0xf0]  ;;  %v2859_v26 = vld [vmem:[#allocation6 + $0x34] sm:$0xf]  ;;  %v2737_v27 = vld [vmem:[#allocation6 + $0x38] sm:$0xf0] }
  0x1b   :  { %313 = vmatpush.bf16.msra.mxu0 %v2760_v10  ;;  %v2736_v28 = vor.u32 %v2860_v25, %v2735_v24  ;;  %v2740_v29 = vor.u32 %v2859_v26, %v2737_v27  ;;  %v2727_v30 = vld [vmem:[#allocation6 + $0x20] sm:$0xf]  ;;  %v2858_v31 = vld [vmem:[#allocation6 + $0x24] sm:$0xf0]  ;;  %v2857_v32 = vld [vmem:[#allocation6 + $0x24] sm:$0xf] }
  0x1c   :  { %402 = vmatpush.bf16.msra.mxu1 %v2764_v11  ;;  %v2729_v33 = vld [vmem:[#allocation6 + $0x28] sm:$0xf0]  ;;  %v2728_v34 = vor.u32 %v2858_v31, %v2727_v30  ;;  %v2719_v36 = vld [vmem:[#allocation6 + $0x10] sm:$0xf]  ;;  %v2856_v37 = vld [vmem:[#allocation6 + $0x14] sm:$0xf0] }
  0x1d   :  { %v2732_v35 = vor.u32 %v2857_v32, %v2729_v33  ;;  %v2855_v38 = vld [vmem:[#allocation6 + $0x14] sm:$0xf]  ;;  %v2721_v39 = vld [vmem:[#allocation6 + $0x18] sm:$0xf0]  ;;  %v2720_v40 = vor.u32 %v2856_v37, %v2719_v36  ;;  %v2711_v42 = vld [vmem:[#allocation6] sm:$0xf] }
  0x1e   :  { %v2724_v41 = vor.u32 %v2855_v38, %v2721_v39  ;;  %v2854_v43 = vld [vmem:[#allocation6 + $0x4] sm:$0xf0]  ;;  %v2853_v44 = vld [vmem:[#allocation6 + $0x4] sm:$0xf]  ;;  %v2713_v45 = vld [vmem:[#allocation6 + $0x8] sm:$0xf0] }
  0x1f   :  { %314 = vmatpush.bf16.msra.mxu0 %v2752_v16  ;;  %v2712_v46 = vor.u32 %v2854_v43, %v2711_v42  ;;  %v2716_v47 = vor.u32 %v2853_v44, %v2713_v45  ;;  %v2837_v48 = vld [vmem:[#allocation3] sm:$0xff]  ;;  %v2838_v49 = vld [vmem:[#allocation3 + $0x8] sm:$0xff]  ;;  %v2839_v50 = vld [vmem:[#allocation3 + $0x10] sm:$0xff]  ;;  %s3289_s17 = smov [#allocation11]   ;;  %s2630_s21 = sshll.u32 %s4935_s5, 4  ;;  %s2631_s21 = int_to_ptr.hbm [resolvable:$true] %s2630_s21 }
  0x20   :  { %403 = vmatpush.bf16.msra.mxu1 %v2756_v17  ;;  %v2840_v51 = vld [vmem:[#allocation3 + $0x18] sm:$0xff]  ;;  %v2841_v52 = vld [vmem:[#allocation3 + $0x20] sm:$0xff]  ;;  %v2842_v53 = vld [vmem:[#allocation3 + $0x28] sm:$0xff]  ;;  %s2628_s18 = sshll.u32 %s3289_s17, 4  ;;  %s2629_s18 = int_to_ptr.vmem [resolvable:$true] %s2628_s18 }
  0x21   :  { %v2843_v54 = vld [vmem:[#allocation3 + $0x30] sm:$0xff]  ;;  %v2844_v55 = vld [vmem:[#allocation3 + $0x38] sm:$0xff]  ;;  %v130_v58 = vld [vmem:[#allocation8] sm:$0x3] }
  0x22   :  { %v2876_v56 = vld [vmem:[#allocation9 + $0x38] sm:$0xff]  ;;  %v3335_v59 = vperm.slane %v130_v58, 0  ;;  %v2875_v60 = vld [vmem:[#allocation9 + $0x30] sm:$0xff]  ;;  %v2874_v1 = vld [vmem:[#allocation9 + $0x28] sm:$0xff]  ;;  %v3347_v14 = vperm.slane %v130_v58, 1 }
  0x23   :  { %315 = vmatpush.bf16.msra.mxu0 %v2744_v22  ;;  %v2884_v57 = vld [vmem:[#allocation9 + $0x78] sm:$0xff]  ;;  %2314 = vmatpush.bf16.msra.mxu2 %v2876_v56  ;;  %v2883_v61 = vld [vmem:[#allocation9 + $0x70] sm:$0xff]  ;;  %v2882_v2 = vld [vmem:[#allocation9 + $0x68] sm:$0xff] }
  0x24   :  { %404 = vmatpush.bf16.msra.mxu1 %v2748_v23  ;;  %2403 = vmatpush.bf16.msra.mxu3 %v2884_v57  ;;  %v2845_v62 = vld [vmem:[#allocation3 + $0x40] sm:$0xff]  ;;  %v2871_v17 = vld [vmem:[#allocation9 + $0x10] sm:$0xff]  ;;  %v2846_v21 = vld [vmem:[#allocation3 + $0x48] sm:$0xff] }
  0x25   :  { %v2873_v5 = vld [vmem:[#allocation9 + $0x20] sm:$0xff]  ;;  %v2872_v12 = vld [vmem:[#allocation9 + $0x18] sm:$0xff]  ;;  %v2879_v18 = vld [vmem:[#allocation9 + $0x50] sm:$0xff] }
  0x26   :  { %v2881_v6 = vld [vmem:[#allocation9 + $0x60] sm:$0xff]  ;;  %v2880_v13 = vld [vmem:[#allocation9 + $0x58] sm:$0xff]  ;;  %v2870_v24 = vld [vmem:[#allocation9 + $0x8] sm:$0xff] }
  0x27   :  { %316 = vmatpush.bf16.msra.mxu0 %v2736_v28  ;;  %2315 = vmatpush.bf16.msra.mxu2 %v2875_v60  ;;  %v2878_v25 = vld [vmem:[#allocation9 + $0x48] sm:$0xff]  ;;  %v2869_v30 = vld [vmem:[#allocation9] sm:$0xff] }
  0x28   :  { %405 = vmatpush.bf16.msra.mxu1 %v2740_v29  ;;  %2404 = vmatpush.bf16.msra.mxu3 %v2883_v61  ;;  %v2877_v31 = vld [vmem:[#allocation9 + $0x40] sm:$0xff] }
  0x2b   :  { %317 = vmatpush.bf16.msra.mxu0 %v2728_v34  ;;  %2316 = vmatpush.bf16.msra.mxu2 %v2874_v1 }
  0x2c   :  { %406 = vmatpush.bf16.msra.mxu1 %v2732_v35  ;;  %2405 = vmatpush.bf16.msra.mxu3 %v2882_v2 }
  0x2f   :  { %318 = vmatpush.bf16.msra.mxu0 %v2720_v40  ;;  %2317 = vmatpush.bf16.msra.mxu2 %v2873_v5 }
  0x30   :  { %407 = vmatpush.bf16.msra.mxu1 %v2724_v41  ;;  %2406 = vmatpush.bf16.msra.mxu3 %v2881_v6 }
  0x33   :  { %319 = vmatpush.bf16.msra.mxu0 %v2712_v46  ;;  %2318 = vmatpush.bf16.msra.mxu2 %v2872_v12  ;;  %v2847_v46 = vld [vmem:[#allocation3 + $0x50] sm:$0xff] }
  0x34   :  { %408 = vmatpush.bf16.msra.mxu1 %v2716_v47  ;;  %2407 = vmatpush.bf16.msra.mxu3 %v2880_v13 }
  0x36   :  { %320 = vmatmul.bf16.vlgmr.msra.gmra.mxu0 %v2837_v48 }
  0x37   :  { %409 = vmatmul.bf16.vlgmr.msra.gmra.mxu1 %v2837_v48  ;;  %2319 = vmatpush.bf16.msra.mxu2 %v2871_v17 }
  0x38   :  { %2408 = vmatpush.bf16.msra.mxu3 %v2879_v18 }
  0x3b   :  { %2320 = vmatpush.bf16.msra.mxu2 %v2870_v24 }
  0x3c   :  { %2409 = vmatpush.bf16.msra.mxu3 %v2878_v25 }
  0x3f   :  { %2321 = vmatpush.bf16.msra.mxu2 %v2869_v30 }
  0x40   :  { %2410 = vmatpush.bf16.msra.mxu3 %v2877_v31 }
  0x46   :  { %325 = vmatmul.bf16.gmra.mxu0 %v2838_v49 }
  0x47   :  { %414 = vmatmul.bf16.gmra.mxu1 %v2838_v49 }
  0x56   :  { %330 = vmatmul.bf16.gmra.mxu0 %v2839_v50 }
  0x57   :  { %419 = vmatmul.bf16.gmra.mxu1 %v2839_v50 }
  0x66   :  { %335 = vmatmul.bf16.gmra.mxu0 %v2840_v51 }
  0x67   :  { %424 = vmatmul.bf16.gmra.mxu1 %v2840_v51 }
  0x76   :  { %340 = vmatmul.bf16.gmra.mxu0 %v2841_v52 }
  0x77   :  { %429 = vmatmul.bf16.gmra.mxu1 %v2841_v52 }
  0x86   :  { %345 = vmatmul.bf16.gmra.mxu0 %v2842_v53 }
  0x87   :  { %434 = vmatmul.bf16.gmra.mxu1 %v2842_v53 }
  0x96   :  { %350 = vmatmul.bf16.gmra.mxu0 %v2843_v54 }
  0x97   :  { %439 = vmatmul.bf16.gmra.mxu1 %v2843_v54 }
  0xa6   :  { %355 = vmatmul.bf16.gmra.mxu0 %v2844_v55 }
  0xa7   :  { %444 = vmatmul.bf16.gmra.mxu1 %v2844_v55 }
  0xb3   :  { %v321_v63 = vpop.f32.mrf.mxu0 }
  0xb4   :  { %v3338_v0 = vadd.f32 %v321_v63, %v3335_v59  ;;  %v410_v8 = vpop.f32.mrf.mxu1 }
  0xb5   :  { %v3354_v19 = vadd.f32 %v410_v8, %v3347_v14 }
  0xb6   :  { %v3341_v3 = vmul.f32 0.70710677, %v3338_v0  ;;  %360 = vmatmul.bf16.gmra.mxu0 %v2845_v62 }
  0xb7   :  { %449 = vmatmul.bf16.gmra.mxu1 %v2845_v62  ;;  %v3357_v28 = vmul.f32 0.70710677, %v3354_v19 }
  0xb8   :  { %v618_v4 = vand.u32 2147483647, %v3341_v3  ;;  %vm1834_vm0 = vcmp.lt.f32.partialorder %v3341_v3, 0.0 }
  0xb9   :  { %v3363_v33 = vand.u32 2147483647, %v3357_v28  ;;  %vm1835_vm2 = vcmp.lt.f32.partialorder %v3357_v28, 0.0 }
  0xba   :  { %v682_v7 = vmul.f32 0.3275911, %v618_v4  ;;  %v1450_v38 = vsub.f32 0.0, %v618_v4 }
  0xbb   :  { %v323_v9 = vpop.f32.mrf.mxu0  ;;  %v683_v39 = vmul.f32 0.3275911, %v3363_v33  ;;  %v1451_v25 = vsub.f32 0.0, %v3363_v33 }
  0xbc   :  { %v746_v10 = vadd.f32 1.0, %v682_v7  ;;  %v3345_v11 = vadd.f32 %v323_v9, %v3335_v59  ;;  %v412_v26 = vpop.f32.mrf.mxu1  ;;  %v1514_v44 = vmul.f32 %v1450_v38, %v618_v4  ;;  %v2848_v9 = vld [vmem:[#allocation3 + $0x58] sm:$0xff] }
  0xbd   :  { %v3360_v29 = vadd.f32 %v412_v26, %v3347_v14  ;;  %v747_v45 = vadd.f32 1.0, %v683_v39 }
  0xbe   :  { %2895 = vrcp.f32 %v746_v10  ;;  %v3350_v15 = vmul.f32 0.70710677, %v3345_v11  ;;  %v1578_v53 = vmul.f32 1.442695, %v1514_v44 }
  0xbf   :  { %v3366_v35 = vmul.f32 0.70710677, %v3360_v29 }
  0xc0   :  { %v620_v16 = vand.u32 2147483647, %v3350_v15  ;;  %vm1836_vm1 = vcmp.lt.f32.partialorder %v3350_v15, 0.0 }
  0xc1   :  { %v3370_v40 = vand.u32 2147483647, %v3366_v35  ;;  %vm1837_vm3 = vcmp.lt.f32.partialorder %v3366_v35, 0.0 }
  0xc2   :  { %v684_v20 = vmul.f32 0.3275911, %v620_v16  ;;  %v1452_v42 = vsub.f32 0.0, %v620_v16 }
  0xc3   :  { %v685_v49 = vmul.f32 0.3275911, %v3370_v40  ;;  %v326_v57 = vpop.f32.mrf.mxu0 }
  0xc4   :  { %v2896_v22 = vpop.eup %2895  ;;  %v748_v23 = vadd.f32 1.0, %v684_v20  ;;  %v1516_v51 = vmul.f32 %v1452_v42, %v620_v16  ;;  %v415_v2 = vpop.f32.mrf.mxu1  ;;  %v3379_v18 = vadd.f32 %v326_v57, %v3335_v59 }
  0xc5   :  { %v874_v27 = vmul.f32 1.0614054, %v2896_v22  ;;  %v749_v54 = vadd.f32 1.0, %v685_v49  ;;  %v3397_v38 = vadd.f32 %v415_v2, %v3347_v14 }
  0xc6   :  { %2897 = vrcp.f32 %v748_v23  ;;  %365 = vmatmul.bf16.gmra.mxu0 %v2846_v21  ;;  %v1582_v56 = vmul.f32 1.442695, %v1516_v51  ;;  %v3388_v26 = vmul.f32 0.70710677, %v3379_v18 }
  0xc7   :  { %454 = vmatmul.bf16.gmra.mxu1 %v2846_v21  ;;  %v938_v32 = vadd.f32 -1.4531521, %v874_v27  ;;  %2899 = vrcp.f32 %v747_v45 }
  0xc8   :  { %2901 = vpow2.f32 %v1578_v53  ;;  %v622_v42 = vand.u32 2147483647, %v3388_v26  ;;  %vm1838_vm4 = vcmp.lt.f32.partialorder %v3388_v26, 0.0 }
  0xc9   :  { %v1002_v37 = vmul.f32 %v2896_v22, %v938_v32  ;;  %2903 = vrcp.f32 %v749_v54 }
  0xca   :  { %2905 = vpow2.f32 %v1582_v56 }
  0xcb   :  { %v1066_v43 = vadd.f32 1.4214138, %v1002_v37  ;;  %v328_v13 = vpop.f32.mrf.mxu0  ;;  %v1453_v37 = vsub.f32 0.0, %v3370_v40 }
  0xcc   :  { %v2898_v34 = vpop.eup %2897  ;;  %v3382_v21 = vadd.f32 %v328_v13, %v3335_v59  ;;  %v417_v30 = vpop.f32.mrf.mxu1 }
  0xcd   :  { %v876_v36 = vmul.f32 1.0614054, %v2898_v34  ;;  %v1130_v48 = vmul.f32 %v2896_v22, %v1066_v43  ;;  %v3373_v62 = vpop.eup %2899  ;;  %v3402_v3 = vadd.f32 %v417_v30, %v3347_v14  ;;  %v1517_v49 = vmul.f32 %v1453_v37, %v3370_v40 }
  0xce   :  { %v875_v4 = vmul.f32 1.0614054, %v3373_v62  ;;  %v2902_v5 = vpop.eup %2901  ;;  %v3392_v31 = vmul.f32 0.70710677, %v3382_v21  ;;  %v493_v30 = vmul.f32 0.5, %v3360_v29 }
  0xcf   :  { %v940_v41 = vadd.f32 -1.4531521, %v876_v36  ;;  %v1194_v52 = vadd.f32 -0.28449672, %v1130_v48  ;;  %v3376_v8 = vpop.eup %2903  ;;  %v492_v48 = vmul.f32 0.5, %v3345_v11 }
  0xd0   :  { %v2906_v12 = vpop.eup %2905  ;;  %v939_v17 = vadd.f32 -1.4531521, %v875_v4  ;;  %v877_v23 = vmul.f32 1.0614054, %v3376_v8  ;;  %v3406_v15 = vand.u32 2147483647, %v3392_v31 }
  0xd1   :  { %v1004_v47 = vmul.f32 %v2898_v34, %v940_v41  ;;  %v1258_v58 = vmul.f32 %v2896_v22, %v1194_v52  ;;  %v1515_v41 = vmul.f32 %v1451_v25, %v3363_v33  ;;  %v3412_v33 = vmul.f32 0.70710677, %v3397_v38 }
  0xd2   :  { %v1003_v24 = vmul.f32 %v3373_v62, %v939_v17  ;;  %v941_v36 = vadd.f32 -1.4531521, %v877_v23  ;;  %v686_v52 = vmul.f32 0.3275911, %v622_v42  ;;  %v3416_v53 = vmul.f32 0.70710677, %v3402_v3 }
  0xd3   :  { %v1068_v50 = vadd.f32 1.4214138, %v1004_v47  ;;  %v1322_v61 = vadd.f32 0.2548296, %v1258_v58  ;;  %v1580_v51 = vmul.f32 1.442695, %v1515_v41  ;;  %v331_v56 = vpop.f32.mrf.mxu0 }
  0xd4   :  { %v1067_v39 = vadd.f32 1.4214138, %v1003_v24  ;;  %v1005_v47 = vmul.f32 %v3376_v8, %v941_v36  ;;  %v2849_v58 = vld [vmem:[#allocation3 + $0x60] sm:$0xff]  ;;  %v1584_v11 = vmul.f32 1.442695, %v1517_v49  ;;  %v332_v25 = vadd.f32 %v331_v56, %v3335_v59 }
  0xd5   :  { %v1132_v55 = vmul.f32 %v2898_v34, %v1068_v50  ;;  %v1386_v1 = vmul.f32 %v2896_v22, %v1322_v61  ;;  %v623_v40 = vand.u32 2147483647, %v3412_v33  ;;  %2907 = vpow2.f32 %v1580_v51 }
  0xd6   :  { %370 = vmatmul.bf16.gmra.mxu0 %v2847_v46  ;;  %v1131_v50 = vmul.f32 %v3373_v62, %v1067_v39  ;;  %v1069_v57 = vadd.f32 1.4214138, %v1005_v47  ;;  %2909 = vpow2.f32 %v1584_v11  ;;  %v1456_v37 = vsub.f32 0.0, %v3406_v15 }
  0xd7   :  { %459 = vmatmul.bf16.gmra.mxu1 %v2847_v46  ;;  %v1196_v60 = vadd.f32 -0.28449672, %v1132_v55  ;;  %v1706_v7 = vmul.f32 %v2902_v5, %v1386_v1  ;;  %v490_v46 = vmul.f32 0.5, %v3338_v0  ;;  %v688_v55 = vmul.f32 0.3275911, %v3406_v15 }
  0xd8   :  { %v1195_v61 = vadd.f32 -0.28449672, %v1131_v50  ;;  %v625_v1 = vand.u32 2147483647, %v3416_v53  ;;  %v1133_v2 = vmul.f32 %v3376_v8, %v1069_v57  ;;  %v1454_v5 = vsub.f32 0.0, %v622_v42 }
  0xd9   :  { %v1260_v63 = vmul.f32 %v2898_v34, %v1196_v60  ;;  %v1770_v16 = vsub.f32 1.0, %v1706_v7  ;;  %v3441_v47 = vmul.f32 0.5, %v3397_v38  ;;  %v3454_v38 = vmul.f32 0.5, %v3382_v21 }
  0xda   :  { %v1259_v4 = vmul.f32 %v3373_v62, %v1195_v61  ;;  %v1197_v7 = vadd.f32 -0.28449672, %v1133_v2  ;;  %v689_v13 = vmul.f32 0.3275911, %v625_v1  ;;  %v1518_v24 = vmul.f32 %v1454_v5, %v622_v42 }
  0xdb   :  { %v1324_v6 = vadd.f32 0.2548296, %v1260_v63  ;;  %v1898_v22 = vsub.f32 0.0, %v1770_v16  ;;  %v750_v63 = vadd.f32 1.0, %v686_v52  ;;  %v2908_v23 = vpop.eup %2907  ;;  %v333_v41 = vpop.f32.mrf.mxu0  ;;  %v3436_v42 = vmul.f32 0.5, %v3379_v18 }
  0xdc   :  { %v1261_v17 = vmul.f32 %v3376_v8, %v1197_v7  ;;  %v753_v39 = vadd.f32 1.0, %v689_v13  ;;  %v1520_v18 = vmul.f32 %v1456_v37, %v3406_v15  ;;  %v3467_v28 = vmul.f32 0.5, %v332_v25 }
  0xdd   :  { %v1388_v10 = vmul.f32 %v2898_v34, %v1324_v6  ;;  %v1962_v34 = vsel %vm1834_vm0, %v1898_v22, %v1770_v16  ;;  %v752_v6 = vadd.f32 1.0, %v688_v55  ;;  %2911 = vrcp.f32 %v750_v63  ;;  %v420_v16 = vpop.f32.mrf.mxu1 }
  0xde   :  { %v2026_v44 = vadd.f32 1.0, %v1962_v34  ;;  %v1590_v63 = vmul.f32 1.442695, %v1520_v18  ;;  %vm1840_vm5 = vcmp.lt.f32.partialorder %v3392_v31, 0.0  ;;  %vm1839_vm6 = vcmp.lt.f32.partialorder %v3412_v33, 0.0 }
  0xdf   :  { %v1708_v20 = vmul.f32 %v2906_v12, %v1388_v10  ;;  %v1455_v10 = vsub.f32 0.0, %v623_v40  ;;  %v1323_v12 = vadd.f32 0.2548296, %v1259_v4  ;;  %2913 = vrcp.f32 %v752_v6 }
  0xe0   :  { %v2090_v0 = vmul.f32 %v2026_v44, %v490_v46  ;;  %v1457_v44 = vsub.f32 0.0, %v625_v1  ;;  %v1586_v46 = vmul.f32 1.442695, %v1518_v24  ;;  %vm1841_vm7 = vcmp.lt.f32.partialorder %v3416_v53, 0.0 }
  0xe1   :  { %v1772_v27 = vsub.f32 1.0, %v1708_v20  ;;  %v3425_v20 = vmul.f32 0.5, %v3354_v19  ;;  %v1387_v22 = vmul.f32 %v3373_v62, %v1323_v12  ;;  %v1519_v34 = vmul.f32 %v1455_v10, %v623_v40  ;;  %v2910_v62 = vpop.eup %2909 }
  0xe2   :  { %v421_v19 = vadd.f32 %v420_v16, %v3347_v14  ;;  %v1521_v55 = vmul.f32 %v1457_v44, %v625_v1 }
  0xe3   :  { %v1900_v32 = vsub.f32 0.0, %v1772_v27  ;;  %v1707_v36 = vmul.f32 %v2908_v23, %v1387_v22  ;;  %v3438_v29 = vpop.eup %2911  ;;  %v1588_v50 = vmul.f32 1.442695, %v1519_v34 }
  0xe4   :  { %v878_v57 = vmul.f32 1.0614054, %v3438_v29  ;;  %v1592_v4 = vmul.f32 1.442695, %v1521_v55  ;;  %v3479_v13 = vmul.f32 0.5, %v421_v19 }
  0xe5   :  { %v1964_v43 = vsel %vm1836_vm1, %v1900_v32, %v1772_v27  ;;  %v1325_v27 = vadd.f32 0.2548296, %v1261_v17  ;;  %v3448_v52 = vpop.eup %2913  ;;  %v422_v15 = vpop.f32.mrf.mxu1 }
  0xe6   :  { %375 = vmatmul.bf16.gmra.mxu0 %v2848_v9  ;;  %v2028_v45 = vadd.f32 1.0, %v1964_v43  ;;  %v880_v61 = vmul.f32 1.0614054, %v3448_v52  ;;  %v3475_v5 = vadd.f32 %v422_v15, %v3347_v14  ;;  %v942_v7 = vadd.f32 -1.4531521, %v878_v57 }
  0xe7   :  { %464 = vmatmul.bf16.gmra.mxu1 %v2848_v9  ;;  %v687_v9 = vmul.f32 0.3275911, %v623_v40  ;;  %v1389_v43 = vmul.f32 %v3376_v8, %v1325_v27  ;;  %v3446_v8 = vadd.f32 %v333_v41, %v3335_v59 }
  0xe8   :  { %v2092_v54 = vmul.f32 %v2028_v45, %v492_v48  ;;  %v1771_v45 = vsub.f32 1.0, %v1707_v36  ;;  %v3443_v48 = vmul.f32 0.70710677, %v332_v25  ;;  %v944_v16 = vadd.f32 -1.4531521, %v880_v61  ;;  %v2850_v36 = vld [vmem:[#allocation3 + $0x68] sm:$0xff] }
  0xe9   :  { %v751_v32 = vadd.f32 1.0, %v687_v9  ;;  %v1709_v49 = vmul.f32 %v2910_v62, %v1389_v43  ;;  %v1006_v23 = vmul.f32 %v3438_v29, %v942_v7  ;;  %v3503_v61 = vmul.f32 0.5, %v3446_v8 }
  0xea   :  { %v2154_v60 = vpack.c.bf16 %v2092_v54, %v2090_v0  ;;  %v1899_v51 = vsub.f32 0.0, %v1771_v45  ;;  %v3451_v0 = vmul.f32 0.70710677, %v421_v19  ;;  %v626_v11 = vand.u32 2147483647, %v3443_v48 }
  0xeb   :  { %2915 = vrcp.f32 %v751_v32  ;;  %v1773_v54 = vsub.f32 1.0, %v1709_v49  ;;  %v1008_v32 = vmul.f32 %v3448_v52, %v944_v16  ;;  %v1070_v41 = vadd.f32 1.4214138, %v1006_v23 }
  0xec   :  { %2322 = vmatmul.bf16.vlgmr.msra.gmra.mxu2 %v2154_v60  ;;  %2917 = vrcp.f32 %v753_v39  ;;  %v1963_v56 = vsel %vm1835_vm2, %v1899_v51, %v1771_v45  ;;  %v3464_v60 = vmul.f32 0.70710677, %v3446_v8  ;;  %v627_v1 = vand.u32 2147483647, %v3451_v0 }
  0xed   :  { %2919 = vpow2.f32 %v1586_v46  ;;  %v1901_v40 = vsub.f32 0.0, %v1773_v54  ;;  %v2027_v21 = vadd.f32 1.0, %v1963_v56  ;;  %v690_v10 = vmul.f32 0.3275911, %v626_v11  ;;  %v336_v56 = vpop.f32.mrf.mxu0 }
  0xee   :  { %2921 = vpow2.f32 %v1588_v50  ;;  %v1458_v12 = vsub.f32 0.0, %v626_v11  ;;  %v3482_v17 = vand.u32 2147483647, %v3464_v60  ;;  %v691_v25 = vmul.f32 0.3275911, %v627_v1 }
  0xef   :  { %v2091_v35 = vmul.f32 %v2027_v21, %v3425_v20  ;;  %v1459_v27 = vsub.f32 0.0, %v627_v1  ;;  %v3493_v39 = vmul.f32 0.70710677, %v3475_v5  ;;  %v1072_v62 = vadd.f32 1.4214138, %v1008_v32 }
  0xf0   :  { %v1522_v43 = vmul.f32 %v1458_v12, %v626_v11  ;;  %2923 = vpow2.f32 %v1590_v63  ;;  %v692_v45 = vmul.f32 0.3275911, %v3482_v17  ;;  %v1134_v46 = vmul.f32 %v3438_v29, %v1070_v41 }
  0xf1   :  { %v3472_v2 = vpop.eup %2915  ;;  %2925 = vpow2.f32 %v1592_v4  ;;  %v755_v50 = vadd.f32 1.0, %v691_v25  ;;  %v1136_v51 = vmul.f32 %v3448_v52, %v1072_v62  ;;  %v629_v55 = vand.u32 2147483647, %v3493_v39 }
  0xf2   :  { %v3477_v9 = vpop.eup %2917  ;;  %v879_v34 = vmul.f32 1.0614054, %v3472_v2  ;;  %v1198_v57 = vadd.f32 -0.28449672, %v1134_v46  ;;  %v1594_v15 = vmul.f32 1.442695, %v1522_v43 }
  0xf3   :  { %v3486_v24 = vpop.eup %2919  ;;  %v881_v20 = vmul.f32 1.0614054, %v3477_v9  ;;  %v756_v63 = vadd.f32 1.0, %v692_v45  ;;  %v693_v16 = vmul.f32 0.3275911, %v629_v55  ;;  %v3519_v43 = vmul.f32 0.5, %v3475_v5 }
  0xf4   :  { %v3490_v37 = vpop.eup %2921  ;;  %v943_v44 = vadd.f32 -1.4531521, %v879_v34  ;;  %vm1842_vm8 = vcmp.lt.f32.partialorder %v3443_v48, 0.0  ;;  %vm1844_vm9 = vcmp.lt.f32.partialorder %v3464_v60, 0.0  ;;  %vm1843_vm10 = vcmp.lt.f32.partialorder %v3451_v0, 0.0 }
  0xf5   :  { %v945_v49 = vadd.f32 -1.4531521, %v881_v20  ;;  %v757_v45 = vadd.f32 1.0, %v693_v16  ;;  %vm1845_vm11 = vcmp.lt.f32.partialorder %v3493_v39, 0.0 }
  0xf6   :  { %380 = vmatmul.bf16.gmra.mxu0 %v2849_v58  ;;  %v1007_v18 = vmul.f32 %v3472_v2, %v943_v44  ;;  %v2924_v12 = vpop.eup %2923 }
  0xf7   :  { %469 = vmatmul.bf16.gmra.mxu1 %v2849_v58  ;;  %v3460_v58 = vmul.f32 0.5, %v3402_v3  ;;  %v1965_v3 = vsel %vm1837_vm3, %v1901_v40, %v1773_v54  ;;  %v1523_v54 = vmul.f32 %v1459_v27, %v627_v1  ;;  %v1009_v11 = vmul.f32 %v3477_v9, %v945_v49  ;;  %v2926_v8 = vpop.eup %2925 }
  0xf8   :  { %v2029_v6 = vadd.f32 1.0, %v1965_v3  ;;  %v1200_v40 = vadd.f32 -0.28449672, %v1136_v51  ;;  %v1071_v21 = vadd.f32 1.4214138, %v1007_v18  ;;  %v1262_v3 = vmul.f32 %v3438_v29, %v1198_v57 }
  0xf9   :  { %v1073_v4 = vadd.f32 1.4214138, %v1009_v11  ;;  %v1460_v1 = vsub.f32 0.0, %v3482_v17  ;;  %v1596_v25 = vmul.f32 1.442695, %v1523_v54  ;;  %v337_v27 = vadd.f32 %v336_v56, %v3335_v59 }
  0xfa   :  { %v2093_v22 = vmul.f32 %v2029_v6, %v493_v30  ;;  %v754_v30 = vadd.f32 1.0, %v690_v10  ;;  %v425_v6 = vpop.f32.mrf.mxu1  ;;  %v1264_v7 = vmul.f32 %v3448_v52, %v1200_v40  ;;  %v1135_v10 = vmul.f32 %v3472_v2, %v1071_v21 }
  0xfb   :  { %v1137_v23 = vmul.f32 %v3477_v9, %v1073_v4 }
  0xfc   :  { %v2155_v19 = vpack.c.bf16 %v2093_v22, %v2091_v35  ;;  %2927 = vrcp.f32 %v754_v30  ;;  %v1461_v35 = vsub.f32 0.0, %v629_v55  ;;  %v1326_v22 = vadd.f32 0.2548296, %v1262_v3 }
  0xfd   :  { %2929 = vrcp.f32 %v755_v50  ;;  %v1328_v32 = vadd.f32 0.2548296, %v1264_v7  ;;  %v1199_v34 = vadd.f32 -0.28449672, %v1135_v10  ;;  %v1201_v41 = vadd.f32 -0.28449672, %v1137_v23 }
  0xfe   :  { %2411 = vmatmul.bf16.vlgmr.msra.gmra.mxu3 %v2155_v19  ;;  %2931 = vrcp.f32 %v756_v63  ;;  %v1390_v19 = vmul.f32 %v3438_v29, %v1326_v22  ;;  %v1524_v30 = vmul.f32 %v1460_v1, %v3482_v17  ;;  %v1525_v46 = vmul.f32 %v1461_v35, %v629_v55 }
  0xff   :  { %v1392_v62 = vmul.f32 %v3448_v52, %v1328_v32  ;;  %v1263_v44 = vmul.f32 %v3472_v2, %v1199_v34  ;;  %v1265_v50 = vmul.f32 %v3477_v9, %v1201_v41  ;;  %2933 = vpow2.f32 %v1594_v15  ;;  %v338_v52 = vpop.f32.mrf.mxu0 }
 0x100   :  { %v1710_v49 = vmul.f32 %v3486_v24, %v1390_v19  ;;  %v3527_v29 = vmul.f32 0.70710677, %v337_v27  ;;  %2935 = vpow2.f32 %v1596_v25  ;;  %v1598_v24 = vmul.f32 1.442695, %v1524_v30 }
 0x101   :  { %v1712_v18 = vmul.f32 %v2924_v12, %v1392_v62  ;;  %v1327_v17 = vadd.f32 0.2548296, %v1263_v44  ;;  %v1329_v56 = vadd.f32 0.2548296, %v1265_v50  ;;  %v3533_v55 = vmul.f32 0.5, %v337_v27 }
 0x102   :  { %v3515_v20 = vpop.eup %2927  ;;  %v1774_v54 = vsub.f32 1.0, %v1710_v49  ;;  %2937 = vrcp.f32 %v757_v45  ;;  %v1600_v40 = vmul.f32 1.442695, %v1525_v46  ;;  %v630_v3 = vand.u32 2147483647, %v3527_v29  ;;  %v427_v10 = vpop.f32.mrf.mxu1 }
 0x103   :  { %v3525_v51 = vpop.eup %2929  ;;  %v1776_v57 = vsub.f32 1.0, %v1712_v18  ;;  %v1391_v11 = vmul.f32 %v3472_v2, %v1327_v17  ;;  %v1393_v63 = vmul.f32 %v3477_v9, %v1329_v56  ;;  %v3541_v4 = vadd.f32 %v338_v52, %v3335_v59 }
 0x104   :  { %v3536_v15 = vpop.eup %2931  ;;  %v1902_v21 = vsub.f32 0.0, %v1774_v54  ;;  %v882_v16 = vmul.f32 1.0614054, %v3515_v20  ;;  %2939 = vpow2.f32 %v1598_v24  ;;  %v694_v34 = vmul.f32 0.3275911, %v630_v3 }
 0x105   :  { %v1904_v1 = vsub.f32 0.0, %v1776_v57  ;;  %v1713_v12 = vmul.f32 %v2926_v8, %v1393_v63  ;;  %v3548_v35 = vpop.eup %2933  ;;  %v884_v25 = vmul.f32 1.0614054, %v3536_v15  ;;  %v3558_v8 = vmul.f32 0.70710677, %v3541_v4 }
 0x106   :  { %385 = vmatmul.bf16.gmra.mxu0 %v2850_v36  ;;  %v1966_v2 = vsel %vm1838_vm4, %v1902_v21, %v1774_v54  ;;  %v3553_v27 = vpop.eup %2935  ;;  %v3561_v19 = vadd.f32 %v427_v10, %v3347_v14  ;;  %v946_v45 = vadd.f32 -1.4531521, %v882_v16  ;;  %2941 = vpow2.f32 %v1600_v40 }
 0x107   :  { %474 = vmatmul.bf16.gmra.mxu1 %v2850_v36  ;;  %v426_v36 = vadd.f32 %v425_v6, %v3347_v14  ;;  %v1711_v6 = vmul.f32 %v3490_v37, %v1391_v11  ;;  %v1968_v9 = vsel %vm1840_vm5, %v1904_v1, %v1776_v57  ;;  %v2030_v22 = vadd.f32 1.0, %v1966_v2 }
 0x108   :  { %v2032_v32 = vadd.f32 1.0, %v1968_v9  ;;  %v1777_v26 = vsub.f32 1.0, %v1713_v12  ;;  %v3563_v41 = vpop.eup %2937  ;;  %v948_v50 = vadd.f32 -1.4531521, %v884_v25  ;;  %v758_v56 = vadd.f32 1.0, %v694_v34 }
 0x109   :  { %v3530_v5 = vmul.f32 0.70710677, %v426_v36  ;;  %v1775_v23 = vsub.f32 1.0, %v1711_v6  ;;  %v3555_v37 = vmul.f32 0.5, %v426_v36  ;;  %v2094_v30 = vmul.f32 %v2030_v22, %v3436_v42  ;;  %v2851_v6 = vld [vmem:[#allocation3 + $0x70] sm:$0xff] }
 0x10a   :  { %v2096_v62 = vmul.f32 %v2032_v32, %v3454_v38  ;;  %v1905_v44 = vsub.f32 0.0, %v1777_v26  ;;  %v1462_v36 = vsub.f32 0.0, %v630_v3  ;;  %v3572_v42 = vmul.f32 0.70710677, %v3561_v19  ;;  %v3574_v24 = vpop.eup %2939 }
 0x10b   :  { %v631_v7 = vand.u32 2147483647, %v3530_v5  ;;  %v1903_v31 = vsub.f32 0.0, %v1775_v23  ;;  %v632_v57 = vand.u32 2147483647, %v3558_v8  ;;  %v1010_v33 = vmul.f32 %v3515_v20, %v946_v45 }
 0x10c   :  { %v2156_v17 = vpack.c.bf16 %v2096_v62, %v2094_v30  ;;  %v1969_v52 = vsel %vm1841_vm7, %v1905_v44, %v1777_v26  ;;  %v1012_v11 = vmul.f32 %v3536_v15, %v948_v50  ;;  %v883_v21 = vmul.f32 1.0614054, %v3525_v51  ;;  %v3586_v26 = vpop.eup %2941  ;;  %v430_v62 = vpop.f32.mrf.mxu1 }
 0x10d   :  { %v695_v46 = vmul.f32 0.3275911, %v631_v7  ;;  %v1967_v49 = vsel %vm1839_vm6, %v1903_v31, %v1775_v23  ;;  %v1463_v18 = vsub.f32 0.0, %v631_v7  ;;  %v2033_v38 = vadd.f32 1.0, %v1969_v52 }
 0x10e   :  { %v2031_v54 = vadd.f32 1.0, %v1967_v49  ;;  %2327 = vmatmul.bf16.gmra.mxu2 %v2156_v17  ;;  %v1526_v53 = vmul.f32 %v1462_v36, %v630_v3  ;;  %v1074_v2 = vadd.f32 1.4214138, %v1010_v33  ;;  %v1076_v12 = vadd.f32 1.4214138, %v1012_v11  ;;  %v341_v3 = vpop.f32.mrf.mxu0 }
 0x10f   :  { %v759_v63 = vadd.f32 1.0, %v695_v46  ;;  %v2097_v1 = vmul.f32 %v2033_v38, %v3460_v58  ;;  %v1527_v10 = vmul.f32 %v1463_v18, %v631_v7  ;;  %v885_v16 = vmul.f32 1.0614054, %v3563_v41 }
 0x110   :  { %v2095_v40 = vmul.f32 %v2031_v54, %v3441_v47  ;;  %2943 = vrcp.f32 %v758_v56  ;;  %v633_v9 = vand.u32 2147483647, %v3572_v42  ;;  %v947_v23 = vadd.f32 -1.4531521, %v883_v21 }
 0x111   :  { %v696_v25 = vmul.f32 0.3275911, %v632_v57  ;;  %v1138_v32 = vmul.f32 %v3515_v20, %v1074_v2  ;;  %v1140_v47 = vmul.f32 %v3536_v15, %v1076_v12  ;;  %v949_v58 = vadd.f32 -1.4531521, %v885_v16 }
 0x112   :  { %v2157_v22 = vpack.c.bf16 %v2097_v1, %v2095_v40  ;;  %v1602_v7 = vmul.f32 1.442695, %v1526_v53  ;;  %v3589_v34 = vmul.f32 0.5, %v3541_v4  ;;  %v1464_v31 = vsub.f32 0.0, %v632_v57 }
 0x113   :  { %v1011_v30 = vmul.f32 %v3525_v51, %v947_v23  ;;  %2945 = vrcp.f32 %v759_v63  ;;  %v1202_v44 = vadd.f32 -0.28449672, %v1138_v32  ;;  %v1204_v45 = vadd.f32 -0.28449672, %v1140_v47 }
 0x114   :  { %2416 = vmatmul.bf16.gmra.mxu3 %v2157_v22  ;;  %v1013_v36 = vmul.f32 %v3563_v41, %v949_v58  ;;  %v697_v46 = vmul.f32 0.3275911, %v633_v9  ;;  %v1465_v49 = vsub.f32 0.0, %v633_v9  ;;  %v342_v50 = vadd.f32 %v341_v3, %v3335_v59 }
 0x115   :  { %v1075_v18 = vadd.f32 1.4214138, %v1011_v30  ;;  %v760_v17 = vadd.f32 1.0, %v696_v25  ;;  %v1266_v52 = vmul.f32 %v3515_v20, %v1202_v44  ;;  %v1268_v4 = vmul.f32 %v3536_v15, %v1204_v45  ;;  %v432_v45 = vpop.f32.mrf.mxu1 }
 0x116   :  { %390 = vmatmul.bf16.gmra.mxu0 %v2851_v6  ;;  %v1077_v54 = vadd.f32 1.4214138, %v1013_v36  ;;  %v3596_v56 = vpop.eup %2943  ;;  %v1604_v38 = vmul.f32 1.442695, %v1527_v10  ;;  %v1528_v33 = vmul.f32 %v1464_v31, %v632_v57  ;;  %v431_v11 = vadd.f32 %v430_v62, %v3347_v14 }
 0x117   :  { %479 = vmatmul.bf16.gmra.mxu1 %v2851_v6  ;;  %v1139_v21 = vmul.f32 %v3525_v51, %v1075_v18  ;;  %v3601_v53 = vmul.f32 0.5, %v3561_v19  ;;  %v1330_v63 = vadd.f32 0.2548296, %v1266_v52  ;;  %v1332_v40 = vadd.f32 0.2548296, %v1268_v4 }
 0x118   :  { %v1141_v1 = vmul.f32 %v3563_v41, %v1077_v54  ;;  %v761_v6 = vadd.f32 1.0, %v697_v46  ;;  %v1529_v2 = vmul.f32 %v1465_v49, %v633_v9  ;;  %v3606_v12 = vmul.f32 0.70710677, %v342_v50 }
 0x119   :  { %v1203_v57 = vadd.f32 -0.28449672, %v1139_v21  ;;  %v3608_v10 = vpop.eup %2945  ;;  %2947 = vrcp.f32 %v760_v17  ;;  %v1394_v16 = vmul.f32 %v3515_v20, %v1330_v63  ;;  %v1396_v19 = vmul.f32 %v3536_v15, %v1332_v40  ;;  %v343_v15 = vpop.f32.mrf.mxu0 }
 0x11a   :  { %v1205_v22 = vadd.f32 -0.28449672, %v1141_v1  ;;  %2949 = vpow2.f32 %v1602_v7  ;;  %v1606_v23 = vmul.f32 1.442695, %v1528_v33  ;;  %v3612_v25 = vmul.f32 0.70710677, %v431_v11 }
 0x11b   :  { %v1267_v3 = vmul.f32 %v3525_v51, %v1203_v57  ;;  %2951 = vpow2.f32 %v1604_v38  ;;  %v1714_v9 = vmul.f32 %v3548_v35, %v1394_v16  ;;  %v1716_v32 = vmul.f32 %v3574_v24, %v1396_v19 }
 0x11c   :  { %v1269_v47 = vmul.f32 %v3563_v41, %v1205_v22  ;;  %2953 = vrcp.f32 %v761_v6  ;;  %v3618_v58 = vmul.f32 0.5, %v342_v50  ;;  %v634_v20 = vand.u32 2147483647, %v3606_v12 }
 0x11d   :  { %v1331_v31 = vadd.f32 0.2548296, %v1267_v3  ;;  %v1608_v7 = vmul.f32 1.442695, %v1529_v2  ;;  %v1778_v30 = vsub.f32 1.0, %v1714_v9  ;;  %v1780_v62 = vsub.f32 1.0, %v1716_v32 }
 0x11e   :  { %v1333_v44 = vadd.f32 0.2548296, %v1269_v47  ;;  %2955 = vpow2.f32 %v1606_v23  ;;  %v3623_v35 = vmul.f32 0.5, %v431_v11  ;;  %v635_v24 = vand.u32 2147483647, %v3612_v25 }
 0x11f   :  { %v1395_v36 = vmul.f32 %v3525_v51, %v1331_v31  ;;  %v3627_v46 = vpop.eup %2947  ;;  %v344_v49 = vadd.f32 %v343_v15, %v3335_v59  ;;  %v1906_v50 = vsub.f32 0.0, %v1778_v30  ;;  %v1908_v18 = vsub.f32 0.0, %v1780_v62 }
 0x120   :  { %v1397_v17 = vmul.f32 %v3563_v41, %v1333_v44  ;;  %v3631_v52 = vpop.eup %2949  ;;  %v698_v4 = vmul.f32 0.3275911, %v634_v20  ;;  %v1466_v54 = vsub.f32 0.0, %v634_v20  ;;  %v886_v33 = vmul.f32 1.0614054, %v3596_v56 }
 0x121   :  { %v1715_v38 = vmul.f32 %v3553_v27, %v1395_v36  ;;  %v3635_v11 = vpop.eup %2951  ;;  %v3638_v51 = vadd.f32 %v432_v45, %v3347_v14  ;;  %v1970_v21 = vsel %vm1842_vm8, %v1906_v50, %v1778_v30  ;;  %v1972_v63 = vsel %vm1844_vm9, %v1908_v18, %v1780_v62  ;;  %v346_v31 = vpop.f32.mrf.mxu0 }
 0x122   :  { %v1717_v41 = vmul.f32 %v3586_v26, %v1397_v17  ;;  %v3645_v40 = vpop.eup %2953  ;;  %v2034_v1 = vadd.f32 1.0, %v1970_v21  ;;  %v2036_v6 = vadd.f32 1.0, %v1972_v63  ;;  %v888_v2 = vmul.f32 1.0614054, %v3627_v46  ;;  %v2852_v21 = vld [vmem:[#allocation3 + $0x78] sm:$0xff] }
 0x123   :  { %v1779_v27 = vsub.f32 1.0, %v1715_v38  ;;  %v699_v57 = vmul.f32 0.3275911, %v635_v24  ;;  %v1467_v16 = vsub.f32 0.0, %v635_v24  ;;  %v3648_v19 = vmul.f32 0.70710677, %v344_v49 }
 0x124   :  { %v1781_v22 = vsub.f32 1.0, %v1717_v41  ;;  %v3650_v23 = vpop.eup %2955  ;;  %v2098_v48 = vmul.f32 %v2034_v1, %v3467_v28  ;;  %v2100_v60 = vmul.f32 %v2036_v6, %v3503_v61  ;;  %v950_v26 = vadd.f32 -1.4531521, %v886_v33 }
 0x125   :  { %v1907_v3 = vsub.f32 0.0, %v1779_v27  ;;  %2957 = vpow2.f32 %v1608_v7  ;;  %v762_v9 = vadd.f32 1.0, %v698_v4  ;;  %v3655_v32 = vmul.f32 0.70710677, %v3638_v51 }
 0x126   :  { %v1909_v47 = vsub.f32 0.0, %v1781_v22  ;;  %v1530_v15 = vmul.f32 %v1466_v54, %v634_v20  ;;  %v2158_v30 = vpack.c.bf16 %v2100_v60, %v2098_v48  ;;  %v952_v44 = vadd.f32 -1.4531521, %v888_v2  ;;  %395 = vmatmul.bf16.gmra.mxu0 %v2852_v21 }
 0x127   :  { %v1971_v62 = vsel %vm1843_vm10, %v1907_v3, %v1779_v27  ;;  %v763_v45 = vadd.f32 1.0, %v699_v57  ;;  %v636_v28 = vand.u32 2147483647, %v3648_v19  ;;  %v1531_v7 = vmul.f32 %v1467_v16, %v635_v24  ;;  %484 = vmatmul.bf16.gmra.mxu1 %v2852_v21 }
 0x128   :  { %v1973_v61 = vsel %vm1845_vm11, %v1909_v47, %v1781_v22  ;;  %v2035_v36 = vadd.f32 1.0, %v1971_v62  ;;  %2332 = vmatmul.bf16.gmra.mxu2 %v2158_v30  ;;  %v1014_v18 = vmul.f32 %v3596_v56, %v950_v26  ;;  %v1016_v20 = vmul.f32 %v3627_v46, %v952_v44 }
 0x129   :  { %v2037_v50 = vadd.f32 1.0, %v1973_v61  ;;  %v3664_v17 = vmul.f32 0.5, %v344_v49  ;;  %v637_v0 = vand.u32 2147483647, %v3655_v32  ;;  %v3668_v4 = vadd.f32 %v346_v31, %v3335_v59  ;;  %v435_v49 = vpop.f32.mrf.mxu1 }
 0x12a   :  { %v887_v54 = vmul.f32 1.0614054, %v3608_v10  ;;  %v2099_v39 = vmul.f32 %v2035_v36, %v3479_v13  ;;  %v1078_v24 = vadd.f32 1.4214138, %v1014_v18  ;;  %v1080_v33 = vadd.f32 1.4214138, %v1016_v20 }
 0x12b   :  { %v2101_v38 = vmul.f32 %v2037_v50, %v3519_v43  ;;  %v3673_v63 = vpop.eup %2957  ;;  %2959 = vrcp.f32 %v762_v9  ;;  %v1468_v41 = vsub.f32 0.0, %v636_v28  ;;  %v889_v1 = vmul.f32 1.0614054, %v3645_v40 }
 0x12c   :  { %v951_v6 = vadd.f32 -1.4531521, %v887_v54  ;;  %v700_v27 = vmul.f32 0.3275911, %v636_v28  ;;  %v1142_v57 = vmul.f32 %v3596_v56, %v1078_v24  ;;  %v1144_v16 = vmul.f32 %v3627_v46, %v1080_v33  ;;  %v348_v33 = vpop.f32.mrf.mxu0 }
 0x12d   :  { %v2159_v2 = vpack.c.bf16 %v2101_v38, %v2099_v39  ;;  %v1469_v13 = vsub.f32 0.0, %v637_v0  ;;  %v3679_v43 = vmul.f32 0.70710677, %v3668_v4  ;;  %v953_v22 = vadd.f32 -1.4531521, %v889_v1 }
 0x12e   :  { %v1015_v48 = vmul.f32 %v3608_v10, %v951_v6  ;;  %v1610_v60 = vmul.f32 1.442695, %v1530_v15  ;;  %v3683_v3 = vadd.f32 %v435_v49, %v3347_v14  ;;  %v1206_v26 = vadd.f32 -0.28449672, %v1142_v57 }
 0x12f   :  { %2421 = vmatmul.bf16.gmra.mxu3 %v2159_v2  ;;  %v1208_v9 = vadd.f32 -0.28449672, %v1144_v16  ;;  %v1612_v47 = vmul.f32 1.442695, %v1531_v7  ;;  %v1532_v31 = vmul.f32 %v1468_v41, %v636_v28  ;;  %v1017_v30 = vmul.f32 %v3645_v40, %v953_v22 }
 0x130   :  { %v1079_v62 = vadd.f32 1.4214138, %v1015_v48  ;;  %v764_v44 = vadd.f32 1.0, %v700_v27  ;;  %v701_v61 = vmul.f32 0.3275911, %v637_v0  ;;  %v1270_v36 = vmul.f32 %v3596_v56, %v1206_v26 }
 0x131   :  { %v1272_v50 = vmul.f32 %v3627_v46, %v1208_v9  ;;  %v3688_v18 = vpop.eup %2959  ;;  %v1533_v15 = vmul.f32 %v1469_v13, %v637_v0  ;;  %v638_v20 = vand.u32 2147483647, %v3679_v43  ;;  %v1081_v54 = vadd.f32 1.4214138, %v1017_v30 }
 0x132   :  { %v1143_v39 = vmul.f32 %v3608_v10, %v1079_v62  ;;  %2961 = vrcp.f32 %v763_v45  ;;  %v3693_v28 = vmul.f32 0.70710677, %v3683_v3  ;;  %v1334_v7 = vadd.f32 0.2548296, %v1270_v36 }
 0x133   :  { %v1336_v38 = vadd.f32 0.2548296, %v1272_v50  ;;  %vm1846_vm12 = vcmp.lt.f32.partialorder %v3527_v29, 0.0  ;;  %vm1848_vm13 = vcmp.lt.f32.partialorder %v3558_v8, 0.0  ;;  %2963 = vpow2.f32 %v1610_v60 }
 0x134   :  { %v1614_v24 = vmul.f32 1.442695, %v1532_v31  ;;  %v1145_v0 = vmul.f32 %v3645_v40, %v1081_v54  ;;  %v1207_v21 = vadd.f32 -0.28449672, %v1143_v39  ;;  %2965 = vpow2.f32 %v1612_v47 }
 0x135   :  { %v765_v41 = vadd.f32 1.0, %v701_v61  ;;  %v1398_v49 = vmul.f32 %v3596_v56, %v1334_v7  ;;  %v1400_v45 = vmul.f32 %v3627_v46, %v1336_v38  ;;  %2967 = vrcp.f32 %v764_v44 }
 0x136   :  { %v1616_v1 = vmul.f32 1.442695, %v1533_v15  ;;  %v1209_v6 = vadd.f32 -0.28449672, %v1145_v0  ;;  %v1271_v27 = vmul.f32 %v3608_v10, %v1207_v21  ;;  %v1470_v2 = vsub.f32 0.0, %v638_v20  ;;  %v351_v0 = vpop.f32.mrf.mxu0 }
 0x137   :  { %v639_v57 = vand.u32 2147483647, %v3693_v28  ;;  %v1718_v16 = vmul.f32 %v3631_v52, %v1398_v49  ;;  %v1720_v13 = vmul.f32 %v3650_v23, %v1400_v45  ;;  %2969 = vpow2.f32 %v1614_v24  ;;  %v437_v23 = vpop.f32.mrf.mxu1 }
 0x138   :  { %v702_v22 = vmul.f32 0.3275911, %v638_v20  ;;  %v1273_v48 = vmul.f32 %v3645_v40, %v1209_v6  ;;  %v1335_v60 = vadd.f32 0.2548296, %v1271_v27  ;;  %v3705_v56 = vpop.eup %2961  ;;  %vm1847_vm14 = vcmp.lt.f32.partialorder %v3530_v5, 0.0 }
 0x139   :  { %2971 = vrcp.f32 %v765_v41  ;;  %v349_v46 = vadd.f32 %v348_v33, %v3335_v59  ;;  %v1782_v26 = vsub.f32 1.0, %v1718_v16  ;;  %v1784_v9 = vsub.f32 1.0, %v1720_v13  ;;  %v3709_v47 = vpop.eup %2963 }
 0x13a   :  { %v3712_v52 = vmul.f32 0.5, %v3638_v51  ;;  %2973 = vpow2.f32 %v1616_v1  ;;  %v1337_v31 = vadd.f32 0.2548296, %v1273_v48  ;;  %v1399_v30 = vmul.f32 %v3608_v10, %v1335_v60  ;;  %v3715_v62 = vpop.eup %2965 }
 0x13b   :  { %vm1849_vm15 = vcmp.lt.f32.partialorder %v3572_v42, 0.0  ;;  %v1534_v44 = vmul.f32 %v1470_v2, %v638_v20  ;;  %v1471_v61 = vsub.f32 0.0, %v639_v57  ;;  %v1910_v36 = vsub.f32 0.0, %v1782_v26  ;;  %v3718_v15 = vpop.eup %2967 }
 0x13c   :  { %v1912_v50 = vsub.f32 0.0, %v1784_v9  ;;  %v3721_v54 = vmul.f32 0.5, %v3668_v4  ;;  %v766_v51 = vadd.f32 1.0, %v702_v22  ;;  %v1401_v39 = vmul.f32 %v3645_v40, %v1337_v31 }
 0x13d   :  { %v1719_v7 = vmul.f32 %v3635_v11, %v1399_v30  ;;  %v3725_v38 = vmul.f32 0.70710677, %v349_v46  ;;  %v438_v10 = vadd.f32 %v437_v23, %v3347_v14  ;;  %v1974_v20 = vsel %vm1846_vm12, %v1910_v36, %v1782_v26  ;;  %v3732_v33 = vpop.eup %2969 }
 0x13e   :  { %v1976_v24 = vsel %vm1848_vm13, %v1912_v50, %v1784_v9  ;;  %v2038_v4 = vadd.f32 1.0, %v1974_v20  ;;  %v1721_v41 = vmul.f32 %v3673_v63, %v1401_v39  ;;  %v1618_v11 = vmul.f32 1.442695, %v1534_v44 }
 0x13f   :  { %v2040_v21 = vadd.f32 1.0, %v1976_v24  ;;  %v1783_v40 = vsub.f32 1.0, %v1719_v7  ;;  %v3735_v49 = vpop.eup %2971  ;;  %v703_v45 = vmul.f32 0.3275911, %v639_v57  ;;  %v1535_v1 = vmul.f32 %v1471_v61, %v639_v57  ;;  %v440_v50 = vpop.f32.mrf.mxu1 }
 0x140   :  { %v890_v6 = vmul.f32 1.0614054, %v3688_v18  ;;  %v3738_v29 = vpop.eup %2973  ;;  %v2102_v8 = vmul.f32 %v2038_v4, %v3533_v55  ;;  %v1785_v2 = vsub.f32 1.0, %v1721_v41  ;;  %2975 = vrcp.f32 %v766_v51 }
 0x141   :  { %v2104_v27 = vmul.f32 %v2040_v21, %v3589_v34  ;;  %v1911_v16 = vsub.f32 0.0, %v1783_v40  ;;  %v640_v13 = vand.u32 2147483647, %v3725_v38  ;;  %v3743_v63 = vmul.f32 0.70710677, %v438_v10 }
 0x142   :  { %v3746_v22 = vadd.f32 %v351_v0, %v3335_v59  ;;  %v1913_v57 = vsub.f32 0.0, %v1785_v2  ;;  %v892_v26 = vmul.f32 1.0614054, %v3718_v15  ;;  %2977 = vpow2.f32 %v1618_v11 }
 0x143   :  { %v2160_v48 = vpack.c.bf16 %v2104_v27, %v2102_v8  ;;  %v1975_v60 = vsel %vm1847_vm14, %v1911_v16, %v1783_v40  ;;  %v3752_v55 = vmul.f32 0.5, %v3683_v3  ;;  %v767_v34 = vadd.f32 1.0, %v703_v45  ;;  %v353_v40 = vpop.f32.mrf.mxu0 }
 0x144   :  { %v2039_v9 = vadd.f32 1.0, %v1975_v60  ;;  %v1620_v23 = vmul.f32 1.442695, %v1535_v1  ;;  %v1977_v31 = vsel %vm1849_vm15, %v1913_v57, %v1785_v2  ;;  %v954_v30 = vadd.f32 -1.4531521, %v890_v6 }
 0x145   :  { %2337 = vmatmul.bf16.gmra.mxu2 %v2160_v48  ;;  %v956_v44 = vadd.f32 -1.4531521, %v892_v26  ;;  %v3756_v61 = vmul.f32 0.5, %v349_v46  ;;  %v704_v36 = vmul.f32 0.3275911, %v640_v13  ;;  %v1472_v5 = vsub.f32 0.0, %v640_v13 }
 0x146   :  { %v2041_v51 = vadd.f32 1.0, %v1977_v31  ;;  %v641_v39 = vand.u32 2147483647, %v3743_v63  ;;  %v3760_v3 = vmul.f32 0.70710677, %v3746_v22  ;;  %v1018_v7 = vmul.f32 %v3688_v18, %v954_v30  ;;  %v3764_v24 = vpop.eup %2975 }
 0x147   :  { %v1020_v20 = vmul.f32 %v3718_v15, %v956_v44  ;;  %v2103_v42 = vmul.f32 %v2039_v9, %v3555_v37  ;;  %v891_v0 = vmul.f32 1.0614054, %v3705_v56  ;;  %v893_v4 = vmul.f32 1.0614054, %v3735_v49 }
 0x148   :  { %v2105_v46 = vmul.f32 %v2041_v51, %v3601_v53  ;;  %v3770_v21 = vmul.f32 0.5, %v438_v10  ;;  %v3773_v41 = vadd.f32 %v440_v50, %v3347_v14  ;;  %v1082_v11 = vadd.f32 1.4214138, %v1018_v7  ;;  %v3775_v1 = vpop.eup %2977 }
 0x149   :  { %v1084_v45 = vadd.f32 1.4214138, %v1020_v20  ;;  %v1536_v6 = vmul.f32 %v1472_v5, %v640_v13  ;;  %v955_v27 = vadd.f32 -1.4531521, %v891_v0  ;;  %v957_v37 = vadd.f32 -1.4531521, %v893_v4 }
 0x14a   :  { %v2161_v8 = vpack.c.bf16 %v2105_v46, %v2103_v42  ;;  %v768_v2 = vadd.f32 1.0, %v704_v36  ;;  %v1473_v53 = vsub.f32 0.0, %v641_v39  ;;  %v1146_v16 = vmul.f32 %v3688_v18, %v1082_v11  ;;  %v442_v42 = vpop.f32.mrf.mxu1 }
 0x14b   :  { %v1148_v48 = vmul.f32 %v3718_v15, %v1084_v45  ;;  %v705_v10 = vmul.f32 0.3275911, %v641_v39  ;;  %v642_v57 = vand.u32 2147483647, %v3760_v3  ;;  %v1019_v60 = vmul.f32 %v3705_v56, %v955_v27 }
 0x14c   :  { %2426 = vmatmul.bf16.gmra.mxu3 %v2161_v8  ;;  %v1021_v26 = vmul.f32 %v3735_v49, %v957_v37  ;;  %2979 = vrcp.f32 %v767_v34  ;;  %v3783_v13 = vmul.f32 0.70710677, %v3773_v41  ;;  %v1210_v9 = vadd.f32 -0.28449672, %v1146_v16 }
 0x14d   :  { %v1212_v31 = vadd.f32 -0.28449672, %v1148_v48  ;;  %2981 = vpow2.f32 %v1620_v23  ;;  %v1622_v30 = vmul.f32 1.442695, %v1536_v6  ;;  %v1083_v44 = vadd.f32 1.4214138, %v1019_v60 }
 0x14e   :  { %v1085_v36 = vadd.f32 1.4214138, %v1021_v26  ;;  %2983 = vrcp.f32 %v768_v2  ;;  %v1537_v5 = vmul.f32 %v1473_v53, %v641_v39  ;;  %v1274_v50 = vmul.f32 %v3688_v18, %v1210_v9  ;;  %v356_v2 = vpop.f32.mrf.mxu0 }
 0x14f   :  { %v1276_v51 = vmul.f32 %v3718_v15, %v1212_v31  ;;  %v769_v7 = vadd.f32 1.0, %v705_v10  ;;  %v706_v20 = vmul.f32 0.3275911, %v642_v57  ;;  %v1147_v34 = vmul.f32 %v3705_v56, %v1083_v44 }
 0x150   :  { %v1149_v46 = vmul.f32 %v3735_v49, %v1085_v36  ;;  %v643_v0 = vand.u32 2147483647, %v3783_v13  ;;  %v3791_v23 = vadd.f32 %v353_v40, %v3335_v59  ;;  %v1338_v4 = vadd.f32 0.2548296, %v1274_v50 }
 0x151   :  { %v1340_v11 = vadd.f32 0.2548296, %v1276_v51  ;;  %vm1850_vm0 = vcmp.lt.f32.partialorder %v3606_v12, 0.0  ;;  %vm1852_vm1 = vcmp.lt.f32.partialorder %v3648_v19, 0.0  ;;  %2985 = vpow2.f32 %v1622_v30 }
 0x152   :  { %v1474_v39 = vsub.f32 0.0, %v642_v57  ;;  %v1211_v45 = vadd.f32 -0.28449672, %v1147_v34  ;;  %v1213_v6 = vadd.f32 -0.28449672, %v1149_v46  ;;  %v3795_v8 = vpop.eup %2979  ;;  %v3798_v37 = vadd.f32 %v442_v42, %v3347_v14 }
 0x153   :  { %v1624_v27 = vmul.f32 1.442695, %v1537_v5  ;;  %v1402_v40 = vmul.f32 %v3688_v18, %v1338_v4  ;;  %v1404_v53 = vmul.f32 %v3718_v15, %v1340_v11  ;;  %v3802_v16 = vpop.eup %2981  ;;  %2987 = vrcp.f32 %v769_v7 }
 0x154   :  { %v3805_v48 = vmul.f32 0.5, %v3746_v22  ;;  %v1275_v10 = vmul.f32 %v3705_v56, %v1211_v45  ;;  %v1277_v60 = vmul.f32 %v3735_v49, %v1213_v6  ;;  %v3809_v26 = vpop.eup %2983  ;;  %v1475_v9 = vsub.f32 0.0, %v643_v0  ;;  %v445_v45 = vpop.f32.mrf.mxu1 }
 0x155   :  { %v3812_v31 = vmul.f32 0.70710677, %v3791_v23  ;;  %v1722_v18 = vmul.f32 %v3709_v47, %v1402_v40  ;;  %v1724_v15 = vmul.f32 %v3732_v33, %v1404_v53  ;;  %v770_v30 = vadd.f32 1.0, %v706_v20 }
 0x156   :  { %v1538_v44 = vmul.f32 %v1474_v39, %v642_v57  ;;  %v1339_v36 = vadd.f32 0.2548296, %v1275_v10  ;;  %v1341_v5 = vadd.f32 0.2548296, %v1277_v60  ;;  %vm1851_vm2 = vcmp.lt.f32.partialorder %v3612_v25, 0.0 }
 0x157   :  { %vm1853_vm3 = vcmp.lt.f32.partialorder %v3655_v32, 0.0  ;;  %2989 = vpow2.f32 %v1624_v27  ;;  %v3819_v22 = vmul.f32 0.70710677, %v3798_v37  ;;  %v1786_v50 = vsub.f32 1.0, %v1722_v18  ;;  %v3821_v7 = vpop.eup %2985 }
 0x158   :  { %v1788_v51 = vsub.f32 1.0, %v1724_v15  ;;  %v3824_v47 = vmul.f32 0.5, %v3773_v41  ;;  %v707_v33 = vmul.f32 0.3275911, %v643_v0  ;;  %v1403_v57 = vmul.f32 %v3705_v56, %v1339_v36 }
 0x159   :  { %v1405_v20 = vmul.f32 %v3735_v49, %v1341_v5  ;;  %v1539_v42 = vmul.f32 %v1475_v9, %v643_v0  ;;  %v644_v34 = vand.u32 2147483647, %v3812_v31  ;;  %v1914_v46 = vsub.f32 0.0, %v1786_v50  ;;  %v3829_v11 = vpop.eup %2987 }
 0x15a   :  { %v1916_v4 = vsub.f32 0.0, %v1788_v51  ;;  %2991 = vrcp.f32 %v770_v30  ;;  %v1626_v39 = vmul.f32 1.442695, %v1538_v44  ;;  %v1723_v6 = vmul.f32 %v3715_v62, %v1403_v57 }
 0x15b   :  { %v1725_v41 = vmul.f32 %v3738_v29, %v1405_v20  ;;  %v645_v27 = vand.u32 2147483647, %v3819_v22  ;;  %v3835_v56 = vadd.f32 %v356_v2, %v3335_v59  ;;  %v1978_v49 = vsel %vm1850_vm0, %v1914_v46, %v1786_v50  ;;  %v358_v2 = vpop.f32.mrf.mxu0 }
 0x15c   :  { %v1980_v0 = vsel %vm1852_vm1, %v1916_v4, %v1788_v51  ;;  %v2042_v40 = vadd.f32 1.0, %v1978_v49  ;;  %v1787_v10 = vsub.f32 1.0, %v1723_v6  ;;  %v771_v62 = vadd.f32 1.0, %v707_v33 }
 0x15d   :  { %v2044_v53 = vadd.f32 1.0, %v1980_v0  ;;  %v1789_v60 = vsub.f32 1.0, %v1725_v41  ;;  %v3841_v9 = vpop.eup %2989  ;;  %v1628_v18 = vmul.f32 1.442695, %v1539_v42  ;;  %v1476_v29 = vsub.f32 0.0, %v644_v34 }
 0x15e   :  { %v3844_v15 = vadd.f32 %v445_v45, %v3347_v14  ;;  %v2106_v30 = vmul.f32 %v2042_v40, %v3618_v58  ;;  %v1915_v44 = vsub.f32 0.0, %v1787_v10  ;;  %2993 = vpow2.f32 %v1626_v39 }
 0x15f   :  { %v2108_v12 = vmul.f32 %v2044_v53, %v3664_v17  ;;  %v1917_v19 = vsub.f32 0.0, %v1789_v60  ;;  %v3849_v36 = vmul.f32 0.5, %v3791_v23  ;;  %v708_v5 = vmul.f32 0.3275911, %v644_v34 }
 0x160   :  { %v3852_v50 = vmul.f32 0.70710677, %v3835_v56  ;;  %v3854_v51 = vpop.eup %2991  ;;  %v709_v33 = vmul.f32 0.3275911, %v645_v27  ;;  %v1979_v20 = vsel %vm1851_vm2, %v1915_v44, %v1787_v10  ;;  %v1477_v17 = vsub.f32 0.0, %v645_v27 }
 0x161   :  { %v2162_v57 = vpack.c.bf16 %v2108_v12, %v2106_v30  ;;  %v1981_v58 = vsel %vm1853_vm3, %v1917_v19, %v1789_v60  ;;  %v3861_v42 = vmul.f32 0.70710677, %v3844_v15  ;;  %v2043_v23 = vadd.f32 1.0, %v1979_v20 }
 0x162   :  { %v2045_v46 = vadd.f32 1.0, %v1981_v58  ;;  %v1540_v4 = vmul.f32 %v1476_v29, %v644_v34  ;;  %v894_v39 = vmul.f32 1.0614054, %v3764_v24  ;;  %v896_v45 = vmul.f32 1.0614054, %v3809_v26 }
 0x163   :  { %2342 = vmatmul.bf16.gmra.mxu2 %v2162_v57  ;;  %v895_v6 = vmul.f32 1.0614054, %v3795_v8  ;;  %v646_v25 = vand.u32 2147483647, %v3852_v50  ;;  %v2107_v41 = vmul.f32 %v2043_v23, %v3623_v35  ;;  %v897_v49 = vmul.f32 1.0614054, %v3829_v11  ;;  %v3876_v20 = vpop.f32.mrf.mxu0 }
 0x164   :  { %v2109_v32 = vmul.f32 %v2045_v46, %v3712_v52  ;;  %2995 = vrcp.f32 %v771_v62  ;;  %v958_v0 = vadd.f32 -1.4531521, %v894_v39  ;;  %v960_v40 = vadd.f32 -1.4531521, %v896_v45  ;;  %v3870_v34 = vpop.eup %2993 }
 0x165   :  { %v959_v53 = vadd.f32 -1.4531521, %v895_v6  ;;  %v772_v10 = vadd.f32 1.0, %v708_v5  ;;  %v1541_v60 = vmul.f32 %v1477_v17, %v645_v27  ;;  %v961_v30 = vadd.f32 -1.4531521, %v897_v49  ;;  %v447_v27 = vpop.f32.mrf.mxu1 }
 0x166   :  { %v2163_v29 = vpack.c.bf16 %v2109_v32, %v2107_v41  ;;  %v647_v12 = vand.u32 2147483647, %v3861_v42  ;;  %v1022_v44 = vmul.f32 %v3764_v24, %v958_v0  ;;  %v1024_v35 = vmul.f32 %v3809_v26, %v960_v40 }
 0x167   :  { %v1023_v52 = vmul.f32 %v3795_v8, %v959_v53  ;;  %v1630_v19 = vmul.f32 1.442695, %v1540_v4  ;;  %v773_v57 = vadd.f32 1.0, %v709_v33  ;;  %v1478_v62 = vsub.f32 0.0, %v646_v25 }
 0x168   :  { %2431 = vmatmul.bf16.gmra.mxu3 %v2163_v29  ;;  %v1025_v58 = vmul.f32 %v3829_v11, %v961_v30  ;;  %2997 = vpow2.f32 %v1628_v18  ;;  %v1086_v5 = vadd.f32 1.4214138, %v1022_v44  ;;  %v1088_v17 = vadd.f32 1.4214138, %v1024_v35 }
 0x169   :  { %v1087_v23 = vadd.f32 1.4214138, %v1023_v52  ;;  %2999 = vrcp.f32 %v772_v10  ;;  %v1632_v46 = vmul.f32 1.442695, %v1541_v60  ;;  %v710_v39 = vmul.f32 0.3275911, %v646_v25 }
 0x16a   :  { %v1089_v45 = vadd.f32 1.4214138, %v1025_v58  ;;  %v3879_v6 = vpop.eup %2995  ;;  %v1479_v41 = vsub.f32 0.0, %v647_v12  ;;  %v1150_v33 = vmul.f32 %v3764_v24, %v1086_v5  ;;  %v1152_v4 = vmul.f32 %v3809_v26, %v1088_v17 }
 0x16b   :  { %v1151_v32 = vmul.f32 %v3795_v8, %v1087_v23  ;;  %v1542_v49 = vmul.f32 %v1478_v62, %v646_v25  ;;  %v359_v18 = vadd.f32 %v358_v2, %v3335_v59  ;;  %v448_v0 = vadd.f32 %v447_v27, %v3347_v14 }
 0x16c   :  { %v1153_v40 = vmul.f32 %v3829_v11, %v1089_v45  ;;  %3001 = vpow2.f32 %v1630_v19  ;;  %v1214_v53 = vadd.f32 -0.28449672, %v1150_v33  ;;  %v1216_v10 = vadd.f32 -0.28449672, %v1152_v4 }
 0x16d   :  { %v1215_v60 = vadd.f32 -0.28449672, %v1151_v32  ;;  %3003 = vrcp.f32 %v773_v57  ;;  %v774_v29 = vadd.f32 1.0, %v710_v39  ;;  %v711_v30 = vmul.f32 0.3275911, %v647_v12 }
 0x16e   :  { %v1217_v44 = vadd.f32 -0.28449672, %v1153_v40  ;;  %v3887_v35 = vpop.eup %2997  ;;  %v1543_v52 = vmul.f32 %v1479_v41, %v647_v12  ;;  %v1278_v58 = vmul.f32 %v3764_v24, %v1214_v53  ;;  %v1280_v25 = vmul.f32 %v3809_v26, %v1216_v10  ;;  %v3905_v41 = vpop.f32.mrf.mxu0 }
 0x16f   :  { %v1279_v2 = vmul.f32 %v3795_v8, %v1215_v60  ;;  %v3892_v62 = vpop.eup %2999  ;;  %v1634_v27 = vmul.f32 1.442695, %v1542_v49  ;;  %v3894_v19 = vmul.f32 0.70710677, %v359_v18  ;;  %v3896_v5 = vmul.f32 0.70710677, %v448_v0 }
 0x170   :  { %v1281_v57 = vmul.f32 %v3829_v11, %v1217_v44  ;;  %3005 = vpow2.f32 %v1632_v46  ;;  %v1342_v17 = vadd.f32 0.2548296, %v1278_v58  ;;  %v1344_v23 = vadd.f32 0.2548296, %v1280_v25  ;;  %v450_v44 = vpop.f32.mrf.mxu1 }
 0x171   :  { %v1343_v39 = vadd.f32 0.2548296, %v1279_v2  ;;  %vm1854_vm4 = vcmp.lt.f32.partialorder %v3679_v43, 0.0  ;;  %vm1855_vm5 = vcmp.lt.f32.partialorder %v3693_v28, 0.0  ;;  %vm1856_vm6 = vcmp.lt.f32.partialorder %v3725_v38, 0.0 }
 0x172   :  { %v3903_v12 = vmul.f32 0.5, %v3798_v37  ;;  %3007 = vrcp.f32 %v774_v29  ;;  %v775_v45 = vadd.f32 1.0, %v711_v30  ;;  %v1345_v33 = vadd.f32 0.2548296, %v1281_v57  ;;  %v3907_v4 = vpop.eup %3001 }
 0x173   :  { %vm1857_vm7 = vcmp.lt.f32.partialorder %v3743_v63, 0.0  ;;  %v1636_v46 = vmul.f32 1.442695, %v1543_v52  ;;  %v1406_v32 = vmul.f32 %v3764_v24, %v1342_v17  ;;  %v1408_v49 = vmul.f32 %v3809_v26, %v1344_v23  ;;  %v3913_v53 = vpop.eup %3003 }
 0x174   :  { %v1407_v40 = vmul.f32 %v3795_v8, %v1343_v39  ;;  %v3916_v37 = vmul.f32 0.5, %v3835_v56  ;;  %3009 = vpow2.f32 %v1634_v27  ;;  %v648_v10 = vand.u32 2147483647, %v3894_v19 }
 0x175   :  { %v1409_v60 = vmul.f32 %v3829_v11, %v1345_v33  ;;  %v649_v29 = vand.u32 2147483647, %v3896_v5  ;;  %v1726_v30 = vmul.f32 %v3775_v1, %v1406_v32  ;;  %v1728_v24 = vmul.f32 %v3821_v7, %v1408_v49 }
 0x176   :  { %v1727_v26 = vmul.f32 %v3802_v16, %v1407_v40  ;;  %v3925_v8 = vmul.f32 0.5, %v3844_v15  ;;  %3011 = vrcp.f32 %v775_v45  ;;  %v3929_v56 = vadd.f32 %v3876_v20, %v3335_v59  ;;  %v3932_v11 = vpop.eup %3005 }
 0x177   :  { %v1729_v52 = vmul.f32 %v3841_v9, %v1409_v60  ;;  %3013 = vpow2.f32 %v1636_v46  ;;  %v1790_v58 = vsub.f32 1.0, %v1726_v30  ;;  %v1792_v1 = vsub.f32 1.0, %v1728_v24 }
 0x178   :  { %v1791_v25 = vsub.f32 1.0, %v1727_v26  ;;  %v3934_v7 = vpop.eup %3007  ;;  %v3936_v16 = vmul.f32 0.5, %v359_v18  ;;  %v712_v15 = vmul.f32 0.3275911, %v648_v10  ;;  %v3938_v2 = vmul.f32 0.5, %v448_v0 }
 0x179   :  { %v1793_v27 = vsub.f32 1.0, %v1729_v52  ;;  %v713_v57 = vmul.f32 0.3275911, %v649_v29  ;;  %v1918_v20 = vsub.f32 0.0, %v1790_v58  ;;  %v1920_v17 = vsub.f32 0.0, %v1792_v1  ;;  %v3957_v52 = vpop.f32.mrf.mxu0 }
 0x17a   :  { %v1919_v23 = vsub.f32 0.0, %v1791_v25  ;;  %v3940_v39 = vpop.eup %3009  ;;  %v1480_v9 = vsub.f32 0.0, %v648_v10  ;;  %v3943_v45 = vmul.f32 0.70710677, %v3929_v56  ;;  %v898_v46 = vmul.f32 1.0614054, %v3854_v51 }
 0x17b   :  { %v1921_v33 = vsub.f32 0.0, %v1793_v27  ;;  %v1982_v18 = vsel %vm1854_vm4, %v1918_v20, %v1790_v58  ;;  %v1984_v0 = vsel %vm1856_vm6, %v1920_v17, %v1792_v1  ;;  %v900_v49 = vmul.f32 1.0614054, %v3892_v62 }
 0x17c   :  { %v1983_v32 = vsel %vm1855_vm5, %v1919_v23, %v1791_v25  ;;  %v3953_v40 = vpop.eup %3011  ;;  %v2046_v60 = vadd.f32 1.0, %v1982_v18  ;;  %v2048_v30 = vadd.f32 1.0, %v1984_v0  ;;  %v776_v58 = vadd.f32 1.0, %v712_v15  ;;  %v452_v0 = vpop.f32.mrf.mxu1 }
 0x17d   :  { %v1985_v24 = vsel %vm1857_vm7, %v1921_v33, %v1793_v27  ;;  %v2047_v26 = vadd.f32 1.0, %v1983_v32  ;;  %v3959_v43 = vpop.eup %3013  ;;  %v1481_v38 = vsub.f32 0.0, %v649_v29  ;;  %v3962_v1 = vadd.f32 %v450_v44, %v3347_v14 }
 0x17e   :  { %v2049_v28 = vadd.f32 1.0, %v1985_v24  ;;  %v1544_v25 = vmul.f32 %v1480_v9, %v648_v10  ;;  %v2110_v20 = vmul.f32 %v2046_v60, %v3721_v54  ;;  %v2112_v17 = vmul.f32 %v2048_v30, %v3756_v61 }
 0x17f   :  { %v962_v23 = vadd.f32 -1.4531521, %v898_v46  ;;  %v650_v63 = vand.u32 2147483647, %v3943_v45  ;;  %v2111_v27 = vmul.f32 %v2047_v26, %v3752_v55  ;;  %v964_v18 = vadd.f32 -1.4531521, %v900_v49 }
 0x180   :  { %v2113_v33 = vmul.f32 %v2049_v28, %v3770_v21  ;;  %v2164_v15 = vpack.c.bf16 %v2112_v17, %v2110_v20  ;;  %v899_v44 = vmul.f32 1.0614054, %v3879_v6  ;;  %v901_v10 = vmul.f32 1.0614054, %v3913_v53 }
 0x181   :  { %v1026_v32 = vmul.f32 %v3854_v51, %v962_v23  ;;  %v777_v9 = vadd.f32 1.0, %v713_v57  ;;  %v3973_v54 = vmul.f32 0.70710677, %v3962_v1  ;;  %v1028_v46 = vmul.f32 %v3892_v62, %v964_v18 }
 0x182   :  { %v2165_v61 = vpack.c.bf16 %v2113_v33, %v2111_v27  ;;  %v1545_v60 = vmul.f32 %v1481_v38, %v649_v29  ;;  %2347 = vmatmul.bf16.gmra.mxu2 %v2164_v15  ;;  %v963_v21 = vadd.f32 -1.4531521, %v899_v44  ;;  %v965_v49 = vadd.f32 -1.4531521, %v901_v10  ;;  %v3986_v27 = vpop.f32.mrf.mxu0 }
 0x183   :  { %v1090_v55 = vadd.f32 1.4214138, %v1026_v32  ;;  %3015 = vrcp.f32 %v776_v58  ;;  %v1482_v30 = vsub.f32 0.0, %v650_v63  ;;  %v364_v24 = vadd.f32 %v3905_v41, %v3335_v59 }
 0x184   :  { %2436 = vmatmul.bf16.gmra.mxu3 %v2165_v61  ;;  %v1092_v26 = vadd.f32 1.4214138, %v1028_v46  ;;  %v714_v28 = vmul.f32 0.3275911, %v650_v63  ;;  %v1027_v20 = vmul.f32 %v3879_v6, %v963_v21  ;;  %v1029_v17 = vmul.f32 %v3913_v53, %v965_v49 }
 0x185   :  { %v1154_v57 = vmul.f32 %v3854_v51, %v1090_v55  ;;  %v1638_v23 = vmul.f32 1.442695, %v1544_v25  ;;  %v651_v29 = vand.u32 2147483647, %v3973_v54  ;;  %v3983_v38 = vadd.f32 %v452_v0, %v3347_v14 }
 0x186   :  { %v1156_v58 = vmul.f32 %v3892_v62, %v1092_v26  ;;  %3017 = vrcp.f32 %v777_v9  ;;  %v1091_v33 = vadd.f32 1.4214138, %v1027_v20  ;;  %v1093_v18 = vadd.f32 1.4214138, %v1029_v17 }
 0x187   :  { %v1218_v41 = vadd.f32 -0.28449672, %v1154_v57  ;;  %v1640_v15 = vmul.f32 1.442695, %v1545_v60  ;;  %v1546_v32 = vmul.f32 %v1482_v30, %v650_v63  ;;  %v3988_v44 = vmul.f32 0.70710677, %v364_v24  ;;  %v455_v63 = vpop.f32.mrf.mxu1 }
 0x188   :  { %v1220_v10 = vadd.f32 -0.28449672, %v1156_v58  ;;  %v778_v61 = vadd.f32 1.0, %v714_v28  ;;  %v1155_v46 = vmul.f32 %v3879_v6, %v1091_v33  ;;  %v1157_v0 = vmul.f32 %v3913_v53, %v1093_v18 }
 0x189   :  { %v1282_v25 = vmul.f32 %v3854_v51, %v1218_v41  ;;  %v3993_v55 = vpop.eup %3015  ;;  %v715_v9 = vmul.f32 0.3275911, %v651_v29  ;;  %v1483_v21 = vsub.f32 0.0, %v651_v29  ;;  %v3996_v49 = vmul.f32 0.70710677, %v3983_v38 }
 0x18a   :  { %v1284_v60 = vmul.f32 %v3892_v62, %v1220_v10  ;;  %3019 = vpow2.f32 %v1638_v23  ;;  %v1219_v26 = vadd.f32 -0.28449672, %v1155_v46  ;;  %v1221_v28 = vadd.f32 -0.28449672, %v1157_v0 }
 0x18b   :  { %v1346_v30 = vadd.f32 0.2548296, %v1282_v25  ;;  %vm1858_vm8 = vcmp.lt.f32.partialorder %v3760_v3, 0.0  ;;  %3021 = vpow2.f32 %v1640_v15  ;;  %v1642_v57 = vmul.f32 1.442695, %v1546_v32 }
 0x18c   :  { %v652_v20 = vand.u32 2147483647, %v3988_v44  ;;  %v1348_v17 = vadd.f32 0.2548296, %v1284_v60  ;;  %v4001_v58 = vpop.eup %3017  ;;  %vm1860_vm9 = vcmp.lt.f32.partialorder %v3812_v31, 0.0  ;;  %v4005_v41 = vmul.f32 0.5, %v3929_v56 }
 0x18d   :  { %v1410_v23 = vmul.f32 %v3854_v51, %v1346_v30  ;;  %v1283_v33 = vmul.f32 %v3879_v6, %v1219_v26  ;;  %v1285_v18 = vmul.f32 %v3913_v53, %v1221_v28  ;;  %3023 = vrcp.f32 %v778_v61  ;;  %v4025_v30 = vpop.f32.mrf.mxu0 }
 0x18e   :  { %v779_v10 = vadd.f32 1.0, %v715_v9  ;;  %v1547_v15 = vmul.f32 %v1483_v21, %v651_v29  ;;  %v1412_v32 = vmul.f32 %v3892_v62, %v1348_v17  ;;  %v653_v25 = vand.u32 2147483647, %v3996_v49 }
 0x18f   :  { %v1730_v46 = vmul.f32 %v3870_v34, %v1410_v23  ;;  %v1347_v0 = vadd.f32 0.2548296, %v1283_v33  ;;  %v1349_v60 = vadd.f32 0.2548296, %v1285_v18  ;;  %vm1859_vm10 = vcmp.lt.f32.partialorder %v3783_v13, 0.0 }
 0x190   :  { %vm1861_vm11 = vcmp.lt.f32.partialorder %v3819_v22, 0.0  ;;  %3025 = vpow2.f32 %v1642_v57  ;;  %v4016_v51 = vmul.f32 0.5, %v3962_v1  ;;  %v1484_v56 = vsub.f32 0.0, %v652_v20  ;;  %v4019_v29 = vpop.eup %3019 }
 0x191   :  { %v1732_v61 = vmul.f32 %v3907_v4, %v1412_v32  ;;  %v4021_v62 = vmul.f32 0.5, %v364_v24  ;;  %v1794_v9 = vsub.f32 1.0, %v1730_v46  ;;  %v1411_v34 = vmul.f32 %v3879_v6, %v1347_v0  ;;  %v4027_v26 = vpop.eup %3021 }
 0x192   :  { %v1413_v21 = vmul.f32 %v3913_v53, %v1349_v60  ;;  %3027 = vrcp.f32 %v779_v10  ;;  %v1644_v28 = vmul.f32 1.442695, %v1547_v15  ;;  %v4031_v1 = vadd.f32 %v3957_v52, %v3335_v59  ;;  %v457_v15 = vpop.f32.mrf.mxu1 }
 0x193   :  { %v1796_v4 = vsub.f32 1.0, %v1732_v61  ;;  %v1485_v57 = vsub.f32 0.0, %v653_v25  ;;  %v1922_v17 = vsub.f32 0.0, %v1794_v9  ;;  %v1731_v24 = vmul.f32 %v3887_v35, %v1411_v34  ;;  %v4035_v6 = vpop.eup %3023 }
 0x194   :  { %v1733_v23 = vmul.f32 %v3932_v11, %v1413_v21  ;;  %v716_v53 = vmul.f32 0.3275911, %v652_v20  ;;  %v1548_v33 = vmul.f32 %v1484_v56, %v652_v20  ;;  %v717_v18 = vmul.f32 0.3275911, %v653_v25 }
 0x195   :  { %v1924_v32 = vsub.f32 0.0, %v1796_v4  ;;  %v4038_v10 = vmul.f32 0.5, %v3983_v38  ;;  %v1986_v52 = vsel %vm1858_vm8, %v1922_v17, %v1794_v9  ;;  %v1795_v46 = vsub.f32 1.0, %v1731_v24 }
 0x196   :  { %v1797_v0 = vsub.f32 1.0, %v1733_v23  ;;  %v4042_v60 = vpop.eup %3025  ;;  %v4045_v35 = vmul.f32 0.70710677, %v4031_v1  ;;  %v4048_v11 = vadd.f32 %v455_v63, %v3347_v14  ;;  %v2050_v56 = vadd.f32 1.0, %v1986_v52 }
 0x197   :  { %4965 = vst [vmem:[#allocation16_spill] sm:$0xff] %v4038_v10  ;;  %v1988_v20 = vsel %vm1860_vm9, %v1924_v32, %v1796_v4  ;;  %v1549_v38 = vmul.f32 %v1485_v57, %v653_v25  ;;  %v1923_v34 = vsub.f32 0.0, %v1795_v46  ;;  %3029 = vpow2.f32 %v1644_v28 }
 0x198   :  { %v2052_v61 = vadd.f32 1.0, %v1988_v20  ;;  %v1925_v21 = vsub.f32 0.0, %v1797_v0  ;;  %v4052_v3 = vpop.eup %3027  ;;  %v780_v9 = vadd.f32 1.0, %v716_v53  ;;  %v1646_v17 = vmul.f32 1.442695, %v1548_v33 }
 0x199   :  { %v781_v24 = vadd.f32 1.0, %v717_v18  ;;  %v2114_v23 = vmul.f32 %v2050_v56, %v3805_v48  ;;  %v1987_v63 = vsel %vm1859_vm10, %v1923_v34, %v1795_v46  ;;  %v654_v25 = vand.u32 2147483647, %v4045_v35  ;;  %v4064_v18 = vpop.f32.mrf.mxu0 }
 0x19a   :  { %v2116_v10 = vmul.f32 %v2052_v61, %v3849_v36  ;;  %v1989_v31 = vsel %vm1861_vm11, %v1925_v21, %v1797_v0  ;;  %v4062_v4 = vmul.f32 0.70710677, %v4048_v11  ;;  %v2051_v57 = vadd.f32 1.0, %v1987_v63  ;;  %v4079_v34 = vpop.f32.mrf.mxu1 }
 0x19b   :  { %v2053_v28 = vadd.f32 1.0, %v1989_v31  ;;  %v1648_v53 = vmul.f32 1.442695, %v1549_v38  ;;  %v902_v48 = vmul.f32 1.0614054, %v3934_v7  ;;  %v4070_v13 = vadd.f32 %v3986_v27, %v3335_v59 }
 0x19c   :  { %4966 = vst [vmem:[#allocation17_spill] sm:$0xff] %v4062_v4  ;;  %v2166_v33 = vpack.c.bf16 %v2116_v10, %v2114_v23  ;;  %v904_v36 = vmul.f32 1.0614054, %v3993_v55  ;;  %v2115_v22 = vmul.f32 %v2051_v57, %v3824_v47  ;;  %v903_v52 = vmul.f32 1.0614054, %v3953_v40 }
 0x19d   :  { %v2117_v32 = vmul.f32 %v2053_v28, %v3903_v12  ;;  %3031 = vrcp.f32 %v780_v9  ;;  %v966_v46 = vadd.f32 -1.4531521, %v902_v48  ;;  %v905_v0 = vmul.f32 1.0614054, %v4001_v58  ;;  %v4076_v20 = vpop.eup %3029 }
 0x19e   :  { %2352 = vmatmul.bf16.gmra.mxu2 %v2166_v33  ;;  %v968_v10 = vadd.f32 -1.4531521, %v904_v36  ;;  %v1486_v56 = vsub.f32 0.0, %v654_v25  ;;  %v655_v38 = vand.u32 2147483647, %v4062_v4  ;;  %3033 = vpow2.f32 %v1646_v17 }
 0x19f   :  { %v2167_v61 = vpack.c.bf16 %v2117_v32, %v2115_v22  ;;  %v967_v27 = vadd.f32 -1.4531521, %v903_v52  ;;  %v1030_v47 = vmul.f32 %v3934_v7, %v966_v46  ;;  %v969_v21 = vadd.f32 -1.4531521, %v905_v0 }
 0x1a0   :  { %v1032_v12 = vmul.f32 %v3993_v55, %v968_v10  ;;  %3035 = vrcp.f32 %v781_v24  ;;  %v4084_v9 = vmul.f32 0.70710677, %v4070_v13  ;;  %v4087_v23 = vadd.f32 %v457_v15, %v3347_v14 }
 0x1a1   :  { %2441 = vmatmul.bf16.gmra.mxu3 %v2167_v61  ;;  %v1031_v63 = vmul.f32 %v3953_v40, %v967_v27  ;;  %v718_v31 = vmul.f32 0.3275911, %v654_v25  ;;  %v1094_v57 = vadd.f32 1.4214138, %v1030_v47  ;;  %v1033_v28 = vmul.f32 %v4001_v58, %v969_v21 }
 0x1a2   :  { %4967 = vst [vmem:[#allocation18_spill] sm:$0xff] %v4084_v9  ;;  %v1096_v17 = vadd.f32 1.4214138, %v1032_v12  ;;  %3037 = vpow2.f32 %v1648_v53  ;;  %v1550_v33 = vmul.f32 %v1486_v56, %v654_v25  ;;  %v1487_v48 = vsub.f32 0.0, %v655_v38  ;;  %v4106_v12 = vpop.f32.mrf.mxu0 }
 0x1a3   :  { %v1095_v36 = vadd.f32 1.4214138, %v1031_v63  ;;  %v4091_v22 = vpop.eup %3031  ;;  %v719_v24 = vmul.f32 0.3275911, %v655_v38  ;;  %v1158_v32 = vmul.f32 %v3934_v7, %v1094_v57  ;;  %v1097_v52 = vadd.f32 1.4214138, %v1033_v28 }
 0x1a4   :  { %v1160_v15 = vmul.f32 %v3993_v55, %v1096_v17  ;;  %v4096_v46 = vmul.f32 0.5, %v4031_v1  ;;  %v656_v10 = vand.u32 2147483647, %v4084_v9  ;;  %v4100_v0 = vmul.f32 0.70710677, %v4087_v23  ;;  %v4103_v53 = vpop.eup %3033 }
 0x1a5   :  { %v1159_v25 = vmul.f32 %v3953_v40, %v1095_v36  ;;  %v782_v56 = vadd.f32 1.0, %v718_v31  ;;  %v1222_v61 = vadd.f32 -0.28449672, %v1158_v32  ;;  %v1161_v47 = vmul.f32 %v4001_v58, %v1097_v52 }
 0x1a6   :  { %4968 = vst [vmem:[#allocation19_spill] sm:$0xff] %v4096_v46  ;;  %v1224_v27 = vadd.f32 -0.28449672, %v1160_v15  ;;  %v4108_v21 = vpop.eup %3035  ;;  %v1650_v1 = vmul.f32 1.442695, %v1550_v33  ;;  %v4111_v63 = vmul.f32 0.5, %v4048_v11  ;;  %v1551_v57 = vmul.f32 %v1487_v48, %v655_v38  ;;  %v4119_v33 = vpop.f32.mrf.mxu1 }
 0x1a7   :  { %v1223_v17 = vadd.f32 -0.28449672, %v1159_v25  ;;  %v783_v28 = vadd.f32 1.0, %v719_v24  ;;  %v1286_v36 = vmul.f32 %v3934_v7, %v1222_v61  ;;  %v1225_v31 = vadd.f32 -0.28449672, %v1161_v47 }
 0x1a8   :  { %v1288_v4 = vmul.f32 %v3993_v55, %v1224_v27  ;;  %v4115_v32 = vpop.eup %3037  ;;  %v720_v15 = vmul.f32 0.3275911, %v656_v10  ;;  %v1488_v52 = vsub.f32 0.0, %v656_v10  ;;  %v657_v46 = vand.u32 2147483647, %v4100_v0 }
 0x1a9   :  { %v1287_v9 = vmul.f32 %v3953_v40, %v1223_v17  ;;  %3039 = vrcp.f32 %v782_v56  ;;  %v1350_v11 = vadd.f32 0.2548296, %v1286_v36  ;;  %v1289_v48 = vmul.f32 %v4001_v58, %v1225_v31 }
 0x1aa   :  { %v1352_v38 = vadd.f32 0.2548296, %v1288_v4  ;;  %vm1862_vm12 = vcmp.lt.f32.partialorder %v3852_v50, 0.0  ;;  %vm1864_vm13 = vcmp.lt.f32.partialorder %v3894_v19, 0.0  ;;  %3041 = vpow2.f32 %v1650_v1 }
 0x1ab   :  { %v1652_v24 = vmul.f32 1.442695, %v1551_v57  ;;  %v4126_v25 = vadd.f32 %v4025_v30, %v3335_v59  ;;  %v1351_v61 = vadd.f32 0.2548296, %v1287_v9  ;;  %vm1863_vm14 = vcmp.lt.f32.partialorder %v3861_v42, 0.0 }
 0x1ac   :  { %3043 = vrcp.f32 %v783_v28  ;;  %v1414_v56 = vmul.f32 %v3934_v7, %v1350_v11  ;;  %v1416_v4 = vmul.f32 %v3993_v55, %v1352_v38  ;;  %v1353_v27 = vadd.f32 0.2548296, %v1289_v48 }
 0x1ad   :  { %vm1865_vm15 = vcmp.lt.f32.partialorder %v3896_v5, 0.0  ;;  %v784_v47 = vadd.f32 1.0, %v720_v15  ;;  %v1552_v17 = vmul.f32 %v1488_v52, %v656_v10  ;;  %v721_v36 = vmul.f32 0.3275911, %v657_v46 }
 0x1ae   :  { %v1415_v1 = vmul.f32 %v3953_v40, %v1351_v61  ;;  %v1489_v57 = vsub.f32 0.0, %v657_v46  ;;  %v1734_v30 = vmul.f32 %v3940_v39, %v1414_v56  ;;  %v1736_v9 = vmul.f32 %v4019_v29, %v1416_v4  ;;  %v4146_v39 = vpop.f32.mrf.mxu0 }
 0x1af   :  { %v1417_v31 = vmul.f32 %v4001_v58, %v1353_v27  ;;  %3045 = vpow2.f32 %v1652_v24  ;;  %v4137_v7 = vmul.f32 0.5, %v4070_v13  ;;  %v4140_v55 = vmul.f32 0.70710677, %v4126_v25  ;;  %v4143_v10 = vpop.eup %3039 }
 0x1b0   :  { %v1735_v28 = vmul.f32 %v3959_v43, %v1415_v1  ;;  %v1798_v15 = vsub.f32 1.0, %v1734_v30  ;;  %v1800_v40 = vsub.f32 1.0, %v1736_v9  ;;  %v906_v29 = vmul.f32 1.0614054, %v4035_v6  ;;  %v4149_v58 = vpop.eup %3041 }
 0x1b1   :  { %4969 = vst [vmem:[#allocation20_spill] sm:$0xff] %v4140_v55  ;;  %v1737_v52 = vmul.f32 %v4027_v26, %v1417_v31  ;;  %3047 = vrcp.f32 %v784_v47  ;;  %v1654_v13 = vmul.f32 1.442695, %v1552_v17  ;;  %v785_v11 = vadd.f32 1.0, %v721_v36 }
 0x1b2   :  { %v1799_v38 = vsub.f32 1.0, %v1735_v28  ;;  %v4151_v48 = vpop.eup %3043  ;;  %v1553_v24 = vmul.f32 %v1489_v57, %v657_v46  ;;  %v1926_v43 = vsub.f32 0.0, %v1798_v15  ;;  %v1928_v61 = vsub.f32 0.0, %v1800_v40  ;;  %v4163_v46 = vpop.f32.mrf.mxu1 }
 0x1b3   :  { %v1801_v56 = vsub.f32 1.0, %v1737_v52  ;;  %v658_v4 = vand.u32 2147483647, %v4140_v55  ;;  %v4156_v26 = vadd.f32 %v4079_v34, %v3347_v14  ;;  %v908_v1 = vmul.f32 1.0614054, %v4091_v22 }
 0x1b4   :  { %v1927_v27 = vsub.f32 0.0, %v1799_v38  ;;  %v1990_v47 = vsel %vm1862_vm12, %v1926_v43, %v1798_v15  ;;  %v1992_v17 = vsel %vm1864_vm13, %v1928_v61, %v1800_v40  ;;  %v970_v57 = vadd.f32 -1.4531521, %v906_v29 }
 0x1b5   :  { %v1929_v36 = vsub.f32 0.0, %v1801_v56  ;;  %v4165_v30 = vpop.eup %3045  ;;  %3049 = vpow2.f32 %v1654_v13  ;;  %v2054_v9 = vadd.f32 1.0, %v1990_v47  ;;  %v2056_v31 = vadd.f32 1.0, %v1992_v17  ;;  %v2412_v47 = vpop.f32.mrf.mxu3 }
 0x1b6   :  { %v1991_v34 = vsel %vm1863_vm14, %v1927_v27, %v1799_v38  ;;  %v4170_v28 = vmul.f32 0.5, %v4087_v23  ;;  %3051 = vrcp.f32 %v785_v11  ;;  %v4177_v40 = vmul.f32 0.70710677, %v4156_v26  ;;  %v2323_v27 = vpop.f32.mrf.mxu2 }
 0x1b7   :  { %v1993_v50 = vsel %vm1865_vm15, %v1929_v36, %v1801_v56  ;;  %v2055_v19 = vadd.f32 1.0, %v1991_v34  ;;  %v4174_v15 = vpop.eup %3047  ;;  %v2118_v52 = vmul.f32 %v2054_v9, %v3916_v37  ;;  %v2120_v29 = vmul.f32 %v2056_v31, %v3936_v16  ;;  %v4187_v37 = vld [vmem:[%s4934_s4] ss:$0 sm:$0xff]  ;;  %v381_v36 = vpop.f32.mrf.mxu0 }
 0x1b8   :  { %4970 = vst [vmem:[#allocation21_spill] sm:$0xff] %v4177_v40  ;;  %v2057_v13 = vadd.f32 1.0, %v1993_v50  ;;  %v1656_v42 = vmul.f32 1.442695, %v1553_v24  ;;  %v722_v38 = vmul.f32 0.3275911, %v658_v4  ;;  %v1034_v23 = vmul.f32 %v4035_v6, %v970_v57 }
 0x1b9   :  { %v972_v43 = vadd.f32 -1.4531521, %v908_v1  ;;  %v1490_v11 = vsub.f32 0.0, %v658_v4  ;;  %v2168_v61 = vpack.c.bf16 %v2120_v29, %v2118_v52  ;;  %v2119_v5 = vmul.f32 %v2055_v19, %v3925_v8 }
 0x1ba   :  { %v2121_v56 = vmul.f32 %v2057_v13, %v3938_v2  ;;  %v1098_v24 = vadd.f32 1.4214138, %v1034_v23  ;;  %v907_v1 = vmul.f32 1.0614054, %v4052_v3  ;;  %v909_v17 = vmul.f32 1.0614054, %v4108_v21 }
 0x1bb   :  { %v1036_v16 = vmul.f32 %v4091_v22, %v972_v43  ;;  %v4192_v57 = vpop.eup %3049  ;;  %v659_v8 = vand.u32 2147483647, %v4177_v40  ;;  %2357 = vmatmul.bf16.gmra.mxu2 %v2168_v61  ;;  %v2413_v9 = vadd.f32 %v2412_v47, %v2323_v27  ;;  %v4196_v31 = vadd.f32 %v381_v36, %v3335_v59  ;;  %v4203_v61 = vpop.f32.mrf.mxu1 }
 0x1bc   :  { %v2169_v2 = vpack.c.bf16 %v2121_v56, %v2119_v5  ;;  %v4198_v34 = vpop.eup %3051  ;;  %v1162_v19 = vmul.f32 %v4035_v6, %v1098_v24  ;;  %v971_v52 = vadd.f32 -1.4531521, %v907_v1  ;;  %v973_v29 = vadd.f32 -1.4531521, %v909_v17 }
 0x1bd   :  { %v1100_v50 = vadd.f32 1.4214138, %v1036_v16  ;;  %v786_v13 = vadd.f32 1.0, %v722_v38  ;;  %v1554_v43 = vmul.f32 %v1490_v11, %v658_v4  ;;  %v2560_v23 = vadd.f32 %v4187_v37, %v2413_v9 }
 0x1be   :  { %2446 = vmatmul.bf16.gmra.mxu3 %v2169_v2  ;;  %v910_v40 = vmul.f32 1.0614054, %v4143_v10  ;;  %v1226_v56 = vadd.f32 -0.28449672, %v1162_v19  ;;  %v1035_v27 = vmul.f32 %v4052_v3, %v971_v52  ;;  %v1037_v47 = vmul.f32 %v4108_v21, %v973_v29 }
 0x1bf   :  { %v1164_v5 = vmul.f32 %v4091_v22, %v1100_v50  ;;  %3053 = vpow2.f32 %v1656_v42  ;;  %v4210_v16 = vadd.f32 %v4064_v18, %v3335_v59  ;;  %2592 = vst [vmem:[#allocation11] sm:$0xff] %v2560_v23  ;;  %v4213_v4 = vmul.f32 0.70710677, %v4196_v31 }
 0x1c0   :  { %v912_v38 = vmul.f32 1.0614054, %v4174_v15  ;;  %v1290_v24 = vmul.f32 %v4035_v6, %v1226_v56  ;;  %v1099_v1 = vadd.f32 1.4214138, %v1035_v27  ;;  %v1101_v17 = vadd.f32 1.4214138, %v1037_v47 }
 0x1c1   :  { %4971 = vst [vmem:[#allocation22_spill] sm:$0xff] %v4213_v4  ;;  %v1228_v11 = vadd.f32 -0.28449672, %v1164_v5  ;;  %3055 = vrcp.f32 %v786_v13  ;;  %v1658_v36 = vmul.f32 1.442695, %v1554_v43  ;;  %v1491_v2 = vsub.f32 0.0, %v659_v8 }
 0x1c2   :  { %v974_v9 = vadd.f32 -1.4531521, %v910_v40  ;;  %v1354_v50 = vadd.f32 0.2548296, %v1290_v24  ;;  %v1163_v18 = vmul.f32 %v4052_v3, %v1099_v1  ;;  %v1165_v19 = vmul.f32 %v4108_v21, %v1101_v17 }
 0x1c3   :  { %v1292_v42 = vmul.f32 %v4091_v22, %v1228_v11  ;;  %vm1866_vm0 = vcmp.lt.f32.partialorder %v3943_v45, 0.0  ;;  %v4222_v52 = vmul.f32 0.70710677, %v4210_v16  ;;  %v4225_v29 = vand.u32 2147483647, %v4213_v4  ;;  %v2414_v4 = vpop.f32.mrf.mxu3 }
 0x1c4   :  { %v976_v23 = vadd.f32 -1.4531521, %v912_v38  ;;  %v1038_v13 = vmul.f32 %v4143_v10, %v974_v9  ;;  %v1418_v40 = vmul.f32 %v4035_v6, %v1354_v50  ;;  %v1227_v5 = vadd.f32 -0.28449672, %v1163_v18 }
 0x1c5   :  { %4972 = vst [vmem:[#allocation23_spill] sm:$0xff] %v4222_v52  ;;  %v1356_v43 = vadd.f32 0.2548296, %v1292_v42  ;;  %v1229_v56 = vadd.f32 -0.28449672, %v1165_v19  ;;  %v4229_v27 = vpop.eup %3053  ;;  %vm1868_vm1 = vcmp.lt.f32.partialorder %v3988_v44, 0.0  ;;  %3057 = vpow2.f32 %v1658_v36 }
 0x1c6   :  { %v723_v47 = vmul.f32 0.3275911, %v659_v8  ;;  %v4234_v11 = vadd.f32 %v4119_v33, %v3347_v14  ;;  %v1040_v24 = vmul.f32 %v4174_v15, %v976_v23  ;;  %v1738_v1 = vmul.f32 %v4042_v60, %v1418_v40 }
 0x1c7   :  { %v1420_v38 = vmul.f32 %v4091_v22, %v1356_v43  ;;  %v1291_v6 = vmul.f32 %v4052_v3, %v1227_v5  ;;  %v1293_v17 = vmul.f32 %v4108_v21, %v1229_v56  ;;  %v4241_v9 = vpop.eup %3055  ;;  %v1555_v42 = vmul.f32 %v1491_v2, %v659_v8  ;;  %v470_v22 = vpop.f32.mrf.mxu1 }
 0x1c8   :  { %v660_v36 = vand.u32 2147483647, %v4222_v52  ;;  %v730_v50 = vmul.f32 0.3275911, %v4225_v29  ;;  %v1102_v18 = vadd.f32 1.4214138, %v1038_v13  ;;  %v4252_v8 = vadd.f32 %v470_v22, %v3347_v14 }
 0x1c9   :  { %v1740_v33 = vmul.f32 %v4103_v53, %v1420_v38  ;;  %v1802_v19 = vsub.f32 1.0, %v1738_v1  ;;  %v1355_v23 = vadd.f32 0.2548296, %v1291_v6  ;;  %v1357_v55 = vadd.f32 0.2548296, %v1293_v17 }
 0x1ca   :  { %vm1867_vm2 = vcmp.lt.f32.partialorder %v3973_v54, 0.0  ;;  %vm1869_vm3 = vcmp.lt.f32.partialorder %v3996_v49, 0.0  ;;  %v787_v60 = vadd.f32 1.0, %v723_v47  ;;  %v4249_v43 = vmul.f32 0.70710677, %v4234_v11  ;;  %4974 = vst [vmem:[#allocation25_spill] sm:$0xff] %v4252_v8 }
 0x1cb   :  { %v1104_v2 = vadd.f32 1.4214138, %v1040_v24  ;;  %v1804_v40 = vsub.f32 1.0, %v1740_v33  ;;  %v1930_v13 = vsub.f32 0.0, %v1802_v19  ;;  %v1419_v53 = vmul.f32 %v4052_v3, %v1355_v23  ;;  %v4256_v56 = vpop.eup %3057  ;;  %v2325_v33 = vpop.f32.mrf.mxu2 }
 0x1cc   :  { %4973 = vst [vmem:[#allocation24_spill] sm:$0xff] %v4249_v43  ;;  %v1421_v5 = vmul.f32 %v4108_v21, %v1357_v55  ;;  %v1660_v38 = vmul.f32 1.442695, %v1555_v42  ;;  %v1492_v1 = vsub.f32 0.0, %v660_v36  ;;  %v794_v6 = vadd.f32 1.0, %v730_v50 }
 0x1cd   :  { %4975 = vst [vmem:[#allocation26_spill] sm:$0xff] %v4256_v56  ;;  %v1166_v47 = vmul.f32 %v4143_v10, %v1102_v18  ;;  %v1932_v17 = vsub.f32 0.0, %v1804_v40  ;;  %v1994_v52 = vsel %vm1866_vm0, %v1930_v13, %v1802_v19  ;;  %v1739_v22 = vmul.f32 %v4076_v20, %v1419_v53 }
 0x1ce   :  { %v1741_v24 = vmul.f32 %v4115_v32, %v1421_v5  ;;  %v661_v3 = vand.u32 2147483647, %v4249_v43  ;;  %v2058_v21 = vadd.f32 1.0, %v1994_v52  ;;  %v4265_v55 = vmul.f32 0.70710677, %v4252_v8  ;;  %v383_v43 = vpop.f32.mrf.mxu0 }
 0x1cf   :  { %v1168_v42 = vmul.f32 %v4174_v15, %v1104_v2  ;;  %v1996_v50 = vsel %vm1868_vm1, %v1932_v17, %v1804_v40  ;;  %v1803_v18 = vsub.f32 1.0, %v1739_v22  ;;  %v2415_v19 = vadd.f32 %v2414_v4, %v2325_v33 }
 0x1d0   :  { %v1805_v45 = vsub.f32 1.0, %v1741_v24  ;;  %v724_v23 = vmul.f32 0.3275911, %v660_v36  ;;  %v2060_v20 = vadd.f32 1.0, %v1996_v50  ;;  %3059 = vrcp.f32 %v794_v6  ;;  %v4976_v24 = vld [vmem:[#allocation16_spill] sm:$0xff]  ;;  %v472_v50 = vpop.f32.mrf.mxu1 }
 0x1d1   :  { %v1230_v32 = vadd.f32 -0.28449672, %v1166_v47  ;;  %v1556_v13 = vmul.f32 %v1492_v1, %v660_v36  ;;  %v1931_v53 = vsub.f32 0.0, %v1803_v18  ;;  %v2561_v52 = vadd.f32 %v4187_v37, %v2415_v19 }
 0x1d2   :  { %v1933_v5 = vsub.f32 0.0, %v1805_v45  ;;  %v1493_v56 = vsub.f32 0.0, %v661_v3  ;;  %v2122_v8 = vmul.f32 %v2058_v21, %v4005_v41  ;;  %v2124_v2 = vmul.f32 %v2060_v20, %v4021_v62 }
 0x1d3   :  { %v4274_v44 = vadd.f32 %v383_v43, %v3335_v59  ;;  %v1995_v4 = vsel %vm1867_vm2, %v1931_v53, %v1803_v18  ;;  %v4281_v36 = vand.u32 2147483647, %v4265_v55  ;;  %2593 = vst [vmem:[#allocation11 + $0x8] sm:$0xff] %v2561_v52  ;;  %v1232_v1 = vadd.f32 -0.28449672, %v1168_v42  ;;  %v4978_v53 = vld [vmem:[#allocation18_spill] sm:$0xff] }
 0x1d4   :  { %v1997_v40 = vsel %vm1869_vm3, %v1933_v5, %v1805_v45  ;;  %v2170_v6 = vpack.c.bf16 %v2124_v2, %v2122_v8  ;;  %v2059_v47 = vadd.f32 1.0, %v1995_v4  ;;  %v1294_v41 = vmul.f32 %v4143_v10, %v1230_v32 }
 0x1d5   :  { %v2061_v17 = vadd.f32 1.0, %v1997_v40  ;;  %3061 = vrcp.f32 %v787_v60  ;;  %v788_v62 = vadd.f32 1.0, %v724_v23  ;;  %v725_v43 = vmul.f32 0.3275911, %v661_v3 }
 0x1d6   :  { %v4286_v54 = vadd.f32 %v4106_v12, %v3335_v59  ;;  %v4288_v22 = vpop.eup %3059  ;;  %3063 = vpow2.f32 %v1660_v38  ;;  %2362 = vmatmul.bf16.gmra.mxu2 %v2170_v6  ;;  %v2123_v49 = vmul.f32 %v2059_v47, %v4016_v51  ;;  %v4293_v8 = vmul.f32 0.70710677, %v4274_v44 }
 0x1d7   :  { %v2125_v33 = vmul.f32 %v2061_v17, %v4976_v24  ;;  %v1662_v21 = vmul.f32 1.442695, %v1556_v13  ;;  %v1557_v42 = vmul.f32 %v1493_v56, %v661_v3  ;;  %v731_v60 = vmul.f32 0.3275911, %v4281_v36 }
 0x1d8   :  { %v911_v18 = vmul.f32 1.0614054, %v4151_v48  ;;  %v4299_v12 = vadd.f32 %v4163_v46, %v3347_v14  ;;  %v1296_v45 = vmul.f32 %v4174_v15, %v1232_v1  ;;  %v1358_v51 = vadd.f32 0.2548296, %v1294_v41 }
 0x1d9   :  { %v2171_v38 = vpack.c.bf16 %v2125_v33, %v2123_v49  ;;  %3065 = vrcp.f32 %v788_v62  ;;  %v789_v19 = vadd.f32 1.0, %v725_v43  ;;  %v4303_v23 = vmul.f32 0.70710677, %v4286_v54 }
 0x1da   :  { %v922_v56 = vmul.f32 1.0614054, %v4288_v22  ;;  %vm1870_vm4 = vcmp.lt.f32.partialorder %v4045_v35, 0.0  ;;  %v4308_v3 = vand.u32 2147483647, %v4293_v8  ;;  %v4311_v46 = vadd.f32 %v472_v50, %v3347_v14 }
 0x1db   :  { %4977 = vst [vmem:[#allocation16_spill] sm:$0xff] %v4303_v23  ;;  %2451 = vmatmul.bf16.gmra.mxu3 %v2171_v38  ;;  %v1360_v20 = vadd.f32 0.2548296, %v1296_v45  ;;  %v1422_v32 = vmul.f32 %v4143_v10, %v1358_v51  ;;  %v4314_v13 = vpop.eup %3061  ;;  %vm1872_vm5 = vcmp.lt.f32.partialorder %v4978_v53, 0.0  ;;  %3067 = vpow2.f32 %v1662_v21  ;;  %v4980_v53 = vld [vmem:[#allocation19_spill] sm:$0xff] }
 0x1dc   :  { %v795_v5 = vadd.f32 1.0, %v731_v60  ;;  %v913_v52 = vmul.f32 1.0614054, %v4198_v34  ;;  %v975_v2 = vadd.f32 -1.4531521, %v911_v18  ;;  %v4318_v4 = vpop.eup %3063  ;;  %v4326_v10 = vmul.f32 0.5, %v4126_v25 }
 0x1dd   :  { %v1664_v40 = vmul.f32 1.442695, %v1557_v42  ;;  %v4321_v1 = vmul.f32 0.70710677, %v4299_v12  ;;  %v1424_v6 = vmul.f32 %v4174_v15, %v1360_v20  ;;  %v1742_v47 = vmul.f32 %v4149_v58, %v1422_v32  ;;  %v2417_v20 = vpop.f32.mrf.mxu3 }
 0x1de   :  { %3069 = vrcp.f32 %v789_v19  ;;  %v662_v17 = vand.u32 2147483647, %v4303_v23  ;;  %v986_v41 = vadd.f32 -1.4531521, %v922_v56  ;;  %v732_v62 = vmul.f32 0.3275911, %v4308_v3 }
 0x1df   :  { %4979 = vst [vmem:[#allocation18_spill] sm:$0xff] %v4321_v1  ;;  %v4331_v43 = vmul.f32 0.70710677, %v4311_v46  ;;  %v1744_v49 = vmul.f32 %v4192_v57, %v1424_v6  ;;  %v1806_v24 = vsub.f32 1.0, %v1742_v47  ;;  %v4334_v33 = vpop.eup %3065  ;;  %v4337_v15 = vmul.f32 0.5, %v4156_v26 }
 0x1e0   :  { %3071 = vrcp.f32 %v795_v5  ;;  %v977_v25 = vadd.f32 -1.4531521, %v913_v52  ;;  %v1039_v58 = vmul.f32 %v4151_v48, %v975_v2  ;;  %v4341_v21 = vmul.f32 0.5, %v4210_v16  ;;  %v2328_v16 = vpop.f32.mrf.mxu2 }
 0x1e1   :  { %3073 = vpow2.f32 %v1664_v40  ;;  %v663_v42 = vand.u32 2147483647, %v4321_v1  ;;  %v1808_v60 = vsub.f32 1.0, %v1744_v49  ;;  %v4344_v50 = vpop.eup %3067  ;;  %v726_v57 = vmul.f32 0.3275911, %v662_v17 }
 0x1e2   :  { %v1934_v18 = vsub.f32 0.0, %v1806_v24  ;;  %v1041_v38 = vmul.f32 %v4198_v34, %v977_v25  ;;  %v1103_v45 = vadd.f32 1.4214138, %v1039_v58  ;;  %v1050_v26 = vmul.f32 %v4288_v22, %v986_v41 }
 0x1e3   :  { %v796_v51 = vadd.f32 1.0, %v732_v62  ;;  %v4349_v19 = vand.u32 2147483647, %v4331_v43  ;;  %v1936_v56 = vsub.f32 0.0, %v1808_v60  ;;  %v2418_v40 = vadd.f32 %v2417_v20, %v2328_v16  ;;  %v386_v20 = vpop.f32.mrf.mxu0 }
 0x1e4   :  { %v4351_v32 = vpop.eup %3069  ;;  %v1998_v5 = vsel %vm1870_vm4, %v1934_v18, %v1806_v24  ;;  %v1105_v52 = vadd.f32 1.4214138, %v1041_v38  ;;  %v1167_v2 = vmul.f32 %v4151_v48, %v1103_v45  ;;  %v1494_v6 = vsub.f32 0.0, %v662_v17 }
 0x1e5   :  { %v727_v47 = vmul.f32 0.3275911, %v663_v42  ;;  %v4358_v41 = vadd.f32 %v4146_v39, %v3335_v59  ;;  %v2000_v62 = vsel %vm1872_vm5, %v1936_v56, %v1808_v60  ;;  %v2062_v25 = vadd.f32 1.0, %v1998_v5 }
 0x1e6   :  { %v4362_v49 = vpop.eup %3071  ;;  %v2064_v58 = vadd.f32 1.0, %v2000_v62  ;;  %v1169_v35 = vmul.f32 %v4198_v34, %v1105_v52  ;;  %v1231_v24 = vadd.f32 -0.28449672, %v1167_v2  ;;  %v790_v38 = vadd.f32 1.0, %v726_v57 }
 0x1e7   :  { %v4365_v18 = vpop.eup %3073  ;;  %v1495_v45 = vsub.f32 0.0, %v663_v42  ;;  %3075 = vrcp.f32 %v796_v51  ;;  %v2562_v16 = vadd.f32 %v4187_v37, %v2418_v40  ;;  %v1114_v39 = vadd.f32 1.4214138, %v1050_v26 }
 0x1e8   :  { %v733_v1 = vmul.f32 0.3275911, %v4349_v19  ;;  %v2126_v60 = vmul.f32 %v2062_v25, %v4980_v53  ;;  %v2128_v56 = vmul.f32 %v2064_v58, %v4137_v7  ;;  %v1558_v5 = vmul.f32 %v1494_v6, %v662_v17  ;;  %v4982_v58 = vld [vmem:[#allocation17_spill] sm:$0xff] }
 0x1e9   :  { %v923_v62 = vmul.f32 1.0614054, %v4362_v49  ;;  %v1233_v52 = vadd.f32 -0.28449672, %v1169_v35  ;;  %v1295_v2 = vmul.f32 %v4151_v48, %v1231_v24  ;;  %2594 = vst [vmem:[#allocation11 + $0x10] sm:$0xff] %v2562_v16  ;;  %v791_v57 = vadd.f32 1.0, %v727_v47 }
 0x1ea   :  { %v4374_v51 = vmul.f32 0.70710677, %v4358_v41  ;;  %v2172_v40 = vpack.c.bf16 %v2128_v56, %v2126_v60  ;;  %v4377_v26 = vadd.f32 %v386_v20, %v3335_v59  ;;  %v4381_v25 = vadd.f32 %v4203_v61, %v3347_v14 }
 0x1eb   :  { %v1498_v7 = vsub.f32 0.0, %v4225_v29  ;;  %v1297_v17 = vmul.f32 %v4198_v34, %v1233_v52  ;;  %v1359_v6 = vadd.f32 0.2548296, %v1295_v2  ;;  %vm1871_vm6 = vcmp.lt.f32.partialorder %v4982_v58, 0.0 }
 0x1ec   :  { %4981 = vst [vmem:[#allocation19_spill] sm:$0xff] %v4374_v51  ;;  %3077 = vrcp.f32 %v790_v38  ;;  %v1559_v47 = vmul.f32 %v1495_v45, %v663_v42  ;;  %v1178_v35 = vmul.f32 %v4288_v22, %v1114_v39  ;;  %v797_v24 = vadd.f32 1.0, %v733_v1  ;;  %2367 = vmatmul.bf16.gmra.mxu2 %v2172_v40 }
 0x1ed   :  { %v4387_v16 = vpop.eup %3075  ;;  %v987_v20 = vadd.f32 -1.4531521, %v923_v62  ;;  %v1361_v53 = vadd.f32 0.2548296, %v1297_v17  ;;  %v1423_v61 = vmul.f32 %v4151_v48, %v1359_v6  ;;  %v4391_v60 = vmul.f32 0.70710677, %v4377_v26 }
 0x1ee   :  { %vm1873_vm7 = vcmp.lt.f32.partialorder %v4100_v0, 0.0  ;;  %v4395_v56 = vmul.f32 0.5, %v4234_v11  ;;  %v1666_v38 = vmul.f32 1.442695, %v1558_v5  ;;  %3079 = vrcp.f32 %v791_v57 }
 0x1ef   :  { %4983 = vst [vmem:[#allocation17_spill] sm:$0xff] %v4391_v60  ;;  %v664_v42 = vand.u32 2147483647, %v4374_v51  ;;  %v4399_v1 = vmul.f32 0.70710677, %v4381_v25  ;;  %v1562_v45 = vmul.f32 %v1498_v7, %v4225_v29  ;;  %v1425_v39 = vmul.f32 %v4198_v34, %v1361_v53 }
 0x1f0   :  { %v1743_v48 = vmul.f32 %v4165_v30, %v1423_v61  ;;  %v1668_v62 = vmul.f32 1.442695, %v1559_v47  ;;  %v1242_v52 = vadd.f32 -0.28449672, %v1178_v35  ;;  %v924_v2 = vmul.f32 1.0614054, %v4387_v16 }
 0x1f1   :  { %4984 = vst [vmem:[#allocation27_spill] sm:$0xff] %v4399_v1  ;;  %3081 = vrcp.f32 %v797_v24  ;;  %v1051_v11 = vmul.f32 %v4362_v49, %v987_v20  ;;  %v1745_v5 = vmul.f32 %v4229_v27, %v1425_v39  ;;  %v4408_v40 = vand.u32 2147483647, %v4391_v60  ;;  %v475_v27 = vpop.f32.mrf.mxu1 }
 0x1f2   :  { %v1807_v57 = vsub.f32 1.0, %v1743_v48  ;;  %v4410_v17 = vpop.eup %3077  ;;  %v4413_v29 = vmul.f32 0.5, %v4286_v54  ;;  %3083 = vpow2.f32 %v1666_v38  ;;  %v4416_v30 = vmul.f32 0.5, %v4299_v12 }
 0x1f3   :  { %v1496_v34 = vsub.f32 0.0, %v664_v42  ;;  %v665_v7 = vand.u32 2147483647, %v4399_v1  ;;  %v1674_v6 = vmul.f32 1.442695, %v1562_v45  ;;  %v1809_v47 = vsub.f32 1.0, %v1745_v5 }
 0x1f4   :  { %4985 = vst [vmem:[#allocation28_spill] sm:$0xff] %v4413_v29  ;;  %v1935_v35 = vsub.f32 0.0, %v1807_v57  ;;  %v4419_v24 = vpop.eup %3079  ;;  %3085 = vpow2.f32 %v1668_v62  ;;  %v4422_v20 = vmul.f32 0.5, %v4358_v41  ;;  %v1306_v54 = vmul.f32 %v4288_v22, %v1242_v52 }
 0x1f5   :  { %4986 = vst [vmem:[#allocation29_spill] sm:$0xff] %v4416_v30  ;;  %v988_v53 = vadd.f32 -1.4531521, %v924_v2  ;;  %v1115_v61 = vadd.f32 1.4214138, %v1051_v11  ;;  %v1937_v38 = vsub.f32 0.0, %v1809_v47  ;;  %v1560_v5 = vmul.f32 %v1496_v34, %v664_v42  ;;  %v2330_v2 = vpop.f32.mrf.mxu2  ;;  %v2419_v11 = vpop.f32.mrf.mxu3 }
 0x1f6   :  { %4987 = vst [vmem:[#allocation30_spill] sm:$0xff] %v4422_v20  ;;  %v1999_v12 = vsel %vm1871_vm6, %v1935_v35, %v1807_v57  ;;  %v734_v39 = vmul.f32 0.3275911, %v4408_v40  ;;  %v728_v48 = vmul.f32 0.3275911, %v664_v42  ;;  %v4431_v62 = vadd.f32 %v475_v27, %v3347_v14 }
 0x1f7   :  { %v4428_v45 = vpop.eup %3081  ;;  %v2063_v30 = vadd.f32 1.0, %v1999_v12  ;;  %v729_v41 = vmul.f32 0.3275911, %v665_v7  ;;  %v1497_v20 = vsub.f32 0.0, %v665_v7  ;;  %3087 = vpow2.f32 %v1674_v6 }
 0x1f8   :  { %v2001_v52 = vsel %vm1873_vm7, %v1937_v38, %v1809_v47  ;;  %v4435_v58 = vpop.eup %3083  ;;  %v1370_v57 = vadd.f32 0.2548296, %v1306_v54  ;;  %v1499_v35 = vsub.f32 0.0, %v4281_v36  ;;  %v1052_v29 = vmul.f32 %v4387_v16, %v988_v53 }
 0x1f9   :  { %4988 = vst [vmem:[#allocation31_spill] sm:$0xff] %v4435_v58  ;;  %v2065_v42 = vadd.f32 1.0, %v2001_v52  ;;  %v1179_v34 = vmul.f32 %v4362_v49, %v1115_v61  ;;  %v1500_v27 = vsub.f32 0.0, %v4308_v3  ;;  %v925_v12 = vmul.f32 1.0614054, %v4428_v45 }
 0x1fa   :  { %v798_v6 = vadd.f32 1.0, %v734_v39  ;;  %v4442_v1 = vpop.eup %3085  ;;  %v2127_v0 = vmul.f32 %v2063_v30, %v4111_v63  ;;  %v4447_v54 = vmul.f32 0.70710677, %v4431_v62  ;;  %v2420_v38 = vadd.f32 %v2419_v11, %v2330_v2  ;;  %v388_v2 = vpop.f32.mrf.mxu0 }
 0x1fb   :  { %4989 = vst [vmem:[#allocation32_spill] sm:$0xff] %v4442_v1  ;;  %v2129_v47 = vmul.f32 %v2065_v42, %v4170_v28  ;;  %v792_v58 = vadd.f32 1.0, %v728_v48  ;;  %v1670_v53 = vmul.f32 1.442695, %v1560_v5  ;;  %v1561_v52 = vmul.f32 %v1497_v20, %v665_v7 }
 0x1fc   :  { %4990 = vst [vmem:[#allocation33_spill] sm:$0xff] %v4447_v54  ;;  %v914_v61 = vmul.f32 1.0614054, %v4241_v9  ;;  %v1434_v51 = vmul.f32 %v4288_v22, %v1370_v57  ;;  %v1116_v23 = vadd.f32 1.4214138, %v1052_v29  ;;  %v2563_v39 = vadd.f32 %v4187_v37, %v2420_v38 }
 0x1fd   :  { %v2173_v60 = vpack.c.bf16 %v2129_v47, %v2127_v0  ;;  %v3088_v1 = vpop.eup %3087  ;;  %v4453_v63 = vmul.f32 0.5, %v4381_v25  ;;  %v793_v28 = vadd.f32 1.0, %v729_v41  ;;  %v1243_v30 = vadd.f32 -0.28449672, %v1179_v34 }
 0x1fe   :  { %v1563_v42 = vmul.f32 %v1499_v35, %v4281_v36  ;;  %v1564_v48 = vmul.f32 %v1500_v27, %v4308_v3  ;;  %v989_v7 = vadd.f32 -1.4531521, %v925_v12  ;;  %3089 = vrcp.f32 %v798_v6  ;;  %2595 = vst [vmem:[#allocation11 + $0x18] sm:$0xff] %v2563_v39  ;;  %v4995_v39 = vld [vmem:[#allocation22_spill] sm:$0xff] }
 0x1ff   :  { %4991 = vst [vmem:[#allocation34_spill] sm:$0xff] %v4453_v63  ;;  %2456 = vmatmul.bf16.gmra.mxu3 %v2173_v60  ;;  %v4458_v22 = vand.u32 2147483647, %v4447_v54  ;;  %3091 = vrcp.f32 %v792_v58  ;;  %v1672_v29 = vmul.f32 1.442695, %v1561_v52  ;;  %v1501_v20 = vsub.f32 0.0, %v4349_v19 }
 0x200   :  { %v978_v25 = vadd.f32 -1.4531521, %v914_v61  ;;  %3093 = vpow2.f32 %v1670_v53  ;;  %v4461_v5 = vmul.f32 %v3088_v1, %v1434_v51  ;;  %v1180_v36 = vmul.f32 %v4387_v16, %v1116_v23  ;;  %v4992_v23 = vld [vmem:[#allocation25_spill] sm:$0xff] }
 0x201   :  { %v4465_v41 = vadd.f32 %v388_v2, %v3335_v59  ;;  %3095 = vrcp.f32 %v793_v28  ;;  %v1307_v3 = vmul.f32 %v4362_v49, %v1243_v30  ;;  %v1676_v60 = vmul.f32 1.442695, %v1563_v42  ;;  %v477_v30 = vpop.f32.mrf.mxu1 }
 0x202   :  { %v916_v11 = vmul.f32 1.0614054, %v4334_v33  ;;  %v1678_v57 = vmul.f32 1.442695, %v1564_v48  ;;  %v1053_v58 = vmul.f32 %v4428_v45, %v989_v7  ;;  %v735_v35 = vmul.f32 0.3275911, %v4458_v22 }
 0x203   :  { %v1042_v34 = vmul.f32 %v4241_v9, %v978_v25  ;;  %3097 = vpow2.f32 %v1672_v29  ;;  %v4473_v51 = vmul.f32 0.5, %v4196_v31  ;;  %v4476_v1 = vmul.f32 0.5, %v4992_v23 }
 0x204   :  { %v1565_v27 = vmul.f32 %v1501_v20, %v4349_v19  ;;  %v4479_v12 = vpop.eup %3089  ;;  %v1818_v6 = vsub.f32 1.0, %v4461_v5  ;;  %v4483_v0 = vmul.f32 0.5, %v4274_v44  ;;  %v1244_v47 = vadd.f32 -0.28449672, %v1180_v36 }
 0x205   :  { %v4486_v38 = vmul.f32 0.70710677, %v4465_v41  ;;  %v4488_v53 = vpop.eup %3091  ;;  %v1371_v31 = vadd.f32 0.2548296, %v1307_v3  ;;  %3099 = vpow2.f32 %v1676_v60  ;;  %v4491_v52 = vmul.f32 0.5, %v4311_v46 }
 0x206   :  { %v980_v61 = vadd.f32 -1.4531521, %v916_v11  ;;  %v4493_v19 = vpop.eup %3093  ;;  %vm1882_vm8 = vcmp.lt.f32.partialorder %v4995_v39, 0.0  ;;  %3101 = vpow2.f32 %v1678_v57  ;;  %v1117_v28 = vadd.f32 1.4214138, %v1053_v58 }
 0x207   :  { %4993 = vst [vmem:[#allocation25_spill] sm:$0xff] %v4486_v38  ;;  %v799_v44 = vadd.f32 1.0, %v735_v35  ;;  %v1106_v42 = vadd.f32 1.4214138, %v1042_v34  ;;  %v4496_v2 = vpop.eup %3095  ;;  %v1680_v48 = vmul.f32 1.442695, %v1565_v27  ;;  %v1308_v25 = vmul.f32 %v4387_v16, %v1244_v47  ;;  %v2333_v27 = vpop.f32.mrf.mxu2 }
 0x208   :  { %4994 = vst [vmem:[#allocation35_spill] sm:$0xff] %v4493_v19  ;;  %v926_v7 = vmul.f32 1.0614054, %v4479_v12  ;;  %v1044_v29 = vmul.f32 %v4334_v33, %v980_v61  ;;  %v915_v46 = vmul.f32 1.0614054, %v4314_v13  ;;  %v1946_v20 = vsub.f32 0.0, %v1818_v6  ;;  %v2422_v47 = vpop.f32.mrf.mxu3 }
 0x209   :  { %v4503_v5 = vand.u32 2147483647, %v4486_v38  ;;  %v1170_v36 = vmul.f32 %v4241_v9, %v1106_v42  ;;  %v4506_v3 = vpop.eup %3097  ;;  %v1435_v60 = vmul.f32 %v4362_v49, %v1371_v31  ;;  %v4510_v11 = vadd.f32 %v477_v30, %v3347_v14 }
 0x20a   :  { %4996 = vst [vmem:[#allocation22_spill] sm:$0xff] %v4506_v3  ;;  %v1108_v57 = vadd.f32 1.4214138, %v1044_v29  ;;  %v917_v58 = vmul.f32 1.0614054, %v4351_v32  ;;  %v1181_v35 = vmul.f32 %v4428_v45, %v1117_v28  ;;  %3103 = vrcp.f32 %v799_v44 }
 0x20b   :  { %v1234_v34 = vadd.f32 -0.28449672, %v1170_v36  ;;  %v979_v23 = vadd.f32 -1.4531521, %v915_v46  ;;  %v3100_v61 = vpop.eup %3099  ;;  %v990_v63 = vadd.f32 -1.4531521, %v926_v7  ;;  %v2423_v3 = vadd.f32 %v2422_v47, %v2333_v27 }
 0x20c   :  { %v1172_v42 = vmul.f32 %v4334_v33, %v1108_v57  ;;  %v981_v38 = vadd.f32 -1.4531521, %v917_v58  ;;  %v3102_v49 = vpop.eup %3101  ;;  %v1372_v31 = vadd.f32 0.2548296, %v1308_v25  ;;  %v736_v30 = vmul.f32 0.3275911, %v4503_v5 }
 0x20d   :  { %v1298_v29 = vmul.f32 %v4241_v9, %v1234_v34  ;;  %v1043_v54 = vmul.f32 %v4314_v13, %v979_v23  ;;  %v4519_v28 = vmul.f32 0.70710677, %v4510_v11  ;;  %v2564_v7 = vadd.f32 %v4187_v37, %v2423_v3  ;;  %v4997_v47 = vld [vmem:[#allocation20_spill] sm:$0xff] }
 0x20e   :  { %v1236_v44 = vadd.f32 -0.28449672, %v1172_v42  ;;  %v1045_v46 = vmul.f32 %v4351_v32, %v981_v38  ;;  %v1755_v36 = vmul.f32 %v3100_v61, %v1435_v60  ;;  %v1245_v57 = vadd.f32 -0.28449672, %v1181_v35 }
 0x20f   :  { %v1362_v58 = vadd.f32 0.2548296, %v1298_v29  ;;  %v1107_v27 = vadd.f32 1.4214138, %v1043_v54  ;;  %vm1874_vm9 = vcmp.lt.f32.partialorder %v4997_v47, 0.0  ;;  %v2010_v25 = vsel %vm1882_vm8, %v1946_v20, %v1818_v6  ;;  %2596 = vst [vmem:[#allocation11 + $0x20] sm:$0xff] %v2564_v7 }
 0x210   :  { %v1054_v34 = vmul.f32 %v4479_v12, %v990_v63  ;;  %v1300_v23 = vmul.f32 %v4334_v33, %v1236_v44  ;;  %v1109_v19 = vadd.f32 1.4214138, %v1045_v46  ;;  %v4528_v42 = vpop.eup %3103  ;;  %v1436_v38 = vmul.f32 %v4387_v16, %v1372_v31  ;;  %v4998_v20 = vld [vmem:[#allocation23_spill] sm:$0xff]  ;;  %v4999_v16 = vld [vmem:[#allocation26_spill] sm:$0xff] }
 0x211   :  { %v800_v37 = vadd.f32 1.0, %v736_v30  ;;  %v1426_v3 = vmul.f32 %v4241_v9, %v1362_v58  ;;  %v1171_v54 = vmul.f32 %v4314_v13, %v1107_v27  ;;  %vm1883_vm10 = vcmp.lt.f32.partialorder %v4265_v55, 0.0 }
 0x212   :  { %3105 = vpow2.f32 %v1680_v48  ;;  %v4535_v6 = vand.u32 2147483647, %v4519_v28  ;;  %v1364_v63 = vadd.f32 0.2548296, %v1300_v23  ;;  %v1173_v39 = vmul.f32 %v4351_v32, %v1109_v19 }
 0x213   :  { %vm1876_vm11 = vcmp.lt.f32.partialorder %v4998_v20, 0.0  ;;  %v1819_v60 = vsub.f32 1.0, %v1755_v36  ;;  %v1309_v35 = vmul.f32 %v4428_v45, %v1245_v57  ;;  %v1746_v61 = vmul.f32 %v4999_v16, %v1426_v3  ;;  %v391_v16 = vpop.f32.mrf.mxu0 }
 0x214   :  { %v1235_v31 = vadd.f32 -0.28449672, %v1171_v54  ;;  %v2074_v9 = vadd.f32 1.0, %v2010_v25  ;;  %v1118_v30 = vadd.f32 1.4214138, %v1054_v34  ;;  %v1428_v29 = vmul.f32 %v4334_v33, %v1364_v63 }
 0x215   :  { %v1237_v44 = vadd.f32 -0.28449672, %v1173_v39  ;;  %v4542_v48 = vmul.f32 %v3102_v49, %v1436_v38  ;;  %v927_v46 = vmul.f32 1.0614054, %v4528_v42  ;;  %3107 = vrcp.f32 %v800_v37 }
 0x216   :  { %v1810_v7 = vsub.f32 1.0, %v1746_v61  ;;  %v737_v19 = vmul.f32 0.3275911, %v4535_v6  ;;  %v1748_v36 = vmul.f32 %v4344_v50, %v1428_v29  ;;  %v1299_v57 = vmul.f32 %v4314_v13, %v1235_v31  ;;  %v5001_v61 = vld [vmem:[#allocation24_spill] sm:$0xff] }
 0x217   :  { %v1301_v58 = vmul.f32 %v4351_v32, %v1237_v44  ;;  %v1947_v27 = vsub.f32 0.0, %v1819_v60  ;;  %v1373_v25 = vadd.f32 0.2548296, %v1309_v35  ;;  %v1502_v34 = vsub.f32 0.0, %v4408_v40  ;;  %v5000_v35 = vld [vmem:[#allocation21_spill] sm:$0xff] }
 0x218   :  { %v1938_v33 = vsub.f32 0.0, %v1810_v7  ;;  %v3106_v23 = vpop.eup %3105  ;;  %v1182_v49 = vmul.f32 %v4479_v12, %v1118_v30  ;;  %v1812_v38 = vsub.f32 1.0, %v1748_v36  ;;  %v1363_v3 = vadd.f32 0.2548296, %v1299_v57 }
 0x219   :  { %v1365_v37 = vadd.f32 0.2548296, %v1301_v58  ;;  %v4552_v54 = vmul.f32 %v2074_v9, %v4473_v51  ;;  %v991_v63 = vadd.f32 -1.4531521, %v927_v46  ;;  %v1503_v50 = vsub.f32 0.0, %v4458_v22 }
 0x21a   :  { %v2002_v39 = vsel %vm1874_vm9, %v1938_v33, %v1810_v7  ;;  %vm1875_vm12 = vcmp.lt.f32.partialorder %v5000_v35, 0.0  ;;  %vm1877_vm13 = vcmp.lt.f32.partialorder %v5001_v61, 0.0  ;;  %v1820_v31 = vsub.f32 1.0, %v4542_v48 }
 0x21b   :  { %vm1884_vm14 = vcmp.lt.f32.partialorder %v4293_v8, 0.0  ;;  %v801_v30 = vadd.f32 1.0, %v737_v19  ;;  %v1940_v29 = vsub.f32 0.0, %v1812_v38  ;;  %v1427_v51 = vmul.f32 %v4314_v13, %v1363_v3  ;;  %v4562_v9 = vpop.eup %3107 }
 0x21c   :  { %v2011_v44 = vsel %vm1883_vm10, %v1947_v27, %v1819_v60  ;;  %v1566_v47 = vmul.f32 %v1502_v34, %v4408_v40  ;;  %v2066_v46 = vadd.f32 1.0, %v2002_v39  ;;  %v1429_v7 = vmul.f32 %v4351_v32, %v1365_v37  ;;  %v480_v40 = vpop.f32.mrf.mxu1 }
 0x21d   :  { %v1437_v36 = vmul.f32 %v4428_v45, %v1373_v25  ;;  %v1246_v57 = vadd.f32 -0.28449672, %v1182_v49  ;;  %v2004_v48 = vsel %vm1876_vm11, %v1940_v29, %v1812_v38  ;;  %v4572_v19 = vadd.f32 %v391_v16, %v3335_v59 }
 0x21e   :  { %v1055_v13 = vmul.f32 %v4528_v42, %v991_v63  ;;  %v2068_v58 = vadd.f32 1.0, %v2004_v48  ;;  %v1747_v55 = vmul.f32 %v4318_v4, %v1427_v51  ;;  %v1749_v60 = vmul.f32 %v4365_v18, %v1429_v7 }
 0x21f   :  { %v1948_v27 = vsub.f32 0.0, %v1820_v31  ;;  %v1567_v32 = vmul.f32 %v1503_v50, %v4458_v22  ;;  %v928_v45 = vmul.f32 1.0614054, %v4562_v9  ;;  %3109 = vrcp.f32 %v801_v30  ;;  %v2335_v50 = vpop.f32.mrf.mxu2 }
 0x220   :  { %v2130_v20 = vmul.f32 %v2066_v46, %v4326_v10  ;;  %v2132_v25 = vmul.f32 %v2068_v58, %v4341_v21  ;;  %v1811_v34 = vsub.f32 1.0, %v1747_v55  ;;  %v1813_v33 = vsub.f32 1.0, %v1749_v60  ;;  %v2424_v10 = vpop.f32.mrf.mxu3 }
 0x221   :  { %v4581_v49 = vmul.f32 %v3106_v23, %v1437_v36  ;;  %v4584_v38 = vmul.f32 0.5, %v4377_v26  ;;  %v1310_v4 = vmul.f32 %v4479_v12, %v1246_v57  ;;  %v4588_v18 = vmul.f32 0.70710677, %v4572_v19 }
 0x222   :  { %v1119_v22 = vadd.f32 1.4214138, %v1055_v13  ;;  %v2174_v3 = vpack.c.bf16 %v2132_v25, %v2130_v20  ;;  %v1939_v37 = vsub.f32 0.0, %v1811_v34  ;;  %v1941_v63 = vsub.f32 0.0, %v1813_v33 }
 0x223   :  { %v2075_v39 = vadd.f32 1.0, %v2011_v44  ;;  %v1682_v21 = vmul.f32 1.442695, %v1566_v47  ;;  %v4591_v16 = vmul.f32 0.5, %v4431_v62  ;;  %v1684_v23 = vmul.f32 1.442695, %v1567_v32 }
 0x224   :  { %v2012_v26 = vsel %vm1884_vm14, %v1948_v27, %v1820_v31  ;;  %v992_v30 = vadd.f32 -1.4531521, %v928_v45  ;;  %2372 = vmatmul.bf16.gmra.mxu2 %v2174_v3  ;;  %v2003_v29 = vsel %vm1875_vm12, %v1939_v37, %v1811_v34  ;;  %v2005_v51 = vsel %vm1877_vm13, %v1941_v63, %v1813_v33  ;;  %v393_v27 = vpop.f32.mrf.mxu0  ;;  %v482_v32 = vpop.f32.mrf.mxu1 }
 0x225   :  { %v4599_v46 = vpop.eup %3109  ;;  %vm1885_vm15 = vcmp.lt.f32.partialorder %v4331_v43, 0.0  ;;  %v2067_v44 = vadd.f32 1.0, %v2003_v29  ;;  %v2069_v47 = vadd.f32 1.0, %v2005_v51  ;;  %v4603_v62 = vand.u32 2147483647, %v4588_v18 }
 0x226   :  { %v2425_v7 = vadd.f32 %v2424_v10, %v2335_v50  ;;  %v1821_v8 = vsub.f32 1.0, %v4581_v49  ;;  %v1374_v31 = vadd.f32 0.2548296, %v1310_v4  ;;  %v1183_v36 = vmul.f32 %v4528_v42, %v1119_v22 }
 0x227   :  { %v4608_v35 = vadd.f32 %v480_v40, %v3347_v14  ;;  %v4611_v61 = vmul.f32 %v2075_v39, %v4476_v1  ;;  %3111 = vpow2.f32 %v1682_v21  ;;  %v2131_v57 = vmul.f32 %v2067_v44, %v4337_v15  ;;  %v4624_v15 = vld [vmem:[%s4934_s4] ss:$0 sm:$0xff] }
 0x228   :  { %v2133_v48 = vmul.f32 %v2069_v47, %v4395_v56  ;;  %v2076_v13 = vadd.f32 1.0, %v2012_v26  ;;  %v4616_v58 = vmul.f32 0.5, %v4465_v41  ;;  %v1056_v55 = vmul.f32 %v4562_v9, %v992_v30 }
 0x229   :  { %v929_v60 = vmul.f32 1.0614054, %v4599_v46  ;;  %3113 = vpow2.f32 %v1684_v23  ;;  %v738_v1 = vmul.f32 0.3275911, %v4603_v62  ;;  %v2565_v56 = vadd.f32 %v4624_v15, %v2425_v7 }
 0x22a   :  { %v2175_v40 = vpack.c.bf16 %v2133_v48, %v2131_v57  ;;  %v1949_v45 = vsub.f32 0.0, %v1821_v8  ;;  %v1438_v41 = vmul.f32 %v4479_v12, %v1374_v31  ;;  %v1247_v20 = vadd.f32 -0.28449672, %v1183_v36 }
 0x22b   :  { %v4629_v25 = vmul.f32 0.70710677, %v4608_v35  ;;  %2597 = vst [vmem:[#allocation11 + $0x28] sm:$0xff] %v2565_v56  ;;  %v4632_v34 = vadd.f32 %v393_v27, %v3335_v59  ;;  %v4635_v33 = vadd.f32 %v482_v32, %v3347_v14  ;;  %v918_v49 = vmul.f32 1.0614054, %v4410_v17 }
 0x22c   :  { %2461 = vmatmul.bf16.gmra.mxu3 %v2175_v40  ;;  %v920_v4 = vmul.f32 1.0614054, %v4488_v53  ;;  %v4640_v22 = vmul.f32 %v2076_v13, %v4483_v0  ;;  %v1120_v12 = vadd.f32 1.4214138, %v1056_v55  ;;  %v993_v3 = vadd.f32 -1.4531521, %v929_v60 }
 0x22d   :  { %v919_v37 = vmul.f32 1.0614054, %v4419_v24  ;;  %v3112_v63 = vpop.eup %3111  ;;  %v1504_v50 = vsub.f32 0.0, %v4503_v5  ;;  %v802_v10 = vadd.f32 1.0, %v738_v1  ;;  %v4645_v39 = vmul.f32 0.70710677, %v4632_v34 }
 0x22e   :  { %v4648_v21 = vmul.f32 0.70710677, %v4635_v33  ;;  %v2013_v23 = vsel %vm1885_vm15, %v1949_v45, %v1821_v8  ;;  %v4653_v0 = vand.u32 2147483647, %v4629_v25  ;;  %v982_v26 = vadd.f32 -1.4531521, %v918_v49 }
 0x22f   :  { %v984_v30 = vadd.f32 -1.4531521, %v920_v4  ;;  %v4655_v29 = vpop.eup %3113  ;;  %v4657_v51 = vmul.f32 %v3112_v63, %v1438_v41  ;;  %v1311_v44 = vmul.f32 %v4528_v42, %v1247_v20  ;;  %v4661_v47 = vmul.f32 0.5, %v4510_v11  ;;  %v5002_v45 = vld [vmem:[#allocation17_spill] sm:$0xff] }
 0x230   :  { %v4664_v7 = vand.u32 2147483647, %v4645_v39  ;;  %v4667_v43 = vand.u32 2147483647, %v4648_v21  ;;  %v1046_v8 = vmul.f32 %v4410_v17, %v982_v26  ;;  %v983_v36 = vadd.f32 -1.4531521, %v919_v37 }
 0x231   :  { %v1048_v31 = vmul.f32 %v4488_v53, %v984_v30  ;;  %v1184_v57 = vmul.f32 %v4562_v9, %v1120_v12  ;;  %v1568_v48 = vmul.f32 %v1504_v50, %v4503_v5  ;;  %v1057_v13 = vmul.f32 %v4599_v46, %v993_v3 }
 0x232   :  { %v740_v11 = vmul.f32 0.3275911, %v4664_v7  ;;  %v1505_v55 = vsub.f32 0.0, %v4535_v6  ;;  %3115 = vrcp.f32 %v802_v10  ;;  %v739_v60 = vmul.f32 0.3275911, %v4653_v0 }
 0x233   :  { %v1110_v27 = vadd.f32 1.4214138, %v1046_v8  ;;  %v1822_v32 = vsub.f32 1.0, %v4657_v51  ;;  %v741_v1 = vmul.f32 0.3275911, %v4667_v43  ;;  %vm1886_vm0 = vcmp.lt.f32.partialorder %v5002_v45, 0.0 }
 0x234   :  { %v804_v40 = vadd.f32 1.0, %v740_v11  ;;  %v921_v56 = vmul.f32 1.0614054, %v4496_v2  ;;  %v1375_v5 = vadd.f32 0.2548296, %v1311_v44  ;;  %v1047_v49 = vmul.f32 %v4419_v24, %v983_v36 }
 0x235   :  { %v1112_v41 = vadd.f32 1.4214138, %v1048_v31  ;;  %v1174_v20 = vmul.f32 %v4410_v17, %v1110_v27  ;;  %v2077_v4 = vadd.f32 1.0, %v2013_v23  ;;  %v1248_v12 = vadd.f32 -0.28449672, %v1184_v57  ;;  %v2338_v57 = vpop.f32.mrf.mxu2 }
 0x236   :  { %v1121_v3 = vadd.f32 1.4214138, %v1057_v13  ;;  %3117 = vrcp.f32 %v804_v40  ;;  %v1686_v37 = vmul.f32 1.442695, %v1568_v48  ;;  %v803_v63 = vadd.f32 1.0, %v739_v60  ;;  %v2427_v13 = vpop.f32.mrf.mxu3 }
 0x237   :  { %v1176_v50 = vmul.f32 %v4488_v53, %v1112_v41  ;;  %v1238_v10 = vadd.f32 -0.28449672, %v1174_v20  ;;  %v1950_v26 = vsub.f32 0.0, %v1822_v32  ;;  %v1569_v30 = vmul.f32 %v1505_v55, %v4535_v6 }
 0x238   :  { %v805_v51 = vadd.f32 1.0, %v741_v1  ;;  %v985_v8 = vadd.f32 -1.4531521, %v921_v56  ;;  %v4685_v44 = vpop.eup %3115  ;;  %v1439_v31 = vmul.f32 %v4528_v42, %v1375_v5  ;;  %v1111_v36 = vadd.f32 1.4214138, %v1047_v49  ;;  %v5003_v56 = vld [vmem:[#allocation16_spill] sm:$0xff] }
 0x239   :  { %v1240_v11 = vadd.f32 -0.28449672, %v1176_v50  ;;  %v1302_v23 = vmul.f32 %v4410_v17, %v1238_v10  ;;  %v1312_v48 = vmul.f32 %v4562_v9, %v1248_v12  ;;  %v1185_v60 = vmul.f32 %v4599_v46, %v1121_v3 }
 0x23a   :  { %v1049_v27 = vmul.f32 %v4496_v2, %v985_v8  ;;  %v2428_v40 = vadd.f32 %v2427_v13, %v2338_v57  ;;  %3119 = vrcp.f32 %v803_v63  ;;  %v1175_v1 = vmul.f32 %v4419_v24, %v1111_v36  ;;  %v5004_v63 = vld [vmem:[#allocation19_spill] sm:$0xff] }
 0x23b   :  { %v1304_v6 = vmul.f32 %v4488_v53, %v1240_v11  ;;  %v1366_v55 = vadd.f32 0.2548296, %v1302_v23  ;;  %vm1878_vm1 = vcmp.lt.f32.partialorder %v5003_v56, 0.0  ;;  %v930_v5 = vmul.f32 1.0614054, %v4685_v44  ;;  %v5005_v36 = vld [vmem:[#allocation31_spill] sm:$0xff] }
 0x23c   :  { %v4694_v42 = vpop.eup %3117  ;;  %3121 = vrcp.f32 %v805_v51  ;;  %v1113_v41 = vadd.f32 1.4214138, %v1049_v27  ;;  %v2566_v20 = vadd.f32 %v4624_v15, %v2428_v40  ;;  %v1239_v3 = vadd.f32 -0.28449672, %v1175_v1 }
 0x23d   :  { %3123 = vpow2.f32 %v1686_v37  ;;  %v1368_v49 = vadd.f32 0.2548296, %v1304_v6  ;;  %v1430_v12 = vmul.f32 %v4410_v17, %v1366_v55  ;;  %vm1880_vm2 = vcmp.lt.f32.partialorder %v5004_v63, 0.0 }
 0x23e   :  { %v2014_v50 = vsel %vm1886_vm0, %v1950_v26, %v1822_v32  ;;  %v1376_v10 = vadd.f32 0.2548296, %v1312_v48  ;;  %v1249_v8 = vadd.f32 -0.28449672, %v1185_v60  ;;  %v1177_v11 = vmul.f32 %v4496_v2, %v1113_v41  ;;  %2598 = vst [vmem:[#allocation11 + $0x30] sm:$0xff] %v2566_v20  ;;  %v5006_v60 = vld [vmem:[#allocation35_spill] sm:$0xff] }
 0x23f   :  { %v932_v23 = vmul.f32 1.0614054, %v4694_v42  ;;  %v1432_v51 = vmul.f32 %v4488_v53, %v1368_v49  ;;  %v1750_v57 = vmul.f32 %v5005_v36, %v1430_v12  ;;  %v1303_v37 = vmul.f32 %v4419_v24, %v1239_v3 }
 0x240   :  { %v4709_v17 = vmul.f32 %v2077_v4, %v4491_v52  ;;  %v1759_v13 = vmul.f32 %v4655_v29, %v1439_v31  ;;  %v994_v45 = vadd.f32 -1.4531521, %v930_v5  ;;  %v1241_v32 = vadd.f32 -0.28449672, %v1177_v11  ;;  %v4712_v26 = vpop.eup %3119  ;;  %v5007_v29 = vld [vmem:[#allocation18_spill] sm:$0xff]  ;;  %v5008_v31 = vld [vmem:[#allocation33_spill] sm:$0xff] }
 0x241   :  { %v1688_v48 = vmul.f32 1.442695, %v1569_v30  ;;  %v1752_v27 = vmul.f32 %v5006_v60, %v1432_v51  ;;  %v1814_v40 = vsub.f32 1.0, %v1750_v57  ;;  %v1367_v6 = vadd.f32 0.2548296, %v1303_v37  ;;  %v5009_v51 = vld [vmem:[#allocation32_spill] sm:$0xff]  ;;  %v396_v57 = vpop.f32.mrf.mxu0 }
 0x242   :  { %v4715_v53 = vpop.eup %3121  ;;  %v2078_v55 = vadd.f32 1.0, %v2014_v50  ;;  %v1440_v1 = vmul.f32 %v4562_v9, %v1376_v10  ;;  %v1313_v41 = vmul.f32 %v4599_v46, %v1249_v8  ;;  %v1305_v52 = vmul.f32 %v4496_v2, %v1241_v32  ;;  %v2429_v32 = vpop.f32.mrf.mxu3 }
 0x243   :  { %v3124_v4 = vpop.eup %3123  ;;  %vm1879_vm3 = vcmp.lt.f32.partialorder %v5007_v29, 0.0  ;;  %vm1887_vm4 = vcmp.lt.f32.partialorder %v5008_v31, 0.0  ;;  %v996_v5 = vadd.f32 -1.4531521, %v932_v23  ;;  %v1816_v30 = vsub.f32 1.0, %v1752_v27  ;;  %v5010_v23 = vld [vmem:[#allocation27_spill] sm:$0xff] }
 0x244   :  { %v1942_v20 = vsub.f32 0.0, %v1814_v40  ;;  %v1431_v49 = vmul.f32 %v4419_v24, %v1367_v6  ;;  %v1823_v12 = vsub.f32 1.0, %v1759_v13  ;;  %v1058_v3 = vmul.f32 %v4685_v44, %v994_v45  ;;  %v2340_v45 = vpop.f32.mrf.mxu2 }
 0x245   :  { %v931_v50 = vmul.f32 1.0614054, %v4712_v26  ;;  %v1369_v9 = vadd.f32 0.2548296, %v1305_v52  ;;  %v933_v10 = vmul.f32 1.0614054, %v4715_v53  ;;  %v4730_v37 = vmul.f32 %v3124_v4, %v1440_v1 }
 0x246   :  { %v1944_v8 = vsub.f32 0.0, %v1816_v30  ;;  %v2006_v11 = vsel %vm1878_vm1, %v1942_v20, %v1814_v40  ;;  %v1751_v36 = vmul.f32 %v5009_v51, %v1431_v49  ;;  %vm1881_vm5 = vcmp.lt.f32.partialorder %v5010_v23, 0.0  ;;  %v5011_v49 = vld [vmem:[#allocation22_spill] sm:$0xff]  ;;  %v5012_v51 = vld [vmem:[#allocation25_spill] sm:$0xff] }
 0x247   :  { %v1377_v24 = vadd.f32 0.2548296, %v1313_v41  ;;  %3125 = vpow2.f32 %v1688_v48  ;;  %v2070_v13 = vadd.f32 1.0, %v2006_v11  ;;  %v1060_v60 = vmul.f32 %v4694_v42, %v996_v5  ;;  %v5013_v5 = vld [vmem:[#allocation28_spill] sm:$0xff]  ;;  %v5016_v23 = vld [vmem:[#allocation34_spill] sm:$0xff] }
 0x248   :  { %v2008_v27 = vsel %vm1880_vm2, %v1944_v8, %v1816_v30  ;;  %v1433_v56 = vmul.f32 %v4496_v2, %v1369_v9  ;;  %v1815_v40 = vsub.f32 1.0, %v1751_v36  ;;  %v4737_v6 = vmul.f32 %v2078_v55, %v4584_v38  ;;  %v5014_v30 = vld [vmem:[#allocation30_spill] sm:$0xff] }
 0x249   :  { %v1951_v52 = vsub.f32 0.0, %v1823_v12  ;;  %v1122_v20 = vadd.f32 1.4214138, %v1058_v3  ;;  %v2072_v1 = vadd.f32 1.0, %v2008_v27  ;;  %v1506_v41 = vsub.f32 0.0, %v4603_v62 }
 0x24a   :  { %v995_v48 = vadd.f32 -1.4531521, %v931_v50  ;;  %v997_v4 = vadd.f32 -1.4531521, %v933_v10  ;;  %v1753_v11 = vmul.f32 %v5011_v49, %v1433_v56  ;;  %vm1888_vm6 = vcmp.lt.f32.partialorder %v5012_v51, 0.0  ;;  %v485_v50 = vpop.f32.mrf.mxu1 }
 0x24b   :  { %v2134_v63 = vmul.f32 %v2070_v13, %v5013_v5  ;;  %v2136_v8 = vmul.f32 %v2072_v1, %v5014_v30  ;;  %v1943_v2 = vsub.f32 0.0, %v1815_v40  ;;  %v4745_v9 = vadd.f32 %v396_v57, %v3335_v59 }
 0x24c   :  { %v1824_v38 = vsub.f32 1.0, %v4730_v37  ;;  %v1441_v55 = vmul.f32 %v4599_v46, %v1377_v24  ;;  %v1124_v3 = vadd.f32 1.4214138, %v1060_v60  ;;  %v1817_v36 = vsub.f32 1.0, %v1753_v11 }
 0x24d   :  { %v3126_v10 = vpop.eup %3125  ;;  %v2015_v27 = vsel %vm1887_vm4, %v1951_v52, %v1823_v12  ;;  %v1186_v56 = vmul.f32 %v4685_v44, %v1122_v20  ;;  %v2176_v13 = vpack.c.bf16 %v2136_v8, %v2134_v63  ;;  %v2007_v1 = vsel %vm1879_vm3, %v1943_v2, %v1815_v40  ;;  %v2343_v52 = vpop.f32.mrf.mxu2 }
 0x24e   :  { %v1570_v57 = vmul.f32 %v1506_v41, %v4603_v62  ;;  %v1059_v49 = vmul.f32 %v4712_v26, %v995_v48  ;;  %v1061_v37 = vmul.f32 %v4715_v53, %v997_v4  ;;  %v1945_v46 = vsub.f32 0.0, %v1817_v36  ;;  %v2432_v20 = vpop.f32.mrf.mxu3  ;;  %v398_v63 = vpop.f32.mrf.mxu0 }
 0x24f   :  { %2377 = vmatmul.bf16.gmra.mxu2 %v2176_v13  ;;  %v2071_v24 = vadd.f32 1.0, %v2007_v1  ;;  %v4758_v60 = vmul.f32 0.70710677, %v4745_v9  ;;  %v4761_v31 = vadd.f32 %v485_v50, %v3347_v14  ;;  %v2430_v12 = vadd.f32 %v2429_v32, %v2340_v45 }
 0x250   :  { %v1952_v29 = vsub.f32 0.0, %v1824_v38  ;;  %v4763_v40 = vmul.f32 %v3126_v10, %v1441_v55  ;;  %v1188_v62 = vmul.f32 %v4694_v42, %v1124_v3  ;;  %v2009_v41 = vsel %vm1881_vm5, %v1945_v46, %v1817_v36  ;;  %v5015_v55 = vld [vmem:[#allocation29_spill] sm:$0xff] }
 0x251   :  { %v1250_v48 = vadd.f32 -0.28449672, %v1186_v56  ;;  %v1508_v4 = vsub.f32 0.0, %v4664_v7  ;;  %v2073_v11 = vadd.f32 1.0, %v2009_v41  ;;  %v4770_v5 = vand.u32 2147483647, %v4758_v60 }
 0x252   :  { %v1690_v30 = vmul.f32 1.442695, %v1570_v57  ;;  %v1123_v45 = vadd.f32 1.4214138, %v1059_v49  ;;  %v4773_v32 = vmul.f32 0.70710677, %v4761_v31  ;;  %v2567_v8 = vadd.f32 %v4624_v15, %v2430_v12 }
 0x253   :  { %v1125_v2 = vadd.f32 1.4214138, %v1061_v37  ;;  %v2135_v3 = vmul.f32 %v2071_v24, %v5015_v55  ;;  %v2137_v36 = vmul.f32 %v2073_v11, %v5016_v23  ;;  %v742_v50 = vmul.f32 0.3275911, %v4770_v5 }
 0x254   :  { %v2016_v10 = vsel %vm1888_vm6, %v1952_v29, %v1824_v38  ;;  %v1252_v56 = vadd.f32 -0.28449672, %v1188_v62  ;;  %v4782_v13 = vand.u32 2147483647, %v4773_v32  ;;  %2599 = vst [vmem:[#allocation11 + $0x38] sm:$0xff] %v2567_v8  ;;  %v4785_v1 = vadd.f32 %v398_v63, %v3335_v59  ;;  %v487_v29 = vpop.f32.mrf.mxu1 }
 0x255   :  { %v1314_v57 = vmul.f32 %v4685_v44, %v1250_v48  ;;  %v1572_v49 = vmul.f32 %v1508_v4, %v4664_v7  ;;  %v2177_v37 = vpack.c.bf16 %v2137_v36, %v2135_v3  ;;  %v806_v46 = vadd.f32 1.0, %v742_v50  ;;  %v2345_v7 = vpop.f32.mrf.mxu2 }
 0x256   :  { %v4789_v24 = vadd.f32 1.0, %v2015_v27  ;;  %v1825_v12 = vsub.f32 1.0, %v4763_v40  ;;  %vm1889_vm7 = vcmp.lt.f32.partialorder %v4519_v28, 0.0  ;;  %v1187_v51 = vmul.f32 %v4712_v26, %v1123_v45  ;;  %v2434_v27 = vpop.f32.mrf.mxu3 }
 0x257   :  { %v743_v38 = vmul.f32 0.3275911, %v4782_v13  ;;  %v4795_v62 = vadd.f32 1.0, %v2016_v10  ;;  %v1507_v59 = vsub.f32 0.0, %v4653_v0  ;;  %v1189_v41 = vmul.f32 %v4715_v53, %v1125_v2  ;;  %2466 = vmatmul.bf16.gmra.mxu3 %v2177_v37 }
 0x258   :  { %3127 = vrcp.f32 %v806_v46  ;;  %v1316_v48 = vmul.f32 %v4694_v42, %v1252_v56  ;;  %v1509_v40 = vsub.f32 0.0, %v4667_v43  ;;  %v4802_v11 = vmul.f32 0.70710677, %v4785_v1 }
 0x259   :  { %v807_v4 = vadd.f32 1.0, %v743_v38  ;;  %v1378_v63 = vadd.f32 0.2548296, %v1314_v57  ;;  %3129 = vpow2.f32 %v1690_v30  ;;  %v1694_v45 = vmul.f32 1.442695, %v1572_v49 }
 0x25a   :  { %v4805_v8 = vadd.f32 %v487_v29, %v3347_v14  ;;  %v1953_v55 = vsub.f32 0.0, %v1825_v12  ;;  %v1251_v2 = vadd.f32 -0.28449672, %v1187_v51  ;;  %v4808_v3 = vand.u32 2147483647, %v4802_v11 }
 0x25b   :  { %3131 = vrcp.f32 %v807_v4  ;;  %v1571_v23 = vmul.f32 %v1507_v59, %v4653_v0  ;;  %v1253_v36 = vadd.f32 -0.28449672, %v1189_v41  ;;  %v2178_v10 = vpack.c.bf16 %v4640_v22, %v4552_v54 }
 0x25c   :  { %v4812_v50 = vmul.f32 0.70710677, %v4805_v8  ;;  %v1380_v30 = vadd.f32 0.2548296, %v1316_v48  ;;  %v1573_v56 = vmul.f32 %v1509_v40, %v4667_v43  ;;  %v744_v14 = vmul.f32 0.3275911, %v4808_v3 }
 0x25d   :  { %v2433_v57 = vadd.f32 %v2432_v20, %v2343_v52  ;;  %v1442_v37 = vmul.f32 %v4685_v44, %v1378_v63  ;;  %3133 = vpow2.f32 %v1694_v45  ;;  %v2435_v46 = vadd.f32 %v2434_v27, %v2345_v7  ;;  %v2348_v59 = vpop.f32.mrf.mxu2 }
 0x25e   :  { %v4818_v49 = vpop.eup %3127  ;;  %v4822_v0 = vand.u32 2147483647, %v4812_v50  ;;  %v1315_v51 = vmul.f32 %v4712_v26, %v1251_v2  ;;  %v808_v54 = vadd.f32 1.0, %v744_v14  ;;  %v2017_v52 = vsel %vm1889_vm7, %v1953_v55, %v1825_v12  ;;  %v2437_v41 = vpop.f32.mrf.mxu3 }
 0x25f   :  { %v934_v38 = vmul.f32 1.0614054, %v4818_v49  ;;  %v2568_v22 = vadd.f32 %v4624_v15, %v2433_v57  ;;  %v3130_v43 = vpop.eup %3129  ;;  %v1317_v20 = vmul.f32 %v4715_v53, %v1253_v36  ;;  %2382 = vmatmul.bf16.gmra.mxu2 %v2178_v10  ;;  %v2569_v29 = vadd.f32 %v4624_v15, %v2435_v46 }
 0x260   :  { %v745_v44 = vmul.f32 0.3275911, %v4822_v0  ;;  %v1444_v27 = vmul.f32 %v4694_v42, %v1380_v30  ;;  %3135 = vrcp.f32 %v808_v54  ;;  %v2438_v40 = vadd.f32 %v2437_v41, %v2348_v59 }
 0x261   :  { %v4832_v7 = vpop.eup %3131  ;;  %v998_v48 = vadd.f32 -1.4531521, %v934_v38  ;;  %2600 = vst [vmem:[#allocation11 + $0x40] sm:$0xff] %v2568_v22  ;;  %v4835_v4 = vmul.f32 %v3130_v43, %v1442_v37  ;;  %v1696_v28 = vmul.f32 1.442695, %v1573_v56  ;;  %v1510_v42 = vsub.f32 0.0, %v4770_v5 }
 0x262   :  { %v935_v12 = vmul.f32 1.0614054, %v4832_v7  ;;  %v809_v63 = vadd.f32 1.0, %v745_v44  ;;  %2601 = vst [vmem:[#allocation11 + $0x48] sm:$0xff] %v2569_v29  ;;  %v1379_v45 = vadd.f32 0.2548296, %v1315_v51  ;;  %v2570_v36 = vadd.f32 %v4624_v15, %v2438_v40 }
 0x263   :  { %v1692_v55 = vmul.f32 1.442695, %v1571_v23  ;;  %v1062_v2 = vmul.f32 %v4818_v49, %v998_v48  ;;  %v3134_v10 = vpop.eup %3133  ;;  %v2179_v14 = vpack.c.bf16 %v4709_v17, %v4611_v61  ;;  %v4845_v56 = vmul.f32 %v4789_v24, %v4591_v16 }
 0x264   :  { %v999_v30 = vadd.f32 -1.4531521, %v935_v12  ;;  %3137 = vrcp.f32 %v809_v63  ;;  %v1764_v57 = vmul.f32 %v3134_v10, %v1444_v27  ;;  %v1381_v37 = vadd.f32 0.2548296, %v1317_v20  ;;  %2602 = vst [vmem:[#allocation11 + $0x50] sm:$0xff] %v2570_v36 }
 0x265   :  { %v1126_v46 = vadd.f32 1.4214138, %v1062_v2  ;;  %v1826_v23 = vsub.f32 1.0, %v4835_v4  ;;  %3139 = vpow2.f32 %v1696_v28  ;;  %v1512_v38 = vsub.f32 0.0, %v4808_v3  ;;  %v2350_v44 = vpop.f32.mrf.mxu2 }
 0x266   :  { %v1063_v51 = vmul.f32 %v4832_v7, %v999_v30  ;;  %v4850_v54 = vpop.eup %3135  ;;  %v2144_v61 = vmul.f32 %v4795_v62, %v4616_v58  ;;  %v2081_v17 = vadd.f32 1.0, %v2017_v52  ;;  %vm1890_vm8 = vcmp.lt.f32.partialorder %v4588_v18, 0.0  ;;  %v2439_v29 = vpop.f32.mrf.mxu3 }
 0x267   :  { %3141 = vpow2.f32 %v1692_v55  ;;  %v1190_v16 = vmul.f32 %v4818_v49, %v1126_v46  ;;  %v1443_v24 = vmul.f32 %v4712_v26, %v1379_v45  ;;  %v1574_v22 = vmul.f32 %v1510_v42, %v4770_v5  ;;  %2471 = vmatmul.bf16.gmra.mxu3 %v2179_v14 }
 0x268   :  { %v1127_v43 = vadd.f32 1.4214138, %v1063_v51  ;;  %v936_v20 = vmul.f32 1.0614054, %v4850_v54  ;;  %v1828_v59 = vsub.f32 1.0, %v1764_v57  ;;  %v1445_v41 = vmul.f32 %v4715_v53, %v1381_v37 }
 0x269   :  { %v1254_v58 = vadd.f32 -0.28449672, %v1190_v16  ;;  %v2440_v62 = vadd.f32 %v2439_v29, %v2350_v44  ;;  %v1954_v27 = vsub.f32 0.0, %v1826_v23  ;;  %v1576_v40 = vmul.f32 %v1512_v38, %v4808_v3 }
 0x26a   :  { %v4860_v52 = vpop.eup %3137  ;;  %v1000_v48 = vadd.f32 -1.4531521, %v936_v20  ;;  %v1513_v26 = vsub.f32 0.0, %v4822_v0  ;;  %v1191_v4 = vmul.f32 %v4832_v7, %v1127_v43  ;;  %v1698_v53 = vmul.f32 1.442695, %v1574_v22 }
 0x26b   :  { %v1318_v5 = vmul.f32 %v4818_v49, %v1254_v58  ;;  %v937_v28 = vmul.f32 1.0614054, %v4860_v52  ;;  %v2571_v12 = vadd.f32 %v4624_v15, %v2440_v62  ;;  %v3140_v63 = vpop.eup %3139  ;;  %v1511_v45 = vsub.f32 0.0, %v4782_v13 }
 0x26c   :  { %v1064_v55 = vmul.f32 %v4850_v54, %v1000_v48  ;;  %v2180_v2 = vpack.c.bf16 %v2144_v61, %v4737_v6  ;;  %v2145_v3 = vmul.f32 %v2081_v17, %v4661_v47  ;;  %v1956_v10 = vsub.f32 0.0, %v1828_v59 }
 0x26d   :  { %v3142_v36 = vpop.eup %3141  ;;  %v1765_v42 = vmul.f32 %v3140_v63, %v1445_v41  ;;  %v1001_v30 = vadd.f32 -1.4531521, %v937_v28  ;;  %2603 = vst [vmem:[#allocation11 + $0x58] sm:$0xff] %v2571_v12  ;;  %v1702_v37 = vmul.f32 1.442695, %v1576_v40  ;;  %v1577_v46 = vmul.f32 %v1513_v26, %v4822_v0  ;;  %v2353_v17 = vpop.f32.mrf.mxu2 }
 0x26e   :  { %v1763_v14 = vmul.f32 %v3142_v36, %v1443_v24  ;;  %v1128_v57 = vadd.f32 1.4214138, %v1064_v55  ;;  %vm1892_vm9 = vcmp.lt.f32.partialorder %v4645_v39, 0.0  ;;  %v1382_v51 = vadd.f32 0.2548296, %v1318_v5  ;;  %v2442_v24 = vpop.f32.mrf.mxu3 }
 0x26f   :  { %v1255_v38 = vadd.f32 -0.28449672, %v1191_v4  ;;  %v1065_v16 = vmul.f32 %v4860_v52, %v1001_v30  ;;  %v2018_v6 = vsel %vm1890_vm8, %v1954_v27, %v1826_v23  ;;  %3143 = vpow2.f32 %v1698_v53  ;;  %2387 = vmatmul.bf16.gmra.mxu2 %v2180_v2 }
 0x270   :  { %v1575_v47 = vmul.f32 %v1511_v45, %v4782_v13  ;;  %v1192_v61 = vmul.f32 %v4850_v54, %v1128_v57  ;;  %v2020_v22 = vsel %vm1892_vm9, %v1956_v10, %v1828_v59  ;;  %v1829_v43 = vsub.f32 1.0, %v1765_v42 }
 0x271   :  { %v1129_v0 = vadd.f32 1.4214138, %v1065_v16  ;;  %v2443_v20 = vadd.f32 %v2442_v24, %v2353_v17  ;;  %v1827_v39 = vsub.f32 1.0, %v1763_v14  ;;  %3145 = vpow2.f32 %v1702_v37 }
 0x272   :  { %v1256_v44 = vadd.f32 -0.28449672, %v1192_v61  ;;  %v1704_v29 = vmul.f32 1.442695, %v1577_v46  ;;  %v1446_v41 = vmul.f32 %v4818_v49, %v1382_v51  ;;  %v1319_v18 = vmul.f32 %v4832_v7, %v1255_v38 }
 0x273   :  { %v1193_v23 = vmul.f32 %v4860_v52, %v1129_v0  ;;  %v2572_v13 = vadd.f32 %v4624_v15, %v2443_v20  ;;  %v2084_v58 = vadd.f32 1.0, %v2020_v22  ;;  %v1700_v62 = vmul.f32 1.442695, %v1575_v47 }
 0x274   :  { %v1320_v27 = vmul.f32 %v4850_v54, %v1256_v44  ;;  %v2181_v59 = vpack.c.bf16 %v2145_v3, %v4845_v56  ;;  %v548_v48 = vmul.f32 0.5, %v4632_v34  ;;  %v1957_v40 = vsub.f32 0.0, %v1829_v43 }
 0x275   :  { %v1257_v26 = vadd.f32 -0.28449672, %v1193_v23  ;;  %2604 = vst [vmem:[#allocation11 + $0x60] sm:$0xff] %v2572_v13  ;;  %v3144_v5 = vpop.eup %3143  ;;  %v2082_v4 = vadd.f32 1.0, %v2018_v6  ;;  %v1955_v49 = vsub.f32 0.0, %v1827_v39  ;;  %3147 = vpow2.f32 %v1704_v29  ;;  %v2355_v56 = vpop.f32.mrf.mxu2 }
 0x276   :  { %v1384_v28 = vadd.f32 0.2548296, %v1320_v27  ;;  %v546_v12 = vmul.f32 0.5, %v4572_v19  ;;  %v1766_v63 = vmul.f32 %v3144_v5, %v1446_v41  ;;  %v1383_v53 = vadd.f32 0.2548296, %v1319_v18  ;;  %v2444_v36 = vpop.f32.mrf.mxu3 }
 0x277   :  { %v1321_v45 = vmul.f32 %v4860_v52, %v1257_v26  ;;  %v3146_v55 = vpop.eup %3145  ;;  %v2148_v2 = vmul.f32 %v2084_v58, %v548_v48  ;;  %vm1893_vm10 = vcmp.lt.f32.partialorder %v4648_v21, 0.0  ;;  %3149 = vpow2.f32 %v1700_v62  ;;  %2476 = vmatmul.bf16.gmra.mxu3 %v2181_v59 }
 0x278   :  { %v1448_v34 = vmul.f32 %v4850_v54, %v1384_v28  ;;  %vm1891_vm11 = vcmp.lt.f32.partialorder %v4629_v25, 0.0  ;;  %v2021_v3 = vsel %vm1893_vm10, %v1957_v40, %v1829_v43  ;;  %v2445_v42 = vadd.f32 %v2444_v36, %v2355_v56 }
 0x279   :  { %v1385_v10 = vadd.f32 0.2548296, %v1321_v45  ;;  %v2146_v19 = vmul.f32 %v2082_v4, %v546_v12  ;;  %v2019_v30 = vsel %vm1891_vm11, %v1955_v49, %v1827_v39  ;;  %v1830_v57 = vsub.f32 1.0, %v1766_v63 }
 0x27a   :  { %v1768_v14 = vmul.f32 %v3146_v55, %v1448_v34  ;;  %v1447_v37 = vmul.f32 %v4832_v7, %v1383_v53  ;;  %v2573_v21 = vadd.f32 %v4624_v15, %v2445_v42  ;;  %v2085_v54 = vadd.f32 1.0, %v2021_v3 }
 0x27b   :  { %v1449_v46 = vmul.f32 %v4860_v52, %v1385_v10  ;;  %v3148_v51 = vpop.eup %3147  ;;  %v2182_v16 = vpack.c.bf16 %v2148_v2, %v2146_v19  ;;  %v2083_v47 = vadd.f32 1.0, %v2019_v30  ;;  %v549_v61 = vmul.f32 0.5, %v4635_v33 }
 0x27c   :  { %v1832_v38 = vsub.f32 1.0, %v1768_v14  ;;  %2605 = vst [vmem:[#allocation11 + $0x68] sm:$0xff] %v2573_v21  ;;  %v1958_v24 = vsub.f32 0.0, %v1830_v57  ;;  %v547_v43 = vmul.f32 0.5, %v4608_v35  ;;  %vm1896_vm12 = vcmp.lt.f32.partialorder %v4802_v11, 0.0 }
 0x27d   :  { %v1769_v6 = vmul.f32 %v3148_v51, %v1449_v46  ;;  %v3150_v25 = vpop.eup %3149  ;;  %v2149_v7 = vmul.f32 %v2085_v54, %v549_v61  ;;  %v2358_v52 = vpop.f32.mrf.mxu2  ;;  %vm1894_vm13 = vcmp.lt.f32.partialorder %v4758_v60, 0.0  ;;  %v552_v11 = vmul.f32 0.5, %v4785_v1 }
 0x27e   :  { %v1960_v17 = vsub.f32 0.0, %v1832_v38  ;;  %v1767_v22 = vmul.f32 %v3150_v25, %v1447_v37  ;;  %v2447_v0 = vpop.f32.mrf.mxu3  ;;  %v2147_v29 = vmul.f32 %v2083_v47, %v547_v43  ;;  %v2022_v41 = vsel %vm1894_vm13, %v1958_v24, %v1830_v57 }
 0x27f   :  { %2392 = vmatmul.bf16.gmra.mxu2 %v2182_v16  ;;  %v1833_v39 = vsub.f32 1.0, %v1769_v6  ;;  %v2448_v44 = vadd.f32 %v2447_v0, %v2358_v52  ;;  %v2086_v35 = vadd.f32 1.0, %v2022_v41  ;;  %v550_v27 = vmul.f32 0.5, %v4745_v9 }
 0x280   :  { %v2024_v20 = vsel %vm1896_vm12, %v1960_v17, %v1832_v38  ;;  %v1831_v18 = vsub.f32 1.0, %v1767_v22  ;;  %v2183_v13 = vpack.c.bf16 %v2149_v7, %v2147_v29  ;;  %vm1897_vm14 = vcmp.lt.f32.partialorder %v4812_v50, 0.0 }
 0x281   :  { %v2574_v33 = vadd.f32 %v4624_v15, %v2448_v44  ;;  %v2088_v23 = vadd.f32 1.0, %v2024_v20  ;;  %v1961_v58 = vsub.f32 0.0, %v1833_v39  ;;  %v2150_v5 = vmul.f32 %v2086_v35, %v550_v27 }
 0x282   :  { %v1959_v62 = vsub.f32 0.0, %v1831_v18  ;;  %vm1895_vm15 = vcmp.lt.f32.partialorder %v4773_v32, 0.0  ;;  %v553_v9 = vmul.f32 0.5, %v4805_v8  ;;  %v551_v63 = vmul.f32 0.5, %v4761_v31 }
 0x283   :  { %2606 = vst [vmem:[#allocation11 + $0x70] sm:$0xff] %v2574_v33  ;;  %v2152_v59 = vmul.f32 %v2088_v23, %v552_v11  ;;  %v2025_v40 = vsel %vm1897_vm14, %v1961_v58, %v1833_v39 }
 0x284   :  { %v2023_v4 = vsel %vm1895_vm15, %v1959_v62, %v1831_v18  ;;  %v2089_v28 = vadd.f32 1.0, %v2025_v40 }
 0x285   :  { %v2360_v48 = vpop.f32.mrf.mxu2  ;;  %v2184_v12 = vpack.c.bf16 %v2152_v59, %v2150_v5  ;;  %v2087_v1 = vadd.f32 1.0, %v2023_v4 }
 0x286   :  { %v2449_v60 = vpop.f32.mrf.mxu3  ;;  %v2153_v50 = vmul.f32 %v2089_v28, %v553_v9 }
 0x287   :  { %2481 = vmatmul.bf16.gmra.mxu3 %v2183_v13  ;;  %v2450_v26 = vadd.f32 %v2449_v60, %v2360_v48  ;;  %v2151_v2 = vmul.f32 %v2087_v1, %v551_v63 }
 0x289   :  { %v2575_v49 = vadd.f32 %v4624_v15, %v2450_v26  ;;  %v2185_v32 = vpack.c.bf16 %v2153_v50, %v2151_v2 }
 0x28b   :  { %2607 = vst [vmem:[#allocation11 + $0x78] sm:$0xff] %v2575_v49 }
 0x28d   :  { %v2363_v53 = vpop.f32.mrf.mxu2 }
 0x28e   :  { %v2452_v45 = vpop.f32.mrf.mxu3 }
 0x28f   :  { %2397 = vmatmul.bf16.gmra.mxu2 %v2184_v12  ;;  %v2453_v55 = vadd.f32 %v2452_v45, %v2363_v53 }
 0x291   :  { %v2576_v34 = vadd.f32 %v4624_v15, %v2453_v55  ;;  %v3152_v55 = vld [vmem:[%s4934_s4] ss:$0 sm:$0xff] }
 0x293   :  { %2608 = vst [vmem:[#allocation11 + $0x80] sm:$0xff] %v2576_v34 }
 0x295   :  { %v2365_v56 = vpop.f32.mrf.mxu2 }
 0x296   :  { %v2454_v36 = vpop.f32.mrf.mxu3 }
 0x297   :  { %2486 = vmatmul.bf16.gmra.mxu3 %v2185_v32  ;;  %v2455_v3 = vadd.f32 %v2454_v36, %v2365_v56 }
 0x299   :  { %v2577_v10 = vadd.f32 %v4624_v15, %v2455_v3 }
 0x29b   :  { %2609 = vst [vmem:[#allocation11 + $0x88] sm:$0xff] %v2577_v10 }
 0x29d   :  { %v2368_v8 = vpop.f32.mrf.mxu2 }
 0x29e   :  { %v2457_v42 = vpop.f32.mrf.mxu3 }
 0x29f   :  { %v2458_v31 = vadd.f32 %v2457_v42, %v2368_v8 }
 0x2a1   :  { %v2578_v19 = vadd.f32 %v4624_v15, %v2458_v31 }
 0x2a3   :  { %2610 = vst [vmem:[#allocation11 + $0x90] sm:$0xff] %v2578_v19 }
 0x2a5   :  { %v2370_v30 = vpop.f32.mrf.mxu2 }
 0x2a6   :  { %v2459_v14 = vpop.f32.mrf.mxu3 }
 0x2a7   :  { %v2460_v57 = vadd.f32 %v2459_v14, %v2370_v30 }
 0x2a9   :  { %v2579_v37 = vadd.f32 %v4624_v15, %v2460_v57 }
 0x2ab   :  { %2611 = vst [vmem:[#allocation11 + $0x98] sm:$0xff] %v2579_v37 }
 0x2ad   :  { %v2373_v46 = vpop.f32.mrf.mxu2 }
 0x2af   :  { %v2462_v21 = vpop.f32.mrf.mxu3 }
 0x2b0   :  { %v2463_v51 = vadd.f32 %v2462_v21, %v2373_v46 }
 0x2b2   :  { %v2580_v54 = vadd.f32 %v4624_v15, %v2463_v51 }
 0x2b4   :  { %2612 = vst [vmem:[#allocation11 + $0xa0] sm:$0xff] %v2580_v54 }
 0x2b5   :  { %v2375_v38 = vpop.f32.mrf.mxu2 }
 0x2b7   :  { %v2464_v16 = vpop.f32.mrf.mxu3 }
 0x2b8   :  { %v2465_v6 = vadd.f32 %v2464_v16, %v2375_v38 }
 0x2ba   :  { %v2581_v25 = vadd.f32 %v4624_v15, %v2465_v6 }
 0x2bc   :  { %2613 = vst [vmem:[#allocation11 + $0xa8] sm:$0xff] %v2581_v25 }
 0x2d2   :  { %v2378_v47 = vpop.f32.mrf.mxu2 }
 0x2da   :  { %v2467_v61 = vpop.f32.mrf.mxu3  ;;  %v2380_v17 = vpop.f32.mrf.mxu2 }
 0x2db   :  { %v2468_v24 = vadd.f32 %v2467_v61, %v2378_v47 }
 0x2dd   :  { %v2582_v22 = vadd.f32 %v4624_v15, %v2468_v24 }
 0x2df   :  { %2614 = vst [vmem:[#allocation11 + $0xb0] sm:$0xff] %v2582_v22 }
 0x2e2   :  { %v2469_v43 = vpop.f32.mrf.mxu3  ;;  %v2383_v7 = vpop.f32.mrf.mxu2 }
 0x2e3   :  { %v2470_v52 = vadd.f32 %v2469_v43, %v2380_v17 }
 0x2e5   :  { %v2583_v0 = vadd.f32 %v4624_v15, %v2470_v52 }
 0x2e7   :  { %2615 = vst [vmem:[#allocation11 + $0xb8] sm:$0xff] %v2583_v0 }
 0x2ea   :  { %v2472_v20 = vpop.f32.mrf.mxu3  ;;  %v2385_v39 = vpop.f32.mrf.mxu2 }
 0x2eb   :  { %v2473_v44 = vadd.f32 %v2472_v20, %v2383_v7 }
 0x2ed   :  { %v2584_v29 = vadd.f32 %v4624_v15, %v2473_v44 }
 0x2ef   :  { %2616 = vst [vmem:[#allocation11 + $0xc0] sm:$0xff] %v2584_v29 }
 0x2f2   :  { %v2474_v41 = vpop.f32.mrf.mxu3  ;;  %v2388_v18 = vpop.f32.mrf.mxu2 }
 0x2f3   :  { %v2475_v33 = vadd.f32 %v2474_v41, %v2385_v39 }
 0x2f5   :  { %v2585_v23 = vadd.f32 %v4624_v15, %v2475_v33 }
 0x2f7   :  { %2617 = vst [vmem:[#allocation11 + $0xc8] sm:$0xff] %v2585_v23 }
 0x2fa   :  { %v2477_v13 = vpop.f32.mrf.mxu3  ;;  %v2390_v58 = vpop.f32.mrf.mxu2 }
 0x2fb   :  { %v2478_v35 = vadd.f32 %v2477_v13, %v2388_v18 }
 0x2fd   :  { %v2586_v11 = vadd.f32 %v4624_v15, %v2478_v35 }
 0x2ff   :  { %2618 = vst [vmem:[#allocation11 + $0xd0] sm:$0xff] %v2586_v11 }
 0x302   :  { %v2479_v62 = vpop.f32.mrf.mxu3  ;;  %v2393_v27 = vpop.f32.mrf.mxu2 }
 0x303   :  { %v2480_v59 = vadd.f32 %v2479_v62, %v2390_v58 }
 0x305   :  { %v2587_v48 = vadd.f32 %v4624_v15, %v2480_v59 }
 0x307   :  { %2619 = vst [vmem:[#allocation11 + $0xd8] sm:$0xff] %v2587_v48 }
 0x30a   :  { %v2482_v60 = vpop.f32.mrf.mxu3  ;;  %v2395_v26 = vpop.f32.mrf.mxu2 }
 0x30b   :  { %v2483_v40 = vadd.f32 %v2482_v60, %v2393_v27 }
 0x30d   :  { %v2588_v5 = vadd.f32 %v4624_v15, %v2483_v40 }
 0x30f   :  { %2620 = vst [vmem:[#allocation11 + $0xe0] sm:$0xff] %v2588_v5 }
 0x312   :  { %v2484_v4 = vpop.f32.mrf.mxu3  ;;  %v2398_v12 = vpop.f32.mrf.mxu2 }
 0x313   :  { %v2485_v49 = vadd.f32 %v2484_v4, %v2395_v26 }
 0x315   :  { %v2589_v28 = vadd.f32 %v4624_v15, %v2485_v49 }
 0x317   :  { %2621 = vst [vmem:[#allocation11 + $0xe8] sm:$0xff] %v2589_v28 }
 0x31a   :  { %v2487_v1 = vpop.f32.mrf.mxu3  ;;  %v2400_v50 = vpop.f32.mrf.mxu2 }
 0x31b   :  { %v2488_v9 = vadd.f32 %v2487_v1, %v2398_v12 }
 0x31d   :  { %v2590_v63 = vadd.f32 %v4624_v15, %v2488_v9 }
 0x31f   :  { %2622 = vst [vmem:[#allocation11 + $0xf0] sm:$0xff] %v2590_v63 }
 0x322   :  { %v2489_v53 = vpop.f32.mrf.mxu3 }
 0x323   :  { %v2490_v45 = vadd.f32 %v2489_v53, %v2400_v50 }
 0x325   :  { %v2591_v2 = vadd.f32 %v3152_v55, %v2490_v45 }
 0x327   :  { %2623 = vst [vmem:[#allocation11 + $0xf8] sm:$0xff] %v2591_v2 }
 0x328   :  { %2636 = dma.vmem_to_hbm [thread:$0]  %s2629_s18, 4096, %s2631_s21, [#allocation5], %s3282_s26, %s3282_s26, %s3283_s27  }
 0x329   :  { %3279 = dma.done.wait [#allocation5], 4096  }
 0x32a   :  { %3280 = vsyncadd [#allocation5], 4294963200 }
 0x32b   :  { %2641 = vsyncpa [#allocation4], 1 }
 0x32c   :  { %2642 = vsyncpa [#allocation7], 1 }
 0x32d   :  { %2643 = vsyncpa [#allocation10], 1 }
 0x32e   :  { %2644 = vsyncpa [#allocation5], 1 }

</bundles_post_ra>
